<compile_context>
chip_gen: v7x
topology: tpu7x:2x2x1
jax: 0.10.0
libtpu: 0.0.40
codegen_flags: <defaults>
</compile_context>

<pallas_src>
import functools

import numpy as np

import jax
import jax.numpy as jnp
from jax.experimental import pallas as pl
from jax.experimental.pallas import tpu as pltpu


# ---------------------------------------------------------------------------
# Pallas kernels
# ---------------------------------------------------------------------------

def _conv_matmul_kernel(w_ref, p_ref, b_ref, o_ref, *, activation):
    # w: (Cout, K) bf16, p: (K, THW) bf16 -> (Cout, THW) f32 (lane-dense output)
    acc = jnp.dot(w_ref[...], p_ref[...], preferred_element_type=jnp.float32)
    acc = acc + b_ref[...]                      # (Cout, 1) bias broadcast
    if activation == "relu":
        acc = jnp.maximum(acc, 0.0)
    elif activation == "tanh":
        acc = jnp.tanh(acc)
    o_ref[...] = acc.astype(o_ref.dtype)


def conv_matmul(wmat, patches, bias=None, activation="none"):
    """wmat: (Cout, K) bf16; patches: (N, K, M) bf16 -> (N, Cout, M) f32."""
    Cout, K = wmat.shape
    N, K2, M = patches.shape
    assert K == K2
    if bias is None:
        bias = jnp.zeros((Cout,), jnp.float32)
    bias2 = jnp.asarray(bias, jnp.float32).reshape(Cout, 1)

    # Pixel tile: whole sample if small, otherwise the largest 128-multiple
    # divisor of M (keeps stores unmasked and avoids any M padding copy).
    thw = M
    if M > 2048:
        for cand in range(2048, 0, -128):
            if M % cand == 0:
                thw = cand
                break

    out = pl.pallas_call(
        functools.partial(_conv_matmul_kernel, activation=activation),
        out_shape=jax.ShapeDtypeStruct((N, Cout, M), jnp.float32),
        grid=(N, M // thw),
        in_specs=[
            pl.BlockSpec((Cout, K), lambda n, t: (0, 0)),
            pl.BlockSpec((None, K, thw), lambda n, t: (n, 0, t)),
            pl.BlockSpec((Cout, 1), lambda n, t: (0, 0)),
        ],
        out_specs=pl.BlockSpec((None, Cout, thw), lambda n, t: (n, 0, t)),
        compiler_params=pltpu.CompilerParams(
            dimension_semantics=("parallel", "parallel")),
    )(wmat, patches, bias2)
    return out


def _norm_kernel(x_ref, rho_ref, gamma_ref, beta_ref, *rest,
                 eps, relu, unbiased, use_ln, has_skip):
    if has_skip:
        skip_ref, o_ref = rest
    else:
        (o_ref,) = rest

    x = x_ref[...].astype(jnp.float32)          # (C, HW)
    C, HW = x.shape

    # instance statistics (per channel)
    in_mean = jnp.mean(x, axis=1, keepdims=True)
    xc = x - in_mean
    in_denom = float(HW - 1) if unbiased else float(HW)
    in_var = jnp.sum(xc * xc, axis=1, keepdims=True) / in_denom
    out = xc * jax.lax.rsqrt(in_var + eps)

    if use_ln:
        # layer statistics (over channels and pixels)
        ln_mean = jnp.mean(x, axis=(0, 1), keepdims=True)
        xl = x - ln_mean
        ln_denom = float(C * HW - 1) if unbiased else float(C * HW)
        ln_var = jnp.sum(xl * xl, axis=(0, 1), keepdims=True) / ln_denom
        out_ln = xl * jax.lax.rsqrt(ln_var + eps)
        rho = rho_ref[...]                      # (C, 1)
        out = rho * out + (1.0 - rho) * out_ln

    out = out * gamma_ref[...] + beta_ref[...]  # (C, 1) per-sample scale/shift
    if relu:
        out = jnp.maximum(out, 0.0)
    if has_skip:
        out = out + skip_ref[...].astype(jnp.float32)   # fused residual add
    o_ref[...] = out.astype(o_ref.dtype)


def mixed_norm(x, rho, gamma, beta, *, eps=1e-5, relu=False,
               unbiased=True, use_ln=True, skip=None):
    """x: (N, C, H, W); rho: (C,); gamma/beta: (C,) or (N, C); skip: like x."""
    N, C, H, W = x.shape
    HW = H * W
    x2 = x.reshape(N, C, HW)
    rho_a = jnp.asarray(rho, jnp.float32).reshape(C, 1)
    gamma_a = jnp.broadcast_to(
        jnp.asarray(gamma, jnp.float32).reshape(-1, C), (N, C)).reshape(N, C, 1)
    beta_a = jnp.broadcast_to(
        jnp.asarray(beta, jnp.float32).reshape(-1, C), (N, C)).reshape(N, C, 1)

    in_specs = [
        pl.BlockSpec((None, C, HW), lambda n: (n, 0, 0)),
        pl.BlockSpec((C, 1), lambda n: (0, 0)),
        pl.BlockSpec((None, C, 1), lambda n: (n, 0, 0)),
        pl.BlockSpec((None, C, 1), lambda n: (n, 0, 0)),
    ]
    args = [x2, rho_a, gamma_a, beta_a]
    if skip is not None:
        in_specs.append(pl.BlockSpec((None, C, HW), lambda n: (n, 0, 0)))
        args.append(skip.reshape(N, C, HW))

    out = pl.pallas_call(
        functools.partial(_norm_kernel, eps=eps, relu=relu, unbiased=unbiased,
                          use_ln=use_ln, has_skip=skip is not None),
        out_shape=jax.ShapeDtypeStruct((N, C, HW), jnp.float32),
        grid=(N,),
        in_specs=in_specs,
        out_specs=pl.BlockSpec((None, C, HW), lambda n: (n, 0, 0)),
        compiler_params=pltpu.CompilerParams(dimension_semantics=("parallel",)),
    )(*args)
    return out.reshape(N, C, H, W)


def instance_norm(x, relu=False, skip=None):
    C = x.shape[1]
    return mixed_norm(x, jnp.zeros((C,), jnp.float32),
                      jnp.ones((C,), jnp.float32), jnp.zeros((C,), jnp.float32),
                      relu=relu, unbiased=False, use_ln=False, skip=skip)


def iln(x, rho, gamma, beta, relu=False, skip=None):
    return mixed_norm(x, rho, gamma, beta, relu=relu,
                      unbiased=True, use_ln=True, skip=skip)


def adailn(x, rho, gamma, beta, relu=False, skip=None):
    return mixed_norm(x, rho, gamma, beta, relu=relu,
                      unbiased=True, use_ln=True, skip=skip)


# ---------------------------------------------------------------------------
# Convolution: reflect-pad / stride / nearest-upsample folded into the im2col
# gather indices; matmul runs in the Pallas kernel above.
# ---------------------------------------------------------------------------

def _src_indices(size, kernel, stride, pad, upsample=1):
    """Per-(kernel tap, output position) source index along one spatial dim,
    composing nearest x`upsample`, ReflectionPad(`pad`) and stride."""
    up = size * upsample
    padded = up + 2 * pad
    out = (padded - kernel) // stride + 1
    t = np.arange(padded) - pad
    t = np.abs(t)                                   # reflect (no edge repeat)
    t = np.where(t >= up, 2 * (up - 1) - t, t)
    src = t // upsample
    idx = np.stack([src[k + stride * np.arange(out)] for k in range(kernel)],
                   axis=0)                          # (kernel, out)
    return idx.astype(np.int32)


def _im2col(x, KH, KW, stride, pad, upsample=1):
    """x: (N, C, H, W) -> patches (N, C*KH*KW, OH*OW) with pixels on the last
    (lane-contiguous) axis.  K ordering (c, kh, kw) matches w.reshape(Cout,-1)."""
    N, C, H, W = x.shape
    ridx = _src_indices(H, KH, stride, pad, upsample)   # (KH, OH)
    cidx = _src_indices(W, KW, stride, pad, upsample)   # (KW, OW)
    OH, OW = ridx.shape[1], cidx.shape[1]
    g = x[:, :, ridx, :]                 # (N, C, KH, OH, W)
    g = g[:, :, :, :, cidx]              # (N, C, KH, OH, KW, OW)
    g = g.transpose(0, 1, 2, 4, 3, 5)    # (N, C, KH, KW, OH, OW)
    patches = g.reshape(N, C * KH * KW, OH * OW)
    return patches, OH, OW


def conv2d(x, w, bias=None, stride=1, pad=0, upsample=1, activation="none"):
    """x: (N, Cin, H, W); w: (Cout, Cin, KH, KW).  Returns (N, Cout, OH, OW)."""
    N, C, H, W = x.shape
    Cout, Cin, KH, KW = w.shape
    assert Cin == C
    patches, OH, OW = _im2col(x.astype(jnp.bfloat16), KH, KW, stride, pad,
                              upsample)
    wmat = w.reshape(Cout, C * KH * KW).astype(jnp.bfloat16)
    out = conv_matmul(wmat, patches, bias=bias, activation=activation)
    return out.reshape(N, Cout, OH, OW)


# ---------------------------------------------------------------------------
# Parameter init (deterministic, synthetic)
# ---------------------------------------------------------------------------

def init_params(key, input_nc=3, output_nc=3, ngf=8, n_blocks=2,
                n_downsampling=2):
    keys = iter(jax.random.split(key, 128))

    def w(shape):
        return (0.05 * jax.random.normal(next(keys), shape)).astype(jnp.float32)

    p = {}
    p["down_conv0"] = w((ngf, input_nc, 7, 7))
    p["down_convs"] = []
    for i in range(n_downsampling):
        mult = 2 ** i
        p["down_convs"].append(w((ngf * mult * 2, ngf * mult, 3, 3)))
    mult = 2 ** n_downsampling
    C = ngf * mult
    p["res_blocks"] = [(w((C, C, 3, 3)), w((C, C, 3, 3))) for _ in range(n_blocks)]
    p["gap_fc"] = w((1, C))
    p["gmp_fc"] = w((1, C))
    p["conv1x1_w"] = w((C, 2 * C, 1, 1))
    p["conv1x1_b"] = w((C,))
    p["fc1"] = w((C, C))
    p["fc2"] = w((C, C))
    p["gamma_fc"] = w((C, C))
    p["beta_fc"] = w((C, C))
    p["up1"] = [{"conv1": w((C, C, 3, 3)),
                 "conv2": w((C, C, 3, 3)),
                 "rho1": jnp.full((C,), 0.9, jnp.float32),
                 "rho2": jnp.full((C,), 0.9, jnp.float32)}
                for _ in range(n_blocks)]
    p["up2"] = []
    for i in range(n_downsampling):
        m = 2 ** (n_downsampling - i)
        cin = ngf * m
        cout = cin // 2
        p["up2"].append({"conv": w((cout, cin, 3, 3)),
                         "iln_rho": jnp.zeros((cout,), jnp.float32),
                         "iln_gamma": jnp.ones((cout,), jnp.float32),
                         "iln_beta": jnp.zeros((cout,), jnp.float32)})
    p["final_conv"] = w((output_nc, ngf, 7, 7))
    return p


# ---------------------------------------------------------------------------
# Forward pass (mirrors ResnetGenerator.forward, lightFC=True)
# ---------------------------------------------------------------------------

def resnet_generator(params, x):
    # ---- DownBlock ----
    h = conv2d(x, params["down_conv0"], pad=3)                  # 7x7, reflect 3
    h = instance_norm(h, relu=True)
    for wconv in params["down_convs"]:
        h = conv2d(h, wconv, stride=2, pad=1)
        h = instance_norm(h, relu=True)
    for (w1, w2) in params["res_blocks"]:
        r = conv2d(h, w1, pad=1)
        r = instance_norm(r, relu=True)
        r = conv2d(r, w2, pad=1)
        h = instance_norm(r, relu=False, skip=h)                # fused residual

    N, C, H, W = h.shape
    h_flat = h.reshape(N, C, H * W)

    # ---- CAM branch (tiny FC / pooling in plain jnp) ----
    gap_vec = jnp.mean(h_flat, axis=2)                          # (N, C)
    gmp_vec = jnp.max(h_flat, axis=2)                           # (N, C)
    gap_logit = gap_vec @ params["gap_fc"].T                    # (N, 1)
    gmp_logit = gmp_vec @ params["gmp_fc"].T                    # (N, 1)
    cam_logit = jnp.concatenate([gap_logit, gmp_logit], axis=1)

    # Fold channel re-weighting + concat + 1x1 conv into one (C, C) matmul:
    # y = (W[:, :C] * gap_w + W[:, C:] * gmp_w) @ h + b, then ReLU.
    gap_w = params["gap_fc"].reshape(-1)
    gmp_w = params["gmp_fc"].reshape(-1)
    w1x1 = params["conv1x1_w"].reshape(C, 2 * C)
    w_fold = w1x1[:, :C] * gap_w[None, :] + w1x1[:, C:] * gmp_w[None, :]
    hc = conv_matmul(w_fold.astype(jnp.bfloat16),
                     h_flat.astype(jnp.bfloat16),
                     bias=params["conv1x1_b"], activation="relu")   # (N, C, HW)
    heatmap = jnp.sum(hc, axis=1, keepdims=True).reshape(N, 1, H, W)

    # ---- light FC -> gamma / beta (tiny; plain jnp) ----
    x_ = jnp.mean(hc, axis=2)                                   # (N, C)
    x_ = jnp.maximum(x_ @ params["fc1"].T, 0.0)
    x_ = jnp.maximum(x_ @ params["fc2"].T, 0.0)
    gamma = x_ @ params["gamma_fc"].T
    beta = x_ @ params["beta_fc"].T

    h = hc.reshape(N, C, H, W)

    # ---- UpBlock1: ResnetAdaILNBlocks ----
    for blk in params["up1"]:
        r = conv2d(h, blk["conv1"], pad=1)
        r = adailn(r, blk["rho1"], gamma, beta, relu=True)
        r = conv2d(r, blk["conv2"], pad=1)
        h = adailn(r, blk["rho2"], gamma, beta, relu=False, skip=h)

    # ---- UpBlock2 (nearest x2 upsample folded into the conv gather) ----
    for up in params["up2"]:
        h = conv2d(h, up["conv"], pad=1, upsample=2)
        h = iln(h, up["iln_rho"], up["iln_gamma"], up["iln_beta"], relu=True)
    out = conv2d(h, params["final_conv"], pad=3, activation="tanh")

    return out, cam_logit, heatmap


# ---------------------------------------------------------------------------

if __name__ == "__main__":
    key = jax.random.PRNGKey(0)
    pkey, xkey = jax.random.split(key)

    # small config: input_nc=3, output_nc=3, ngf=8, n_blocks=2,
    # n_downsampling=2, img_size=32, lightFC=True
    params = init_params(pkey, input_nc=3, output_nc=3, ngf=8,
                         n_blocks=2, n_downsampling=2)
    x = jax.random.normal(xkey, (2, 3, 32, 32), jnp.float32)

    fwd = jax.jit(resnet_generator)
    out, cam_logit, heatmap = fwd(params, x)
    jax.block_until_ready((out, cam_logit, heatmap))

    assert out.shape == (2, 3, 32, 32)
    assert cam_logit.shape == (2, 2)
    assert heatmap.shape == (2, 1, 8, 8)
    assert bool(jnp.all(jnp.isfinite(out)))
    print("KERNEL_OK")
</pallas_src>

<mosaic_0001>
module attributes {stable_mosaic.version = 11 : i64} {
  func.func @_conv_matmul_kernel(%arg0: i32, %arg1: i32, %arg2: memref<8x147xbf16, #tpu.memory_space<vmem>>, %arg3: memref<1x147x1024xbf16, #tpu.memory_space<vmem>>, %arg4: memref<8x1xf32, #tpu.memory_space<vmem>>, %arg5: memref<1x8x1024xf32, #tpu.memory_space<vmem>>) attributes {dimension_semantics = [#tpu.dimension_semantics<parallel>, #tpu.dimension_semantics<parallel>], iteration_bounds = array<i64: 2, 1>, scalar_prefetch = 0 : i64, scratch_operands = 0 : i64, tpu.core_type = #tpu.core_type<tc>, window_params = [{pipeline_mode = #tpu.pipeline_mode<synchronous>, transform_indices = @transform_0, window_bounds = array<i64: 8, 147>}, {transform_indices = @transform_1, window_bounds = array<i64: 1, 147, 1024>}, {pipeline_mode = #tpu.pipeline_mode<synchronous>, transform_indices = @transform_2, window_bounds = array<i64: 8, 1>}, {transform_indices = @transform_3, window_bounds = array<i64: 1, 8, 1024>}]} {
    %c0 = arith.constant 0 : index
    %c0_0 = arith.constant 0 : index
    %0 = vector.load %arg2[%c0, %c0_0] : memref<8x147xbf16, #tpu.memory_space<vmem>>, vector<8x147xbf16>
    %c0_1 = arith.constant 0 : index
    %c0_2 = arith.constant 0 : index
    %c0_3 = arith.constant 0 : index
    %1 = vector.load %arg3[%c0_1, %c0_2, %c0_3] : memref<1x147x1024xbf16, #tpu.memory_space<vmem>>, vector<1x147x1024xbf16>
    %2 = vector.shape_cast %1 : vector<1x147x1024xbf16> to vector<147x1024xbf16>
    %cst = arith.constant dense<0.000000e+00> : vector<8x1024xf32>
    %3 = tpu.matmul %0, %2, %cst {dimension_numbers = #tpu.dot_dimension_numbers<[1], [0], [0], [1], [0, 0, 1, 1], [], []>} : vector<8x147xbf16>, vector<147x1024xbf16>, vector<8x1024xf32> -> vector<8x1024xf32>
    %c0_4 = arith.constant 0 : index
    %c0_5 = arith.constant 0 : index
    %4 = vector.load %arg4[%c0_4, %c0_5] : memref<8x1xf32, #tpu.memory_space<vmem>>, vector<8x1xf32>
    %5 = vector.broadcast %4 : vector<8x1xf32> to vector<8x1024xf32>
    %6 = arith.addf %3, %5 : vector<8x1024xf32>
    %c0_6 = arith.constant 0 : index
    %c0_7 = arith.constant 0 : index
    %c0_8 = arith.constant 0 : index
    %7 = vector.load %arg5[%c0_6, %c0_7, %c0_8] : memref<1x8x1024xf32, #tpu.memory_space<vmem>>, vector<1x8x1024xf32>
    %8 = vector.shape_cast %7 : vector<1x8x1024xf32> to vector<8x1024xf32>
    %9 = vector.shape_cast %6 : vector<8x1024xf32> to vector<1x8x1024xf32>
    tpu.vector_store %arg5[%c0_6, %c0_7, %c0_8], %9 {strides = array<i32>} : memref<1x8x1024xf32, #tpu.memory_space<vmem>>, vector<1x8x1024xf32>,
    return
  }
  func.func @transform_0(%arg0: i32, %arg1: i32) -> (i32, i32) {
    %c0_i32 = arith.constant 0 : i32
    %c0_i32_0 = arith.constant 0 : i32
    %c0_i32_1 = arith.constant 0 : i32
    return %c0_i32, %c0_i32_0 : i32, i32
  }
  func.func @transform_1(%arg0: i32, %arg1: i32) -> (i32, i32, i32) {
    %c0_i32 = arith.constant 0 : i32
    %c0_i32_0 = arith.constant 0 : i32
    return %arg0, %c0_i32, %arg1 : i32, i32, i32
  }
  func.func @transform_2(%arg0: i32, %arg1: i32) -> (i32, i32) {
    %c0_i32 = arith.constant 0 : i32
    %c0_i32_0 = arith.constant 0 : i32
    %c0_i32_1 = arith.constant 0 : i32
    return %c0_i32, %c0_i32_0 : i32, i32
  }
  func.func @transform_3(%arg0: i32, %arg1: i32) -> (i32, i32, i32) {
    %c0_i32 = arith.constant 0 : i32
    %c0_i32_0 = arith.constant 0 : i32
    return %arg0, %c0_i32, %arg1 : i32, i32, i32
  }
}

module attributes {stable_mosaic.version = 11 : i64} {
  func.func @_norm_kernel(%arg0: i32, %arg1: memref<1x8x1024xf32, #tpu.memory_space<vmem>>, %arg2: memref<8x1xf32, #tpu.memory_space<vmem>>, %arg3: memref<1x8x1xf32, #tpu.memory_space<vmem>>, %arg4: memref<1x8x1xf32, #tpu.memory_space<vmem>>, %arg5: memref<1x8x1024xf32, #tpu.memory_space<vmem>>) attributes {dimension_semantics = [#tpu.dimension_semantics<parallel>], iteration_bounds = array<i64: 2>, scalar_prefetch = 0 : i64, scratch_operands = 0 : i64, tpu.core_type = #tpu.core_type<tc>, window_params = [{transform_indices = @transform_0, window_bounds = array<i64: 1, 8, 1024>}, {pipeline_mode = #tpu.pipeline_mode<synchronous>, transform_indices = @transform_1, window_bounds = array<i64: 8, 1>}, {transform_indices = @transform_2, window_bounds = array<i64: 1, 8, 1>}, {transform_indices = @transform_3, window_bounds = array<i64: 1, 8, 1>}, {transform_indices = @transform_4, window_bounds = array<i64: 1, 8, 1024>}]} {
    %c0 = arith.constant 0 : index
    %c0_0 = arith.constant 0 : index
    %c0_1 = arith.constant 0 : index
    %0 = vector.load %arg1[%c0, %c0_0, %c0_1] : memref<1x8x1024xf32, #tpu.memory_space<vmem>>, vector<1x8x1024xf32>
    %1 = vector.shape_cast %0 : vector<1x8x1024xf32> to vector<8x1024xf32>
    %cst = arith.constant dense<0.000000e+00> : vector<8xf32>
    %2 = vector.multi_reduction <add>, %1, %cst [1] : vector<8x1024xf32> to vector<8xf32>
    %3 = vector.shape_cast %2 : vector<8xf32> to vector<8x1xf32>
    %cst_2 = arith.constant 1.024000e+03 : f32
    %4 = vector.broadcast %cst_2 : f32 to vector<8x1xf32>
    %5 = arith.divf %3, %4 : vector<8x1xf32>
    %6 = vector.broadcast %5 : vector<8x1xf32> to vector<8x1024xf32>
    %7 = arith.subf %1, %6 : vector<8x1024xf32>
    %8 = arith.mulf %7, %7 : vector<8x1024xf32>
    %cst_3 = arith.constant dense<0.000000e+00> : vector<8xf32>
    %9 = vector.multi_reduction <add>, %8, %cst_3 [1] : vector<8x1024xf32> to vector<8xf32>
    %10 = vector.shape_cast %9 : vector<8xf32> to vector<8x1xf32>
    %cst_4 = arith.constant 1.024000e+03 : f32
    %11 = vector.broadcast %cst_4 : f32 to vector<8x1xf32>
    %12 = arith.divf %10, %11 : vector<8x1xf32>
    %cst_5 = arith.constant 9.99999974E-6 : f32
    %13 = vector.broadcast %cst_5 : f32 to vector<8x1xf32>
    %14 = arith.addf %12, %13 : vector<8x1xf32>
    %15 = math.rsqrt %14 : vector<8x1xf32>
    %16 = vector.broadcast %15 : vector<8x1xf32> to vector<8x1024xf32>
    %17 = arith.mulf %7, %16 : vector<8x1024xf32>
    %c0_6 = arith.constant 0 : index
    %c0_7 = arith.constant 0 : index
    %c0_8 = arith.constant 0 : index
    %18 = vector.load %arg3[%c0_6, %c0_7, %c0_8] : memref<1x8x1xf32, #tpu.memory_space<vmem>>, vector<1x8x1xf32>
    %19 = vector.shape_cast %18 : vector<1x8x1xf32> to vector<8x1xf32>
    %20 = vector.broadcast %19 : vector<8x1xf32> to vector<8x1024xf32>
    %21 = arith.mulf %17, %20 : vector<8x1024xf32>
    %c0_9 = arith.constant 0 : index
    %c0_10 = arith.constant 0 : index
    %c0_11 = arith.constant 0 : index
    %22 = vector.load %arg4[%c0_9, %c0_10, %c0_11] : memref<1x8x1xf32, #tpu.memory_space<vmem>>, vector<1x8x1xf32>
    %23 = vector.shape_cast %22 : vector<1x8x1xf32> to vector<8x1xf32>
    %24 = vector.broadcast %23 : vector<8x1xf32> to vector<8x1024xf32>
    %25 = arith.addf %21, %24 : vector<8x1024xf32>
    %cst_12 = arith.constant 0.000000e+00 : f32
    %26 = vector.broadcast %cst_12 : f32 to vector<8x1024xf32>
    %27 = arith.maximumf %25, %26 : vector<8x1024xf32>
    %c0_13 = arith.constant 0 : index
    %c0_14 = arith.constant 0 : index
    %c0_15 = arith.constant 0 : index
    %28 = vector.load %arg5[%c0_13, %c0_14, %c0_15] : memref<1x8x1024xf32, #tpu.memory_space<vmem>>, vector<1x8x1024xf32>
    %29 = vector.shape_cast %28 : vector<1x8x1024xf32> to vector<8x1024xf32>
    %30 = vector.shape_cast %27 : vector<8x1024xf32> to vector<1x8x1024xf32>
    tpu.vector_store %arg5[%c0_13, %c0_14, %c0_15], %30 {strides = array<i32>} : memref<1x8x1024xf32, #tpu.memory_space<vmem>>, vector<1x8x1024xf32>,
    return
  }
  func.func @transform_0(%arg0: i32) -> (i32, i32, i32) {
    %c0_i32 = arith.constant 0 : i32
    %c0_i32_0 = arith.constant 0 : i32
    %c0_i32_1 = arith.constant 0 : i32
    return %arg0, %c0_i32, %c0_i32_0 : i32, i32, i32
  }
  func.func @transform_1(%arg0: i32) -> (i32, i32) {
    %c0_i32 = arith.constant 0 : i32
    %c0_i32_0 = arith.constant 0 : i32
    %c0_i32_1 = arith.constant 0 : i32
    return %c0_i32, %c0_i32_0 : i32, i32
  }
  func.func @transform_2(%arg0: i32) -> (i32, i32, i32) {
    %c0_i32 = arith.constant 0 : i32
    %c0_i32_0 = arith.constant 0 : i32
    %c0_i32_1 = arith.constant 0 : i32
    return %arg0, %c0_i32, %c0_i32_0 : i32, i32, i32
  }
  func.func @transform_3(%arg0: i32) -> (i32, i32, i32) {
    %c0_i32 = arith.constant 0 : i32
    %c0_i32_0 = arith.constant 0 : i32
    %c0_i32_1 = arith.constant 0 : i32
    return %arg0, %c0_i32, %c0_i32_0 : i32, i32, i32
  }
  func.func @transform_4(%arg0: i32) -> (i32, i32, i32) {
    %c0_i32 = arith.constant 0 : i32
    %c0_i32_0 = arith.constant 0 : i32
    %c0_i32_1 = arith.constant 0 : i32
    return %arg0, %c0_i32, %c0_i32_0 : i32, i32, i32
  }
}

module attributes {stable_mosaic.version = 11 : i64} {
  func.func @_conv_matmul_kernel(%arg0: i32, %arg1: i32, %arg2: memref<16x72xbf16, #tpu.memory_space<vmem>>, %arg3: memref<1x72x256xbf16, #tpu.memory_space<vmem>>, %arg4: memref<16x1xf32, #tpu.memory_space<vmem>>, %arg5: memref<1x16x256xf32, #tpu.memory_space<vmem>>) attributes {dimension_semantics = [#tpu.dimension_semantics<parallel>, #tpu.dimension_semantics<parallel>], iteration_bounds = array<i64: 2, 1>, scalar_prefetch = 0 : i64, scratch_operands = 0 : i64, tpu.core_type = #tpu.core_type<tc>, window_params = [{pipeline_mode = #tpu.pipeline_mode<synchronous>, transform_indices = @transform_0, window_bounds = array<i64: 16, 72>}, {transform_indices = @transform_1, window_bounds = array<i64: 1, 72, 256>}, {pipeline_mode = #tpu.pipeline_mode<synchronous>, transform_indices = @transform_2, window_bounds = array<i64: 16, 1>}, {transform_indices = @transform_3, window_bounds = array<i64: 1, 16, 256>}]} {
    %c0 = arith.constant 0 : index
    %c0_0 = arith.constant 0 : index
    %0 = vector.load %arg2[%c0, %c0_0] : memref<16x72xbf16, #tpu.memory_space<vmem>>, vector<16x72xbf16>
    %c0_1 = arith.constant 0 : index
    %c0_2 = arith.constant 0 : index
    %c0_3 = arith.constant 0 : index
    %1 = vector.load %arg3[%c0_1, %c0_2, %c0_3] : memref<1x72x256xbf16, #tpu.memory_space<vmem>>, vector<1x72x256xbf16>
    %2 = vector.shape_cast %1 : vector<1x72x256xbf16> to vector<72x256xbf16>
    %cst = arith.constant dense<0.000000e+00> : vector<16x256xf32>
    %3 = tpu.matmul %0, %2, %cst {dimension_numbers = #tpu.dot_dimension_numbers<[1], [0], [0], [1], [0, 0, 1, 1], [], []>} : vector<16x72xbf16>, vector<72x256xbf16>, vector<16x256xf32> -> vector<16x256xf32>
    %c0_4 = arith.constant 0 : index
    %c0_5 = arith.constant 0 : index
    %4 = vector.load %arg4[%c0_4, %c0_5] : memref<16x1xf32, #tpu.memory_space<vmem>>, vector<16x1xf32>
    %5 = vector.broadcast %4 : vector<16x1xf32> to vector<16x256xf32>
    %6 = arith.addf %3, %5 : vector<16x256xf32>
    %c0_6 = arith.constant 0 : index
    %c0_7 = arith.constant 0 : index
    %c0_8 = arith.constant 0 : index
    %7 = vector.load %arg5[%c0_6, %c0_7, %c0_8] : memref<1x16x256xf32, #tpu.memory_space<vmem>>, vector<1x16x256xf32>
    %8 = vector.shape_cast %7 : vector<1x16x256xf32> to vector<16x256xf32>
    %9 = vector.shape_cast %6 : vector<16x256xf32> to vector<1x16x256xf32>
    tpu.vector_store %arg5[%c0_6, %c0_7, %c0_8], %9 {strides = array<i32>} : memref<1x16x256xf32, #tpu.memory_space<vmem>>, vector<1x16x256xf32>,
    return
  }
  func.func @transform_0(%arg0: i32, %arg1: i32) -> (i32, i32) {
    %c0_i32 = arith.constant 0 : i32
    %c0_i32_0 = arith.constant 0 : i32
    %c0_i32_1 = arith.constant 0 : i32
    return %c0_i32, %c0_i32_0 : i32, i32
  }
  func.func @transform_1(%arg0: i32, %arg1: i32) -> (i32, i32, i32) {
    %c0_i32 = arith.constant 0 : i32
    %c0_i32_0 = arith.constant 0 : i32
    return %arg0, %c0_i32, %arg1 : i32, i32, i32
  }
  func.func @transform_2(%arg0: i32, %arg1: i32) -> (i32, i32) {
    %c0_i32 = arith.constant 0 : i32
    %c0_i32_0 = arith.constant 0 : i32
    %c0_i32_1 = arith.constant 0 : i32
    return %c0_i32, %c0_i32_0 : i32, i32
  }
  func.func @transform_3(%arg0: i32, %arg1: i32) -> (i32, i32, i32) {
    %c0_i32 = arith.constant 0 : i32
    %c0_i32_0 = arith.constant 0 : i32
    return %arg0, %c0_i32, %arg1 : i32, i32, i32
  }
}

module attributes {stable_mosaic.version = 11 : i64} {
  func.func @_norm_kernel(%arg0: i32, %arg1: memref<1x16x256xf32, #tpu.memory_space<vmem>>, %arg2: memref<16x1xf32, #tpu.memory_space<vmem>>, %arg3: memref<1x16x1xf32, #tpu.memory_space<vmem>>, %arg4: memref<1x16x1xf32, #tpu.memory_space<vmem>>, %arg5: memref<1x16x256xf32, #tpu.memory_space<vmem>>) attributes {dimension_semantics = [#tpu.dimension_semantics<parallel>], iteration_bounds = array<i64: 2>, scalar_prefetch = 0 : i64, scratch_operands = 0 : i64, tpu.core_type = #tpu.core_type<tc>, window_params = [{transform_indices = @transform_0, window_bounds = array<i64: 1, 16, 256>}, {pipeline_mode = #tpu.pipeline_mode<synchronous>, transform_indices = @transform_1, window_bounds = array<i64: 16, 1>}, {transform_indices = @transform_2, window_bounds = array<i64: 1, 16, 1>}, {transform_indices = @transform_3, window_bounds = array<i64: 1, 16, 1>}, {transform_indices = @transform_4, window_bounds = array<i64: 1, 16, 256>}]} {
    %c0 = arith.constant 0 : index
    %c0_0 = arith.constant 0 : index
    %c0_1 = arith.constant 0 : index
    %0 = vector.load %arg1[%c0, %c0_0, %c0_1] : memref<1x16x256xf32, #tpu.memory_space<vmem>>, vector<1x16x256xf32>
    %1 = vector.shape_cast %0 : vector<1x16x256xf32> to vector<16x256xf32>
    %cst = arith.constant dense<0.000000e+00> : vector<16xf32>
    %2 = vector.multi_reduction <add>, %1, %cst [1] : vector<16x256xf32> to vector<16xf32>
    %3 = vector.shape_cast %2 : vector<16xf32> to vector<16x1xf32>
    %cst_2 = arith.constant 2.560000e+02 : f32
    %4 = vector.broadcast %cst_2 : f32 to vector<16x1xf32>
    %5 = arith.divf %3, %4 : vector<16x1xf32>
    %6 = vector.broadcast %5 : vector<16x1xf32> to vector<16x256xf32>
    %7 = arith.subf %1, %6 : vector<16x256xf32>
    %8 = arith.mulf %7, %7 : vector<16x256xf32>
    %cst_3 = arith.constant dense<0.000000e+00> : vector<16xf32>
    %9 = vector.multi_reduction <add>, %8, %cst_3 [1] : vector<16x256xf32> to vector<16xf32>
    %10 = vector.shape_cast %9 : vector<16xf32> to vector<16x1xf32>
    %cst_4 = arith.constant 2.560000e+02 : f32
    %11 = vector.broadcast %cst_4 : f32 to vector<16x1xf32>
    %12 = arith.divf %10, %11 : vector<16x1xf32>
    %cst_5 = arith.constant 9.99999974E-6 : f32
    %13 = vector.broadcast %cst_5 : f32 to vector<16x1xf32>
    %14 = arith.addf %12, %13 : vector<16x1xf32>
    %15 = math.rsqrt %14 : vector<16x1xf32>
    %16 = vector.broadcast %15 : vector<16x1xf32> to vector<16x256xf32>
    %17 = arith.mulf %7, %16 : vector<16x256xf32>
    %c0_6 = arith.constant 0 : index
    %c0_7 = arith.constant 0 : index
    %c0_8 = arith.constant 0 : index
    %18 = vector.load %arg3[%c0_6, %c0_7, %c0_8] : memref<1x16x1xf32, #tpu.memory_space<vmem>>, vector<1x16x1xf32>
    %19 = vector.shape_cast %18 : vector<1x16x1xf32> to vector<16x1xf32>
    %20 = vector.broadcast %19 : vector<16x1xf32> to vector<16x256xf32>
    %21 = arith.mulf %17, %20 : vector<16x256xf32>
    %c0_9 = arith.constant 0 : index
    %c0_10 = arith.constant 0 : index
    %c0_11 = arith.constant 0 : index
    %22 = vector.load %arg4[%c0_9, %c0_10, %c0_11] : memref<1x16x1xf32, #tpu.memory_space<vmem>>, vector<1x16x1xf32>
    %23 = vector.shape_cast %22 : vector<1x16x1xf32> to vector<16x1xf32>
    %24 = vector.broadcast %23 : vector<16x1xf32> to vector<16x256xf32>
    %25 = arith.addf %21, %24 : vector<16x256xf32>
    %cst_12 = arith.constant 0.000000e+00 : f32
    %26 = vector.broadcast %cst_12 : f32 to vector<16x256xf32>
    %27 = arith.maximumf %25, %26 : vector<16x256xf32>
    %c0_13 = arith.constant 0 : index
    %c0_14 = arith.constant 0 : index
    %c0_15 = arith.constant 0 : index
    %28 = vector.load %arg5[%c0_13, %c0_14, %c0_15] : memref<1x16x256xf32, #tpu.memory_space<vmem>>, vector<1x16x256xf32>
    %29 = vector.shape_cast %28 : vector<1x16x256xf32> to vector<16x256xf32>
    %30 = vector.shape_cast %27 : vector<16x256xf32> to vector<1x16x256xf32>
    tpu.vector_store %arg5[%c0_13, %c0_14, %c0_15], %30 {strides = array<i32>} : memref<1x16x256xf32, #tpu.memory_space<vmem>>, vector<1x16x256xf32>,
    return
  }
  func.func @transform_0(%arg0: i32) -> (i32, i32, i32) {
    %c0_i32 = arith.constant 0 : i32
    %c0_i32_0 = arith.constant 0 : i32
    %c0_i32_1 = arith.constant 0 : i32
    return %arg0, %c0_i32, %c0_i32_0 : i32, i32, i32
  }
  func.func @transform_1(%arg0: i32) -> (i32, i32) {
    %c0_i32 = arith.constant 0 : i32
    %c0_i32_0 = arith.constant 0 : i32
    %c0_i32_1 = arith.constant 0 : i32
    return %c0_i32, %c0_i32_0 : i32, i32
  }
  func.func @transform_2(%arg0: i32) -> (i32, i32, i32) {
    %c0_i32 = arith.constant 0 : i32
    %c0_i32_0 = arith.constant 0 : i32
    %c0_i32_1 = arith.constant 0 : i32
    return %arg0, %c0_i32, %c0_i32_0 : i32, i32, i32
  }
  func.func @transform_3(%arg0: i32) -> (i32, i32, i32) {
    %c0_i32 = arith.constant 0 : i32
    %c0_i32_0 = arith.constant 0 : i32
    %c0_i32_1 = arith.constant 0 : i32
    return %arg0, %c0_i32, %c0_i32_0 : i32, i32, i32
  }
  func.func @transform_4(%arg0: i32) -> (i32, i32, i32) {
    %c0_i32 = arith.constant 0 : i32
    %c0_i32_0 = arith.constant 0 : i32
    %c0_i32_1 = arith.constant 0 : i32
    return %arg0, %c0_i32, %c0_i32_0 : i32, i32, i32
  }
}

module attributes {stable_mosaic.version = 11 : i64} {
  func.func @_conv_matmul_kernel(%arg0: i32, %arg1: i32, %arg2: memref<32x144xbf16, #tpu.memory_space<vmem>>, %arg3: memref<1x144x64xbf16, #tpu.memory_space<vmem>>, %arg4: memref<32x1xf32, #tpu.memory_space<vmem>>, %arg5: memref<1x32x64xf32, #tpu.memory_space<vmem>>) attributes {dimension_semantics = [#tpu.dimension_semantics<parallel>, #tpu.dimension_semantics<parallel>], iteration_bounds = array<i64: 2, 1>, scalar_prefetch = 0 : i64, scratch_operands = 0 : i64, tpu.core_type = #tpu.core_type<tc>, window_params = [{pipeline_mode = #tpu.pipeline_mode<synchronous>, transform_indices = @transform_0, window_bounds = array<i64: 32, 144>}, {transform_indices = @transform_1, window_bounds = array<i64: 1, 144, 64>}, {pipeline_mode = #tpu.pipeline_mode<synchronous>, transform_indices = @transform_2, window_bounds = array<i64: 32, 1>}, {transform_indices = @transform_3, window_bounds = array<i64: 1, 32, 64>}]} {
    %c0 = arith.constant 0 : index
    %c0_0 = arith.constant 0 : index
    %0 = vector.load %arg2[%c0, %c0_0] : memref<32x144xbf16, #tpu.memory_space<vmem>>, vector<32x144xbf16>
    %c0_1 = arith.constant 0 : index
    %c0_2 = arith.constant 0 : index
    %c0_3 = arith.constant 0 : index
    %1 = vector.load %arg3[%c0_1, %c0_2, %c0_3] : memref<1x144x64xbf16, #tpu.memory_space<vmem>>, vector<1x144x64xbf16>
    %2 = vector.shape_cast %1 : vector<1x144x64xbf16> to vector<144x64xbf16>
    %cst = arith.constant dense<0.000000e+00> : vector<32x64xf32>
    %3 = tpu.matmul %0, %2, %cst {dimension_numbers = #tpu.dot_dimension_numbers<[1], [0], [0], [1], [0, 0, 1, 1], [], []>} : vector<32x144xbf16>, vector<144x64xbf16>, vector<32x64xf32> -> vector<32x64xf32>
    %c0_4 = arith.constant 0 : index
    %c0_5 = arith.constant 0 : index
    %4 = vector.load %arg4[%c0_4, %c0_5] : memref<32x1xf32, #tpu.memory_space<vmem>>, vector<32x1xf32>
    %5 = vector.broadcast %4 : vector<32x1xf32> to vector<32x64xf32>
    %6 = arith.addf %3, %5 : vector<32x64xf32>
    %c0_6 = arith.constant 0 : index
    %c0_7 = arith.constant 0 : index
    %c0_8 = arith.constant 0 : index
    %7 = vector.load %arg5[%c0_6, %c0_7, %c0_8] : memref<1x32x64xf32, #tpu.memory_space<vmem>>, vector<1x32x64xf32>
    %8 = vector.shape_cast %7 : vector<1x32x64xf32> to vector<32x64xf32>
    %9 = vector.shape_cast %6 : vector<32x64xf32> to vector<1x32x64xf32>
    tpu.vector_store %arg5[%c0_6, %c0_7, %c0_8], %9 {strides = array<i32>} : memref<1x32x64xf32, #tpu.memory_space<vmem>>, vector<1x32x64xf32>,
    return
  }
  func.func @transform_0(%arg0: i32, %arg1: i32) -> (i32, i32) {
    %c0_i32 = arith.constant 0 : i32
    %c0_i32_0 = arith.constant 0 : i32
    %c0_i32_1 = arith.constant 0 : i32
    return %c0_i32, %c0_i32_0 : i32, i32
  }
  func.func @transform_1(%arg0: i32, %arg1: i32) -> (i32, i32, i32) {
    %c0_i32 = arith.constant 0 : i32
    %c0_i32_0 = arith.constant 0 : i32
    return %arg0, %c0_i32, %arg1 : i32, i32, i32
  }
  func.func @transform_2(%arg0: i32, %arg1: i32) -> (i32, i32) {
    %c0_i32 = arith.constant 0 : i32
    %c0_i32_0 = arith.constant 0 : i32
    %c0_i32_1 = arith.constant 0 : i32
    return %c0_i32, %c0_i32_0 : i32, i32
  }
  func.func @transform_3(%arg0: i32, %arg1: i32) -> (i32, i32, i32) {
    %c0_i32 = arith.constant 0 : i32
    %c0_i32_0 = arith.constant 0 : i32
    return %arg0, %c0_i32, %arg1 : i32, i32, i32
  }
}

module attributes {stable_mosaic.version = 11 : i64} {
  func.func @_norm_kernel(%arg0: i32, %arg1: memref<1x32x64xf32, #tpu.memory_space<vmem>>, %arg2: memref<32x1xf32, #tpu.memory_space<vmem>>, %arg3: memref<1x32x1xf32, #tpu.memory_space<vmem>>, %arg4: memref<1x32x1xf32, #tpu.memory_space<vmem>>, %arg5: memref<1x32x64xf32, #tpu.memory_space<vmem>>) attributes {dimension_semantics = [#tpu.dimension_semantics<parallel>], iteration_bounds = array<i64: 2>, scalar_prefetch = 0 : i64, scratch_operands = 0 : i64, tpu.core_type = #tpu.core_type<tc>, window_params = [{transform_indices = @transform_0, window_bounds = array<i64: 1, 32, 64>}, {pipeline_mode = #tpu.pipeline_mode<synchronous>, transform_indices = @transform_1, window_bounds = array<i64: 32, 1>}, {transform_indices = @transform_2, window_bounds = array<i64: 1, 32, 1>}, {transform_indices = @transform_3, window_bounds = array<i64: 1, 32, 1>}, {transform_indices = @transform_4, window_bounds = array<i64: 1, 32, 64>}]} {
    %c0 = arith.constant 0 : index
    %c0_0 = arith.constant 0 : index
    %c0_1 = arith.constant 0 : index
    %0 = vector.load %arg1[%c0, %c0_0, %c0_1] : memref<1x32x64xf32, #tpu.memory_space<vmem>>, vector<1x32x64xf32>
    %1 = vector.shape_cast %0 : vector<1x32x64xf32> to vector<32x64xf32>
    %cst = arith.constant dense<0.000000e+00> : vector<32xf32>
    %2 = vector.multi_reduction <add>, %1, %cst [1] : vector<32x64xf32> to vector<32xf32>
    %3 = vector.shape_cast %2 : vector<32xf32> to vector<32x1xf32>
    %cst_2 = arith.constant 6.400000e+01 : f32
    %4 = vector.broadcast %cst_2 : f32 to vector<32x1xf32>
    %5 = arith.divf %3, %4 : vector<32x1xf32>
    %6 = vector.broadcast %5 : vector<32x1xf32> to vector<32x64xf32>
    %7 = arith.subf %1, %6 : vector<32x64xf32>
    %8 = arith.mulf %7, %7 : vector<32x64xf32>
    %cst_3 = arith.constant dense<0.000000e+00> : vector<32xf32>
    %9 = vector.multi_reduction <add>, %8, %cst_3 [1] : vector<32x64xf32> to vector<32xf32>
    %10 = vector.shape_cast %9 : vector<32xf32> to vector<32x1xf32>
    %cst_4 = arith.constant 6.400000e+01 : f32
    %11 = vector.broadcast %cst_4 : f32 to vector<32x1xf32>
    %12 = arith.divf %10, %11 : vector<32x1xf32>
    %cst_5 = arith.constant 9.99999974E-6 : f32
    %13 = vector.broadcast %cst_5 : f32 to vector<32x1xf32>
    %14 = arith.addf %12, %13 : vector<32x1xf32>
    %15 = math.rsqrt %14 : vector<32x1xf32>
    %16 = vector.broadcast %15 : vector<32x1xf32> to vector<32x64xf32>
    %17 = arith.mulf %7, %16 : vector<32x64xf32>
    %c0_6 = arith.constant 0 : index
    %c0_7 = arith.constant 0 : index
    %c0_8 = arith.constant 0 : index
    %18 = vector.load %arg3[%c0_6, %c0_7, %c0_8] : memref<1x32x1xf32, #tpu.memory_space<vmem>>, vector<1x32x1xf32>
    %19 = vector.shape_cast %18 : vector<1x32x1xf32> to vector<32x1xf32>
    %20 = vector.broadcast %19 : vector<32x1xf32> to vector<32x64xf32>
    %21 = arith.mulf %17, %20 : vector<32x64xf32>
    %c0_9 = arith.constant 0 : index
    %c0_10 = arith.constant 0 : index
    %c0_11 = arith.constant 0 : index
    %22 = vector.load %arg4[%c0_9, %c0_10, %c0_11] : memref<1x32x1xf32, #tpu.memory_space<vmem>>, vector<1x32x1xf32>
    %23 = vector.shape_cast %22 : vector<1x32x1xf32> to vector<32x1xf32>
    %24 = vector.broadcast %23 : vector<32x1xf32> to vector<32x64xf32>
    %25 = arith.addf %21, %24 : vector<32x64xf32>
    %cst_12 = arith.constant 0.000000e+00 : f32
    %26 = vector.broadcast %cst_12 : f32 to vector<32x64xf32>
    %27 = arith.maximumf %25, %26 : vector<32x64xf32>
    %c0_13 = arith.constant 0 : index
    %c0_14 = arith.constant 0 : index
    %c0_15 = arith.constant 0 : index
    %28 = vector.load %arg5[%c0_13, %c0_14, %c0_15] : memref<1x32x64xf32, #tpu.memory_space<vmem>>, vector<1x32x64xf32>
    %29 = vector.shape_cast %28 : vector<1x32x64xf32> to vector<32x64xf32>
    %30 = vector.shape_cast %27 : vector<32x64xf32> to vector<1x32x64xf32>
    tpu.vector_store %arg5[%c0_13, %c0_14, %c0_15], %30 {strides = array<i32>} : memref<1x32x64xf32, #tpu.memory_space<vmem>>, vector<1x32x64xf32>,
    return
  }
  func.func @transform_0(%arg0: i32) -> (i32, i32, i32) {
    %c0_i32 = arith.constant 0 : i32
    %c0_i32_0 = arith.constant 0 : i32
    %c0_i32_1 = arith.constant 0 : i32
    return %arg0, %c0_i32, %c0_i32_0 : i32, i32, i32
  }
  func.func @transform_1(%arg0: i32) -> (i32, i32) {
    %c0_i32 = arith.constant 0 : i32
    %c0_i32_0 = arith.constant 0 : i32
    %c0_i32_1 = arith.constant 0 : i32
    return %c0_i32, %c0_i32_0 : i32, i32
  }
  func.func @transform_2(%arg0: i32) -> (i32, i32, i32) {
    %c0_i32 = arith.constant 0 : i32
    %c0_i32_0 = arith.constant 0 : i32
    %c0_i32_1 = arith.constant 0 : i32
    return %arg0, %c0_i32, %c0_i32_0 : i32, i32, i32
  }
  func.func @transform_3(%arg0: i32) -> (i32, i32, i32) {
    %c0_i32 = arith.constant 0 : i32
    %c0_i32_0 = arith.constant 0 : i32
    %c0_i32_1 = arith.constant 0 : i32
    return %arg0, %c0_i32, %c0_i32_0 : i32, i32, i32
  }
  func.func @transform_4(%arg0: i32) -> (i32, i32, i32) {
    %c0_i32 = arith.constant 0 : i32
    %c0_i32_0 = arith.constant 0 : i32
    %c0_i32_1 = arith.constant 0 : i32
    return %arg0, %c0_i32, %c0_i32_0 : i32, i32, i32
  }
}

module attributes {stable_mosaic.version = 11 : i64} {
  func.func @_conv_matmul_kernel(%arg0: i32, %arg1: i32, %arg2: memref<32x288xbf16, #tpu.memory_space<vmem>>, %arg3: memref<1x288x64xbf16, #tpu.memory_space<vmem>>, %arg4: memref<32x1xf32, #tpu.memory_space<vmem>>, %arg5: memref<1x32x64xf32, #tpu.memory_space<vmem>>) attributes {dimension_semantics = [#tpu.dimension_semantics<parallel>, #tpu.dimension_semantics<parallel>], iteration_bounds = array<i64: 2, 1>, scalar_prefetch = 0 : i64, scratch_operands = 0 : i64, tpu.core_type = #tpu.core_type<tc>, window_params = [{pipeline_mode = #tpu.pipeline_mode<synchronous>, transform_indices = @transform_0, window_bounds = array<i64: 32, 288>}, {transform_indices = @transform_1, window_bounds = array<i64: 1, 288, 64>}, {pipeline_mode = #tpu.pipeline_mode<synchronous>, transform_indices = @transform_2, window_bounds = array<i64: 32, 1>}, {transform_indices = @transform_3, window_bounds = array<i64: 1, 32, 64>}]} {
    %c0 = arith.constant 0 : index
    %c0_0 = arith.constant 0 : index
    %0 = vector.load %arg2[%c0, %c0_0] : memref<32x288xbf16, #tpu.memory_space<vmem>>, vector<32x288xbf16>
    %c0_1 = arith.constant 0 : index
    %c0_2 = arith.constant 0 : index
    %c0_3 = arith.constant 0 : index
    %1 = vector.load %arg3[%c0_1, %c0_2, %c0_3] : memref<1x288x64xbf16, #tpu.memory_space<vmem>>, vector<1x288x64xbf16>
    %2 = vector.shape_cast %1 : vector<1x288x64xbf16> to vector<288x64xbf16>
    %cst = arith.constant dense<0.000000e+00> : vector<32x64xf32>
    %3 = tpu.matmul %0, %2, %cst {dimension_numbers = #tpu.dot_dimension_numbers<[1], [0], [0], [1], [0, 0, 1, 1], [], []>} : vector<32x288xbf16>, vector<288x64xbf16>, vector<32x64xf32> -> vector<32x64xf32>
    %c0_4 = arith.constant 0 : index
    %c0_5 = arith.constant 0 : index
    %4 = vector.load %arg4[%c0_4, %c0_5] : memref<32x1xf32, #tpu.memory_space<vmem>>, vector<32x1xf32>
    %5 = vector.broadcast %4 : vector<32x1xf32> to vector<32x64xf32>
    %6 = arith.addf %3, %5 : vector<32x64xf32>
    %c0_6 = arith.constant 0 : index
    %c0_7 = arith.constant 0 : index
    %c0_8 = arith.constant 0 : index
    %7 = vector.load %arg5[%c0_6, %c0_7, %c0_8] : memref<1x32x64xf32, #tpu.memory_space<vmem>>, vector<1x32x64xf32>
    %8 = vector.shape_cast %7 : vector<1x32x64xf32> to vector<32x64xf32>
    %9 = vector.shape_cast %6 : vector<32x64xf32> to vector<1x32x64xf32>
    tpu.vector_store %arg5[%c0_6, %c0_7, %c0_8], %9 {strides = array<i32>} : memref<1x32x64xf32, #tpu.memory_space<vmem>>, vector<1x32x64xf32>,
    return
  }
  func.func @transform_0(%arg0: i32, %arg1: i32) -> (i32, i32) {
    %c0_i32 = arith.constant 0 : i32
    %c0_i32_0 = arith.constant 0 : i32
    %c0_i32_1 = arith.constant 0 : i32
    return %c0_i32, %c0_i32_0 : i32, i32
  }
  func.func @transform_1(%arg0: i32, %arg1: i32) -> (i32, i32, i32) {
    %c0_i32 = arith.constant 0 : i32
    %c0_i32_0 = arith.constant 0 : i32
    return %arg0, %c0_i32, %arg1 : i32, i32, i32
  }
  func.func @transform_2(%arg0: i32, %arg1: i32) -> (i32, i32) {
    %c0_i32 = arith.constant 0 : i32
    %c0_i32_0 = arith.constant 0 : i32
    %c0_i32_1 = arith.constant 0 : i32
    return %c0_i32, %c0_i32_0 : i32, i32
  }
  func.func @transform_3(%arg0: i32, %arg1: i32) -> (i32, i32, i32) {
    %c0_i32 = arith.constant 0 : i32
    %c0_i32_0 = arith.constant 0 : i32
    return %arg0, %c0_i32, %arg1 : i32, i32, i32
  }
}

module attributes {stable_mosaic.version = 11 : i64} {
  func.func @_norm_kernel(%arg0: i32, %arg1: memref<1x32x64xf32, #tpu.memory_space<vmem>>, %arg2: memref<32x1xf32, #tpu.memory_space<vmem>>, %arg3: memref<1x32x1xf32, #tpu.memory_space<vmem>>, %arg4: memref<1x32x1xf32, #tpu.memory_space<vmem>>, %arg5: memref<1x32x64xf32, #tpu.memory_space<vmem>>, %arg6: memref<1x32x64xf32, #tpu.memory_space<vmem>>) attributes {dimension_semantics = [#tpu.dimension_semantics<parallel>], iteration_bounds = array<i64: 2>, scalar_prefetch = 0 : i64, scratch_operands = 0 : i64, tpu.core_type = #tpu.core_type<tc>, window_params = [{transform_indices = @transform_0, window_bounds = array<i64: 1, 32, 64>}, {pipeline_mode = #tpu.pipeline_mode<synchronous>, transform_indices = @transform_1, window_bounds = array<i64: 32, 1>}, {transform_indices = @transform_2, window_bounds = array<i64: 1, 32, 1>}, {transform_indices = @transform_3, window_bounds = array<i64: 1, 32, 1>}, {transform_indices = @transform_4, window_bounds = array<i64: 1, 32, 64>}, {transform_indices = @transform_5, window_bounds = array<i64: 1, 32, 64>}]} {
    %c0 = arith.constant 0 : index
    %c0_0 = arith.constant 0 : index
    %c0_1 = arith.constant 0 : index
    %0 = vector.load %arg1[%c0, %c0_0, %c0_1] : memref<1x32x64xf32, #tpu.memory_space<vmem>>, vector<1x32x64xf32>
    %1 = vector.shape_cast %0 : vector<1x32x64xf32> to vector<32x64xf32>
    %cst = arith.constant dense<0.000000e+00> : vector<32xf32>
    %2 = vector.multi_reduction <add>, %1, %cst [1] : vector<32x64xf32> to vector<32xf32>
    %3 = vector.shape_cast %2 : vector<32xf32> to vector<32x1xf32>
    %cst_2 = arith.constant 6.400000e+01 : f32
    %4 = vector.broadcast %cst_2 : f32 to vector<32x1xf32>
    %5 = arith.divf %3, %4 : vector<32x1xf32>
    %6 = vector.broadcast %5 : vector<32x1xf32> to vector<32x64xf32>
    %7 = arith.subf %1, %6 : vector<32x64xf32>
    %8 = arith.mulf %7, %7 : vector<32x64xf32>
    %cst_3 = arith.constant dense<0.000000e+00> : vector<32xf32>
    %9 = vector.multi_reduction <add>, %8, %cst_3 [1] : vector<32x64xf32> to vector<32xf32>
    %10 = vector.shape_cast %9 : vector<32xf32> to vector<32x1xf32>
    %cst_4 = arith.constant 6.400000e+01 : f32
    %11 = vector.broadcast %cst_4 : f32 to vector<32x1xf32>
    %12 = arith.divf %10, %11 : vector<32x1xf32>
    %cst_5 = arith.constant 9.99999974E-6 : f32
    %13 = vector.broadcast %cst_5 : f32 to vector<32x1xf32>
    %14 = arith.addf %12, %13 : vector<32x1xf32>
    %15 = math.rsqrt %14 : vector<32x1xf32>
    %16 = vector.broadcast %15 : vector<32x1xf32> to vector<32x64xf32>
    %17 = arith.mulf %7, %16 : vector<32x64xf32>
    %c0_6 = arith.constant 0 : index
    %c0_7 = arith.constant 0 : index
    %c0_8 = arith.constant 0 : index
    %18 = vector.load %arg3[%c0_6, %c0_7, %c0_8] : memref<1x32x1xf32, #tpu.memory_space<vmem>>, vector<1x32x1xf32>
    %19 = vector.shape_cast %18 : vector<1x32x1xf32> to vector<32x1xf32>
    %20 = vector.broadcast %19 : vector<32x1xf32> to vector<32x64xf32>
    %21 = arith.mulf %17, %20 : vector<32x64xf32>
    %c0_9 = arith.constant 0 : index
    %c0_10 = arith.constant 0 : index
    %c0_11 = arith.constant 0 : index
    %22 = vector.load %arg4[%c0_9, %c0_10, %c0_11] : memref<1x32x1xf32, #tpu.memory_space<vmem>>, vector<1x32x1xf32>
    %23 = vector.shape_cast %22 : vector<1x32x1xf32> to vector<32x1xf32>
    %24 = vector.broadcast %23 : vector<32x1xf32> to vector<32x64xf32>
    %25 = arith.addf %21, %24 : vector<32x64xf32>
    %c0_12 = arith.constant 0 : index
    %c0_13 = arith.constant 0 : index
    %c0_14 = arith.constant 0 : index
    %26 = vector.load %arg5[%c0_12, %c0_13, %c0_14] : memref<1x32x64xf32, #tpu.memory_space<vmem>>, vector<1x32x64xf32>
    %27 = vector.shape_cast %26 : vector<1x32x64xf32> to vector<32x64xf32>
    %28 = arith.addf %25, %27 : vector<32x64xf32>
    %c0_15 = arith.constant 0 : index
    %c0_16 = arith.constant 0 : index
    %c0_17 = arith.constant 0 : index
    %29 = vector.load %arg6[%c0_15, %c0_16, %c0_17] : memref<1x32x64xf32, #tpu.memory_space<vmem>>, vector<1x32x64xf32>
    %30 = vector.shape_cast %29 : vector<1x32x64xf32> to vector<32x64xf32>
    %31 = vector.shape_cast %28 : vector<32x64xf32> to vector<1x32x64xf32>
    tpu.vector_store %arg6[%c0_15, %c0_16, %c0_17], %31 {strides = array<i32>} : memref<1x32x64xf32, #tpu.memory_space<vmem>>, vector<1x32x64xf32>,
    return
  }
  func.func @transform_0(%arg0: i32) -> (i32, i32, i32) {
    %c0_i32 = arith.constant 0 : i32
    %c0_i32_0 = arith.constant 0 : i32
    %c0_i32_1 = arith.constant 0 : i32
    return %arg0, %c0_i32, %c0_i32_0 : i32, i32, i32
  }
  func.func @transform_1(%arg0: i32) -> (i32, i32) {
    %c0_i32 = arith.constant 0 : i32
    %c0_i32_0 = arith.constant 0 : i32
    %c0_i32_1 = arith.constant 0 : i32
    return %c0_i32, %c0_i32_0 : i32, i32
  }
  func.func @transform_2(%arg0: i32) -> (i32, i32, i32) {
    %c0_i32 = arith.constant 0 : i32
    %c0_i32_0 = arith.constant 0 : i32
    %c0_i32_1 = arith.constant 0 : i32
    return %arg0, %c0_i32, %c0_i32_0 : i32, i32, i32
  }
  func.func @transform_3(%arg0: i32) -> (i32, i32, i32) {
    %c0_i32 = arith.constant 0 : i32
    %c0_i32_0 = arith.constant 0 : i32
    %c0_i32_1 = arith.constant 0 : i32
    return %arg0, %c0_i32, %c0_i32_0 : i32, i32, i32
  }
  func.func @transform_4(%arg0: i32) -> (i32, i32, i32) {
    %c0_i32 = arith.constant 0 : i32
    %c0_i32_0 = arith.constant 0 : i32
    %c0_i32_1 = arith.constant 0 : i32
    return %arg0, %c0_i32, %c0_i32_0 : i32, i32, i32
  }
  func.func @transform_5(%arg0: i32) -> (i32, i32, i32) {
    %c0_i32 = arith.constant 0 : i32
    %c0_i32_0 = arith.constant 0 : i32
    %c0_i32_1 = arith.constant 0 : i32
    return %arg0, %c0_i32, %c0_i32_0 : i32, i32, i32
  }
}

module attributes {stable_mosaic.version = 11 : i64} {
  func.func @_conv_matmul_kernel(%arg0: i32, %arg1: i32, %arg2: memref<32x32xbf16, #tpu.memory_space<vmem>>, %arg3: memref<1x32x64xbf16, #tpu.memory_space<vmem>>, %arg4: memref<32x1xf32, #tpu.memory_space<vmem>>, %arg5: memref<1x32x64xf32, #tpu.memory_space<vmem>>) attributes {dimension_semantics = [#tpu.dimension_semantics<parallel>, #tpu.dimension_semantics<parallel>], iteration_bounds = array<i64: 2, 1>, scalar_prefetch = 0 : i64, scratch_operands = 0 : i64, tpu.core_type = #tpu.core_type<tc>, window_params = [{pipeline_mode = #tpu.pipeline_mode<synchronous>, transform_indices = @transform_0, window_bounds = array<i64: 32, 32>}, {transform_indices = @transform_1, window_bounds = array<i64: 1, 32, 64>}, {pipeline_mode = #tpu.pipeline_mode<synchronous>, transform_indices = @transform_2, window_bounds = array<i64: 32, 1>}, {transform_indices = @transform_3, window_bounds = array<i64: 1, 32, 64>}]} {
    %c0 = arith.constant 0 : index
    %c0_0 = arith.constant 0 : index
    %0 = vector.load %arg2[%c0, %c0_0] : memref<32x32xbf16, #tpu.memory_space<vmem>>, vector<32x32xbf16>
    %c0_1 = arith.constant 0 : index
    %c0_2 = arith.constant 0 : index
    %c0_3 = arith.constant 0 : index
    %1 = vector.load %arg3[%c0_1, %c0_2, %c0_3] : memref<1x32x64xbf16, #tpu.memory_space<vmem>>, vector<1x32x64xbf16>
    %2 = vector.shape_cast %1 : vector<1x32x64xbf16> to vector<32x64xbf16>
    %cst = arith.constant dense<0.000000e+00> : vector<32x64xf32>
    %3 = tpu.matmul %0, %2, %cst {dimension_numbers = #tpu.dot_dimension_numbers<[1], [0], [0], [1], [0, 0, 1, 1], [], []>} : vector<32x32xbf16>, vector<32x64xbf16>, vector<32x64xf32> -> vector<32x64xf32>
    %c0_4 = arith.constant 0 : index
    %c0_5 = arith.constant 0 : index
    %4 = vector.load %arg4[%c0_4, %c0_5] : memref<32x1xf32, #tpu.memory_space<vmem>>, vector<32x1xf32>
    %5 = vector.broadcast %4 : vector<32x1xf32> to vector<32x64xf32>
    %6 = arith.addf %3, %5 : vector<32x64xf32>
    %cst_6 = arith.constant 0.000000e+00 : f32
    %7 = vector.broadcast %cst_6 : f32 to vector<32x64xf32>
    %8 = arith.maximumf %6, %7 : vector<32x64xf32>
    %c0_7 = arith.constant 0 : index
    %c0_8 = arith.constant 0 : index
    %c0_9 = arith.constant 0 : index
    %9 = vector.load %arg5[%c0_7, %c0_8, %c0_9] : memref<1x32x64xf32, #tpu.memory_space<vmem>>, vector<1x32x64xf32>
    %10 = vector.shape_cast %9 : vector<1x32x64xf32> to vector<32x64xf32>
    %11 = vector.shape_cast %8 : vector<32x64xf32> to vector<1x32x64xf32>
    tpu.vector_store %arg5[%c0_7, %c0_8, %c0_9], %11 {strides = array<i32>} : memref<1x32x64xf32, #tpu.memory_space<vmem>>, vector<1x32x64xf32>,
    return
  }
  func.func @transform_0(%arg0: i32, %arg1: i32) -> (i32, i32) {
    %c0_i32 = arith.constant 0 : i32
    %c0_i32_0 = arith.constant 0 : i32
    %c0_i32_1 = arith.constant 0 : i32
    return %c0_i32, %c0_i32_0 : i32, i32
  }
  func.func @transform_1(%arg0: i32, %arg1: i32) -> (i32, i32, i32) {
    %c0_i32 = arith.constant 0 : i32
    %c0_i32_0 = arith.constant 0 : i32
    return %arg0, %c0_i32, %arg1 : i32, i32, i32
  }
  func.func @transform_2(%arg0: i32, %arg1: i32) -> (i32, i32) {
    %c0_i32 = arith.constant 0 : i32
    %c0_i32_0 = arith.constant 0 : i32
    %c0_i32_1 = arith.constant 0 : i32
    return %c0_i32, %c0_i32_0 : i32, i32
  }
  func.func @transform_3(%arg0: i32, %arg1: i32) -> (i32, i32, i32) {
    %c0_i32 = arith.constant 0 : i32
    %c0_i32_0 = arith.constant 0 : i32
    return %arg0, %c0_i32, %arg1 : i32, i32, i32
  }
}

module attributes {stable_mosaic.version = 11 : i64} {
  func.func @_norm_kernel(%arg0: i32, %arg1: memref<1x32x64xf32, #tpu.memory_space<vmem>>, %arg2: memref<32x1xf32, #tpu.memory_space<vmem>>, %arg3: memref<1x32x1xf32, #tpu.memory_space<vmem>>, %arg4: memref<1x32x1xf32, #tpu.memory_space<vmem>>, %arg5: memref<1x32x64xf32, #tpu.memory_space<vmem>>) attributes {dimension_semantics = [#tpu.dimension_semantics<parallel>], iteration_bounds = array<i64: 2>, scalar_prefetch = 0 : i64, scratch_operands = 0 : i64, tpu.core_type = #tpu.core_type<tc>, window_params = [{transform_indices = @transform_0, window_bounds = array<i64: 1, 32, 64>}, {pipeline_mode = #tpu.pipeline_mode<synchronous>, transform_indices = @transform_1, window_bounds = array<i64: 32, 1>}, {transform_indices = @transform_2, window_bounds = array<i64: 1, 32, 1>}, {transform_indices = @transform_3, window_bounds = array<i64: 1, 32, 1>}, {transform_indices = @transform_4, window_bounds = array<i64: 1, 32, 64>}]} {
    %c0 = arith.constant 0 : index
    %c0_0 = arith.constant 0 : index
    %c0_1 = arith.constant 0 : index
    %0 = vector.load %arg1[%c0, %c0_0, %c0_1] : memref<1x32x64xf32, #tpu.memory_space<vmem>>, vector<1x32x64xf32>
    %1 = vector.shape_cast %0 : vector<1x32x64xf32> to vector<32x64xf32>
    %cst = arith.constant dense<0.000000e+00> : vector<32xf32>
    %2 = vector.multi_reduction <add>, %1, %cst [1] : vector<32x64xf32> to vector<32xf32>
    %3 = vector.shape_cast %2 : vector<32xf32> to vector<32x1xf32>
    %cst_2 = arith.constant 6.400000e+01 : f32
    %4 = vector.broadcast %cst_2 : f32 to vector<32x1xf32>
    %5 = arith.divf %3, %4 : vector<32x1xf32>
    %6 = vector.broadcast %5 : vector<32x1xf32> to vector<32x64xf32>
    %7 = arith.subf %1, %6 : vector<32x64xf32>
    %8 = arith.mulf %7, %7 : vector<32x64xf32>
    %cst_3 = arith.constant dense<0.000000e+00> : vector<32xf32>
    %9 = vector.multi_reduction <add>, %8, %cst_3 [1] : vector<32x64xf32> to vector<32xf32>
    %10 = vector.shape_cast %9 : vector<32xf32> to vector<32x1xf32>
    %cst_4 = arith.constant 6.300000e+01 : f32
    %11 = vector.broadcast %cst_4 : f32 to vector<32x1xf32>
    %12 = arith.divf %10, %11 : vector<32x1xf32>
    %cst_5 = arith.constant 9.99999974E-6 : f32
    %13 = vector.broadcast %cst_5 : f32 to vector<32x1xf32>
    %14 = arith.addf %12, %13 : vector<32x1xf32>
    %15 = math.rsqrt %14 : vector<32x1xf32>
    %16 = vector.broadcast %15 : vector<32x1xf32> to vector<32x64xf32>
    %17 = arith.mulf %7, %16 : vector<32x64xf32>
    %18 = vector.shape_cast %1 : vector<32x64xf32> to vector<1x32x64xf32>
    %cst_6 = arith.constant dense<0.000000e+00> : vector<1xf32>
    %19 = vector.multi_reduction <add>, %18, %cst_6 [1, 2] : vector<1x32x64xf32> to vector<1xf32>
    %20 = vector.shape_cast %19 : vector<1xf32> to vector<1x1x1xf32>
    %21 = vector.extract %20[0, 0, 0] : f32 from vector<1x1x1xf32>
    %22 = vector.broadcast %21 : f32 to vector<1x1xf32>
    %cst_7 = arith.constant 2.048000e+03 : f32
    %23 = vector.broadcast %cst_7 : f32 to vector<1x1xf32>
    %24 = arith.divf %22, %23 : vector<1x1xf32>
    %25 = vector.broadcast %24 : vector<1x1xf32> to vector<32x64xf32>
    %26 = arith.subf %1, %25 : vector<32x64xf32>
    %27 = arith.mulf %26, %26 : vector<32x64xf32>
    %28 = vector.shape_cast %27 : vector<32x64xf32> to vector<1x32x64xf32>
    %cst_8 = arith.constant dense<0.000000e+00> : vector<1xf32>
    %29 = vector.multi_reduction <add>, %28, %cst_8 [1, 2] : vector<1x32x64xf32> to vector<1xf32>
    %30 = vector.shape_cast %29 : vector<1xf32> to vector<1x1x1xf32>
    %31 = vector.extract %30[0, 0, 0] : f32 from vector<1x1x1xf32>
    %32 = vector.broadcast %31 : f32 to vector<1x1xf32>
    %cst_9 = arith.constant 2.047000e+03 : f32
    %33 = vector.broadcast %cst_9 : f32 to vector<1x1xf32>
    %34 = arith.divf %32, %33 : vector<1x1xf32>
    %cst_10 = arith.constant 9.99999974E-6 : f32
    %35 = vector.broadcast %cst_10 : f32 to vector<1x1xf32>
    %36 = arith.addf %34, %35 : vector<1x1xf32>
    %37 = math.rsqrt %36 : vector<1x1xf32>
    %38 = vector.broadcast %37 : vector<1x1xf32> to vector<32x64xf32>
    %39 = arith.mulf %26, %38 : vector<32x64xf32>
    %c0_11 = arith.constant 0 : index
    %c0_12 = arith.constant 0 : index
    %40 = vector.load %arg2[%c0_11, %c0_12] : memref<32x1xf32, #tpu.memory_space<vmem>>, vector<32x1xf32>
    %41 = vector.broadcast %40 : vector<32x1xf32> to vector<32x64xf32>
    %42 = arith.mulf %41, %17 : vector<32x64xf32>
    %cst_13 = arith.constant 1.000000e+00 : f32
    %43 = vector.broadcast %cst_13 : f32 to vector<32x1xf32>
    %44 = arith.subf %43, %40 : vector<32x1xf32>
    %45 = vector.broadcast %44 : vector<32x1xf32> to vector<32x64xf32>
    %46 = arith.mulf %45, %39 : vector<32x64xf32>
    %47 = arith.addf %42, %46 : vector<32x64xf32>
    %c0_14 = arith.constant 0 : index
    %c0_15 = arith.constant 0 : index
    %c0_16 = arith.constant 0 : index
    %48 = vector.load %arg3[%c0_14, %c0_15, %c0_16] : memref<1x32x1xf32, #tpu.memory_space<vmem>>, vector<1x32x1xf32>
    %49 = vector.shape_cast %48 : vector<1x32x1xf32> to vector<32x1xf32>
    %50 = vector.broadcast %49 : vector<32x1xf32> to vector<32x64xf32>
    %51 = arith.mulf %47, %50 : vector<32x64xf32>
    %c0_17 = arith.constant 0 : index
    %c0_18 = arith.constant 0 : index
    %c0_19 = arith.constant 0 : index
    %52 = vector.load %arg4[%c0_17, %c0_18, %c0_19] : memref<1x32x1xf32, #tpu.memory_space<vmem>>, vector<1x32x1xf32>
    %53 = vector.shape_cast %52 : vector<1x32x1xf32> to vector<32x1xf32>
    %54 = vector.broadcast %53 : vector<32x1xf32> to vector<32x64xf32>
    %55 = arith.addf %51, %54 : vector<32x64xf32>
    %cst_20 = arith.constant 0.000000e+00 : f32
    %56 = vector.broadcast %cst_20 : f32 to vector<32x64xf32>
    %57 = arith.maximumf %55, %56 : vector<32x64xf32>
    %c0_21 = arith.constant 0 : index
    %c0_22 = arith.constant 0 : index
    %c0_23 = arith.constant 0 : index
    %58 = vector.load %arg5[%c0_21, %c0_22, %c0_23] : memref<1x32x64xf32, #tpu.memory_space<vmem>>, vector<1x32x64xf32>
    %59 = vector.shape_cast %58 : vector<1x32x64xf32> to vector<32x64xf32>
    %60 = vector.shape_cast %57 : vector<32x64xf32> to vector<1x32x64xf32>
    tpu.vector_store %arg5[%c0_21, %c0_22, %c0_23], %60 {strides = array<i32>} : memref<1x32x64xf32, #tpu.memory_space<vmem>>, vector<1x32x64xf32>,
    return
  }
  func.func @transform_0(%arg0: i32) -> (i32, i32, i32) {
    %c0_i32 = arith.constant 0 : i32
    %c0_i32_0 = arith.constant 0 : i32
    %c0_i32_1 = arith.constant 0 : i32
    return %arg0, %c0_i32, %c0_i32_0 : i32, i32, i32
  }
  func.func @transform_1(%arg0: i32) -> (i32, i32) {
    %c0_i32 = arith.constant 0 : i32
    %c0_i32_0 = arith.constant 0 : i32
    %c0_i32_1 = arith.constant 0 : i32
    return %c0_i32, %c0_i32_0 : i32, i32
  }
  func.func @transform_2(%arg0: i32) -> (i32, i32, i32) {
    %c0_i32 = arith.constant 0 : i32
    %c0_i32_0 = arith.constant 0 : i32
    %c0_i32_1 = arith.constant 0 : i32
    return %arg0, %c0_i32, %c0_i32_0 : i32, i32, i32
  }
  func.func @transform_3(%arg0: i32) -> (i32, i32, i32) {
    %c0_i32 = arith.constant 0 : i32
    %c0_i32_0 = arith.constant 0 : i32
    %c0_i32_1 = arith.constant 0 : i32
    return %arg0, %c0_i32, %c0_i32_0 : i32, i32, i32
  }
  func.func @transform_4(%arg0: i32) -> (i32, i32, i32) {
    %c0_i32 = arith.constant 0 : i32
    %c0_i32_0 = arith.constant 0 : i32
    %c0_i32_1 = arith.constant 0 : i32
    return %arg0, %c0_i32, %c0_i32_0 : i32, i32, i32
  }
}

module attributes {stable_mosaic.version = 11 : i64} {
  func.func @_norm_kernel(%arg0: i32, %arg1: memref<1x32x64xf32, #tpu.memory_space<vmem>>, %arg2: memref<32x1xf32, #tpu.memory_space<vmem>>, %arg3: memref<1x32x1xf32, #tpu.memory_space<vmem>>, %arg4: memref<1x32x1xf32, #tpu.memory_space<vmem>>, %arg5: memref<1x32x64xf32, #tpu.memory_space<vmem>>, %arg6: memref<1x32x64xf32, #tpu.memory_space<vmem>>) attributes {dimension_semantics = [#tpu.dimension_semantics<parallel>], iteration_bounds = array<i64: 2>, scalar_prefetch = 0 : i64, scratch_operands = 0 : i64, tpu.core_type = #tpu.core_type<tc>, window_params = [{transform_indices = @transform_0, window_bounds = array<i64: 1, 32, 64>}, {pipeline_mode = #tpu.pipeline_mode<synchronous>, transform_indices = @transform_1, window_bounds = array<i64: 32, 1>}, {transform_indices = @transform_2, window_bounds = array<i64: 1, 32, 1>}, {transform_indices = @transform_3, window_bounds = array<i64: 1, 32, 1>}, {transform_indices = @transform_4, window_bounds = array<i64: 1, 32, 64>}, {transform_indices = @transform_5, window_bounds = array<i64: 1, 32, 64>}]} {
    %c0 = arith.constant 0 : index
    %c0_0 = arith.constant 0 : index
    %c0_1 = arith.constant 0 : index
    %0 = vector.load %arg1[%c0, %c0_0, %c0_1] : memref<1x32x64xf32, #tpu.memory_space<vmem>>, vector<1x32x64xf32>
    %1 = vector.shape_cast %0 : vector<1x32x64xf32> to vector<32x64xf32>
    %cst = arith.constant dense<0.000000e+00> : vector<32xf32>
    %2 = vector.multi_reduction <add>, %1, %cst [1] : vector<32x64xf32> to vector<32xf32>
    %3 = vector.shape_cast %2 : vector<32xf32> to vector<32x1xf32>
    %cst_2 = arith.constant 6.400000e+01 : f32
    %4 = vector.broadcast %cst_2 : f32 to vector<32x1xf32>
    %5 = arith.divf %3, %4 : vector<32x1xf32>
    %6 = vector.broadcast %5 : vector<32x1xf32> to vector<32x64xf32>
    %7 = arith.subf %1, %6 : vector<32x64xf32>
    %8 = arith.mulf %7, %7 : vector<32x64xf32>
    %cst_3 = arith.constant dense<0.000000e+00> : vector<32xf32>
    %9 = vector.multi_reduction <add>, %8, %cst_3 [1] : vector<32x64xf32> to vector<32xf32>
    %10 = vector.shape_cast %9 : vector<32xf32> to vector<32x1xf32>
    %cst_4 = arith.constant 6.300000e+01 : f32
    %11 = vector.broadcast %cst_4 : f32 to vector<32x1xf32>
    %12 = arith.divf %10, %11 : vector<32x1xf32>
    %cst_5 = arith.constant 9.99999974E-6 : f32
    %13 = vector.broadcast %cst_5 : f32 to vector<32x1xf32>
    %14 = arith.addf %12, %13 : vector<32x1xf32>
    %15 = math.rsqrt %14 : vector<32x1xf32>
    %16 = vector.broadcast %15 : vector<32x1xf32> to vector<32x64xf32>
    %17 = arith.mulf %7, %16 : vector<32x64xf32>
    %18 = vector.shape_cast %1 : vector<32x64xf32> to vector<1x32x64xf32>
    %cst_6 = arith.constant dense<0.000000e+00> : vector<1xf32>
    %19 = vector.multi_reduction <add>, %18, %cst_6 [1, 2] : vector<1x32x64xf32> to vector<1xf32>
    %20 = vector.shape_cast %19 : vector<1xf32> to vector<1x1x1xf32>
    %21 = vector.extract %20[0, 0, 0] : f32 from vector<1x1x1xf32>
    %22 = vector.broadcast %21 : f32 to vector<1x1xf32>
    %cst_7 = arith.constant 2.048000e+03 : f32
    %23 = vector.broadcast %cst_7 : f32 to vector<1x1xf32>
    %24 = arith.divf %22, %23 : vector<1x1xf32>
    %25 = vector.broadcast %24 : vector<1x1xf32> to vector<32x64xf32>
    %26 = arith.subf %1, %25 : vector<32x64xf32>
    %27 = arith.mulf %26, %26 : vector<32x64xf32>
    %28 = vector.shape_cast %27 : vector<32x64xf32> to vector<1x32x64xf32>
    %cst_8 = arith.constant dense<0.000000e+00> : vector<1xf32>
    %29 = vector.multi_reduction <add>, %28, %cst_8 [1, 2] : vector<1x32x64xf32> to vector<1xf32>
    %30 = vector.shape_cast %29 : vector<1xf32> to vector<1x1x1xf32>
    %31 = vector.extract %30[0, 0, 0] : f32 from vector<1x1x1xf32>
    %32 = vector.broadcast %31 : f32 to vector<1x1xf32>
    %cst_9 = arith.constant 2.047000e+03 : f32
    %33 = vector.broadcast %cst_9 : f32 to vector<1x1xf32>
    %34 = arith.divf %32, %33 : vector<1x1xf32>
    %cst_10 = arith.constant 9.99999974E-6 : f32
    %35 = vector.broadcast %cst_10 : f32 to vector<1x1xf32>
    %36 = arith.addf %34, %35 : vector<1x1xf32>
    %37 = math.rsqrt %36 : vector<1x1xf32>
    %38 = vector.broadcast %37 : vector<1x1xf32> to vector<32x64xf32>
    %39 = arith.mulf %26, %38 : vector<32x64xf32>
    %c0_11 = arith.constant 0 : index
    %c0_12 = arith.constant 0 : index
    %40 = vector.load %arg2[%c0_11, %c0_12] : memref<32x1xf32, #tpu.memory_space<vmem>>, vector<32x1xf32>
    %41 = vector.broadcast %40 : vector<32x1xf32> to vector<32x64xf32>
    %42 = arith.mulf %41, %17 : vector<32x64xf32>
    %cst_13 = arith.constant 1.000000e+00 : f32
    %43 = vector.broadcast %cst_13 : f32 to vector<32x1xf32>
    %44 = arith.subf %43, %40 : vector<32x1xf32>
    %45 = vector.broadcast %44 : vector<32x1xf32> to vector<32x64xf32>
    %46 = arith.mulf %45, %39 : vector<32x64xf32>
    %47 = arith.addf %42, %46 : vector<32x64xf32>
    %c0_14 = arith.constant 0 : index
    %c0_15 = arith.constant 0 : index
    %c0_16 = arith.constant 0 : index
    %48 = vector.load %arg3[%c0_14, %c0_15, %c0_16] : memref<1x32x1xf32, #tpu.memory_space<vmem>>, vector<1x32x1xf32>
    %49 = vector.shape_cast %48 : vector<1x32x1xf32> to vector<32x1xf32>
    %50 = vector.broadcast %49 : vector<32x1xf32> to vector<32x64xf32>
    %51 = arith.mulf %47, %50 : vector<32x64xf32>
    %c0_17 = arith.constant 0 : index
    %c0_18 = arith.constant 0 : index
    %c0_19 = arith.constant 0 : index
    %52 = vector.load %arg4[%c0_17, %c0_18, %c0_19] : memref<1x32x1xf32, #tpu.memory_space<vmem>>, vector<1x32x1xf32>
    %53 = vector.shape_cast %52 : vector<1x32x1xf32> to vector<32x1xf32>
    %54 = vector.broadcast %53 : vector<32x1xf32> to vector<32x64xf32>
    %55 = arith.addf %51, %54 : vector<32x64xf32>
    %c0_20 = arith.constant 0 : index
    %c0_21 = arith.constant 0 : index
    %c0_22 = arith.constant 0 : index
    %56 = vector.load %arg5[%c0_20, %c0_21, %c0_22] : memref<1x32x64xf32, #tpu.memory_space<vmem>>, vector<1x32x64xf32>
    %57 = vector.shape_cast %56 : vector<1x32x64xf32> to vector<32x64xf32>
    %58 = arith.addf %55, %57 : vector<32x64xf32>
    %c0_23 = arith.constant 0 : index
    %c0_24 = arith.constant 0 : index
    %c0_25 = arith.constant 0 : index
    %59 = vector.load %arg6[%c0_23, %c0_24, %c0_25] : memref<1x32x64xf32, #tpu.memory_space<vmem>>, vector<1x32x64xf32>
    %60 = vector.shape_cast %59 : vector<1x32x64xf32> to vector<32x64xf32>
    %61 = vector.shape_cast %58 : vector<32x64xf32> to vector<1x32x64xf32>
    tpu.vector_store %arg6[%c0_23, %c0_24, %c0_25], %61 {strides = array<i32>} : memref<1x32x64xf32, #tpu.memory_space<vmem>>, vector<1x32x64xf32>,
    return
  }
  func.func @transform_0(%arg0: i32) -> (i32, i32, i32) {
    %c0_i32 = arith.constant 0 : i32
    %c0_i32_0 = arith.constant 0 : i32
    %c0_i32_1 = arith.constant 0 : i32
    return %arg0, %c0_i32, %c0_i32_0 : i32, i32, i32
  }
  func.func @transform_1(%arg0: i32) -> (i32, i32) {
    %c0_i32 = arith.constant 0 : i32
    %c0_i32_0 = arith.constant 0 : i32
    %c0_i32_1 = arith.constant 0 : i32
    return %c0_i32, %c0_i32_0 : i32, i32
  }
  func.func @transform_2(%arg0: i32) -> (i32, i32, i32) {
    %c0_i32 = arith.constant 0 : i32
    %c0_i32_0 = arith.constant 0 : i32
    %c0_i32_1 = arith.constant 0 : i32
    return %arg0, %c0_i32, %c0_i32_0 : i32, i32, i32
  }
  func.func @transform_3(%arg0: i32) -> (i32, i32, i32) {
    %c0_i32 = arith.constant 0 : i32
    %c0_i32_0 = arith.constant 0 : i32
    %c0_i32_1 = arith.constant 0 : i32
    return %arg0, %c0_i32, %c0_i32_0 : i32, i32, i32
  }
  func.func @transform_4(%arg0: i32) -> (i32, i32, i32) {
    %c0_i32 = arith.constant 0 : i32
    %c0_i32_0 = arith.constant 0 : i32
    %c0_i32_1 = arith.constant 0 : i32
    return %arg0, %c0_i32, %c0_i32_0 : i32, i32, i32
  }
  func.func @transform_5(%arg0: i32) -> (i32, i32, i32) {
    %c0_i32 = arith.constant 0 : i32
    %c0_i32_0 = arith.constant 0 : i32
    %c0_i32_1 = arith.constant 0 : i32
    return %arg0, %c0_i32, %c0_i32_0 : i32, i32, i32
  }
}

module attributes {stable_mosaic.version = 11 : i64} {
  func.func @_conv_matmul_kernel(%arg0: i32, %arg1: i32, %arg2: memref<16x288xbf16, #tpu.memory_space<vmem>>, %arg3: memref<1x288x256xbf16, #tpu.memory_space<vmem>>, %arg4: memref<16x1xf32, #tpu.memory_space<vmem>>, %arg5: memref<1x16x256xf32, #tpu.memory_space<vmem>>) attributes {dimension_semantics = [#tpu.dimension_semantics<parallel>, #tpu.dimension_semantics<parallel>], iteration_bounds = array<i64: 2, 1>, scalar_prefetch = 0 : i64, scratch_operands = 0 : i64, tpu.core_type = #tpu.core_type<tc>, window_params = [{pipeline_mode = #tpu.pipeline_mode<synchronous>, transform_indices = @transform_0, window_bounds = array<i64: 16, 288>}, {transform_indices = @transform_1, window_bounds = array<i64: 1, 288, 256>}, {pipeline_mode = #tpu.pipeline_mode<synchronous>, transform_indices = @transform_2, window_bounds = array<i64: 16, 1>}, {transform_indices = @transform_3, window_bounds = array<i64: 1, 16, 256>}]} {
    %c0 = arith.constant 0 : index
    %c0_0 = arith.constant 0 : index
    %0 = vector.load %arg2[%c0, %c0_0] : memref<16x288xbf16, #tpu.memory_space<vmem>>, vector<16x288xbf16>
    %c0_1 = arith.constant 0 : index
    %c0_2 = arith.constant 0 : index
    %c0_3 = arith.constant 0 : index
    %1 = vector.load %arg3[%c0_1, %c0_2, %c0_3] : memref<1x288x256xbf16, #tpu.memory_space<vmem>>, vector<1x288x256xbf16>
    %2 = vector.shape_cast %1 : vector<1x288x256xbf16> to vector<288x256xbf16>
    %cst = arith.constant dense<0.000000e+00> : vector<16x256xf32>
    %3 = tpu.matmul %0, %2, %cst {dimension_numbers = #tpu.dot_dimension_numbers<[1], [0], [0], [1], [0, 0, 1, 1], [], []>} : vector<16x288xbf16>, vector<288x256xbf16>, vector<16x256xf32> -> vector<16x256xf32>
    %c0_4 = arith.constant 0 : index
    %c0_5 = arith.constant 0 : index
    %4 = vector.load %arg4[%c0_4, %c0_5] : memref<16x1xf32, #tpu.memory_space<vmem>>, vector<16x1xf32>
    %5 = vector.broadcast %4 : vector<16x1xf32> to vector<16x256xf32>
    %6 = arith.addf %3, %5 : vector<16x256xf32>
    %c0_6 = arith.constant 0 : index
    %c0_7 = arith.constant 0 : index
    %c0_8 = arith.constant 0 : index
    %7 = vector.load %arg5[%c0_6, %c0_7, %c0_8] : memref<1x16x256xf32, #tpu.memory_space<vmem>>, vector<1x16x256xf32>
    %8 = vector.shape_cast %7 : vector<1x16x256xf32> to vector<16x256xf32>
    %9 = vector.shape_cast %6 : vector<16x256xf32> to vector<1x16x256xf32>
    tpu.vector_store %arg5[%c0_6, %c0_7, %c0_8], %9 {strides = array<i32>} : memref<1x16x256xf32, #tpu.memory_space<vmem>>, vector<1x16x256xf32>,
    return
  }
  func.func @transform_0(%arg0: i32, %arg1: i32) -> (i32, i32) {
    %c0_i32 = arith.constant 0 : i32
    %c0_i32_0 = arith.constant 0 : i32
    %c0_i32_1 = arith.constant 0 : i32
    return %c0_i32, %c0_i32_0 : i32, i32
  }
  func.func @transform_1(%arg0: i32, %arg1: i32) -> (i32, i32, i32) {
    %c0_i32 = arith.constant 0 : i32
    %c0_i32_0 = arith.constant 0 : i32
    return %arg0, %c0_i32, %arg1 : i32, i32, i32
  }
  func.func @transform_2(%arg0: i32, %arg1: i32) -> (i32, i32) {
    %c0_i32 = arith.constant 0 : i32
    %c0_i32_0 = arith.constant 0 : i32
    %c0_i32_1 = arith.constant 0 : i32
    return %c0_i32, %c0_i32_0 : i32, i32
  }
  func.func @transform_3(%arg0: i32, %arg1: i32) -> (i32, i32, i32) {
    %c0_i32 = arith.constant 0 : i32
    %c0_i32_0 = arith.constant 0 : i32
    return %arg0, %c0_i32, %arg1 : i32, i32, i32
  }
}

module attributes {stable_mosaic.version = 11 : i64} {
  func.func @_norm_kernel(%arg0: i32, %arg1: memref<1x16x256xf32, #tpu.memory_space<vmem>>, %arg2: memref<16x1xf32, #tpu.memory_space<vmem>>, %arg3: memref<1x16x1xf32, #tpu.memory_space<vmem>>, %arg4: memref<1x16x1xf32, #tpu.memory_space<vmem>>, %arg5: memref<1x16x256xf32, #tpu.memory_space<vmem>>) attributes {dimension_semantics = [#tpu.dimension_semantics<parallel>], iteration_bounds = array<i64: 2>, scalar_prefetch = 0 : i64, scratch_operands = 0 : i64, tpu.core_type = #tpu.core_type<tc>, window_params = [{transform_indices = @transform_0, window_bounds = array<i64: 1, 16, 256>}, {pipeline_mode = #tpu.pipeline_mode<synchronous>, transform_indices = @transform_1, window_bounds = array<i64: 16, 1>}, {transform_indices = @transform_2, window_bounds = array<i64: 1, 16, 1>}, {transform_indices = @transform_3, window_bounds = array<i64: 1, 16, 1>}, {transform_indices = @transform_4, window_bounds = array<i64: 1, 16, 256>}]} {
    %c0 = arith.constant 0 : index
    %c0_0 = arith.constant 0 : index
    %c0_1 = arith.constant 0 : index
    %0 = vector.load %arg1[%c0, %c0_0, %c0_1] : memref<1x16x256xf32, #tpu.memory_space<vmem>>, vector<1x16x256xf32>
    %1 = vector.shape_cast %0 : vector<1x16x256xf32> to vector<16x256xf32>
    %cst = arith.constant dense<0.000000e+00> : vector<16xf32>
    %2 = vector.multi_reduction <add>, %1, %cst [1] : vector<16x256xf32> to vector<16xf32>
    %3 = vector.shape_cast %2 : vector<16xf32> to vector<16x1xf32>
    %cst_2 = arith.constant 2.560000e+02 : f32
    %4 = vector.broadcast %cst_2 : f32 to vector<16x1xf32>
    %5 = arith.divf %3, %4 : vector<16x1xf32>
    %6 = vector.broadcast %5 : vector<16x1xf32> to vector<16x256xf32>
    %7 = arith.subf %1, %6 : vector<16x256xf32>
    %8 = arith.mulf %7, %7 : vector<16x256xf32>
    %cst_3 = arith.constant dense<0.000000e+00> : vector<16xf32>
    %9 = vector.multi_reduction <add>, %8, %cst_3 [1] : vector<16x256xf32> to vector<16xf32>
    %10 = vector.shape_cast %9 : vector<16xf32> to vector<16x1xf32>
    %cst_4 = arith.constant 2.550000e+02 : f32
    %11 = vector.broadcast %cst_4 : f32 to vector<16x1xf32>
    %12 = arith.divf %10, %11 : vector<16x1xf32>
    %cst_5 = arith.constant 9.99999974E-6 : f32
    %13 = vector.broadcast %cst_5 : f32 to vector<16x1xf32>
    %14 = arith.addf %12, %13 : vector<16x1xf32>
    %15 = math.rsqrt %14 : vector<16x1xf32>
    %16 = vector.broadcast %15 : vector<16x1xf32> to vector<16x256xf32>
    %17 = arith.mulf %7, %16 : vector<16x256xf32>
    %18 = vector.shape_cast %1 : vector<16x256xf32> to vector<1x16x256xf32>
    %cst_6 = arith.constant dense<0.000000e+00> : vector<1xf32>
    %19 = vector.multi_reduction <add>, %18, %cst_6 [1, 2] : vector<1x16x256xf32> to vector<1xf32>
    %20 = vector.shape_cast %19 : vector<1xf32> to vector<1x1x1xf32>
    %21 = vector.extract %20[0, 0, 0] : f32 from vector<1x1x1xf32>
    %22 = vector.broadcast %21 : f32 to vector<1x1xf32>
    %cst_7 = arith.constant 4.096000e+03 : f32
    %23 = vector.broadcast %cst_7 : f32 to vector<1x1xf32>
    %24 = arith.divf %22, %23 : vector<1x1xf32>
    %25 = vector.broadcast %24 : vector<1x1xf32> to vector<16x256xf32>
    %26 = arith.subf %1, %25 : vector<16x256xf32>
    %27 = arith.mulf %26, %26 : vector<16x256xf32>
    %28 = vector.shape_cast %27 : vector<16x256xf32> to vector<1x16x256xf32>
    %cst_8 = arith.constant dense<0.000000e+00> : vector<1xf32>
    %29 = vector.multi_reduction <add>, %28, %cst_8 [1, 2] : vector<1x16x256xf32> to vector<1xf32>
    %30 = vector.shape_cast %29 : vector<1xf32> to vector<1x1x1xf32>
    %31 = vector.extract %30[0, 0, 0] : f32 from vector<1x1x1xf32>
    %32 = vector.broadcast %31 : f32 to vector<1x1xf32>
    %cst_9 = arith.constant 4.095000e+03 : f32
    %33 = vector.broadcast %cst_9 : f32 to vector<1x1xf32>
    %34 = arith.divf %32, %33 : vector<1x1xf32>
    %cst_10 = arith.constant 9.99999974E-6 : f32
    %35 = vector.broadcast %cst_10 : f32 to vector<1x1xf32>
    %36 = arith.addf %34, %35 : vector<1x1xf32>
    %37 = math.rsqrt %36 : vector<1x1xf32>
    %38 = vector.broadcast %37 : vector<1x1xf32> to vector<16x256xf32>
    %39 = arith.mulf %26, %38 : vector<16x256xf32>
    %c0_11 = arith.constant 0 : index
    %c0_12 = arith.constant 0 : index
    %40 = vector.load %arg2[%c0_11, %c0_12] : memref<16x1xf32, #tpu.memory_space<vmem>>, vector<16x1xf32>
    %41 = vector.broadcast %40 : vector<16x1xf32> to vector<16x256xf32>
    %42 = arith.mulf %41, %17 : vector<16x256xf32>
    %cst_13 = arith.constant 1.000000e+00 : f32
    %43 = vector.broadcast %cst_13 : f32 to vector<16x1xf32>
    %44 = arith.subf %43, %40 : vector<16x1xf32>
    %45 = vector.broadcast %44 : vector<16x1xf32> to vector<16x256xf32>
    %46 = arith.mulf %45, %39 : vector<16x256xf32>
    %47 = arith.addf %42, %46 : vector<16x256xf32>
    %c0_14 = arith.constant 0 : index
    %c0_15 = arith.constant 0 : index
    %c0_16 = arith.constant 0 : index
    %48 = vector.load %arg3[%c0_14, %c0_15, %c0_16] : memref<1x16x1xf32, #tpu.memory_space<vmem>>, vector<1x16x1xf32>
    %49 = vector.shape_cast %48 : vector<1x16x1xf32> to vector<16x1xf32>
    %50 = vector.broadcast %49 : vector<16x1xf32> to vector<16x256xf32>
    %51 = arith.mulf %47, %50 : vector<16x256xf32>
    %c0_17 = arith.constant 0 : index
    %c0_18 = arith.constant 0 : index
    %c0_19 = arith.constant 0 : index
    %52 = vector.load %arg4[%c0_17, %c0_18, %c0_19] : memref<1x16x1xf32, #tpu.memory_space<vmem>>, vector<1x16x1xf32>
    %53 = vector.shape_cast %52 : vector<1x16x1xf32> to vector<16x1xf32>
    %54 = vector.broadcast %53 : vector<16x1xf32> to vector<16x256xf32>
    %55 = arith.addf %51, %54 : vector<16x256xf32>
    %cst_20 = arith.constant 0.000000e+00 : f32
    %56 = vector.broadcast %cst_20 : f32 to vector<16x256xf32>
    %57 = arith.maximumf %55, %56 : vector<16x256xf32>
    %c0_21 = arith.constant 0 : index
    %c0_22 = arith.constant 0 : index
    %c0_23 = arith.constant 0 : index
    %58 = vector.load %arg5[%c0_21, %c0_22, %c0_23] : memref<1x16x256xf32, #tpu.memory_space<vmem>>, vector<1x16x256xf32>
    %59 = vector.shape_cast %58 : vector<1x16x256xf32> to vector<16x256xf32>
    %60 = vector.shape_cast %57 : vector<16x256xf32> to vector<1x16x256xf32>
    tpu.vector_store %arg5[%c0_21, %c0_22, %c0_23], %60 {strides = array<i32>} : memref<1x16x256xf32, #tpu.memory_space<vmem>>, vector<1x16x256xf32>,
    return
  }
  func.func @transform_0(%arg0: i32) -> (i32, i32, i32) {
    %c0_i32 = arith.constant 0 : i32
    %c0_i32_0 = arith.constant 0 : i32
    %c0_i32_1 = arith.constant 0 : i32
    return %arg0, %c0_i32, %c0_i32_0 : i32, i32, i32
  }
  func.func @transform_1(%arg0: i32) -> (i32, i32) {
    %c0_i32 = arith.constant 0 : i32
    %c0_i32_0 = arith.constant 0 : i32
    %c0_i32_1 = arith.constant 0 : i32
    return %c0_i32, %c0_i32_0 : i32, i32
  }
  func.func @transform_2(%arg0: i32) -> (i32, i32, i32) {
    %c0_i32 = arith.constant 0 : i32
    %c0_i32_0 = arith.constant 0 : i32
    %c0_i32_1 = arith.constant 0 : i32
    return %arg0, %c0_i32, %c0_i32_0 : i32, i32, i32
  }
  func.func @transform_3(%arg0: i32) -> (i32, i32, i32) {
    %c0_i32 = arith.constant 0 : i32
    %c0_i32_0 = arith.constant 0 : i32
    %c0_i32_1 = arith.constant 0 : i32
    return %arg0, %c0_i32, %c0_i32_0 : i32, i32, i32
  }
  func.func @transform_4(%arg0: i32) -> (i32, i32, i32) {
    %c0_i32 = arith.constant 0 : i32
    %c0_i32_0 = arith.constant 0 : i32
    %c0_i32_1 = arith.constant 0 : i32
    return %arg0, %c0_i32, %c0_i32_0 : i32, i32, i32
  }
}

module attributes {stable_mosaic.version = 11 : i64} {
  func.func @_conv_matmul_kernel(%arg0: i32, %arg1: i32, %arg2: memref<8x144xbf16, #tpu.memory_space<vmem>>, %arg3: memref<1x144x1024xbf16, #tpu.memory_space<vmem>>, %arg4: memref<8x1xf32, #tpu.memory_space<vmem>>, %arg5: memref<1x8x1024xf32, #tpu.memory_space<vmem>>) attributes {dimension_semantics = [#tpu.dimension_semantics<parallel>, #tpu.dimension_semantics<parallel>], iteration_bounds = array<i64: 2, 1>, scalar_prefetch = 0 : i64, scratch_operands = 0 : i64, tpu.core_type = #tpu.core_type<tc>, window_params = [{pipeline_mode = #tpu.pipeline_mode<synchronous>, transform_indices = @transform_0, window_bounds = array<i64: 8, 144>}, {transform_indices = @transform_1, window_bounds = array<i64: 1, 144, 1024>}, {pipeline_mode = #tpu.pipeline_mode<synchronous>, transform_indices = @transform_2, window_bounds = array<i64: 8, 1>}, {transform_indices = @transform_3, window_bounds = array<i64: 1, 8, 1024>}]} {
    %c0 = arith.constant 0 : index
    %c0_0 = arith.constant 0 : index
    %0 = vector.load %arg2[%c0, %c0_0] : memref<8x144xbf16, #tpu.memory_space<vmem>>, vector<8x144xbf16>
    %c0_1 = arith.constant 0 : index
    %c0_2 = arith.constant 0 : index
    %c0_3 = arith.constant 0 : index
    %1 = vector.load %arg3[%c0_1, %c0_2, %c0_3] : memref<1x144x1024xbf16, #tpu.memory_space<vmem>>, vector<1x144x1024xbf16>
    %2 = vector.shape_cast %1 : vector<1x144x1024xbf16> to vector<144x1024xbf16>
    %cst = arith.constant dense<0.000000e+00> : vector<8x1024xf32>
    %3 = tpu.matmul %0, %2, %cst {dimension_numbers = #tpu.dot_dimension_numbers<[1], [0], [0], [1], [0, 0, 1, 1], [], []>} : vector<8x144xbf16>, vector<144x1024xbf16>, vector<8x1024xf32> -> vector<8x1024xf32>
    %c0_4 = arith.constant 0 : index
    %c0_5 = arith.constant 0 : index
    %4 = vector.load %arg4[%c0_4, %c0_5] : memref<8x1xf32, #tpu.memory_space<vmem>>, vector<8x1xf32>
    %5 = vector.broadcast %4 : vector<8x1xf32> to vector<8x1024xf32>
    %6 = arith.addf %3, %5 : vector<8x1024xf32>
    %c0_6 = arith.constant 0 : index
    %c0_7 = arith.constant 0 : index
    %c0_8 = arith.constant 0 : index
    %7 = vector.load %arg5[%c0_6, %c0_7, %c0_8] : memref<1x8x1024xf32, #tpu.memory_space<vmem>>, vector<1x8x1024xf32>
    %8 = vector.shape_cast %7 : vector<1x8x1024xf32> to vector<8x1024xf32>
    %9 = vector.shape_cast %6 : vector<8x1024xf32> to vector<1x8x1024xf32>
    tpu.vector_store %arg5[%c0_6, %c0_7, %c0_8], %9 {strides = array<i32>} : memref<1x8x1024xf32, #tpu.memory_space<vmem>>, vector<1x8x1024xf32>,
    return
  }
  func.func @transform_0(%arg0: i32, %arg1: i32) -> (i32, i32) {
    %c0_i32 = arith.constant 0 : i32
    %c0_i32_0 = arith.constant 0 : i32
    %c0_i32_1 = arith.constant 0 : i32
    return %c0_i32, %c0_i32_0 : i32, i32
  }
  func.func @transform_1(%arg0: i32, %arg1: i32) -> (i32, i32, i32) {
    %c0_i32 = arith.constant 0 : i32
    %c0_i32_0 = arith.constant 0 : i32
    return %arg0, %c0_i32, %arg1 : i32, i32, i32
  }
  func.func @transform_2(%arg0: i32, %arg1: i32) -> (i32, i32) {
    %c0_i32 = arith.constant 0 : i32
    %c0_i32_0 = arith.constant 0 : i32
    %c0_i32_1 = arith.constant 0 : i32
    return %c0_i32, %c0_i32_0 : i32, i32
  }
  func.func @transform_3(%arg0: i32, %arg1: i32) -> (i32, i32, i32) {
    %c0_i32 = arith.constant 0 : i32
    %c0_i32_0 = arith.constant 0 : i32
    return %arg0, %c0_i32, %arg1 : i32, i32, i32
  }
}

module attributes {stable_mosaic.version = 11 : i64} {
  func.func @_norm_kernel(%arg0: i32, %arg1: memref<1x8x1024xf32, #tpu.memory_space<vmem>>, %arg2: memref<8x1xf32, #tpu.memory_space<vmem>>, %arg3: memref<1x8x1xf32, #tpu.memory_space<vmem>>, %arg4: memref<1x8x1xf32, #tpu.memory_space<vmem>>, %arg5: memref<1x8x1024xf32, #tpu.memory_space<vmem>>) attributes {dimension_semantics = [#tpu.dimension_semantics<parallel>], iteration_bounds = array<i64: 2>, scalar_prefetch = 0 : i64, scratch_operands = 0 : i64, tpu.core_type = #tpu.core_type<tc>, window_params = [{transform_indices = @transform_0, window_bounds = array<i64: 1, 8, 1024>}, {pipeline_mode = #tpu.pipeline_mode<synchronous>, transform_indices = @transform_1, window_bounds = array<i64: 8, 1>}, {transform_indices = @transform_2, window_bounds = array<i64: 1, 8, 1>}, {transform_indices = @transform_3, window_bounds = array<i64: 1, 8, 1>}, {transform_indices = @transform_4, window_bounds = array<i64: 1, 8, 1024>}]} {
    %c0 = arith.constant 0 : index
    %c0_0 = arith.constant 0 : index
    %c0_1 = arith.constant 0 : index
    %0 = vector.load %arg1[%c0, %c0_0, %c0_1] : memref<1x8x1024xf32, #tpu.memory_space<vmem>>, vector<1x8x1024xf32>
    %1 = vector.shape_cast %0 : vector<1x8x1024xf32> to vector<8x1024xf32>
    %cst = arith.constant dense<0.000000e+00> : vector<8xf32>
    %2 = vector.multi_reduction <add>, %1, %cst [1] : vector<8x1024xf32> to vector<8xf32>
    %3 = vector.shape_cast %2 : vector<8xf32> to vector<8x1xf32>
    %cst_2 = arith.constant 1.024000e+03 : f32
    %4 = vector.broadcast %cst_2 : f32 to vector<8x1xf32>
    %5 = arith.divf %3, %4 : vector<8x1xf32>
    %6 = vector.broadcast %5 : vector<8x1xf32> to vector<8x1024xf32>
    %7 = arith.subf %1, %6 : vector<8x1024xf32>
    %8 = arith.mulf %7, %7 : vector<8x1024xf32>
    %cst_3 = arith.constant dense<0.000000e+00> : vector<8xf32>
    %9 = vector.multi_reduction <add>, %8, %cst_3 [1] : vector<8x1024xf32> to vector<8xf32>
    %10 = vector.shape_cast %9 : vector<8xf32> to vector<8x1xf32>
    %cst_4 = arith.constant 1.023000e+03 : f32
    %11 = vector.broadcast %cst_4 : f32 to vector<8x1xf32>
    %12 = arith.divf %10, %11 : vector<8x1xf32>
    %cst_5 = arith.constant 9.99999974E-6 : f32
    %13 = vector.broadcast %cst_5 : f32 to vector<8x1xf32>
    %14 = arith.addf %12, %13 : vector<8x1xf32>
    %15 = math.rsqrt %14 : vector<8x1xf32>
    %16 = vector.broadcast %15 : vector<8x1xf32> to vector<8x1024xf32>
    %17 = arith.mulf %7, %16 : vector<8x1024xf32>
    %18 = vector.shape_cast %1 : vector<8x1024xf32> to vector<1x8x1024xf32>
    %cst_6 = arith.constant dense<0.000000e+00> : vector<1xf32>
    %19 = vector.multi_reduction <add>, %18, %cst_6 [1, 2] : vector<1x8x1024xf32> to vector<1xf32>
    %20 = vector.shape_cast %19 : vector<1xf32> to vector<1x1x1xf32>
    %21 = vector.extract %20[0, 0, 0] : f32 from vector<1x1x1xf32>
    %22 = vector.broadcast %21 : f32 to vector<1x1xf32>
    %cst_7 = arith.constant 8.192000e+03 : f32
    %23 = vector.broadcast %cst_7 : f32 to vector<1x1xf32>
    %24 = arith.divf %22, %23 : vector<1x1xf32>
    %25 = vector.broadcast %24 : vector<1x1xf32> to vector<8x1024xf32>
    %26 = arith.subf %1, %25 : vector<8x1024xf32>
    %27 = arith.mulf %26, %26 : vector<8x1024xf32>
    %28 = vector.shape_cast %27 : vector<8x1024xf32> to vector<1x8x1024xf32>
    %cst_8 = arith.constant dense<0.000000e+00> : vector<1xf32>
    %29 = vector.multi_reduction <add>, %28, %cst_8 [1, 2] : vector<1x8x1024xf32> to vector<1xf32>
    %30 = vector.shape_cast %29 : vector<1xf32> to vector<1x1x1xf32>
    %31 = vector.extract %30[0, 0, 0] : f32 from vector<1x1x1xf32>
    %32 = vector.broadcast %31 : f32 to vector<1x1xf32>
    %cst_9 = arith.constant 8.191000e+03 : f32
    %33 = vector.broadcast %cst_9 : f32 to vector<1x1xf32>
    %34 = arith.divf %32, %33 : vector<1x1xf32>
    %cst_10 = arith.constant 9.99999974E-6 : f32
    %35 = vector.broadcast %cst_10 : f32 to vector<1x1xf32>
    %36 = arith.addf %34, %35 : vector<1x1xf32>
    %37 = math.rsqrt %36 : vector<1x1xf32>
    %38 = vector.broadcast %37 : vector<1x1xf32> to vector<8x1024xf32>
    %39 = arith.mulf %26, %38 : vector<8x1024xf32>
    %c0_11 = arith.constant 0 : index
    %c0_12 = arith.constant 0 : index
    %40 = vector.load %arg2[%c0_11, %c0_12] : memref<8x1xf32, #tpu.memory_space<vmem>>, vector<8x1xf32>
    %41 = vector.broadcast %40 : vector<8x1xf32> to vector<8x1024xf32>
    %42 = arith.mulf %41, %17 : vector<8x1024xf32>
    %cst_13 = arith.constant 1.000000e+00 : f32
    %43 = vector.broadcast %cst_13 : f32 to vector<8x1xf32>
    %44 = arith.subf %43, %40 : vector<8x1xf32>
    %45 = vector.broadcast %44 : vector<8x1xf32> to vector<8x1024xf32>
    %46 = arith.mulf %45, %39 : vector<8x1024xf32>
    %47 = arith.addf %42, %46 : vector<8x1024xf32>
    %c0_14 = arith.constant 0 : index
    %c0_15 = arith.constant 0 : index
    %c0_16 = arith.constant 0 : index
    %48 = vector.load %arg3[%c0_14, %c0_15, %c0_16] : memref<1x8x1xf32, #tpu.memory_space<vmem>>, vector<1x8x1xf32>
    %49 = vector.shape_cast %48 : vector<1x8x1xf32> to vector<8x1xf32>
    %50 = vector.broadcast %49 : vector<8x1xf32> to vector<8x1024xf32>
    %51 = arith.mulf %47, %50 : vector<8x1024xf32>
    %c0_17 = arith.constant 0 : index
    %c0_18 = arith.constant 0 : index
    %c0_19 = arith.constant 0 : index
    %52 = vector.load %arg4[%c0_17, %c0_18, %c0_19] : memref<1x8x1xf32, #tpu.memory_space<vmem>>, vector<1x8x1xf32>
    %53 = vector.shape_cast %52 : vector<1x8x1xf32> to vector<8x1xf32>
    %54 = vector.broadcast %53 : vector<8x1xf32> to vector<8x1024xf32>
    %55 = arith.addf %51, %54 : vector<8x1024xf32>
    %cst_20 = arith.constant 0.000000e+00 : f32
    %56 = vector.broadcast %cst_20 : f32 to vector<8x1024xf32>
    %57 = arith.maximumf %55, %56 : vector<8x1024xf32>
    %c0_21 = arith.constant 0 : index
    %c0_22 = arith.constant 0 : index
    %c0_23 = arith.constant 0 : index
    %58 = vector.load %arg5[%c0_21, %c0_22, %c0_23] : memref<1x8x1024xf32, #tpu.memory_space<vmem>>, vector<1x8x1024xf32>
    %59 = vector.shape_cast %58 : vector<1x8x1024xf32> to vector<8x1024xf32>
    %60 = vector.shape_cast %57 : vector<8x1024xf32> to vector<1x8x1024xf32>
    tpu.vector_store %arg5[%c0_21, %c0_22, %c0_23], %60 {strides = array<i32>} : memref<1x8x1024xf32, #tpu.memory_space<vmem>>, vector<1x8x1024xf32>,
    return
  }
  func.func @transform_0(%arg0: i32) -> (i32, i32, i32) {
    %c0_i32 = arith.constant 0 : i32
    %c0_i32_0 = arith.constant 0 : i32
    %c0_i32_1 = arith.constant 0 : i32
    return %arg0, %c0_i32, %c0_i32_0 : i32, i32, i32
  }
  func.func @transform_1(%arg0: i32) -> (i32, i32) {
    %c0_i32 = arith.constant 0 : i32
    %c0_i32_0 = arith.constant 0 : i32
    %c0_i32_1 = arith.constant 0 : i32
    return %c0_i32, %c0_i32_0 : i32, i32
  }
  func.func @transform_2(%arg0: i32) -> (i32, i32, i32) {
    %c0_i32 = arith.constant 0 : i32
    %c0_i32_0 = arith.constant 0 : i32
    %c0_i32_1 = arith.constant 0 : i32
    return %arg0, %c0_i32, %c0_i32_0 : i32, i32, i32
  }
  func.func @transform_3(%arg0: i32) -> (i32, i32, i32) {
    %c0_i32 = arith.constant 0 : i32
    %c0_i32_0 = arith.constant 0 : i32
    %c0_i32_1 = arith.constant 0 : i32
    return %arg0, %c0_i32, %c0_i32_0 : i32, i32, i32
  }
  func.func @transform_4(%arg0: i32) -> (i32, i32, i32) {
    %c0_i32 = arith.constant 0 : i32
    %c0_i32_0 = arith.constant 0 : i32
    %c0_i32_1 = arith.constant 0 : i32
    return %arg0, %c0_i32, %c0_i32_0 : i32, i32, i32
  }
}

module attributes {stable_mosaic.version = 11 : i64} {
  func.func @_conv_matmul_kernel(%arg0: i32, %arg1: i32, %arg2: memref<3x392xbf16, #tpu.memory_space<vmem>>, %arg3: memref<1x392x1024xbf16, #tpu.memory_space<vmem>>, %arg4: memref<3x1xf32, #tpu.memory_space<vmem>>, %arg5: memref<1x3x1024xf32, #tpu.memory_space<vmem>>) attributes {dimension_semantics = [#tpu.dimension_semantics<parallel>, #tpu.dimension_semantics<parallel>], iteration_bounds = array<i64: 2, 1>, scalar_prefetch = 0 : i64, scratch_operands = 0 : i64, tpu.core_type = #tpu.core_type<tc>, window_params = [{pipeline_mode = #tpu.pipeline_mode<synchronous>, transform_indices = @transform_0, window_bounds = array<i64: 3, 392>}, {transform_indices = @transform_1, window_bounds = array<i64: 1, 392, 1024>}, {pipeline_mode = #tpu.pipeline_mode<synchronous>, transform_indices = @transform_2, window_bounds = array<i64: 3, 1>}, {transform_indices = @transform_3, window_bounds = array<i64: 1, 3, 1024>}]} {
    %c0 = arith.constant 0 : index
    %c0_0 = arith.constant 0 : index
    %0 = vector.load %arg2[%c0, %c0_0] : memref<3x392xbf16, #tpu.memory_space<vmem>>, vector<3x392xbf16>
    %c0_1 = arith.constant 0 : index
    %c0_2 = arith.constant 0 : index
    %c0_3 = arith.constant 0 : index
    %1 = vector.load %arg3[%c0_1, %c0_2, %c0_3] : memref<1x392x1024xbf16, #tpu.memory_space<vmem>>, vector<1x392x1024xbf16>
    %2 = vector.shape_cast %1 : vector<1x392x1024xbf16> to vector<392x1024xbf16>
    %cst = arith.constant dense<0.000000e+00> : vector<3x1024xf32>
    %3 = tpu.matmul %0, %2, %cst {dimension_numbers = #tpu.dot_dimension_numbers<[1], [0], [0], [1], [0, 0, 1, 1], [], []>} : vector<3x392xbf16>, vector<392x1024xbf16>, vector<3x1024xf32> -> vector<3x1024xf32>
    %c0_4 = arith.constant 0 : index
    %c0_5 = arith.constant 0 : index
    %4 = vector.load %arg4[%c0_4, %c0_5] : memref<3x1xf32, #tpu.memory_space<vmem>>, vector<3x1xf32>
    %5 = vector.broadcast %4 : vector<3x1xf32> to vector<3x1024xf32>
    %6 = arith.addf %3, %5 : vector<3x1024xf32>
    %7 = math.tanh %6 : vector<3x1024xf32>
    %c0_6 = arith.constant 0 : index
    %c0_7 = arith.constant 0 : index
    %c0_8 = arith.constant 0 : index
    %8 = vector.load %arg5[%c0_6, %c0_7, %c0_8] : memref<1x3x1024xf32, #tpu.memory_space<vmem>>, vector<1x3x1024xf32>
    %9 = vector.shape_cast %8 : vector<1x3x1024xf32> to vector<3x1024xf32>
    %10 = vector.shape_cast %7 : vector<3x1024xf32> to vector<1x3x1024xf32>
    tpu.vector_store %arg5[%c0_6, %c0_7, %c0_8], %10 {strides = array<i32>} : memref<1x3x1024xf32, #tpu.memory_space<vmem>>, vector<1x3x1024xf32>,
    return
  }
  func.func @transform_0(%arg0: i32, %arg1: i32) -> (i32, i32) {
    %c0_i32 = arith.constant 0 : i32
    %c0_i32_0 = arith.constant 0 : i32
    %c0_i32_1 = arith.constant 0 : i32
    return %c0_i32, %c0_i32_0 : i32, i32
  }
  func.func @transform_1(%arg0: i32, %arg1: i32) -> (i32, i32, i32) {
    %c0_i32 = arith.constant 0 : i32
    %c0_i32_0 = arith.constant 0 : i32
    return %arg0, %c0_i32, %arg1 : i32, i32, i32
  }
  func.func @transform_2(%arg0: i32, %arg1: i32) -> (i32, i32) {
    %c0_i32 = arith.constant 0 : i32
    %c0_i32_0 = arith.constant 0 : i32
    %c0_i32_1 = arith.constant 0 : i32
    return %c0_i32, %c0_i32_0 : i32, i32
  }
  func.func @transform_3(%arg0: i32, %arg1: i32) -> (i32, i32, i32) {
    %c0_i32 = arith.constant 0 : i32
    %c0_i32_0 = arith.constant 0 : i32
    return %arg0, %c0_i32, %arg1 : i32, i32, i32
  }
}

</mosaic_0001>

<bundles_post_ra>
// kernel: resnet_generator.28
= control target key start
LH: loop header
LB: loop body
LE: loop exit
PB: predicated region body
PF: predicated region fallthrough
CT: control target
= control target key end

     0   :  { %s1152_s12 = smov 0   ;;  %s1154_s13 = smov 0   ;;  %s1315_s0 = inlined_call_operand.vmem [shape: bf16[8,147], index: 0, kind: input, shape index: {}]   ;;  %s1316_s1 = inlined_call_operand.vmem [shape: bf16[2,147,1024], index: 1, kind: input, shape index: {}]   ;;  %s1317_s2 = inlined_call_operand.vmem [shape: f32[8,1], index: 2, kind: input, shape index: {}]   ;;  %s1318_s3 = inlined_call_operand.vmem [shape: f32[2,8,1024], index: 3, kind: output, shape index: {}]  }
   0x1   :  { %s1156_s14 = smov 0  }
   0x2 LB: > { %s25_s15 = sadd.s32 1, %s1124_s13  ;;  %p975_p0 = scmp.ge.s32.totalorder %s1128_s14, 1  ;;  %s1128_s14 = sphi %s1156_s14, %s13_s14   ;;  %s1124_s13 = sphi %s1154_s13, %s1320_s13   ;;  %s1120_s12 = sphi %s1152_s12, %s1319_s12  }
   0x3   : > { %p27_p1 = scmp.ge.s32.totalorder %s25_s15, 2  ;;  %p158_p2 = scmp.lt.s32.totalorder %s1128_s14, 3 }
   0x5   : > { %s1322_s15 = smov (%p27_p1, %s25_s15), 0  ;;  %p159_p3 = pnand %p975_p0, %p158_p2 }
   0x6   : > { %p191_p4 = scmp.lt.s32.totalorder (!%p159_p3), %s1120_s12, 1  ;;  %v1173_v0 = vld [vmem:[%s1315_s0] sm:$0xff] (!%p159_p3)  ;;  %vm680_vm0 = vcmask (!%p159_p3), 154624   ;;  %v1130_v3 = vmov (!%p159_p3), 0   ;;  %vm684_vm1 = vcmask (!%p159_p3), 1040384   ;;  %vm685_vm2 = vcmask (!%p159_p3), 1041408  }
   0x7   : > { %162 = sbr.rel (%p159_p3) target bundleno = 318 (0x13e), region = 32  ;;  %v1177_v1 = vcombine.high (!%p159_p3), %v1173_v0, %v1173_v0  ;;  %v288_v2 = vld [vmem:[%s1317_s2] sm:$0xff] (!%p159_p3)  ;;  %1095 = vset.pattern.permute.xlu0 (!%p159_p3), %v1130_v3 }
   0x8   : > { %291 = vperm.xlu0 (!%p159_p3), %1095, %v288_v2  }
   0x9   : > { %1061 = vmatprep.mubr.msk.bf16.mxu0 (!%p159_p3), %vm680_vm0, %v1177_v1  ;;  %1062 = vmatprep.mubr.msk.bf16.mxu1 (!%p159_p3), %vm680_vm0, %v1177_v1 }
   0xe   : > { %s1324_s12 = smov (!%p191_p4, %s1120_s12), 1 }
   0xf   : > { %s1068_s20 = smul.u32 608, %s1324_s12  ;;  %s1067_s24 = sshll.u32 %s1324_s12, 6 }
  0x10   : > { %s1296_s27 = scalar_lea.vmem %s1318_s3, %s1067_s24 }
  0x11   : > { %s1192_s23 = scalar_lea.vmem %s1316_s1, %s1068_s20 }
  0x12   : > { %v212_v4 = vld [vmem:[%s1192_s23] sm:$0xff]  ;;  %v213_v6 = vld [vmem:[%s1192_s23 + $0x8] sm:$0xff] }
  0x13   : > { %v216_v5 = vld [vmem:[%s1192_s23 + $0x20] sm:$0xff]  ;;  %v217_v8 = vld [vmem:[%s1192_s23 + $0x28] sm:$0xff] }
  0x14   : > { %v982_v7 = vcombine.high %v212_v4, %v216_v5  ;;  %v981_v9 = vcombine.low %v212_v4, %v216_v5  ;;  %v220_v10 = vld [vmem:[%s1192_s23 + $0x40] sm:$0xff]  ;;  %v984_v12 = vcombine.high %v213_v6, %v217_v8  ;;  %v983_v13 = vcombine.low %v213_v6, %v217_v8  ;;  %v221_v15 = vld [vmem:[%s1192_s23 + $0x48] sm:$0xff] }
  0x15   : > { %v224_v11 = vld [vmem:[%s1192_s23 + $0x60] sm:$0xff]  ;;  %v225_v16 = vld [vmem:[%s1192_s23 + $0x68] sm:$0xff] }
  0x16   : > { %v990_v14 = vcombine.high %v220_v10, %v224_v11  ;;  %v228_v17 = vld [vmem:[%s1192_s23 + $0x80] sm:$0xff]  ;;  %712 = vmatprep.subr.bf16.mxu0 %v982_v7  ;;  %v992_v18 = vcombine.high %v221_v15, %v225_v16  ;;  %v229_v20 = vld [vmem:[%s1192_s23 + $0x88] sm:$0xff]  ;;  %753 = vmatprep.subr.bf16.mxu1 %v984_v12  ;;  %v989_v22 = vcombine.low %v220_v10, %v224_v11 }
  0x17   : > { %v232_v19 = vld [vmem:[%s1192_s23 + $0xa0] sm:$0xff]  ;;  %v233_v21 = vld [vmem:[%s1192_s23 + $0xa8] sm:$0xff]  ;;  %713 = vmatpush1.bf16.msra.mxu0 %v981_v9  ;;  %754 = vmatpush1.bf16.msra.mxu1 %v983_v13  ;;  %v991_v23 = vcombine.low %v221_v15, %v225_v16  ;;  %v1131_v9 = vmov 65535  }
  0x18   : > { %714 = vmatprep.subr.bf16.mxu0 %v990_v14  ;;  %v998_v24 = vcombine.high %v228_v17, %v232_v19  ;;  %755 = vmatprep.subr.bf16.mxu1 %v992_v18  ;;  %v1000_v25 = vcombine.high %v229_v20, %v233_v21  ;;  %v236_v26 = vld [vmem:[%s1192_s23 + $0xc0] sm:$0xff]  ;;  %v237_v28 = vld [vmem:[%s1192_s23 + $0xc8] sm:$0xff]  ;;  %v997_v30 = vcombine.low %v228_v17, %v232_v19  ;;  %v686_v10 = vsel %vm684_vm1, 4294967295, %v1131_v9 }
  0x19   : > { %v240_v27 = vld [vmem:[%s1192_s23 + $0xe0] sm:$0xff]  ;;  %v241_v29 = vld [vmem:[%s1192_s23 + $0xe8] sm:$0xff]  ;;  %v999_v31 = vcombine.low %v229_v20, %v233_v21  ;;  %v1232_v17 = vsel %vm685_vm2, %v686_v10, 0  ;;  %v262_v10 = vld [vmem:[%s1192_s23 + $0x190] sm:$0xff] }
  0x1a   : > { %v1006_v32 = vcombine.high %v236_v26, %v240_v27  ;;  %v1008_v33 = vcombine.high %v237_v28, %v241_v29  ;;  %v244_v34 = vld [vmem:[%s1192_s23 + $0x100] sm:$0xff]  ;;  %v245_v36 = vld [vmem:[%s1192_s23 + $0x108] sm:$0xff]  ;;  %v1005_v38 = vcombine.low %v236_v26, %v240_v27  ;;  %v1007_v39 = vcombine.low %v237_v28, %v241_v29  ;;  %v218_v26 = vld [vmem:[%s1192_s23 + $0x30] sm:$0xff] }
  0x1b   : > { %715 = vmatpush1.bf16.msra.mxu0 %v989_v22  ;;  %756 = vmatpush1.bf16.msra.mxu1 %v991_v23  ;;  %v248_v35 = vld [vmem:[%s1192_s23 + $0x120] sm:$0xff]  ;;  %v249_v37 = vld [vmem:[%s1192_s23 + $0x128] sm:$0xff]  ;;  %v215_v27 = vld [vmem:[%s1192_s23 + $0x18] sm:$0xff] }
  0x1c   : > { %716 = vmatprep.subr.bf16.mxu0 %v998_v24  ;;  %757 = vmatprep.subr.bf16.mxu1 %v1000_v25  ;;  %v1014_v40 = vcombine.high %v244_v34, %v248_v35  ;;  %v1016_v41 = vcombine.high %v245_v36, %v249_v37  ;;  %v252_v42 = vld [vmem:[%s1192_s23 + $0x140] sm:$0xff]  ;;  %v253_v44 = vld [vmem:[%s1192_s23 + $0x148] sm:$0xff]  ;;  %v1013_v46 = vcombine.low %v244_v34, %v248_v35  ;;  %v214_v25 = vld [vmem:[%s1192_s23 + $0x10] sm:$0xff] }
  0x1d   : > { %v256_v43 = vld [vmem:[%s1192_s23 + $0x160] sm:$0xff]  ;;  %v257_v45 = vld [vmem:[%s1192_s23 + $0x168] sm:$0xff]  ;;  %v1015_v47 = vcombine.low %v245_v36, %v249_v37  ;;  %v219_v28 = vld [vmem:[%s1192_s23 + $0x38] sm:$0xff]  ;;  %v1246_v35 = vcombine.low %v1173_v0, %v1173_v0 }
  0x1e   : > { %v1022_v48 = vcombine.high %v252_v42, %v256_v43  ;;  %v1024_v49 = vcombine.high %v253_v44, %v257_v45  ;;  %v260_v50 = vld [vmem:[%s1192_s23 + $0x180] sm:$0xff]  ;;  %v261_v52 = vld [vmem:[%s1192_s23 + $0x188] sm:$0xff]  ;;  %v1021_v54 = vcombine.low %v252_v42, %v256_v43  ;;  %v1023_v55 = vcombine.low %v253_v44, %v257_v45  ;;  %v226_v34 = vld [vmem:[%s1192_s23 + $0x70] sm:$0xff] }
  0x1f   : > { %717 = vmatpush1.bf16.msra.mxu0 %v997_v30  ;;  %758 = vmatpush1.bf16.msra.mxu1 %v999_v31  ;;  %v264_v51 = vld [vmem:[%s1192_s23 + $0x1a0] sm:$0xff]  ;;  %v265_v53 = vld [vmem:[%s1192_s23 + $0x1a8] sm:$0xff]  ;;  %v986_v31 = vcombine.high %v214_v25, %v218_v26  ;;  %v223_v36 = vld [vmem:[%s1192_s23 + $0x58] sm:$0xff] }
  0x20   : > { %718 = vmatprep.subr.bf16.mxu0 %v1006_v32  ;;  %759 = vmatprep.subr.bf16.mxu1 %v1008_v33  ;;  %v1030_v56 = vcombine.high %v260_v50, %v264_v51  ;;  %v1032_v57 = vcombine.high %v261_v52, %v265_v53  ;;  %v268_v58 = vld [vmem:[%s1192_s23 + $0x1c0] sm:$0xff]  ;;  %v269_v60 = vld [vmem:[%s1192_s23 + $0x1c8] sm:$0xff]  ;;  %v1029_v62 = vcombine.low %v260_v50, %v264_v51  ;;  %v222_v33 = vld [vmem:[%s1192_s23 + $0x50] sm:$0xff] }
  0x21   : > { %v272_v59 = vld [vmem:[%s1192_s23 + $0x1e0] sm:$0xff]  ;;  %v273_v61 = vld [vmem:[%s1192_s23 + $0x1e8] sm:$0xff]  ;;  %v1031_v63 = vcombine.low %v261_v52, %v265_v53  ;;  %v988_v32 = vcombine.high %v215_v27, %v219_v28  ;;  %v227_v37 = vld [vmem:[%s1192_s23 + $0x78] sm:$0xff]  ;;  %v993_v45 = vcombine.low %v222_v33, %v226_v34 }
  0x22   : > { %v1038_v2 = vcombine.high %v268_v58, %v272_v59  ;;  %v1040_v3 = vcombine.high %v269_v60, %v273_v61  ;;  %v276_v4 = vld [vmem:[%s1192_s23 + $0x200] sm:$0xff]  ;;  %v277_v7 = vld [vmem:[%s1192_s23 + $0x208] sm:$0xff]  ;;  %v1037_v12 = vcombine.low %v268_v58, %v272_v59  ;;  %v1039_v13 = vcombine.low %v269_v60, %v273_v61  ;;  %v230_v42 = vld [vmem:[%s1192_s23 + $0x90] sm:$0xff] }
  0x23   : > { %719 = vmatpush1.bf16.msra.mxu0 %v1005_v38  ;;  %760 = vmatpush1.bf16.msra.mxu1 %v1007_v39  ;;  %v280_v5 = vld [vmem:[%s1192_s23 + $0x220] sm:$0xff]  ;;  %v281_v8 = vld [vmem:[%s1192_s23 + $0x228] sm:$0xff]  ;;  %v985_v38 = vcombine.low %v214_v25, %v218_v26  ;;  %v987_v39 = vcombine.low %v215_v27, %v219_v28  ;;  %v234_v43 = vld [vmem:[%s1192_s23 + $0xb0] sm:$0xff] }
  0x24   : > { %720 = vmatprep.subr.bf16.mxu0 %v1014_v40  ;;  %761 = vmatprep.subr.bf16.mxu1 %v1016_v41  ;;  %v284_v6 = vld [vmem:[%s1192_s23 + $0x240] sm:$0x33]  ;;  %v285_v11 = vld [vmem:[%s1192_s23 + $0x248] sm:$0x33]  ;;  %v1046_v14 = vcombine.high %v276_v4, %v280_v5  ;;  %v1048_v16 = vcombine.high %v277_v7, %v281_v8  ;;  %v1045_v19 = vcombine.low %v276_v4, %v280_v5  ;;  %v231_v0 = vld [vmem:[%s1192_s23 + $0x98] sm:$0xff] }
  0x25   : > { %v1054_v15 = vcombine.high %v284_v6, %v284_v6  ;;  %v1056_v18 = vcombine.high %v285_v11, %v285_v11  ;;  %v1053_v20 = vcombine.low %v284_v6, %v284_v6  ;;  %v1047_v21 = vcombine.low %v277_v7, %v281_v8  ;;  %v235_v44 = vld [vmem:[%s1192_s23 + $0xb8] sm:$0xff]  ;;  %v242_v50 = vld [vmem:[%s1192_s23 + $0xf0] sm:$0xff] }
  0x26   : > { %v1055_v23 = vcombine.low %v285_v11, %v285_v11  ;;  %v994_v40 = vcombine.high %v222_v33, %v226_v34  ;;  %v996_v41 = vcombine.high %v223_v36, %v227_v37  ;;  %v239_v51 = vld [vmem:[%s1192_s23 + $0xd8] sm:$0xff]  ;;  %v1001_v53 = vcombine.low %v230_v42, %v234_v43  ;;  %v250_v58 = vld [vmem:[%s1192_s23 + $0x130] sm:$0xff] }
  0x27   : > { %721 = vmatpush1.bf16.msra.mxu0 %v1013_v46  ;;  %762 = vmatpush1.bf16.msra.mxu1 %v1015_v47  ;;  %v692_v22 = vand.u32 %v1054_v15, %v1232_v17  ;;  %v698_v24 = vand.u32 %v1056_v18, %v1232_v17  ;;  %v689_v29 = vand.u32 %v1053_v20, %v1232_v17  ;;  %v243_v52 = vld [vmem:[%s1192_s23 + $0xf8] sm:$0xff]  ;;  %v266_v11 = vld [vmem:[%s1192_s23 + $0x1b0] sm:$0xff] }
  0x28   : > { %722 = vmatprep.subr.bf16.mxu0 %v1022_v48  ;;  %763 = vmatprep.subr.bf16.mxu1 %v1024_v49  ;;  %v695_v30 = vand.u32 %v1055_v23, %v1232_v17  ;;  %v995_v46 = vcombine.low %v223_v36, %v227_v37  ;;  %v1002_v47 = vcombine.high %v230_v42, %v234_v43  ;;  %v238_v49 = vld [vmem:[%s1192_s23 + $0xd0] sm:$0xff]  ;;  %v247_v59 = vld [vmem:[%s1192_s23 + $0x118] sm:$0xff] }
  0x29   : > { %v1004_v48 = vcombine.high %v231_v0, %v235_v44  ;;  %v251_v60 = vld [vmem:[%s1192_s23 + $0x138] sm:$0xff]  ;;  %v1009_v61 = vcombine.low %v238_v49, %v242_v50  ;;  %v274_v20 = vld [vmem:[%s1192_s23 + $0x1f0] sm:$0xff]  ;;  %v1033_v23 = vcombine.low %v262_v10, %v266_v11 }
  0x2a   : > { %v255_v4 = vld [vmem:[%s1192_s23 + $0x158] sm:$0xff]  ;;  %v1019_v7 = vcombine.low %v247_v59, %v251_v60  ;;  %v278_v27 = vld [vmem:[%s1192_s23 + $0x210] sm:$0xff] }
  0x2b   : > { %723 = vmatpush1.bf16.msra.mxu0 %v1021_v54  ;;  %764 = vmatpush1.bf16.msra.mxu1 %v1023_v55  ;;  %v1003_v54 = vcombine.low %v231_v0, %v235_v44  ;;  %v1010_v55 = vcombine.high %v238_v49, %v242_v50  ;;  %v259_v5 = vld [vmem:[%s1192_s23 + $0x178] sm:$0xff]  ;;  %v282_v28 = vld [vmem:[%s1192_s23 + $0x230] sm:$0xff] }
  0x2c   : > { %724 = vmatprep.subr.bf16.mxu0 %v1030_v56  ;;  %765 = vmatprep.subr.bf16.mxu1 %v1032_v57  ;;  %v1012_v56 = vcombine.high %v239_v51, %v243_v52  ;;  %v246_v57 = vld [vmem:[%s1192_s23 + $0x110] sm:$0xff]  ;;  %v1028_v9 = vcombine.high %v255_v4, %v259_v5  ;;  %v1027_v15 = vcombine.low %v255_v4, %v259_v5 }
  0x2d   : > { %v1017_v6 = vcombine.low %v246_v57, %v250_v58  ;;  %v1050_v36 = vcombine.high %v278_v27, %v282_v28 }
  0x2f   : > { %725 = vmatpush1.bf16.msra.mxu0 %v1029_v62  ;;  %766 = vmatpush1.bf16.msra.mxu1 %v1031_v63  ;;  %v1018_v62 = vcombine.high %v246_v57, %v250_v58  ;;  %v1020_v63 = vcombine.high %v247_v59, %v251_v60 }
  0x30   : > { %726 = vmatprep.subr.bf16.mxu0 %v1038_v2  ;;  %767 = vmatprep.subr.bf16.mxu1 %v1040_v3  ;;  %v254_v2 = vld [vmem:[%s1192_s23 + $0x150] sm:$0xff] }
  0x31   : > { %v258_v3 = vld [vmem:[%s1192_s23 + $0x170] sm:$0xff] }
  0x32   : > { %v1026_v8 = vcombine.high %v254_v2, %v258_v3 }
  0x33   : > { %727 = vmatpush1.bf16.msra.mxu0 %v1037_v12  ;;  %768 = vmatpush1.bf16.msra.mxu1 %v1039_v13  ;;  %v263_v12 = vld [vmem:[%s1192_s23 + $0x198] sm:$0xff] }
  0x34   : > { %728 = vmatprep.subr.bf16.mxu0 %v1046_v14  ;;  %769 = vmatprep.subr.bf16.mxu1 %v1048_v16  ;;  %v267_v13 = vld [vmem:[%s1192_s23 + $0x1b8] sm:$0xff]  ;;  %v1025_v14 = vcombine.low %v254_v2, %v258_v3  ;;  %v1034_v16 = vcombine.high %v262_v10, %v266_v11 }
  0x35   : > { %v1036_v18 = vcombine.high %v263_v12, %v267_v13 }
  0x37   : > { %729 = vmatpush1.bf16.msra.mxu0 %v1045_v19  ;;  %770 = vmatpush1.bf16.msra.mxu1 %v1047_v21  ;;  %v270_v19 = vld [vmem:[%s1192_s23 + $0x1d0] sm:$0xff]  ;;  %v271_v21 = vld [vmem:[%s1192_s23 + $0x1d8] sm:$0xff] }
  0x38   : > { %730 = vmatprep.subr.bf16.mxu0 %v692_v22  ;;  %771 = vmatprep.subr.bf16.mxu1 %v698_v24  ;;  %v275_v22 = vld [vmem:[%s1192_s23 + $0x1f8] sm:$0xff]  ;;  %v1035_v24 = vcombine.low %v263_v12, %v267_v13  ;;  %v1042_v25 = vcombine.high %v270_v19, %v274_v20  ;;  %v1041_v33 = vcombine.low %v270_v19, %v274_v20 }
  0x39   : > { %v1044_v26 = vcombine.high %v271_v21, %v275_v22  ;;  %v1043_v34 = vcombine.low %v271_v21, %v275_v22 }
  0x3b   : > { %731 = vmatpush1.bf16.msra.mxu0 %v689_v29  ;;  %772 = vmatpush1.bf16.msra.mxu1 %v695_v30  ;;  %v286_v29 = vld [vmem:[%s1192_s23 + $0x250] sm:$0x33]  ;;  %v279_v30 = vld [vmem:[%s1192_s23 + $0x218] sm:$0xff] }
  0x3c   : > { %794 = vmatprep.subr.bf16.mxu0 %v986_v31  ;;  %835 = vmatprep.subr.bf16.mxu1 %v988_v32  ;;  %v283_v31 = vld [vmem:[%s1192_s23 + $0x238] sm:$0xff]  ;;  %v1058_v37 = vcombine.high %v286_v29, %v286_v29 }
  0x3d   : > { %v287_v32 = vld [vmem:[%s1192_s23 + $0x258] sm:$0x33]  ;;  %v1051_v42 = vcombine.low %v279_v30, %v283_v31 }
  0x3e   : > { %745 = vmatmul.mubr.bf16.vlgmr.msra.gmra.mrb[0].mxu0 %v1246_v35  ;;  %786 = vmatmul.mubr.bf16.vlgmr.msra.gmra.mrb[0].mxu1 %v1246_v35  ;;  %v704_v43 = vand.u32 %v1058_v37, %v1232_v17  ;;  %v1059_v0 = vcombine.low %v287_v32, %v287_v32 }
  0x3f   : > { %795 = vmatpush1.bf16.msra.mxu0 %v985_v38  ;;  %836 = vmatpush1.bf16.msra.mxu1 %v987_v39  ;;  %v1052_v38 = vcombine.high %v279_v30, %v283_v31  ;;  %v1060_v39 = vcombine.high %v287_v32, %v287_v32 }
  0x40   : > { %796 = vmatprep.subr.bf16.mxu0 %v994_v40  ;;  %837 = vmatprep.subr.bf16.mxu1 %v996_v41  ;;  %v1049_v40 = vcombine.low %v278_v27, %v282_v28  ;;  %v1057_v41 = vcombine.low %v286_v29, %v286_v29 }
  0x41   : > { %1063 = vmatprep.mubr.msk.bf16.mxu0 %vm680_vm0, %v1177_v1  ;;  %1064 = vmatprep.mubr.msk.bf16.mxu1 %vm680_vm0, %v1177_v1  ;;  %v1011_v1 = vcombine.low %v239_v51, %v243_v52  ;;  %v710_v44 = vand.u32 %v1060_v39, %v1232_v17 }
  0x43   : > { %797 = vmatpush1.bf16.msra.mxu0 %v993_v45  ;;  %838 = vmatpush1.bf16.msra.mxu1 %v995_v46  ;;  %v701_v45 = vand.u32 %v1057_v41, %v1232_v17  ;;  %v707_v46 = vand.u32 %v1059_v0, %v1232_v17 }
  0x44   : > { %798 = vmatprep.subr.bf16.mxu0 %v1002_v47  ;;  %839 = vmatprep.subr.bf16.mxu1 %v1004_v48 }
  0x47   : > { %799 = vmatpush1.bf16.msra.mxu0 %v1001_v53  ;;  %840 = vmatpush1.bf16.msra.mxu1 %v1003_v54 }
  0x48   : > { %800 = vmatprep.subr.bf16.mxu0 %v1010_v55  ;;  %841 = vmatprep.subr.bf16.mxu1 %v1012_v56 }
  0x4b   : > { %801 = vmatpush1.bf16.msra.mxu0 %v1009_v61  ;;  %842 = vmatpush1.bf16.msra.mxu1 %v1011_v1 }
  0x4c   : > { %802 = vmatprep.subr.bf16.mxu0 %v1018_v62  ;;  %843 = vmatprep.subr.bf16.mxu1 %v1020_v63 }
  0x4f   : > { %803 = vmatpush1.bf16.msra.mxu0 %v1017_v6  ;;  %844 = vmatpush1.bf16.msra.mxu1 %v1019_v7 }
  0x50   : > { %804 = vmatprep.subr.bf16.mxu0 %v1026_v8  ;;  %845 = vmatprep.subr.bf16.mxu1 %v1028_v9 }
  0x53   : > { %805 = vmatpush1.bf16.msra.mxu0 %v1025_v14  ;;  %846 = vmatpush1.bf16.msra.mxu1 %v1027_v15 }
  0x54   : > { %806 = vmatprep.subr.bf16.mxu0 %v1034_v16  ;;  %847 = vmatprep.subr.bf16.mxu1 %v1036_v18 }
  0x57   : > { %807 = vmatpush1.bf16.msra.mxu0 %v1033_v23  ;;  %848 = vmatpush1.bf16.msra.mxu1 %v1035_v24 }
  0x58   : > { %808 = vmatprep.subr.bf16.mxu0 %v1042_v25  ;;  %849 = vmatprep.subr.bf16.mxu1 %v1044_v26 }
  0x5b   : > { %809 = vmatpush1.bf16.msra.mxu0 %v1041_v33  ;;  %850 = vmatpush1.bf16.msra.mxu1 %v1043_v34 }
  0x5c   : > { %810 = vmatprep.subr.bf16.mxu0 %v1050_v36  ;;  %851 = vmatprep.subr.bf16.mxu1 %v1052_v38 }
  0x5f   : > { %811 = vmatpush1.bf16.msra.mxu0 %v1049_v40  ;;  %852 = vmatpush1.bf16.msra.mxu1 %v1051_v42 }
  0x60   : > { %812 = vmatprep.subr.bf16.mxu0 %v704_v43  ;;  %853 = vmatprep.subr.bf16.mxu1 %v710_v44 }
  0x63   : > { %813 = vmatpush1.bf16.msra.mxu0 %v701_v45  ;;  %854 = vmatpush1.bf16.msra.mxu1 %v707_v46 }
  0x66   : > { %827 = vmatmul.mubr.bf16.vlgmr.msra.gmra.mrb[4].mxu0 %v1246_v35  ;;  %868 = vmatmul.mubr.bf16.vlgmr.msra.gmra.mrb[4].mxu1 %v1246_v35 }
  0x87   : > { %v292_v47 = vpop.permute.xlu0 %291 }
 0x111   : > { %v746_v48 = vpop.f32.mrb[0].mxu0  ;;  %v787_v17 = vpop.f32.mrb[0].mxu1 }
 0x112   : > { %v747_v49 = vadd.f32 %v746_v48, %v292_v47  ;;  %v748_v50 = vpop.f32.mrb[1].mxu0  ;;  %v788_v51 = vadd.f32 %v787_v17, %v292_v47  ;;  %v789_v53 = vpop.f32.mrb[1].mxu1 }
 0x113   : > { %v749_v52 = vadd.f32 %v748_v50, %v292_v47  ;;  %v750_v54 = vpop.f32.mrb[2].mxu0  ;;  %v790_v35 = vadd.f32 %v789_v53, %v292_v47  ;;  %v791_v55 = vpop.f32.mrb[2].mxu1 }
 0x114   : > { %876 = vst [vmem:[%s1296_s27] sm:$0xff] %v747_v49  ;;  %v751_v56 = vpop.f32.mrb[3].mxu0  ;;  %878 = vst [vmem:[%s1296_s27 + $0x10] sm:$0xff] %v788_v51  ;;  %v792_v57 = vpop.f32.mrb[3].mxu1 }
 0x115   : > { %877 = vst [vmem:[%s1296_s27 + $0x8] sm:$0xff] %v749_v52  ;;  %879 = vst [vmem:[%s1296_s27 + $0x18] sm:$0xff] %v790_v35 }
 0x139   : > { %v828_v58 = vpop.f32.mrb[4].mxu0  ;;  %v869_v60 = vpop.f32.mrb[4].mxu1 }
 0x13a   : > { %v829_v59 = vadd.f32 %v828_v58, %v292_v47  ;;  %v830_v61 = vpop.f32.mrb[5].mxu0  ;;  %v870_v1 = vadd.f32 %v869_v60, %v292_v47  ;;  %v871_v63 = vpop.f32.mrb[5].mxu1 }
 0x13b   : > { %v831_v62 = vadd.f32 %v830_v61, %v292_v47  ;;  %v832_v2 = vpop.f32.mrb[6].mxu0  ;;  %v872_v3 = vadd.f32 %v871_v63, %v292_v47  ;;  %v873_v4 = vpop.f32.mrb[6].mxu1 }
 0x13c   : > { %880 = vst [vmem:[%s1296_s27 + $0x20] sm:$0xff] %v829_v59  ;;  %v833_v5 = vpop.f32.mrb[7].mxu0  ;;  %882 = vst [vmem:[%s1296_s27 + $0x30] sm:$0xff] %v870_v1  ;;  %v874_v6 = vpop.f32.mrb[7].mxu1 }
 0x13d   : > { %881 = vst [vmem:[%s1296_s27 + $0x28] sm:$0xff] %v831_v62  ;;  %883 = vst [vmem:[%s1296_s27 + $0x38] sm:$0xff] %v872_v3 }
 0x13e PF: > { %s13_s14 = sadd.s32 1, %s1128_s14   ;;  %s1319_s12 = smov %s1124_s13 }
 0x13f   : > { %p10_p5 = scmp.ge.s32.totalorder %s13_s14, 4   ;;  %s1320_s13 = smov %s1322_s15 }
 0x141   :  { %12 = sbr.rel (!%p10_p5) target bundleno = 2 (0x2), region = 62 }

// kernel: resnet_generator.29
= control target key start
LH: loop header
LB: loop body
LE: loop exit
PB: predicated region body
PF: predicated region fallthrough
CT: control target
= control target key end

     0   :  { %s472_s15 = smov 0   ;;  %s503_s0 = inlined_call_operand.vmem [shape: f32[2,8,1024], index: 0, kind: input, shape index: {}]   ;;  %s504_s1 = inlined_call_operand.vmem [shape: f32[8,1], index: 1, kind: input, shape index: {}]   ;;  %s505_s2 = inlined_call_operand.vmem [shape: f32[2,8,1], index: 2, kind: input, shape index: {}]   ;;  %s506_s3 = inlined_call_operand.vmem [shape: f32[2,8,1], index: 3, kind: input, shape index: {}]   ;;  %s507_s4 = inlined_call_operand.vmem [shape: f32[2,8,1024], index: 4, kind: output, shape index: {}]  }
   0x1 LB: > { %s410_s1 = sadd.s32 4294967295, %s444_s15   ;;  %p414_p0 = scmp.ge.s32.totalorder %s444_s15, 1  ;;  %s444_s15 = sphi %s472_s15, %s14_s15  }
   0x2   : > { %p180_p1 = scmp.lt.s32.totalorder %s444_s15, 3 }
   0x4   : > { %p181_p2 = pnand %p414_p0, %p180_p1 }
   0x5   : > { %p214_p3 = scmp.lt.s32.totalorder (!%p181_p2), %s410_s1, 1  ;;  %v446_v15 = vmov (!%p181_p2), 0  }
   0x6   : > { %184 = sbr.rel (%p181_p2) target bundleno = 362 (0x16a), region = 36  ;;  %434 = vset.pattern.permute.xlu1 (!%p181_p2), %v446_v15  ;;  %435 = vset.pattern.permute.xlu0 (!%p181_p2), %v446_v15 }
   0xd   : > { %s509_s1 = smov (!%p214_p3, %s410_s1), 1 }
   0xe   : > { %s423_s16 = sshll.u32 %s509_s1, 6  ;;  %s417_s20 = sshll.u32 %s509_s1, 3 }
   0xf   : > { %s218_s19 = scalar_lea.vmem %s503_s0, %s423_s16  ;;  %s222_s23 = scalar_lea.vmem %s505_s2, %s417_s20 }
  0x10   : > { %v232_v0 = vld [vmem:[%s218_s19] sm:$0xff]  ;;  %v233_v1 = vld [vmem:[%s218_s19 + $0x8] sm:$0xff]  ;;  %v234_v2 = vld [vmem:[%s218_s19 + $0x10] sm:$0xff]  ;;  %s226_s26 = scalar_lea.vmem %s506_s3, %s417_s20  ;;  %s231_s29 = scalar_lea.vmem %s507_s4, %s423_s16 }
  0x11   : > { %v240_v3 = vadd.f32 %v233_v1, %v232_v0  ;;  %v235_v4 = vld [vmem:[%s218_s19 + $0x18] sm:$0xff]  ;;  %v236_v6 = vld [vmem:[%s218_s19 + $0x20] sm:$0xff]  ;;  %v237_v8 = vld [vmem:[%s218_s19 + $0x28] sm:$0xff] }
  0x12   : > { %v238_v10 = vld [vmem:[%s218_s19 + $0x30] sm:$0xff]  ;;  %v239_v12 = vld [vmem:[%s218_s19 + $0x38] sm:$0xff]  ;;  %v287_v16 = vld [vmem:[%s222_s23] sm:$0xff] }
  0x13   : > { %v241_v5 = vadd.f32 %v240_v3, %v234_v2  ;;  %290 = vperm.xlu1 %434, %v287_v16   ;;  %v301_v17 = vld [vmem:[%s226_s26] sm:$0xff] }
  0x15   : > { %v242_v7 = vadd.f32 %v241_v5, %v235_v4 }
  0x17   : > { %v243_v9 = vadd.f32 %v242_v7, %v236_v6  ;;  %304 = vperm.xlu1 %434, %v301_v17  }
  0x19   : > { %v244_v11 = vadd.f32 %v243_v9, %v237_v8 }
  0x1b   : > { %v245_v13 = vadd.f32 %v244_v11, %v238_v10 }
  0x1d   : > { %v246_v14 = vadd.f32 %v245_v13, %v239_v12 }
  0x1f   : > { %247 = vadd.xlane.f32.xlu0 %v246_v14 }
  0x92   : > { %v291_v46 = vpop.permute.xlu1 %290 }
  0x96   : > { %v305_v60 = vpop.permute.xlu1 %304 }
  0xac   : > { %v248_v18 = vpop.xlane.xlu0 %247 }
  0xad   : > { %v250_v19 = vmul.f32 0.0009765625, %v248_v18 }
  0xaf   : > { %v251_v20 = vsub.f32 %v232_v0, %v250_v19  ;;  %v252_v21 = vsub.f32 %v233_v1, %v250_v19  ;;  %v253_v22 = vsub.f32 %v234_v2, %v250_v19  ;;  %v254_v23 = vsub.f32 %v235_v4, %v250_v19 }
  0xb0   : > { %v255_v26 = vsub.f32 %v236_v6, %v250_v19  ;;  %v256_v29 = vsub.f32 %v237_v8, %v250_v19  ;;  %v257_v32 = vsub.f32 %v238_v10, %v250_v19  ;;  %v258_v35 = vsub.f32 %v239_v12, %v250_v19 }
  0xb1   : > { %v259_v24 = vmul.f32 %v251_v20, %v251_v20  ;;  %v260_v25 = vmul.f32 %v252_v21, %v252_v21  ;;  %v261_v27 = vmul.f32 %v253_v22, %v253_v22  ;;  %v262_v30 = vmul.f32 %v254_v23, %v254_v23 }
  0xb2   : > { %v263_v33 = vmul.f32 %v255_v26, %v255_v26  ;;  %v264_v36 = vmul.f32 %v256_v29, %v256_v29  ;;  %v265_v38 = vmul.f32 %v257_v32, %v257_v32  ;;  %v266_v40 = vmul.f32 %v258_v35, %v258_v35 }
  0xb3   : > { %v267_v28 = vadd.f32 %v260_v25, %v259_v24 }
  0xb5   : > { %v268_v31 = vadd.f32 %v267_v28, %v261_v27 }
  0xb7   : > { %v269_v34 = vadd.f32 %v268_v31, %v262_v30 }
  0xb9   : > { %v270_v37 = vadd.f32 %v269_v34, %v263_v33 }
  0xbb   : > { %v271_v39 = vadd.f32 %v270_v37, %v264_v36 }
  0xbd   : > { %v272_v41 = vadd.f32 %v271_v39, %v265_v38 }
  0xbf   : > { %v273_v42 = vadd.f32 %v272_v41, %v266_v40 }
  0xc1   : > { %274 = vadd.xlane.f32.xlu0 %v273_v42 }
 0x14e   : > { %v275_v43 = vpop.xlane.xlu0 %274 }
 0x14f   : > { %v276_v44 = vmul.f32 0.0009765625, %v275_v43 }
 0x151   : > { %v277_v45 = vadd.f32 1e-05, %v276_v44 }
 0x153   : > { %436 = vrsqrt.f32 %v277_v45 }
 0x15d   : > { %v437_v47 = vpop.eup %436 }
 0x15e   : > { %v279_v48 = vmul.f32 %v437_v47, %v251_v20  ;;  %v280_v49 = vmul.f32 %v437_v47, %v252_v21  ;;  %v281_v50 = vmul.f32 %v437_v47, %v253_v22  ;;  %v282_v51 = vmul.f32 %v437_v47, %v254_v23 }
 0x15f   : > { %v283_v52 = vmul.f32 %v437_v47, %v255_v26  ;;  %v284_v53 = vmul.f32 %v437_v47, %v256_v29  ;;  %v285_v54 = vmul.f32 %v437_v47, %v257_v32  ;;  %v286_v55 = vmul.f32 %v437_v47, %v258_v35 }
 0x160   : > { %v293_v56 = vmul.f32 %v291_v46, %v279_v48  ;;  %v294_v57 = vmul.f32 %v291_v46, %v280_v49  ;;  %v295_v58 = vmul.f32 %v291_v46, %v281_v50  ;;  %v296_v59 = vmul.f32 %v291_v46, %v282_v51 }
 0x161   : > { %v297_v61 = vmul.f32 %v291_v46, %v283_v52  ;;  %v298_v62 = vmul.f32 %v291_v46, %v284_v53  ;;  %v299_v63 = vmul.f32 %v291_v46, %v285_v54  ;;  %v300_v0 = vmul.f32 %v291_v46, %v286_v55 }
 0x162   : > { %v307_v1 = vadd.f32 %v305_v60, %v293_v56  ;;  %v308_v2 = vadd.f32 %v305_v60, %v294_v57  ;;  %v309_v3 = vadd.f32 %v305_v60, %v295_v58  ;;  %v310_v4 = vadd.f32 %v305_v60, %v296_v59 }
 0x163   : > { %v311_v5 = vadd.f32 %v305_v60, %v297_v61  ;;  %v312_v6 = vadd.f32 %v305_v60, %v298_v62  ;;  %v313_v7 = vadd.f32 %v305_v60, %v299_v63  ;;  %v314_v8 = vadd.f32 %v305_v60, %v300_v0 }
 0x164   : > { %v315_v9 = vmax.f32 %v307_v1, 0.0  ;;  %v316_v10 = vmax.f32 %v308_v2, 0.0  ;;  %v317_v11 = vmax.f32 %v309_v3, 0.0  ;;  %v318_v12 = vmax.f32 %v310_v4, 0.0 }
 0x165   : > { %v319_v13 = vmax.f32 %v311_v5, 0.0  ;;  %v320_v14 = vmax.f32 %v312_v6, 0.0  ;;  %v321_v15 = vmax.f32 %v313_v7, 0.0  ;;  %v322_v16 = vmax.f32 %v314_v8, 0.0 }
 0x166   : > { %323 = vst [vmem:[%s231_s29] sm:$0xff] %v315_v9  ;;  %324 = vst [vmem:[%s231_s29 + $0x8] sm:$0xff] %v316_v10 }
 0x167   : > { %325 = vst [vmem:[%s231_s29 + $0x10] sm:$0xff] %v317_v11  ;;  %326 = vst [vmem:[%s231_s29 + $0x18] sm:$0xff] %v318_v12 }
 0x168   : > { %327 = vst [vmem:[%s231_s29 + $0x20] sm:$0xff] %v319_v13  ;;  %328 = vst [vmem:[%s231_s29 + $0x28] sm:$0xff] %v320_v14 }
 0x169   : > { %329 = vst [vmem:[%s231_s29 + $0x30] sm:$0xff] %v321_v15  ;;  %330 = vst [vmem:[%s231_s29 + $0x38] sm:$0xff] %v322_v16 }
 0x16a PF: > { %s14_s15 = sadd.s32 1, %s444_s15  }
 0x16b   : > { %p11_p4 = scmp.ge.s32.totalorder %s14_s15, 4  }
 0x16d   :  { %13 = sbr.rel (!%p11_p4) target bundleno = 1 (0x1), region = 72 }

// kernel: resnet_generator.30
= control target key start
LH: loop header
LB: loop body
LE: loop exit
PB: predicated region body
PF: predicated region fallthrough
CT: control target
= control target key end

     0   :  { %s540_s12 = smov 0   ;;  %s542_s13 = smov 0   ;;  %s586_s0 = inlined_call_operand.vmem [shape: bf16[16,72], index: 0, kind: input, shape index: {}]   ;;  %s587_s1 = inlined_call_operand.vmem [shape: bf16[2,72,256], index: 1, kind: input, shape index: {}]   ;;  %s588_s2 = inlined_call_operand.vmem [shape: f32[16,1], index: 2, kind: input, shape index: {}]   ;;  %s589_s3 = inlined_call_operand.vmem [shape: f32[2,16,256], index: 3, kind: output, shape index: {}]  }
   0x1   :  { %s544_s14 = smov 0  }
   0x2 LB: > { %s25_s15 = sadd.s32 1, %s513_s13  ;;  %p433_p0 = scmp.ge.s32.totalorder %s517_s14, 1  ;;  %s517_s14 = sphi %s544_s14, %s13_s14   ;;  %s513_s13 = sphi %s542_s13, %s591_s13   ;;  %s509_s12 = sphi %s540_s12, %s590_s12  }
   0x3   : > { %p27_p1 = scmp.ge.s32.totalorder %s25_s15, 2  ;;  %p158_p2 = scmp.lt.s32.totalorder %s517_s14, 3 }
   0x5   : > { %s593_s15 = smov (%p27_p1, %s25_s15), 0  ;;  %p159_p3 = pnand %p433_p0, %p158_p2 }
   0x6   : > { %p191_p4 = scmp.lt.s32.totalorder (!%p159_p3), %s509_s12, 1  ;;  %v519_v0 = vmov (!%p159_p3), 0   ;;  %v222_v1 = vld [vmem:[%s588_s2] sm:$0xff] (!%p159_p3)  ;;  %v223_v2 = vld [vmem:[%s588_s2 + $0x8] sm:$0xff] (!%p159_p3)  ;;  %vm288_vm0 = vcmask (!%p159_p3), 1043456   ;;  %vm284_vm1 = vcmask (!%p159_p3), 588800  }
   0x7   : > { %162 = sbr.rel (%p159_p3) target bundleno = 257 (0x101), region = 32  ;;  %327 = vmatprep.mubr.bf16.mxu0 (!%p159_p3), %v519_v0  ;;  %479 = vset.pattern.permute.xlu0 (!%p159_p3), %v519_v0  ;;  %v494_v15 = vld [vmem:[%s586_s0] sm:$0xff] (!%p159_p3)  }
   0x8   : > { %226 = vperm.xlu0 (!%p159_p3), %479, %v222_v1  }
   0xc   : > { %231 = vperm.xlu0 (!%p159_p3), %479, %v223_v2  }
   0xe   : > { %s595_s12 = smov (!%p191_p4, %s509_s12), 1 }
   0xf   : > { %s453_s20 = smul.u32 72, %s595_s12  ;;  %s452_s26 = sshll.u32 %s595_s12, 5 }
  0x10   : > { %s208_s29 = scalar_lea.vmem %s589_s3, %s452_s26 }
  0x11   : > { %s198_s23 = scalar_lea.vmem %s587_s1, %s453_s20 }
  0x12   : > { %v480_v3 = vld [vmem:[%s198_s23 + $0x4] ss:$8 sps:$4 sm:$0xff]   ;;  %v482_v4 = vld [vmem:[%s198_s23] ss:$8 sps:$4 sm:$0xff]   ;;  %v483_v5 = vld [vmem:[%s198_s23 + $0x14] ss:$8 sps:$4 sm:$0xff]  }
  0x13   : > { %295 = vmatprep.subr.bf16.mxu0 %v480_v3  ;;  %v485_v6 = vld [vmem:[%s198_s23 + $0x10] ss:$8 sps:$4 sm:$0xff]   ;;  %v486_v7 = vld [vmem:[%s198_s23 + $0x24] ss:$8 sps:$4 sm:$0xff]   ;;  %v488_v8 = vld [vmem:[%s198_s23 + $0x20] ss:$8 sps:$4 sm:$0xff]  }
  0x14   : > { %296 = vmatpush1.bf16.msra.mxu0 %v482_v4  ;;  %v489_v9 = vld [vmem:[%s198_s23 + $0x34] ss:$8 sps:$4 sm:$0xff]   ;;  %v221_v10 = vld [vmem:[%s198_s23 + $0x40] sm:$0xff]  ;;  %v491_v11 = vld [vmem:[%s198_s23 + $0x30] ss:$8 sps:$4 sm:$0xff]  }
  0x15   : > { %297 = vmatprep.subr.bf16.mxu0 %v483_v5  ;;  %v447_v12 = vcombine.high %v221_v10, %v221_v10  ;;  %v446_v13 = vcombine.low %v221_v10, %v221_v10 }
  0x17   : > { %v290_v14 = vsel %vm288_vm0, %v446_v13, 0 }
  0x18   : > { %298 = vmatpush1.bf16.msra.mxu0 %v485_v6 }
  0x19   : > { %299 = vmatprep.subr.bf16.mxu0 %v486_v7 }
  0x1c   : > { %300 = vmatpush1.bf16.msra.mxu0 %v488_v8 }
  0x1d   : > { %301 = vmatprep.subr.bf16.mxu0 %v489_v9 }
  0x20   : > { %302 = vmatpush1.bf16.msra.mxu0 %v491_v11 }
  0x21   : > { %448 = vmatprep.subr.msk.bf16.mxu0 %vm288_vm0, %v447_v12 }
  0x24   : > { %304 = vmatpush1.bf16.msra.mxu0 %v290_v14 }
  0x27   : > { %449 = vmatmul.mubr.msk.bf16.vlgmr.msra.gmra.mrb[0].mxu0 %vm284_vm1, %v494_v15 }
  0x87   : > { %v227_v16 = vpop.permute.xlu0 %226 }
  0x8b   : > { %v232_v20 = vpop.permute.xlu0 %231 }
  0xfa   : > { %v329_v17 = vpop.f32.mrb[0].mxu0 }
  0xfb   : > { %v330_v18 = vadd.f32 %v329_v17, %v227_v16  ;;  %v331_v19 = vpop.f32.mrb[1].mxu0 }
  0xfc   : > { %v332_v21 = vadd.f32 %v331_v19, %v227_v16  ;;  %v333_v22 = vpop.f32.mrb[2].mxu0 }
  0xfd   : > { %338 = vst [vmem:[%s208_s29] sm:$0xff] %v330_v18  ;;  %v334_v23 = vadd.f32 %v333_v22, %v232_v20  ;;  %v335_v24 = vpop.f32.mrb[3].mxu0 }
  0xfe   : > { %339 = vst [vmem:[%s208_s29 + $0x8] sm:$0xff] %v332_v21  ;;  %v336_v25 = vadd.f32 %v335_v24, %v232_v20 }
  0xff   : > { %340 = vst [vmem:[%s208_s29 + $0x10] sm:$0xff] %v334_v23 }
 0x100   : > { %341 = vst [vmem:[%s208_s29 + $0x18] sm:$0xff] %v336_v25 }
 0x101 PF: > { %s13_s14 = sadd.s32 1, %s517_s14   ;;  %s590_s12 = smov %s513_s13 }
 0x102   : > { %p10_p5 = scmp.ge.s32.totalorder %s13_s14, 4   ;;  %s591_s13 = smov %s593_s15 }
 0x104   :  { %12 = sbr.rel (!%p10_p5) target bundleno = 2 (0x2), region = 62 }

// kernel: resnet_generator.31
= control target key start
LH: loop header
LB: loop body
LE: loop exit
PB: predicated region body
PF: predicated region fallthrough
CT: control target
= control target key end

     0   :  { %s462_s15 = smov 0   ;;  %s493_s0 = inlined_call_operand.vmem [shape: f32[2,16,256], index: 0, kind: input, shape index: {}]   ;;  %s494_s1 = inlined_call_operand.vmem [shape: f32[16,1], index: 1, kind: input, shape index: {}]   ;;  %s495_s2 = inlined_call_operand.vmem [shape: f32[2,16,1], index: 2, kind: input, shape index: {}]   ;;  %s496_s3 = inlined_call_operand.vmem [shape: f32[2,16,1], index: 3, kind: input, shape index: {}]   ;;  %s497_s4 = inlined_call_operand.vmem [shape: f32[2,16,256], index: 4, kind: output, shape index: {}]  }
   0x1 LB: > { %s394_s1 = sadd.s32 4294967295, %s434_s15   ;;  %p398_p0 = scmp.ge.s32.totalorder %s434_s15, 1  ;;  %s434_s15 = sphi %s462_s15, %s14_s15  }
   0x2   : > { %p182_p1 = scmp.lt.s32.totalorder %s434_s15, 3 }
   0x4   : > { %p183_p2 = pnand %p398_p0, %p182_p1 }
   0x5   : > { %p218_p3 = scmp.lt.s32.totalorder (!%p183_p2), %s394_s1, 1  ;;  %v436_v0 = vmov (!%p183_p2), 0  }
   0x6   : > { %186 = sbr.rel (%p183_p2) target bundleno = 339 (0x153), region = 36  ;;  %423 = vset.pattern.permute.xlu1 (!%p183_p2), %v436_v0  ;;  %422 = vset.pattern.permute.xlu0 (!%p183_p2), %v436_v0 }
   0xd   : > { %s499_s1 = smov (!%p218_p3, %s394_s1), 1 }
   0xe   : > { %s409_s16 = sshll.u32 %s499_s1, 5  ;;  %s410_s17 = sshll.u32 %s499_s1, 4 }
   0xf   : > { %s222_s20 = scalar_lea.vmem %s493_s0, %s409_s16  ;;  %s227_s23 = scalar_lea.vmem %s495_s2, %s410_s17 }
  0x10   : > { %v238_v1 = vld [vmem:[%s222_s20] sm:$0xff]  ;;  %v239_v2 = vld [vmem:[%s222_s20 + $0x8] sm:$0xff]  ;;  %v240_v3 = vld [vmem:[%s222_s20 + $0x10] sm:$0xff]  ;;  %s232_s26 = scalar_lea.vmem %s496_s3, %s410_s17  ;;  %s237_s29 = scalar_lea.vmem %s497_s4, %s409_s16 }
  0x11   : > { %v242_v4 = vadd.f32 %v239_v2, %v238_v1  ;;  %v241_v5 = vld [vmem:[%s222_s20 + $0x18] sm:$0xff]  ;;  %v276_v6 = vld [vmem:[%s227_s23 + $0x8] sm:$0xff]  ;;  %v291_v8 = vld [vmem:[%s232_s26] sm:$0xff] }
  0x12   : > { %284 = vperm.xlu1 %423, %v276_v6   ;;  %v245_v7 = vadd.f32 %v241_v5, %v240_v3  ;;  %v275_v9 = vld [vmem:[%s227_s23] sm:$0xff]  ;;  %v292_v24 = vld [vmem:[%s232_s26 + $0x8] sm:$0xff] }
  0x13   : > { %243 = vadd.xlane.f32.xlu0 %v242_v4 }
  0x16   : > { %295 = vperm.xlu1 %423, %v291_v8  }
  0x17   : > { %246 = vadd.xlane.f32.xlu0 %v245_v7 }
  0x2d   : > { %279 = vperm.xlu0 %422, %v275_v9  }
  0x91   : > { %v285_v25 = vpop.permute.xlu1 %284 }
  0x95   : > { %v296_v26 = vpop.permute.xlu1 %295 }
  0xa0   : > { %v244_v10 = vpop.xlane.xlu0 %243 }
  0xa1   : > { %v249_v11 = vmul.f32 0.00390625, %v244_v10 }
  0xa3   : > { %v251_v12 = vsub.f32 %v238_v1, %v249_v11  ;;  %v252_v13 = vsub.f32 %v239_v2, %v249_v11 }
  0xa4   : > { %v247_v14 = vpop.xlane.xlu0 %246 }
  0xa5   : > { %v250_v15 = vmul.f32 0.00390625, %v247_v14  ;;  %v255_v16 = vmul.f32 %v251_v12, %v251_v12  ;;  %v256_v17 = vmul.f32 %v252_v13, %v252_v13 }
  0xa7   : > { %v253_v18 = vsub.f32 %v240_v3, %v250_v15  ;;  %v254_v19 = vsub.f32 %v241_v5, %v250_v15  ;;  %v259_v20 = vadd.f32 %v256_v17, %v255_v16 }
  0xa9   : > { %260 = vadd.xlane.f32.xlu1 %v259_v20  ;;  %v257_v21 = vmul.f32 %v253_v18, %v253_v18  ;;  %v258_v22 = vmul.f32 %v254_v19, %v254_v19 }
  0xab   : > { %v262_v23 = vadd.f32 %v258_v22, %v257_v21 }
  0xac   : > { %v280_v34 = vpop.permute.xlu0 %279 }
  0xad   : > { %263 = vadd.xlane.f32.xlu1 %v262_v23 }
  0xbe   : > { %300 = vperm.xlu1 %423, %v292_v24  }
 0x136   : > { %v261_v27 = vpop.xlane.xlu1 %260 }
 0x137   : > { %v265_v28 = vmul.f32 0.00390625, %v261_v27 }
 0x139   : > { %v267_v29 = vadd.f32 1e-05, %v265_v28 }
 0x13a   : > { %v264_v30 = vpop.xlane.xlu1 %263 }
 0x13b   : > { %424 = vrsqrt.f32 %v267_v29  ;;  %v266_v31 = vmul.f32 0.00390625, %v264_v30 }
 0x13d   : > { %v268_v32 = vadd.f32 1e-05, %v266_v31 }
 0x13e   : > { %v301_v48 = vpop.permute.xlu1 %300 }
 0x13f   : > { %426 = vrsqrt.f32 %v268_v32 }
 0x145   : > { %v425_v33 = vpop.eup %424 }
 0x146   : > { %v271_v35 = vmul.f32 %v425_v33, %v251_v12  ;;  %v272_v36 = vmul.f32 %v425_v33, %v252_v13 }
 0x148   : > { %v287_v37 = vmul.f32 %v280_v34, %v271_v35  ;;  %v288_v38 = vmul.f32 %v280_v34, %v272_v36 }
 0x149   : > { %v427_v39 = vpop.eup %426 }
 0x14a   : > { %v273_v40 = vmul.f32 %v427_v39, %v253_v18  ;;  %v274_v41 = vmul.f32 %v427_v39, %v254_v19  ;;  %v303_v42 = vadd.f32 %v296_v26, %v287_v37  ;;  %v304_v43 = vadd.f32 %v296_v26, %v288_v38 }
 0x14c   : > { %v289_v44 = vmul.f32 %v285_v25, %v273_v40  ;;  %v290_v45 = vmul.f32 %v285_v25, %v274_v41  ;;  %v307_v46 = vmax.f32 %v303_v42, 0.0  ;;  %v308_v47 = vmax.f32 %v304_v43, 0.0 }
 0x14e   : > { %v305_v49 = vadd.f32 %v301_v48, %v289_v44  ;;  %v306_v50 = vadd.f32 %v301_v48, %v290_v45  ;;  %311 = vst [vmem:[%s237_s29] sm:$0xff] %v307_v46  ;;  %312 = vst [vmem:[%s237_s29 + $0x8] sm:$0xff] %v308_v47 }
 0x150   : > { %v309_v51 = vmax.f32 %v305_v49, 0.0  ;;  %v310_v52 = vmax.f32 %v306_v50, 0.0 }
 0x152   : > { %313 = vst [vmem:[%s237_s29 + $0x10] sm:$0xff] %v309_v51  ;;  %314 = vst [vmem:[%s237_s29 + $0x18] sm:$0xff] %v310_v52 }
 0x153 PF: > { %s14_s15 = sadd.s32 1, %s434_s15  }
 0x154   : > { %p11_p4 = scmp.ge.s32.totalorder %s14_s15, 4  }
 0x156   :  { %13 = sbr.rel (!%p11_p4) target bundleno = 1 (0x1), region = 72 }

// kernel: resnet_generator.32
= control target key start
LH: loop header
LB: loop body
LE: loop exit
PB: predicated region body
PF: predicated region fallthrough
CT: control target
= control target key end

     0   :  { %s597_s12 = smov 0   ;;  %s599_s13 = smov 0   ;;  %s669_s0 = inlined_call_operand.vmem [shape: bf16[32,144], index: 0, kind: input, shape index: {}]   ;;  %s670_s1 = inlined_call_operand.vmem [shape: bf16[2,144,64], index: 1, kind: input, shape index: {}]   ;;  %s671_s2 = inlined_call_operand.vmem [shape: f32[32,1], index: 2, kind: input, shape index: {}]   ;;  %s672_s3 = inlined_call_operand.vmem [shape: f32[2,32,64], index: 3, kind: output, shape index: {}]  }
   0x1   :  { %s601_s14 = smov 0  }
   0x2 LB: > { %s25_s15 = sadd.s32 1, %s570_s13  ;;  %p469_p0 = scmp.ge.s32.totalorder %s574_s14, 1  ;;  %s574_s14 = sphi %s601_s14, %s13_s14   ;;  %s570_s13 = sphi %s599_s13, %s674_s13   ;;  %s566_s12 = sphi %s597_s12, %s673_s12  }
   0x3   : > { %p27_p1 = scmp.ge.s32.totalorder %s25_s15, 2  ;;  %p156_p2 = scmp.lt.s32.totalorder %s574_s14, 3 }
   0x5   : > { %s676_s15 = smov (%p27_p1, %s25_s15), 0  ;;  %p157_p3 = pnand %p469_p0, %p156_p2 }
   0x6   : > { %p186_p4 = scmp.lt.s32.totalorder (!%p157_p3), %s566_s12, 1  ;;  %v576_v0 = vmov (!%p157_p3), 0   ;;  %v548_v1 = vld [vmem:[%s669_s0 + $0x4] ss:$8 sps:$4 sm:$0xff] (!%p157_p3)   ;;  %vm321_vm0 = vcmask (!%p157_p3), 130048   ;;  %v227_v3 = vld [vmem:[%s671_s2 + $0x10] sm:$0xff] (!%p157_p3) }
   0x7   : > { %160 = sbr.rel (%p157_p3) target bundleno = 271 (0x10f), region = 32  ;;  %328 = vmatprep.subr.bf16.mxu0 (!%p157_p3), %v576_v0  ;;  %491 = vmatprep.subr.bf16.mxu1 (!%p157_p3), %v576_v0  ;;  %v551_v2 = vld [vmem:[%s669_s0 + $0x14] ss:$8 sps:$4 sm:$0xff] (!%p157_p3)   ;;  %v225_v4 = vld [vmem:[%s671_s2] sm:$0xff] (!%p157_p3)  ;;  %v226_v6 = vld [vmem:[%s671_s2 + $0x8] sm:$0xff] (!%p157_p3)  ;;  %vm377_vm1 = vcmask (!%p157_p3), 523264  }
   0x8   : > { %536 = vset.pattern.permute.xlu1 (!%p157_p3), %v576_v0  ;;  %535 = vset.pattern.permute.xlu0 (!%p157_p3), %v576_v0  ;;  %v228_v5 = vld [vmem:[%s671_s2 + $0x18] sm:$0xff] (!%p157_p3)  ;;  %v546_v16 = vld [vmem:[%s669_s0] ss:$8 sps:$4 sm:$0xff] (!%p157_p3)  }
   0x9   : > { %486 = vmatprep.mubr.msk.bf16.mxu0 (!%p157_p3), %vm321_vm0, %v548_v1  ;;  %241 = vperm.xlu1 (!%p157_p3), %536, %v227_v3   ;;  %v549_v17 = vld [vmem:[%s669_s0 + $0x10] ss:$8 sps:$4 sm:$0xff] (!%p157_p3)  }
   0xa   : > { %487 = vmatprep.mubr.msk.bf16.mxu1 (!%p157_p3), %vm321_vm0, %v551_v2  ;;  %231 = vperm.xlu0 (!%p157_p3), %535, %v225_v4  }
   0xd   : > { %246 = vperm.xlu1 (!%p157_p3), %536, %v228_v5  }
   0xe   : > { %s678_s12 = smov (!%p186_p4, %s566_s12), 1  ;;  %236 = vperm.xlu0 %535, %v226_v6  }
   0xf   : > { %s509_s24 = smul.u32 72, %s678_s12  ;;  %s490_s9 = sshll.u32 %s678_s12, 5 }
  0x10   : > { %s201_s16 = scalar_lea.vmem %s672_s3, %s490_s9 }
  0x11   : > { %s639_s4 = scalar_lea.vmem %s670_s1, %s509_s24 }
  0x12   : > { %v537_v7 = vld [vmem:[%s639_s4] sm:$0xff]   ;;  %v538_v8 = vld [vmem:[%s639_s4 + $0x8] sm:$0xff]   ;;  %v539_v9 = vld [vmem:[%s639_s4 + $0x10] sm:$0xff]  }
  0x13   : > { %329 = vmatpush1.bf16.msra.mxu0 %v537_v7  ;;  %500 = vmatpush1.bf16.msra.mxu1 %v537_v7  ;;  %v540_v10 = vld [vmem:[%s639_s4 + $0x18] sm:$0xff]   ;;  %v541_v11 = vld [vmem:[%s639_s4 + $0x20] sm:$0xff]   ;;  %v542_v12 = vld [vmem:[%s639_s4 + $0x28] sm:$0xff]  }
  0x14   : > { %330 = vmatprep.subr.bf16.mxu0 %v576_v0  ;;  %492 = vmatprep.subr.bf16.mxu1 %v576_v0  ;;  %v543_v13 = vld [vmem:[%s639_s4 + $0x30] sm:$0xff]   ;;  %v544_v14 = vld [vmem:[%s639_s4 + $0x38] sm:$0xff]   ;;  %v545_v15 = vld [vmem:[%s639_s4 + $0x40] sm:$0xff]  }
  0x17   : > { %331 = vmatpush1.bf16.msra.mxu0 %v538_v8  ;;  %501 = vmatpush1.bf16.msra.mxu1 %v538_v8 }
  0x18   : > { %332 = vmatprep.subr.bf16.mxu0 %v576_v0  ;;  %493 = vmatprep.subr.bf16.mxu1 %v576_v0 }
  0x1b   : > { %333 = vmatpush1.bf16.msra.mxu0 %v539_v9  ;;  %502 = vmatpush1.bf16.msra.mxu1 %v539_v9 }
  0x1c   : > { %334 = vmatprep.subr.bf16.mxu0 %v576_v0  ;;  %494 = vmatprep.subr.bf16.mxu1 %v576_v0 }
  0x1f   : > { %335 = vmatpush1.bf16.msra.mxu0 %v540_v10  ;;  %503 = vmatpush1.bf16.msra.mxu1 %v540_v10 }
  0x20   : > { %336 = vmatprep.subr.bf16.mxu0 %v576_v0  ;;  %495 = vmatprep.subr.bf16.mxu1 %v576_v0 }
  0x23   : > { %337 = vmatpush1.bf16.msra.mxu0 %v541_v11  ;;  %504 = vmatpush1.bf16.msra.mxu1 %v541_v11 }
  0x24   : > { %338 = vmatprep.subr.bf16.mxu0 %v576_v0  ;;  %496 = vmatprep.subr.bf16.mxu1 %v576_v0 }
  0x27   : > { %339 = vmatpush1.bf16.msra.mxu0 %v542_v12  ;;  %505 = vmatpush1.bf16.msra.mxu1 %v542_v12 }
  0x28   : > { %340 = vmatprep.subr.bf16.mxu0 %v576_v0  ;;  %497 = vmatprep.subr.bf16.mxu1 %v576_v0 }
  0x2b   : > { %341 = vmatpush1.bf16.msra.mxu0 %v543_v13  ;;  %506 = vmatpush1.bf16.msra.mxu1 %v543_v13 }
  0x2c   : > { %342 = vmatprep.subr.bf16.mxu0 %v576_v0  ;;  %498 = vmatprep.subr.bf16.mxu1 %v576_v0 }
  0x2f   : > { %343 = vmatpush1.bf16.msra.mxu0 %v544_v14  ;;  %507 = vmatpush1.bf16.msra.mxu1 %v544_v14 }
  0x30   : > { %344 = vmatprep.subr.bf16.mxu0 %v576_v0  ;;  %499 = vmatprep.subr.bf16.mxu1 %v576_v0 }
  0x33   : > { %345 = vmatpush1.bf16.msra.mxu0 %v545_v15  ;;  %508 = vmatpush1.bf16.msra.mxu1 %v545_v15 }
  0x36   : > { %361 = vmatmul.mubr.bf16.vlgmr.msra.gmra.mrb[0].mxu0 %v546_v16  ;;  %369 = vmatmul.mubr.bf16.vlgmr.msra.gmra.mrb[0].mxu1 %v549_v17 }
  0x88   : > { %v242_v18 = vpop.permute.xlu1 %241 }
  0x89   : > { %v232_v19 = vpop.permute.xlu0 %231 }
  0x8c   : > { %v247_v20 = vpop.permute.xlu1 %246 }
  0x8d   : > { %v237_v21 = vpop.permute.xlu0 %236 }
 0x109   : > { %v362_v22 = vpop.f32.mrb[0].mxu0  ;;  %v370_v23 = vpop.f32.mrb[0].mxu1 }
 0x10a   : > { %v363_v24 = vadd.f32 %v362_v22, %v232_v19  ;;  %v371_v25 = vadd.f32 %v370_v23, %v242_v18  ;;  %v364_v26 = vpop.f32.mrb[1].mxu0  ;;  %v372_v27 = vpop.f32.mrb[1].mxu1 }
 0x10b   : > { %v365_v28 = vpop.f32.mrb[2].mxu0  ;;  %v373_v29 = vpop.f32.mrb[2].mxu1 }
 0x10c   : > { %378 = vst.msk [vmem:[%s201_s16] sm:$0xff] %vm377_vm1, %v363_v24  ;;  %380 = vst.msk [vmem:[%s201_s16 + $0x10] sm:$0xff] %vm377_vm1, %v371_v25  ;;  %v366_v30 = vadd.f32 %v365_v28, %v237_v21  ;;  %v374_v31 = vadd.f32 %v373_v29, %v247_v20  ;;  %v367_v32 = vpop.f32.mrb[3].mxu0  ;;  %v375_v33 = vpop.f32.mrb[3].mxu1 }
 0x10e   : > { %379 = vst.msk [vmem:[%s201_s16 + $0x8] sm:$0xff] %vm377_vm1, %v366_v30  ;;  %381 = vst.msk [vmem:[%s201_s16 + $0x18] sm:$0xff] %vm377_vm1, %v374_v31 }
 0x10f PF: > { %s13_s14 = sadd.s32 1, %s574_s14   ;;  %s673_s12 = smov %s570_s13 }
 0x110   : > { %p10_p5 = scmp.ge.s32.totalorder %s13_s14, 4   ;;  %s674_s13 = smov %s676_s15 }
 0x112   :  { %12 = sbr.rel (!%p10_p5) target bundleno = 2 (0x2), region = 62 }

// kernel: resnet_generator.33
= control target key start
LH: loop header
LB: loop body
LE: loop exit
PB: predicated region body
PF: predicated region fallthrough
CT: control target
= control target key end

     0   :  { %s511_s15 = smov 0   ;;  %s557_s0 = inlined_call_operand.vmem [shape: f32[2,32,64], index: 0, kind: input, shape index: {}]   ;;  %s558_s1 = inlined_call_operand.vmem [shape: f32[32,1], index: 1, kind: input, shape index: {}]   ;;  %s559_s2 = inlined_call_operand.vmem [shape: f32[2,32,1], index: 2, kind: input, shape index: {}]   ;;  %s560_s3 = inlined_call_operand.vmem [shape: f32[2,32,1], index: 3, kind: input, shape index: {}]   ;;  %s561_s4 = inlined_call_operand.vmem [shape: f32[2,32,64], index: 4, kind: output, shape index: {}]  }
   0x1 LB: > { %s439_s1 = sadd.s32 4294967295, %s483_s15   ;;  %p443_p0 = scmp.ge.s32.totalorder %s483_s15, 1  ;;  %s483_s15 = sphi %s511_s15, %s14_s15  }
   0x2   : > { %p182_p1 = scmp.lt.s32.totalorder %s483_s15, 3 }
   0x4   : > { %p183_p2 = pnand %p443_p0, %p182_p1 }
   0x5   : > { %p218_p3 = scmp.lt.s32.totalorder (!%p183_p2), %s439_s1, 1  ;;  %vm242_vm0 = vcmask (!%p183_p2), 523264   ;;  %v485_v8 = vmov (!%p183_p2), 0  }
   0x6   : > { %186 = sbr.rel (%p183_p2) target bundleno = 410 (0x19a), region = 36  ;;  %468 = vset.pattern.permute.xlu1 (!%p183_p2), %v485_v8  ;;  %467 = vset.pattern.permute.xlu0 (!%p183_p2), %v485_v8 }
   0xd   : > { %s563_s1 = smov (!%p218_p3, %s439_s1), 1 }
   0xe   : > { %s519_s16 = sshll.u32 %s563_s1, 5 }
   0xf   : > { %s222_s19 = scalar_lea.vmem %s557_s0, %s519_s16  ;;  %s227_s22 = scalar_lea.vmem %s559_s2, %s519_s16 }
  0x10   : > { %v238_v0 = vld [vmem:[%s222_s19] sm:$0xff]  ;;  %v240_v1 = vld [vmem:[%s222_s19 + $0x10] sm:$0xff]  ;;  %v239_v2 = vld [vmem:[%s222_s19 + $0x8] sm:$0xff]  ;;  %s232_s25 = scalar_lea.vmem %s560_s3, %s519_s16  ;;  %s237_s28 = scalar_lea.vmem %s561_s4, %s519_s16 }
  0x11   : > { %v243_v3 = vsel %vm242_vm0, %v238_v0, 0.0  ;;  %v249_v4 = vsel %vm242_vm0, %v240_v1, 0.0  ;;  %v241_v5 = vld [vmem:[%s222_s19 + $0x18] sm:$0xff]  ;;  %v246_v6 = vsel %vm242_vm0, %v239_v2, 0.0  ;;  %v297_v24 = vld [vmem:[%s227_s22 + $0x8] sm:$0xff]  ;;  %v298_v25 = vld [vmem:[%s227_s22 + $0x10] sm:$0xff] }
  0x12   : > { %244 = vadd.xlane.f32.xlu0 %v243_v3  ;;  %250 = vadd.xlane.f32.xlu1 %v249_v4  ;;  %v252_v7 = vsel %vm242_vm0, %v241_v5, 0.0  ;;  %v296_v26 = vld [vmem:[%s227_s22] sm:$0xff]  ;;  %v299_v27 = vld [vmem:[%s227_s22 + $0x18] sm:$0xff]  ;;  %v325_v29 = vld [vmem:[%s232_s25 + $0x8] sm:$0xff] }
  0x13   : > { %v324_v28 = vld [vmem:[%s232_s25] sm:$0xff]  ;;  %v326_v30 = vld [vmem:[%s232_s25 + $0x10] sm:$0xff]  ;;  %v327_v36 = vld [vmem:[%s232_s25 + $0x18] sm:$0xff] }
  0x16   : > { %247 = vadd.xlane.f32.xlu0 %v246_v6  ;;  %253 = vadd.xlane.f32.xlu1 %v252_v7 }
  0x9f   : > { %v245_v9 = vpop.xlane.xlu0 %244  ;;  %v251_v10 = vpop.xlane.xlu1 %250 }
  0xa0   : > { %v256_v11 = vmul.f32 0.015625, %v245_v9  ;;  %v258_v12 = vmul.f32 0.015625, %v251_v10 }
  0xa2   : > { %v260_v13 = vsub.f32 %v238_v0, %v256_v11  ;;  %v529_v14 = vsub.f32 %v240_v1, %v258_v12 }
  0xa3   : > { %v248_v15 = vpop.xlane.xlu0 %247  ;;  %v254_v31 = vpop.xlane.xlu1 %253 }
  0xa4   : > { %v257_v16 = vmul.f32 0.015625, %v248_v15  ;;  %v264_v17 = vmul.f32 %v260_v13, %v260_v13  ;;  %v266_v18 = vmul.f32 %v529_v14, %v529_v14  ;;  %v259_v32 = vmul.f32 0.015625, %v254_v31 }
  0xa6   : > { %v261_v19 = vsub.f32 %v239_v2, %v257_v16  ;;  %v268_v20 = vsel %vm242_vm0, %v264_v17, 0.0  ;;  %v274_v21 = vsel %vm242_vm0, %v266_v18, 0.0  ;;  %v263_v33 = vsub.f32 %v241_v5, %v259_v32 }
  0xa7   : > { %269 = vadd.xlane.f32.xlu0 %v268_v20 }
  0xa8   : > { %v265_v22 = vmul.f32 %v261_v19, %v261_v19  ;;  %v267_v34 = vmul.f32 %v263_v33, %v263_v33 }
  0xaa   : > { %v271_v23 = vsel %vm242_vm0, %v265_v22, 0.0  ;;  %v277_v35 = vsel %vm242_vm0, %v267_v34, 0.0 }
  0xab   : > { %275 = vadd.xlane.f32.xlu0 %v274_v21  ;;  %272 = vadd.xlane.f32.xlu1 %v271_v23 }
  0xbc   : > { %307 = vperm.xlu1 %468, %v297_v24  }
  0xc0   : > { %312 = vperm.xlu1 %468, %v298_v25  }
  0xc1   : > { %302 = vperm.xlu0 %467, %v296_v26  }
  0xc4   : > { %317 = vperm.xlu1 %468, %v299_v27  }
  0xc8   : > { %330 = vperm.xlu1 %468, %v324_v28  }
  0xcc   : > { %335 = vperm.xlu1 %468, %v325_v29  }
  0xd0   : > { %340 = vperm.xlu1 %468, %v326_v30  }
  0xf4   : > { %278 = vadd.xlane.f32.xlu1 %v277_v35 }
 0x105   : > { %345 = vperm.xlu1 %468, %v327_v36  }
 0x134   : > { %v270_v37 = vpop.xlane.xlu0 %269 }
 0x135   : > { %v280_v38 = vmul.f32 0.015625, %v270_v37 }
 0x137   : > { %v284_v39 = vadd.f32 1e-05, %v280_v38 }
 0x138   : > { %v273_v40 = vpop.xlane.xlu1 %272  ;;  %v276_v41 = vpop.xlane.xlu0 %275 }
 0x139   : > { %469 = vrsqrt.f32 %v284_v39  ;;  %v281_v42 = vmul.f32 0.015625, %v273_v40  ;;  %v282_v43 = vmul.f32 0.015625, %v276_v41 }
 0x13b   : > { %v285_v44 = vadd.f32 1e-05, %v281_v42  ;;  %v286_v45 = vadd.f32 1e-05, %v282_v43 }
 0x13c   : > { %v308_v46 = vpop.permute.xlu1 %307 }
 0x13d   : > { %471 = vrsqrt.f32 %v285_v44 }
 0x13e   : > { %473 = vrsqrt.f32 %v286_v45 }
 0x140   : > { %v313_v47 = vpop.permute.xlu1 %312  ;;  %v303_v49 = vpop.permute.xlu0 %302 }
 0x143   : > { %v470_v48 = vpop.eup %469 }
 0x144   : > { %v318_v50 = vpop.permute.xlu1 %317  ;;  %v292_v51 = vmul.f32 %v470_v48, %v260_v13 }
 0x146   : > { %v320_v52 = vmul.f32 %v303_v49, %v292_v51 }
 0x147   : > { %v472_v53 = vpop.eup %471 }
 0x148   : > { %v474_v54 = vpop.eup %473  ;;  %v293_v55 = vmul.f32 %v472_v53, %v261_v19  ;;  %v331_v56 = vpop.permute.xlu1 %330 }
 0x149   : > { %v348_v57 = vadd.f32 %v331_v56, %v320_v52  ;;  %v294_v59 = vmul.f32 %v474_v54, %v529_v14 }
 0x14a   : > { %v321_v58 = vmul.f32 %v308_v46, %v293_v55 }
 0x14b   : > { %v352_v60 = vmax.f32 %v348_v57, 0.0  ;;  %v322_v63 = vmul.f32 %v313_v47, %v294_v59 }
 0x14c   : > { %v336_v61 = vpop.permute.xlu1 %335 }
 0x14d   : > { %356 = vst.msk [vmem:[%s237_s28] sm:$0xff] %vm242_vm0, %v352_v60  ;;  %v349_v62 = vadd.f32 %v336_v61, %v321_v58 }
 0x14f   : > { %v353_v0 = vmax.f32 %v349_v62, 0.0 }
 0x150   : > { %v341_v1 = vpop.permute.xlu1 %340 }
 0x151   : > { %357 = vst.msk [vmem:[%s237_s28 + $0x8] sm:$0xff] %vm242_vm0, %v353_v0  ;;  %v350_v2 = vadd.f32 %v341_v1, %v322_v63 }
 0x153   : > { %v354_v3 = vmax.f32 %v350_v2, 0.0 }
 0x155   : > { %358 = vst.msk [vmem:[%s237_s28 + $0x10] sm:$0xff] %vm242_vm0, %v354_v3 }
 0x181   : > { %v279_v4 = vpop.xlane.xlu1 %278 }
 0x182   : > { %v283_v5 = vmul.f32 0.015625, %v279_v4 }
 0x184   : > { %v287_v6 = vadd.f32 1e-05, %v283_v5 }
 0x185   : > { %v346_v10 = vpop.permute.xlu1 %345 }
 0x186   : > { %475 = vrsqrt.f32 %v287_v6 }
 0x190   : > { %v476_v7 = vpop.eup %475 }
 0x191   : > { %v295_v8 = vmul.f32 %v476_v7, %v263_v33 }
 0x193   : > { %v323_v9 = vmul.f32 %v318_v50, %v295_v8 }
 0x195   : > { %v351_v11 = vadd.f32 %v346_v10, %v323_v9 }
 0x197   : > { %v355_v12 = vmax.f32 %v351_v11, 0.0 }
 0x199   : > { %359 = vst.msk [vmem:[%s237_s28 + $0x18] sm:$0xff] %vm242_vm0, %v355_v12 }
 0x19a PF: > { %s14_s15 = sadd.s32 1, %s483_s15  }
 0x19b   : > { %p11_p4 = scmp.ge.s32.totalorder %s14_s15, 4  }
 0x19d   :  { %13 = sbr.rel (!%p11_p4) target bundleno = 1 (0x1), region = 72 }

// kernel: resnet_generator.34
= control target key start
LH: loop header
LB: loop body
LE: loop exit
PB: predicated region body
PF: predicated region fallthrough
CT: control target
= control target key end

     0   :  { %s778_s12 = smov 0   ;;  %s780_s13 = smov 0   ;;  %s871_s0 = inlined_call_operand.vmem [shape: bf16[32,288], index: 0, kind: input, shape index: {}]   ;;  %s872_s1 = inlined_call_operand.vmem [shape: bf16[2,288,64], index: 1, kind: input, shape index: {}]   ;;  %s873_s2 = inlined_call_operand.vmem [shape: f32[32,1], index: 2, kind: input, shape index: {}]   ;;  %s874_s3 = inlined_call_operand.vmem [shape: f32[2,32,64], index: 3, kind: output, shape index: {}]  }
   0x1   :  { %s782_s14 = smov 0  }
   0x2 LB: > { %s25_s15 = sadd.s32 1, %s751_s13  ;;  %p606_p0 = scmp.ge.s32.totalorder %s755_s14, 1  ;;  %s755_s14 = sphi %s782_s14, %s13_s14   ;;  %s751_s13 = sphi %s780_s13, %s876_s13   ;;  %s747_s12 = sphi %s778_s12, %s875_s12  }
   0x3   : > { %p27_p1 = scmp.ge.s32.totalorder %s25_s15, 2  ;;  %p156_p2 = scmp.lt.s32.totalorder %s755_s14, 3 }
   0x5   : > { %s878_s15 = smov (%p27_p1, %s25_s15), 0  ;;  %p157_p3 = pnand %p606_p0, %p156_p2 }
   0x6   : > { %p186_p4 = scmp.lt.s32.totalorder (!%p157_p3), %s747_s12, 1  ;;  %vm409_vm0 = vcmask (!%p157_p3), 261120   ;;  %v726_v0 = vld [vmem:[%s871_s0 + $0x4] ss:$12 sps:$4 sm:$0xff] (!%p157_p3)   ;;  %v728_v1 = vld [vmem:[%s871_s0 + $0x8] ss:$12 sps:$4 sm:$0xff] (!%p157_p3)  }
   0x7   : > { %160 = sbr.rel (%p157_p3) target bundleno = 281 (0x119), region = 32  ;;  %448 = vmatprep.mubr.bf16.mxu0 (!%p157_p3), %v726_v0  ;;  %675 = vmatprep.mubr.msk.bf16.mxu1 (!%p157_p3), %vm409_vm0, %v728_v1  ;;  %v757_v2 = vmov (!%p157_p3), 0   ;;  %v247_v3 = vld [vmem:[%s873_s2] sm:$0xff] (!%p157_p3)  ;;  %v249_v4 = vld [vmem:[%s873_s2 + $0x10] sm:$0xff] (!%p157_p3)  ;;  %v248_v5 = vld [vmem:[%s873_s2 + $0x8] sm:$0xff] (!%p157_p3)  ;;  %vm514_vm1 = vcmask (!%p157_p3), 523264  }
   0x8   : > { %705 = vset.pattern.permute.xlu0 (!%p157_p3), %v757_v2  ;;  %706 = vset.pattern.permute.xlu1 (!%p157_p3), %v757_v2  ;;  %v250_v6 = vld [vmem:[%s873_s2 + $0x18] sm:$0xff] (!%p157_p3)  ;;  %v729_v22 = vld [vmem:[%s871_s0 + $0x20] ss:$12 sps:$4 sm:$0xff] (!%p157_p3)  }
   0x9   : > { %253 = vperm.xlu0 (!%p157_p3), %705, %v247_v3   ;;  %263 = vperm.xlu1 (!%p157_p3), %706, %v249_v4   ;;  %v724_v26 = vld [vmem:[%s871_s0] ss:$12 sps:$4 sm:$0xff] (!%p157_p3)   ;;  %v730_v27 = vld [vmem:[%s871_s0 + $0x1c] ss:$12 sps:$4 sm:$0xff] (!%p157_p3)   ;;  %v732_v28 = vld [vmem:[%s871_s0 + $0x18] ss:$12 sps:$4 sm:$0xff] (!%p157_p3)  }
   0xd   : > { %258 = vperm.xlu0 (!%p157_p3), %705, %v248_v5   ;;  %268 = vperm.xlu1 (!%p157_p3), %706, %v250_v6  }
   0xe   : > { %s880_s12 = smov (!%p186_p4, %s747_s12), 1 }
   0xf   : > { %s679_s20 = smul.u32 144, %s880_s12  ;;  %s638_s17 = sshll.u32 %s880_s12, 5 }
  0x11   : > { %s815_s27 = scalar_lea.vmem %s872_s1, %s679_s20  ;;  %s201_s20 = scalar_lea.vmem %s874_s3, %s638_s17 }
  0x12   : > { %v707_v7 = vld [vmem:[%s815_s27 + $0x40] sm:$0xff]   ;;  %v709_v9 = vld [vmem:[%s815_s27 + $0x48] sm:$0xff]   ;;  %v711_v11 = vld [vmem:[%s815_s27 + $0x50] sm:$0xff]  }
  0x13   : > { %v708_v8 = vld [vmem:[%s815_s27] sm:$0xff]   ;;  %639 = vmatprep.subr.bf16.mxu0 %v707_v7  ;;  %v710_v10 = vld [vmem:[%s815_s27 + $0x8] sm:$0xff]   ;;  %v712_v12 = vld [vmem:[%s815_s27 + $0x10] sm:$0xff]  }
  0x14   : > { %640 = vmatpush3.bf16.msra.mxu0 %v708_v8  ;;  %v713_v13 = vld [vmem:[%s815_s27 + $0x58] sm:$0xff]   ;;  %v715_v15 = vld [vmem:[%s815_s27 + $0x60] sm:$0xff]   ;;  %v717_v18 = vld [vmem:[%s815_s27 + $0x68] sm:$0xff]  }
  0x15   : > { %641 = vmatprep.subr.bf16.mxu0 %v709_v9  ;;  %v714_v14 = vld [vmem:[%s815_s27 + $0x18] sm:$0xff]   ;;  %v716_v16 = vld [vmem:[%s815_s27 + $0x20] sm:$0xff]   ;;  %v727_v19 = vld [vmem:[%s815_s27 + $0x88] sm:$0xff]  }
  0x16   : > { %v722_v17 = vld [vmem:[%s815_s27 + $0x80] sm:$0xff]   ;;  %v718_v20 = vld [vmem:[%s815_s27 + $0x28] sm:$0xff]   ;;  %v719_v21 = vld [vmem:[%s815_s27 + $0x70] sm:$0xff]  }
  0x17   : > { %671 = vmatprep.subr.bf16.mxu1 %v722_v17  ;;  %v720_v23 = vld [vmem:[%s815_s27 + $0x30] sm:$0xff]   ;;  %v721_v24 = vld [vmem:[%s815_s27 + $0x78] sm:$0xff]  }
  0x18   : > { %642 = vmatpush3.bf16.msra.mxu0 %v710_v10  ;;  %672 = vmatpush3.bf16.msra.mxu1 %v722_v17  ;;  %v723_v25 = vld [vmem:[%s815_s27 + $0x38] sm:$0xff]  }
  0x19   : > { %643 = vmatprep.subr.bf16.mxu0 %v711_v11  ;;  %673 = vmatprep.subr.bf16.mxu1 %v727_v19 }
  0x1c   : > { %644 = vmatpush3.bf16.msra.mxu0 %v712_v12  ;;  %674 = vmatpush3.bf16.msra.mxu1 %v727_v19 }
  0x1d   : > { %645 = vmatprep.subr.bf16.mxu0 %v713_v13 }
  0x1f   : > { %676 = vmatmul.mubr.msk.bf16.vlgmr.msra.gmra.mrb[0].mxu1 %vm409_vm0, %v729_v22 }
  0x20   : > { %646 = vmatpush3.bf16.msra.mxu0 %v714_v14 }
  0x21   : > { %647 = vmatprep.subr.bf16.mxu0 %v715_v15 }
  0x24   : > { %648 = vmatpush3.bf16.msra.mxu0 %v716_v16 }
  0x25   : > { %649 = vmatprep.subr.bf16.mxu0 %v717_v18 }
  0x28   : > { %650 = vmatpush3.bf16.msra.mxu0 %v718_v20 }
  0x29   : > { %651 = vmatprep.subr.bf16.mxu0 %v719_v21 }
  0x2c   : > { %652 = vmatpush3.bf16.msra.mxu0 %v720_v23 }
  0x2d   : > { %653 = vmatprep.subr.bf16.mxu0 %v721_v24 }
  0x30   : > { %654 = vmatpush3.bf16.msra.mxu0 %v723_v25 }
  0x33   : > { %449 = vmatmul.mubr.bf16.vlgmr.msra.gmra.mrb[0].mxu0 %v724_v26 }
  0x34   : > { %456 = vmatprep.mubr.bf16.mxu0 %v730_v27 }
  0x3b   : > { %457 = vmatmul.mubr.bf16.gmra.mrb[4].mxu0 %v732_v28 }
  0x88   : > { %v254_v33 = vpop.permute.xlu0 %253  ;;  %v264_v44 = vpop.permute.xlu1 %263 }
  0x8c   : > { %v259_v39 = vpop.permute.xlu0 %258  ;;  %v269_v53 = vpop.permute.xlu1 %268 }
  0xf2   : > { %v677_v29 = vpop.f32.mrb[0].mxu1 }
  0xf3   : > { %v499_v30 = vpop.f32.mrb[1].mxu1 }
  0xf4   : > { %v678_v31 = vpop.f32.mrb[2].mxu1 }
  0xf5   : > { %v502_v32 = vpop.f32.mrb[3].mxu1 }
 0x106   : > { %v655_v34 = vpop.f32.mrb[0].mxu0 }
 0x107   : > { %v656_v35 = vpop.f32.mrb[1].mxu0 }
 0x108   : > { %v657_v36 = vadd.f32 %v656_v35, %v655_v34  ;;  %v658_v37 = vpop.f32.mrb[2].mxu0 }
 0x109   : > { %v659_v38 = vpop.f32.mrb[3].mxu0 }
 0x10a   : > { %v660_v40 = vadd.f32 %v659_v38, %v658_v37  ;;  %v451_v41 = vadd.f32 %v657_v36, %v254_v33 }
 0x10c   : > { %v454_v42 = vadd.f32 %v660_v40, %v259_v39  ;;  %v500_v43 = vadd.f32 %v499_v30, %v451_v41 }
 0x10e   : > { %515 = vst.msk [vmem:[%s201_s20] sm:$0xff] %vm514_vm1, %v500_v43  ;;  %v503_v45 = vadd.f32 %v502_v32, %v454_v42  ;;  %v661_v46 = vpop.f32.mrb[4].mxu0 }
 0x10f   : > { %v662_v47 = vpop.f32.mrb[5].mxu0 }
 0x110   : > { %516 = vst.msk [vmem:[%s201_s20 + $0x8] sm:$0xff] %vm514_vm1, %v503_v45  ;;  %v663_v48 = vadd.f32 %v662_v47, %v661_v46  ;;  %v664_v49 = vpop.f32.mrb[6].mxu0 }
 0x111   : > { %v665_v50 = vpop.f32.mrb[7].mxu0 }
 0x112   : > { %v459_v51 = vadd.f32 %v663_v48, %v264_v44  ;;  %v666_v52 = vadd.f32 %v665_v50, %v664_v49 }
 0x114   : > { %v508_v54 = vadd.f32 %v677_v29, %v459_v51  ;;  %v462_v55 = vadd.f32 %v666_v52, %v269_v53 }
 0x116   : > { %517 = vst.msk [vmem:[%s201_s20 + $0x10] sm:$0xff] %vm514_vm1, %v508_v54  ;;  %v511_v56 = vadd.f32 %v678_v31, %v462_v55 }
 0x118   : > { %518 = vst.msk [vmem:[%s201_s20 + $0x18] sm:$0xff] %vm514_vm1, %v511_v56 }
 0x119 PF: > { %s13_s14 = sadd.s32 1, %s755_s14   ;;  %s875_s12 = smov %s751_s13 }
 0x11a   : > { %p10_p5 = scmp.ge.s32.totalorder %s13_s14, 4   ;;  %s876_s13 = smov %s878_s15 }
 0x11c   :  { %12 = sbr.rel (!%p10_p5) target bundleno = 2 (0x2), region = 62 }

// kernel: resnet_generator.37
= control target key start
LH: loop header
LB: loop body
LE: loop exit
PB: predicated region body
PF: predicated region fallthrough
CT: control target
= control target key end

     0   :  { %s582_s18 = smov 0   ;;  %s638_s0 = inlined_call_operand.vmem [shape: f32[2,32,64], index: 0, kind: input, shape index: {}]   ;;  %s639_s1 = inlined_call_operand.vmem [shape: f32[32,1], index: 1, kind: input, shape index: {}]   ;;  %s640_s2 = inlined_call_operand.vmem [shape: f32[2,32,1], index: 2, kind: input, shape index: {}]   ;;  %s641_s3 = inlined_call_operand.vmem [shape: f32[2,32,1], index: 3, kind: input, shape index: {}]   ;;  %s642_s4 = inlined_call_operand.vmem [shape: f32[2,32,64], index: 4, kind: input, shape index: {}]   ;;  %s643_s5 = inlined_call_operand.vmem [shape: f32[2,32,64], index: 5, kind: output, shape index: {}]  }
   0x1 LB: > { %s502_s1 = sadd.s32 4294967295, %s549_s18   ;;  %p506_p0 = scmp.ge.s32.totalorder %s549_s18, 1  ;;  %s549_s18 = sphi %s582_s18, %s15_s18  }
   0x2   : > { %p217_p1 = scmp.lt.s32.totalorder %s549_s18, 3 }
   0x4   : > { %p218_p2 = pnand %p506_p0, %p217_p1 }
   0x5   : > { %p260_p3 = scmp.lt.s32.totalorder (!%p218_p2), %s502_s1, 1  ;;  %vm289_vm0 = vcmask (!%p218_p2), 523264   ;;  %v551_v8 = vmov (!%p218_p2), 0  }
   0x6   : > { %221 = sbr.rel (%p218_p2) target bundleno = 410 (0x19a), region = 40  ;;  %534 = vset.pattern.permute.xlu1 (!%p218_p2), %v551_v8  ;;  %533 = vset.pattern.permute.xlu0 (!%p218_p2), %v551_v8 }
   0xd   : > { %s645_s1 = smov (!%p260_p3, %s502_s1), 1 }
   0xe   : > { %s590_s19 = sshll.u32 %s645_s1, 5 }
   0xf   : > { %s264_s22 = scalar_lea.vmem %s638_s0, %s590_s19  ;;  %s269_s25 = scalar_lea.vmem %s640_s2, %s590_s19 }
  0x10   : > { %v285_v0 = vld [vmem:[%s264_s22] sm:$0xff]  ;;  %v287_v1 = vld [vmem:[%s264_s22 + $0x10] sm:$0xff]  ;;  %v286_v2 = vld [vmem:[%s264_s22 + $0x8] sm:$0xff]  ;;  %s274_s28 = scalar_lea.vmem %s641_s3, %s590_s19  ;;  %s620_s6 = scalar_lea.vmem %s642_s4, %s590_s19 }
  0x11   : > { %v290_v3 = vsel %vm289_vm0, %v285_v0, 0.0  ;;  %v296_v4 = vsel %vm289_vm0, %v287_v1, 0.0  ;;  %v288_v5 = vld [vmem:[%s264_s22 + $0x18] sm:$0xff]  ;;  %v293_v6 = vsel %vm289_vm0, %v286_v2, 0.0  ;;  %v344_v24 = vld [vmem:[%s269_s25 + $0x8] sm:$0xff]  ;;  %v345_v25 = vld [vmem:[%s269_s25 + $0x10] sm:$0xff]  ;;  %s284_s9 = scalar_lea.vmem %s643_s5, %s590_s19 }
  0x12   : > { %291 = vadd.xlane.f32.xlu0 %v290_v3  ;;  %297 = vadd.xlane.f32.xlu1 %v296_v4  ;;  %v299_v7 = vsel %vm289_vm0, %v288_v5, 0.0  ;;  %v343_v26 = vld [vmem:[%s269_s25] sm:$0xff]  ;;  %v346_v27 = vld [vmem:[%s269_s25 + $0x18] sm:$0xff]  ;;  %v372_v29 = vld [vmem:[%s274_s28 + $0x8] sm:$0xff] }
  0x13   : > { %v371_v28 = vld [vmem:[%s274_s28] sm:$0xff]  ;;  %v373_v30 = vld [vmem:[%s274_s28 + $0x10] sm:$0xff]  ;;  %v374_v36 = vld [vmem:[%s274_s28 + $0x18] sm:$0xff] }
  0x14   : > { %v399_v56 = vld [vmem:[%s620_s6] sm:$0xff]  ;;  %v400_v62 = vld [vmem:[%s620_s6 + $0x8] sm:$0xff]  ;;  %v401_v3 = vld [vmem:[%s620_s6 + $0x10] sm:$0xff] }
  0x16   : > { %294 = vadd.xlane.f32.xlu0 %v293_v6  ;;  %300 = vadd.xlane.f32.xlu1 %v299_v7 }
  0x9f   : > { %v292_v9 = vpop.xlane.xlu0 %291  ;;  %v298_v10 = vpop.xlane.xlu1 %297 }
  0xa0   : > { %v303_v11 = vmul.f32 0.015625, %v292_v9  ;;  %v305_v12 = vmul.f32 0.015625, %v298_v10 }
  0xa2   : > { %v307_v13 = vsub.f32 %v285_v0, %v303_v11  ;;  %v600_v14 = vsub.f32 %v287_v1, %v305_v12 }
  0xa3   : > { %v295_v15 = vpop.xlane.xlu0 %294  ;;  %v301_v31 = vpop.xlane.xlu1 %300 }
  0xa4   : > { %v304_v16 = vmul.f32 0.015625, %v295_v15  ;;  %v311_v17 = vmul.f32 %v307_v13, %v307_v13  ;;  %v313_v18 = vmul.f32 %v600_v14, %v600_v14  ;;  %v306_v32 = vmul.f32 0.015625, %v301_v31 }
  0xa6   : > { %v308_v19 = vsub.f32 %v286_v2, %v304_v16  ;;  %v315_v20 = vsel %vm289_vm0, %v311_v17, 0.0  ;;  %v321_v21 = vsel %vm289_vm0, %v313_v18, 0.0  ;;  %v310_v33 = vsub.f32 %v288_v5, %v306_v32 }
  0xa7   : > { %316 = vadd.xlane.f32.xlu0 %v315_v20 }
  0xa8   : > { %v312_v22 = vmul.f32 %v308_v19, %v308_v19  ;;  %v314_v34 = vmul.f32 %v310_v33, %v310_v33 }
  0xaa   : > { %v318_v23 = vsel %vm289_vm0, %v312_v22, 0.0  ;;  %v324_v35 = vsel %vm289_vm0, %v314_v34, 0.0 }
  0xab   : > { %322 = vadd.xlane.f32.xlu0 %v321_v21  ;;  %319 = vadd.xlane.f32.xlu1 %v318_v23 }
  0xbc   : > { %354 = vperm.xlu1 %534, %v344_v24  }
  0xc0   : > { %359 = vperm.xlu1 %534, %v345_v25  }
  0xc1   : > { %349 = vperm.xlu0 %533, %v343_v26  }
  0xc4   : > { %364 = vperm.xlu1 %534, %v346_v27  }
  0xc8   : > { %377 = vperm.xlu1 %534, %v371_v28  }
  0xcc   : > { %382 = vperm.xlu1 %534, %v372_v29  }
  0xd0   : > { %387 = vperm.xlu1 %534, %v373_v30  }
  0xf4   : > { %325 = vadd.xlane.f32.xlu1 %v324_v35 }
 0x105   : > { %392 = vperm.xlu1 %534, %v374_v36  }
 0x134   : > { %v317_v37 = vpop.xlane.xlu0 %316 }
 0x135   : > { %v327_v38 = vmul.f32 0.015625, %v317_v37 }
 0x137   : > { %v331_v39 = vadd.f32 1e-05, %v327_v38 }
 0x138   : > { %v320_v40 = vpop.xlane.xlu1 %319  ;;  %v323_v41 = vpop.xlane.xlu0 %322 }
 0x139   : > { %535 = vrsqrt.f32 %v331_v39  ;;  %v328_v42 = vmul.f32 0.015625, %v320_v40  ;;  %v329_v43 = vmul.f32 0.015625, %v323_v41 }
 0x13b   : > { %v332_v44 = vadd.f32 1e-05, %v328_v42  ;;  %v333_v45 = vadd.f32 1e-05, %v329_v43 }
 0x13c   : > { %v355_v46 = vpop.permute.xlu1 %354 }
 0x13d   : > { %537 = vrsqrt.f32 %v332_v44 }
 0x13e   : > { %539 = vrsqrt.f32 %v333_v45 }
 0x140   : > { %v360_v47 = vpop.permute.xlu1 %359  ;;  %v350_v49 = vpop.permute.xlu0 %349 }
 0x143   : > { %v536_v48 = vpop.eup %535 }
 0x144   : > { %v365_v50 = vpop.permute.xlu1 %364  ;;  %v339_v51 = vmul.f32 %v536_v48, %v307_v13  ;;  %v402_v13 = vld [vmem:[%s620_s6 + $0x18] sm:$0xff] }
 0x146   : > { %v367_v52 = vmul.f32 %v350_v49, %v339_v51 }
 0x147   : > { %v538_v53 = vpop.eup %537 }
 0x148   : > { %v540_v54 = vpop.eup %539  ;;  %v340_v55 = vmul.f32 %v538_v53, %v308_v19  ;;  %v378_v57 = vpop.permute.xlu1 %377 }
 0x149   : > { %v395_v58 = vadd.f32 %v378_v57, %v367_v52  ;;  %v341_v60 = vmul.f32 %v540_v54, %v600_v14 }
 0x14a   : > { %v368_v59 = vmul.f32 %v355_v46, %v340_v55 }
 0x14b   : > { %v403_v61 = vadd.f32 %v399_v56, %v395_v58  ;;  %v369_v1 = vmul.f32 %v360_v47, %v341_v60 }
 0x14c   : > { %v383_v63 = vpop.permute.xlu1 %382 }
 0x14d   : > { %407 = vst.msk [vmem:[%s284_s9] sm:$0xff] %vm289_vm0, %v403_v61  ;;  %v396_v0 = vadd.f32 %v383_v63, %v368_v59 }
 0x14f   : > { %v404_v2 = vadd.f32 %v400_v62, %v396_v0 }
 0x150   : > { %v388_v4 = vpop.permute.xlu1 %387 }
 0x151   : > { %408 = vst.msk [vmem:[%s284_s9 + $0x8] sm:$0xff] %vm289_vm0, %v404_v2  ;;  %v397_v5 = vadd.f32 %v388_v4, %v369_v1 }
 0x153   : > { %v405_v6 = vadd.f32 %v401_v3, %v397_v5 }
 0x155   : > { %409 = vst.msk [vmem:[%s284_s9 + $0x10] sm:$0xff] %vm289_vm0, %v405_v6 }
 0x181   : > { %v326_v7 = vpop.xlane.xlu1 %325 }
 0x182   : > { %v330_v8 = vmul.f32 0.015625, %v326_v7 }
 0x184   : > { %v334_v9 = vadd.f32 1e-05, %v330_v8 }
 0x185   : > { %v393_v14 = vpop.permute.xlu1 %392 }
 0x186   : > { %541 = vrsqrt.f32 %v334_v9 }
 0x190   : > { %v542_v10 = vpop.eup %541 }
 0x191   : > { %v342_v11 = vmul.f32 %v542_v10, %v310_v33 }
 0x193   : > { %v370_v12 = vmul.f32 %v365_v50, %v342_v11 }
 0x195   : > { %v398_v15 = vadd.f32 %v393_v14, %v370_v12 }
 0x197   : > { %v406_v16 = vadd.f32 %v402_v13, %v398_v15 }
 0x199   : > { %410 = vst.msk [vmem:[%s284_s9 + $0x18] sm:$0xff] %vm289_vm0, %v406_v16 }
 0x19a PF: > { %s15_s18 = sadd.s32 1, %s549_s18  }
 0x19b   : > { %p12_p4 = scmp.ge.s32.totalorder %s15_s18, 4  }
 0x19d   :  { %14 = sbr.rel (!%p12_p4) target bundleno = 1 (0x1), region = 79 }

// kernel: resnet_generator.42
= control target key start
LH: loop header
LB: loop body
LE: loop exit
PB: predicated region body
PF: predicated region fallthrough
CT: control target
= control target key end

     0   :  { %s512_s12 = smov 0   ;;  %s514_s13 = smov 0   ;;  %s569_s0 = inlined_call_operand.vmem [shape: bf16[32,32], index: 0, kind: input, shape index: {}]   ;;  %s570_s1 = inlined_call_operand.vmem [shape: bf16[2,32,64], index: 1, kind: input, shape index: {}]   ;;  %s571_s2 = inlined_call_operand.vmem [shape: f32[32,1], index: 2, kind: input, shape index: {}]   ;;  %s572_s3 = inlined_call_operand.vmem [shape: f32[2,32,64], index: 3, kind: output, shape index: {}]  }
   0x1   :  { %s516_s14 = smov 0  }
   0x2 LB: > { %s25_s15 = sadd.s32 1, %s485_s13  ;;  %p409_p0 = scmp.ge.s32.totalorder %s489_s14, 1  ;;  %s489_s14 = sphi %s516_s14, %s13_s14   ;;  %s485_s13 = sphi %s514_s13, %s574_s13   ;;  %s481_s12 = sphi %s512_s12, %s573_s12  }
   0x3   : > { %p27_p1 = scmp.ge.s32.totalorder %s25_s15, 2  ;;  %p156_p2 = scmp.lt.s32.totalorder %s489_s14, 3 }
   0x5   : > { %s576_s15 = smov (%p27_p1, %s25_s15), 0  ;;  %p157_p3 = pnand %p409_p0, %p156_p2 }
   0x6   : > { %p186_p4 = scmp.lt.s32.totalorder (!%p157_p3), %s481_s12, 1  ;;  %v465_v0 = vld [vmem:[%s569_s0] sm:$0xff] (!%p157_p3)   ;;  %vm257_vm0 = vcmask (!%p157_p3), 261120   ;;  %v213_v1 = vld [vmem:[%s571_s2 + $0x10] sm:$0xff] (!%p157_p3)  ;;  %v491_v3 = vmov (!%p157_p3), 0   ;;  %v214_v4 = vld [vmem:[%s571_s2 + $0x18] sm:$0xff] (!%p157_p3) }
   0x7   : > { %160 = sbr.rel (%p157_p3) target bundleno = 246 (0xf6), region = 32  ;;  %432 = vmatprep.mubr.msk.bf16.mxu0 (!%p157_p3), %vm257_vm0, %v465_v0  ;;  %v211_v2 = vld [vmem:[%s571_s2] sm:$0xff] (!%p157_p3)  ;;  %462 = vset.pattern.permute.xlu1 (!%p157_p3), %v491_v3  ;;  %v212_v5 = vld [vmem:[%s571_s2 + $0x8] sm:$0xff] (!%p157_p3)  ;;  %vm317_vm1 = vcmask (!%p157_p3), 523264  }
   0x8   : > { %461 = vset.pattern.permute.xlu0 (!%p157_p3), %v491_v3  ;;  %227 = vperm.xlu1 (!%p157_p3), %462, %v213_v1   ;;  %v466_v8 = vld [vmem:[%s569_s0 + $0x8] sm:$0xff] (!%p157_p3)  }
   0x9   : > { %217 = vperm.xlu0 (!%p157_p3), %461, %v211_v2  }
   0xc   : > { %232 = vperm.xlu1 (!%p157_p3), %462, %v214_v4  }
   0xd   : > { %222 = vperm.xlu0 (!%p157_p3), %461, %v212_v5  }
   0xe   : > { %s578_s12 = smov (!%p186_p4, %s481_s12), 1 }
   0xf   : > { %s422_s22 = sshll.u32 %s578_s12, 4  ;;  %s423_s5 = sshll.u32 %s578_s12, 5 }
  0x10   : > { %s193_s25 = scalar_lea.vmem %s570_s1, %s422_s22  ;;  %s201_s8 = scalar_lea.vmem %s572_s3, %s423_s5 }
  0x11   : > { %v463_v6 = vld [vmem:[%s193_s25] sm:$0xff]   ;;  %v464_v7 = vld [vmem:[%s193_s25 + $0x8] sm:$0xff]  }
  0x12   : > { %428 = vmatprep.subr.bf16.mxu0 %v463_v6 }
  0x13   : > { %429 = vmatpush3.bf16.msra.mxu0 %v463_v6 }
  0x14   : > { %430 = vmatprep.subr.bf16.mxu0 %v464_v7 }
  0x17   : > { %431 = vmatpush3.bf16.msra.mxu0 %v464_v7 }
  0x1a   : > { %433 = vmatmul.mubr.msk.bf16.vlgmr.msra.gmra.mrb[0].mxu0 %vm257_vm0, %v466_v8 }
  0x87   : > { %v228_v9 = vpop.permute.xlu1 %227 }
  0x88   : > { %v218_v10 = vpop.permute.xlu0 %217 }
  0x8b   : > { %v233_v14 = vpop.permute.xlu1 %232 }
  0x8c   : > { %v223_v17 = vpop.permute.xlu0 %222 }
  0xed   : > { %v434_v11 = vpop.f32.mrb[0].mxu0 }
  0xee   : > { %v307_v12 = vadd.f32 %v434_v11, %v228_v9  ;;  %v298_v13 = vpop.f32.mrb[1].mxu0 }
  0xef   : > { %v299_v15 = vadd.f32 %v298_v13, %v218_v10  ;;  %v435_v16 = vpop.f32.mrb[2].mxu0 }
  0xf0   : > { %v315_v18 = vmax.f32 %v307_v12, 0.0  ;;  %v310_v19 = vadd.f32 %v435_v16, %v233_v14  ;;  %v301_v20 = vpop.f32.mrb[3].mxu0 }
  0xf1   : > { %v313_v21 = vmax.f32 %v299_v15, 0.0  ;;  %v302_v22 = vadd.f32 %v301_v20, %v223_v17 }
  0xf2   : > { %320 = vst.msk [vmem:[%s201_s8 + $0x10] sm:$0xff] %vm317_vm1, %v315_v18  ;;  %v316_v23 = vmax.f32 %v310_v19, 0.0 }
  0xf3   : > { %318 = vst.msk [vmem:[%s201_s8] sm:$0xff] %vm317_vm1, %v313_v21  ;;  %v314_v24 = vmax.f32 %v302_v22, 0.0 }
  0xf4   : > { %321 = vst.msk [vmem:[%s201_s8 + $0x18] sm:$0xff] %vm317_vm1, %v316_v23 }
  0xf5   : > { %319 = vst.msk [vmem:[%s201_s8 + $0x8] sm:$0xff] %vm317_vm1, %v314_v24 }
  0xf6 PF: > { %s13_s14 = sadd.s32 1, %s489_s14   ;;  %s573_s12 = smov %s485_s13 }
  0xf7   : > { %p10_p5 = scmp.ge.s32.totalorder %s13_s14, 4   ;;  %s574_s13 = smov %s576_s15 }
  0xf9   :  { %12 = sbr.rel (!%p10_p5) target bundleno = 2 (0x2), region = 62 }

// kernel: resnet_generator.44
= control target key start
LH: loop header
LB: loop body
LE: loop exit
PB: predicated region body
PF: predicated region fallthrough
CT: control target
= control target key end

     0   :  { %s626_s15 = smov 0   ;;  %s745_s0 = inlined_call_operand.vmem [shape: f32[2,32,64], index: 0, kind: input, shape index: {}]   ;;  %s746_s1 = inlined_call_operand.vmem [shape: f32[32,1], index: 1, kind: input, shape index: {}]   ;;  %s747_s2 = inlined_call_operand.vmem [shape: f32[2,32,1], index: 2, kind: input, shape index: {}]   ;;  %s748_s3 = inlined_call_operand.vmem [shape: f32[2,32,1], index: 3, kind: input, shape index: {}]   ;;  %s749_s4 = inlined_call_operand.vmem [shape: f32[2,32,64], index: 4, kind: output, shape index: {}]  }
   0x1 LB: > { %s548_s16 = sadd.s32 4294967295, %s598_s15   ;;  %p552_p0 = scmp.ge.s32.totalorder %s598_s15, 1  ;;  %s598_s15 = sphi %s626_s15, %s14_s15  }
   0x2   : > { %p182_p1 = scmp.lt.s32.totalorder %s598_s15, 3 }
   0x4   : > { %p183_p2 = pnand %p552_p0, %p182_p1 }
   0x5   : > { %p218_p3 = scmp.lt.s32.totalorder (!%p183_p2), %s548_s16, 1  ;;  %vm242_vm0 = vcmask (!%p183_p2), 523264   ;;  %v600_v11 = vmov (!%p183_p2), 0   ;;  %v345_v30 = vld [vmem:[%s746_s1] sm:$0xff] (!%p183_p2)  ;;  %v346_v61 = vld [vmem:[%s746_s1 + $0x8] sm:$0xff] (!%p183_p2)  ;;  %v347_v62 = vld [vmem:[%s746_s1 + $0x10] sm:$0xff] (!%p183_p2) }
   0x6   : > { %186 = sbr.rel (%p183_p2) target bundleno = 476 (0x1dc), region = 36  ;;  %580 = vset.pattern.permute.xlu0 (!%p183_p2), %v600_v11  ;;  %581 = vset.pattern.permute.xlu1 (!%p183_p2), %v600_v11  ;;  %v348_v63 = vld [vmem:[%s746_s1 + $0x18] sm:$0xff] (!%p183_p2) }
   0xd   : > { %s751_s16 = smov (!%p218_p3, %s548_s16), 1 }
   0xe   : > { %s634_s17 = sshll.u32 %s751_s16, 5 }
   0xf   : > { %s222_s20 = scalar_lea.vmem %s745_s0, %s634_s17  ;;  %s667_s25 = scalar_lea.vmem %s747_s2, %s634_s17 }
  0x10   : > { %v238_v0 = vld [vmem:[%s222_s20] sm:$0xff]  ;;  %v640_v1 = vld [vmem:[%s222_s20 + $0x8] sm:$0xff]  ;;  %v240_v2 = vld [vmem:[%s222_s20 + $0x10] sm:$0xff]  ;;  %s675_s28 = scalar_lea.vmem %s748_s3, %s634_s17  ;;  %s237_s13 = scalar_lea.vmem %s749_s4, %s634_s17 }
  0x11   : > { %v642_v3 = vld [vmem:[%s222_s20 + $0x18] sm:$0xff]  ;;  %v243_v4 = vsel %vm242_vm0, %v238_v0, 0.0  ;;  %v246_v5 = vsel %vm242_vm0, %v640_v1, 0.0  ;;  %v249_v6 = vsel %vm242_vm0, %v240_v2, 0.0  ;;  %v406_v31 = vld [vmem:[%s667_s25 + $0x8] sm:$0xff] }
  0x12   : > { %v297_v7 = vadd.f32 %v246_v5, %v243_v4  ;;  %247 = vadd.xlane.f32.xlu1 %v246_v5  ;;  %v252_v8 = vsel %vm242_vm0, %v642_v3, 0.0  ;;  %v408_v32 = vld [vmem:[%s667_s25 + $0x18] sm:$0xff]  ;;  %v434_v33 = vld [vmem:[%s675_s28 + $0x8] sm:$0xff]  ;;  %v407_v5 = vld [vmem:[%s667_s25 + $0x10] sm:$0xff] }
  0x13   : > { %v436_v34 = vld [vmem:[%s675_s28 + $0x18] sm:$0xff] }
  0x14   : > { %v298_v9 = vadd.f32 %v297_v7, %v249_v6  ;;  %v435_v7 = vld [vmem:[%s675_s28 + $0x10] sm:$0xff] }
  0x16   : > { %v299_v10 = vadd.f32 %v298_v9, %v252_v8  ;;  %250 = vadd.xlane.f32.xlu1 %v249_v6  ;;  %v433_v6 = vld [vmem:[%s675_s28] sm:$0xff] }
  0x18   : > { %300 = vadd.xlane.f32.xlu0 %v299_v10 }
  0x1c   : > { %244 = vadd.xlane.f32.xlu0 %v243_v4  ;;  %v405_v4 = vld [vmem:[%s667_s25] sm:$0xff] }
  0x20   : > { %253 = vadd.xlane.f32.xlu0 %v252_v8 }
  0x9f   : > { %v248_v12 = vpop.xlane.xlu1 %247 }
  0xa0   : > { %v257_v37 = vmul.f32 0.015625, %v248_v12 }
  0xa2   : > { %v696_v46 = vsub.f32 %v640_v1, %v257_v37 }
  0xa3   : > { %v251_v13 = vpop.xlane.xlu1 %250 }
  0xa4   : > { %v258_v16 = vmul.f32 0.015625, %v251_v13  ;;  %v265_v56 = vmul.f32 %v696_v46, %v696_v46 }
  0xa5   : > { %v301_v14 = vpop.xlane.xlu0 %300 }
  0xa6   : > { %v302_v15 = vrot.slane %v301_v14, 4  ;;  %v650_v21 = vsub.f32 %v240_v2, %v258_v16  ;;  %v271_v58 = vsel %vm242_vm0, %v265_v56, 0.0 }
  0xa8   : > { %v303_v17 = vadd.f32 %v302_v15, %v301_v14  ;;  %v266_v26 = vmul.f32 %v650_v21, %v650_v21 }
  0xa9   : > { %v245_v18 = vpop.xlane.xlu0 %244 }
  0xaa   : > { %v304_v19 = vrot.slane %v303_v17, 2  ;;  %v256_v20 = vmul.f32 0.015625, %v245_v18  ;;  %v274_v29 = vsel %vm242_vm0, %v266_v26, 0.0 }
  0xac   : > { %v652_v22 = vsub.f32 %v238_v0, %v256_v20  ;;  %v305_v23 = vadd.f32 %v304_v19, %v303_v17 }
  0xad   : > { %v254_v42 = vpop.xlane.xlu0 %253 }
  0xae   : > { %v264_v24 = vmul.f32 %v652_v22, %v652_v22  ;;  %v306_v25 = vrot.slane %v305_v23, 1  ;;  %v259_v50 = vmul.f32 0.015625, %v254_v42 }
  0xb0   : > { %v268_v27 = vsel %vm242_vm0, %v264_v24, 0.0  ;;  %v307_v28 = vadd.f32 %v306_v25, %v305_v23  ;;  %v705_v55 = vsub.f32 %v642_v3, %v259_v50 }
  0xb1   : > { %269 = vadd.xlane.f32.xlu0 %v268_v27 }
  0xb2   : > { %567 = vpush %v307_v28  ;;  %v267_v59 = vmul.f32 %v705_v55, %v705_v55 }
  0xb4   : > { %v277_v60 = vsel %vm242_vm0, %v267_v59, 0.0 }
  0xb5   : > { %275 = vadd.xlane.f32.xlu0 %v274_v29 }
  0xcb   : > { %351 = vperm.xlu0 %580, %v345_v30  }
  0xcf   : > { %416 = vperm.xlu0 %580, %v406_v31  }
  0xd3   : > { %426 = vperm.xlu0 %580, %v408_v32  }
  0xd7   : > { %444 = vperm.xlu0 %580, %v434_v33  }
  0xdb   : > { %454 = vperm.xlu0 %580, %v436_v34  }
  0xe3   : > { %s568_s29 = spop %567 }
  0xe4   : > { %v309_v35 = vstv %s568_s29 }
  0xe5   : > { %v311_v36 = vmul.f32 0.00048828125, %v309_v35 }
  0xe7   : > { %v679_v38 = vsub.f32 %v238_v0, %v311_v36  ;;  %v682_v39 = vsub.f32 %v640_v1, %v311_v36  ;;  %v684_v40 = vsub.f32 %v240_v2, %v311_v36  ;;  %v687_v41 = vsub.f32 %v642_v3, %v311_v36 }
  0xe8   : > { %v373_v0 = vsub.f32 1.0, %v345_v30  ;;  %v374_v1 = vsub.f32 1.0, %v346_v61  ;;  %v375_v2 = vsub.f32 1.0, %v347_v62  ;;  %v376_v3 = vsub.f32 1.0, %v348_v63 }
  0xe9   : > { %v316_v43 = vmul.f32 %v679_v38, %v679_v38  ;;  %v317_v44 = vmul.f32 %v682_v39, %v682_v39  ;;  %v318_v45 = vmul.f32 %v684_v40, %v684_v40  ;;  %v319_v47 = vmul.f32 %v687_v41, %v687_v41 }
  0xeb   : > { %v320_v48 = vsel %vm242_vm0, %v316_v43, 0.0  ;;  %v321_v49 = vsel %vm242_vm0, %v317_v44, 0.0  ;;  %v323_v52 = vsel %vm242_vm0, %v318_v45, 0.0  ;;  %v325_v54 = vsel %vm242_vm0, %v319_v47, 0.0 }
  0xec   : > { %v322_v51 = vadd.f32 %v321_v49, %v320_v48 }
  0xee   : > { %v324_v53 = vadd.f32 %v323_v52, %v322_v51 }
  0xf0   : > { %v326_v57 = vadd.f32 %v325_v54, %v324_v53 }
  0xf2   : > { %327 = vadd.xlane.f32.xlu1 %v326_v57 }
  0xf6   : > { %272 = vadd.xlane.f32.xlu1 %v271_v58 }
  0xfa   : > { %278 = vadd.xlane.f32.xlu1 %v277_v60 }
 0x10b   : > { %356 = vperm.xlu1 %581, %v346_v61  }
 0x10f   : > { %361 = vperm.xlu1 %581, %v347_v62  }
 0x113   : > { %366 = vperm.xlu1 %581, %v348_v63  }
 0x117   : > { %379 = vperm.xlu1 %581, %v373_v0  }
 0x11b   : > { %384 = vperm.xlu1 %581, %v374_v1  }
 0x11f   : > { %389 = vperm.xlu1 %581, %v375_v2  }
 0x123   : > { %394 = vperm.xlu1 %581, %v376_v3  }
 0x127   : > { %411 = vperm.xlu1 %581, %v405_v4  }
 0x12b   : > { %421 = vperm.xlu1 %581, %v407_v5  }
 0x12f   : > { %439 = vperm.xlu1 %581, %v433_v6  }
 0x133   : > { %449 = vperm.xlu1 %581, %v435_v7  }
 0x13e   : > { %v270_v23 = vpop.xlane.xlu0 %269 }
 0x13f   : > { %v281_v25 = vmul.f32 0.015873017, %v270_v23 }
 0x141   : > { %v285_v30 = vadd.f32 1e-05, %v281_v25 }
 0x142   : > { %v276_v26 = vpop.xlane.xlu0 %275 }
 0x143   : > { %v283_v31 = vmul.f32 0.015873017, %v276_v26  ;;  %582 = vrsqrt.f32 %v285_v30 }
 0x145   : > { %v287_v34 = vadd.f32 1e-05, %v283_v31 }
 0x14a   : > { %v352_v37 = vpop.permute.xlu0 %351 }
 0x14d   : > { %v583_v47 = vpop.eup %582 }
 0x14e   : > { %v417_v45 = vpop.permute.xlu0 %416  ;;  %v293_v53 = vmul.f32 %v583_v47, %v652_v22 }
 0x150   : > { %v369_v63 = vmul.f32 %v352_v37, %v293_v53 }
 0x152   : > { %v427_v51 = vpop.permute.xlu0 %426 }
 0x156   : > { %v445_v3 = vpop.permute.xlu0 %444 }
 0x17f   : > { %v328_v8 = vpop.xlane.xlu1 %327 }
 0x180   : > { %v329_v9 = vrot.slane %v328_v8, 4 }
 0x182   : > { %v330_v10 = vadd.f32 %v329_v9, %v328_v8 }
 0x183   : > { %v273_v15 = vpop.xlane.xlu1 %272 }
 0x184   : > { %v331_v11 = vrot.slane %v330_v10, 2  ;;  %v282_v27 = vmul.f32 0.015873017, %v273_v15 }
 0x186   : > { %v332_v12 = vadd.f32 %v331_v11, %v330_v10  ;;  %v286_v32 = vadd.f32 1e-05, %v282_v27  ;;  %v455_v10 = vpop.permute.xlu0 %454 }
 0x187   : > { %v279_v16 = vpop.xlane.xlu1 %278 }
 0x188   : > { %v333_v13 = vrot.slane %v332_v12, 1  ;;  %v284_v28 = vmul.f32 0.015873017, %v279_v16  ;;  %584 = vrsqrt.f32 %v286_v32 }
 0x18a   : > { %v334_v14 = vadd.f32 %v333_v13, %v332_v12  ;;  %v288_v33 = vadd.f32 1e-05, %v284_v28 }
 0x18b   : > { %v357_v17 = vpop.permute.xlu1 %356 }
 0x18c   : > { %569 = vpush %v334_v14  ;;  %586 = vrsqrt.f32 %v288_v33 }
 0x18d   : > { %588 = vrsqrt.f32 %v287_v34 }
 0x18f   : > { %v362_v18 = vpop.permute.xlu1 %361 }
 0x192   : > { %v585_v48 = vpop.eup %584 }
 0x193   : > { %v367_v19 = vpop.permute.xlu1 %366  ;;  %v294_v54 = vmul.f32 %v585_v48, %v696_v46 }
 0x195   : > { %v370_v0 = vmul.f32 %v357_v17, %v294_v54 }
 0x196   : > { %v587_v49 = vpop.eup %586 }
 0x197   : > { %v380_v20 = vpop.permute.xlu1 %379  ;;  %v589_v52 = vpop.eup %588  ;;  %v296_v56 = vmul.f32 %v587_v49, %v705_v55 }
 0x198   : > { %v295_v58 = vmul.f32 %v589_v52, %v650_v21 }
 0x199   : > { %v372_v2 = vmul.f32 %v367_v19, %v296_v56 }
 0x19a   : > { %v371_v1 = vmul.f32 %v362_v18, %v295_v58 }
 0x19b   : > { %v385_v24 = vpop.permute.xlu1 %384 }
 0x19f   : > { %v390_v29 = vpop.permute.xlu1 %389 }
 0x1a3   : > { %v395_v35 = vpop.permute.xlu1 %394 }
 0x1a7   : > { %v412_v44 = vpop.permute.xlu1 %411 }
 0x1ab   : > { %v422_v50 = vpop.permute.xlu1 %421 }
 0x1af   : > { %v440_v22 = vpop.permute.xlu1 %439 }
 0x1bd   : > { %s570_s10 = spop %569 }
 0x1be   : > { %v336_v36 = vstv %s570_s10 }
 0x1bf   : > { %v338_v42 = vmul.f32 0.0004885198, %v336_v36 }
 0x1c1   : > { %v339_v43 = vadd.f32 1e-05, %v338_v42 }
 0x1c3   : > { %590 = vrsqrt.f32 %v339_v43 }
 0x1cd   : > { %v591_v57 = vpop.eup %590 }
 0x1ce   : > { %v344_v59 = vmul.f32 %v591_v57, %v687_v41  ;;  %v341_v60 = vmul.f32 %v591_v57, %v679_v38  ;;  %v342_v61 = vmul.f32 %v591_v57, %v682_v39  ;;  %v343_v62 = vmul.f32 %v591_v57, %v684_v40  ;;  %v450_v40 = vpop.permute.xlu1 %449 }
 0x1d0   : > { %v400_v46 = vmul.f32 %v395_v35, %v344_v59  ;;  %v397_v4 = vmul.f32 %v380_v20, %v341_v60  ;;  %v398_v55 = vmul.f32 %v385_v24, %v342_v61  ;;  %v399_v5 = vmul.f32 %v390_v29, %v343_v62 }
 0x1d2   : > { %v404_v21 = vadd.f32 %v400_v46, %v372_v2  ;;  %v401_v6 = vadd.f32 %v397_v4, %v369_v63  ;;  %v402_v41 = vadd.f32 %v398_v55, %v370_v0  ;;  %v403_v7 = vadd.f32 %v399_v5, %v371_v1 }
 0x1d4   : > { %v432_v38 = vmul.f32 %v427_v51, %v404_v21  ;;  %v429_v8 = vmul.f32 %v412_v44, %v401_v6  ;;  %v430_v39 = vmul.f32 %v417_v45, %v402_v41  ;;  %v431_v9 = vmul.f32 %v422_v50, %v403_v7 }
 0x1d6   : > { %v457_v11 = vadd.f32 %v440_v22, %v429_v8  ;;  %v459_v12 = vadd.f32 %v450_v40, %v431_v9  ;;  %v458_v13 = vadd.f32 %v445_v3, %v430_v39  ;;  %v460_v14 = vadd.f32 %v455_v10, %v432_v38 }
 0x1d8   : > { %v461_v15 = vmax.f32 %v457_v11, 0.0  ;;  %v463_v16 = vmax.f32 %v459_v12, 0.0  ;;  %v462_v17 = vmax.f32 %v458_v13, 0.0  ;;  %v464_v18 = vmax.f32 %v460_v14, 0.0 }
 0x1da   : > { %465 = vst.msk [vmem:[%s237_s13] sm:$0xff] %vm242_vm0, %v461_v15  ;;  %467 = vst.msk [vmem:[%s237_s13 + $0x10] sm:$0xff] %vm242_vm0, %v463_v16 }
 0x1db   : > { %466 = vst.msk [vmem:[%s237_s13 + $0x8] sm:$0xff] %vm242_vm0, %v462_v17  ;;  %468 = vst.msk [vmem:[%s237_s13 + $0x18] sm:$0xff] %vm242_vm0, %v464_v18 }
 0x1dc PF: > { %s14_s15 = sadd.s32 1, %s598_s15  }
 0x1dd   : > { %p11_p4 = scmp.ge.s32.totalorder %s14_s15, 4  }
 0x1df   :  { %13 = sbr.rel (!%p11_p4) target bundleno = 1 (0x1), region = 72 }

// kernel: resnet_generator.46
= control target key start
LH: loop header
LB: loop body
LE: loop exit
PB: predicated region body
PF: predicated region fallthrough
CT: control target
= control target key end

     0   :  { %s697_s18 = smov 0   ;;  %s820_s0 = inlined_call_operand.vmem [shape: f32[2,32,64], index: 0, kind: input, shape index: {}]   ;;  %s821_s1 = inlined_call_operand.vmem [shape: f32[32,1], index: 1, kind: input, shape index: {}]   ;;  %s822_s2 = inlined_call_operand.vmem [shape: f32[2,32,1], index: 2, kind: input, shape index: {}]   ;;  %s823_s3 = inlined_call_operand.vmem [shape: f32[2,32,1], index: 3, kind: input, shape index: {}]   ;;  %s824_s4 = inlined_call_operand.vmem [shape: f32[2,32,64], index: 4, kind: input, shape index: {}]   ;;  %s825_s5 = inlined_call_operand.vmem [shape: f32[2,32,64], index: 5, kind: output, shape index: {}]  }
   0x1 LB: > { %s611_s19 = sadd.s32 4294967295, %s664_s18   ;;  %p615_p0 = scmp.ge.s32.totalorder %s664_s18, 1  ;;  %s664_s18 = sphi %s697_s18, %s15_s18  }
   0x2   : > { %p217_p1 = scmp.lt.s32.totalorder %s664_s18, 3 }
   0x4   : > { %p218_p2 = pnand %p615_p0, %p217_p1 }
   0x5   : > { %p260_p3 = scmp.lt.s32.totalorder (!%p218_p2), %s611_s19, 1  ;;  %vm289_vm0 = vcmask (!%p218_p2), 523264   ;;  %v666_v11 = vmov (!%p218_p2), 0   ;;  %v392_v30 = vld [vmem:[%s821_s1] sm:$0xff] (!%p218_p2)  ;;  %v393_v61 = vld [vmem:[%s821_s1 + $0x8] sm:$0xff] (!%p218_p2)  ;;  %v394_v62 = vld [vmem:[%s821_s1 + $0x10] sm:$0xff] (!%p218_p2) }
   0x6   : > { %221 = sbr.rel (%p218_p2) target bundleno = 476 (0x1dc), region = 40  ;;  %646 = vset.pattern.permute.xlu0 (!%p218_p2), %v666_v11  ;;  %647 = vset.pattern.permute.xlu1 (!%p218_p2), %v666_v11  ;;  %v395_v63 = vld [vmem:[%s821_s1 + $0x18] sm:$0xff] (!%p218_p2) }
   0xd   : > { %s827_s19 = smov (!%p260_p3, %s611_s19), 1 }
   0xe   : > { %s705_s20 = sshll.u32 %s827_s19, 5 }
   0xf   : > { %s264_s23 = scalar_lea.vmem %s820_s0, %s705_s20  ;;  %s738_s28 = scalar_lea.vmem %s822_s2, %s705_s20 }
  0x10   : > { %v285_v0 = vld [vmem:[%s264_s23] sm:$0xff]  ;;  %v711_v1 = vld [vmem:[%s264_s23 + $0x8] sm:$0xff]  ;;  %v287_v2 = vld [vmem:[%s264_s23 + $0x10] sm:$0xff]  ;;  %s746_s6 = scalar_lea.vmem %s823_s3, %s705_s20  ;;  %s279_s17 = scalar_lea.vmem %s824_s4, %s705_s20 }
  0x11   : > { %v713_v3 = vld [vmem:[%s264_s23 + $0x18] sm:$0xff]  ;;  %v290_v4 = vsel %vm289_vm0, %v285_v0, 0.0  ;;  %v293_v5 = vsel %vm289_vm0, %v711_v1, 0.0  ;;  %v296_v6 = vsel %vm289_vm0, %v287_v2, 0.0  ;;  %v453_v31 = vld [vmem:[%s738_s28 + $0x8] sm:$0xff]  ;;  %s284_s22 = scalar_lea.vmem %s825_s5, %s705_s20 }
  0x12   : > { %v344_v7 = vadd.f32 %v293_v5, %v290_v4  ;;  %294 = vadd.xlane.f32.xlu1 %v293_v5  ;;  %v299_v8 = vsel %vm289_vm0, %v713_v3, 0.0  ;;  %v455_v32 = vld [vmem:[%s738_s28 + $0x18] sm:$0xff]  ;;  %v481_v33 = vld [vmem:[%s746_s6 + $0x8] sm:$0xff]  ;;  %v454_v5 = vld [vmem:[%s738_s28 + $0x10] sm:$0xff] }
  0x13   : > { %v483_v34 = vld [vmem:[%s746_s6 + $0x18] sm:$0xff] }
  0x14   : > { %v345_v9 = vadd.f32 %v344_v7, %v296_v6  ;;  %v482_v7 = vld [vmem:[%s746_s6 + $0x10] sm:$0xff] }
  0x16   : > { %v346_v10 = vadd.f32 %v345_v9, %v299_v8  ;;  %297 = vadd.xlane.f32.xlu1 %v296_v6  ;;  %v480_v6 = vld [vmem:[%s746_s6] sm:$0xff] }
  0x18   : > { %347 = vadd.xlane.f32.xlu0 %v346_v10 }
  0x1c   : > { %291 = vadd.xlane.f32.xlu0 %v290_v4  ;;  %v452_v4 = vld [vmem:[%s738_s28] sm:$0xff] }
  0x20   : > { %300 = vadd.xlane.f32.xlu0 %v299_v8 }
  0x9f   : > { %v295_v12 = vpop.xlane.xlu1 %294 }
  0xa0   : > { %v304_v37 = vmul.f32 0.015625, %v295_v12 }
  0xa2   : > { %v767_v46 = vsub.f32 %v711_v1, %v304_v37 }
  0xa3   : > { %v298_v13 = vpop.xlane.xlu1 %297 }
  0xa4   : > { %v305_v16 = vmul.f32 0.015625, %v298_v13  ;;  %v312_v56 = vmul.f32 %v767_v46, %v767_v46 }
  0xa5   : > { %v348_v14 = vpop.xlane.xlu0 %347 }
  0xa6   : > { %v349_v15 = vrot.slane %v348_v14, 4  ;;  %v721_v21 = vsub.f32 %v287_v2, %v305_v16  ;;  %v318_v58 = vsel %vm289_vm0, %v312_v56, 0.0 }
  0xa8   : > { %v350_v17 = vadd.f32 %v349_v15, %v348_v14  ;;  %v313_v26 = vmul.f32 %v721_v21, %v721_v21 }
  0xa9   : > { %v292_v18 = vpop.xlane.xlu0 %291 }
  0xaa   : > { %v351_v19 = vrot.slane %v350_v17, 2  ;;  %v303_v20 = vmul.f32 0.015625, %v292_v18  ;;  %v321_v29 = vsel %vm289_vm0, %v313_v26, 0.0 }
  0xac   : > { %v723_v22 = vsub.f32 %v285_v0, %v303_v20  ;;  %v352_v23 = vadd.f32 %v351_v19, %v350_v17 }
  0xad   : > { %v301_v42 = vpop.xlane.xlu0 %300 }
  0xae   : > { %v311_v24 = vmul.f32 %v723_v22, %v723_v22  ;;  %v353_v25 = vrot.slane %v352_v23, 1  ;;  %v306_v50 = vmul.f32 0.015625, %v301_v42 }
  0xb0   : > { %v315_v27 = vsel %vm289_vm0, %v311_v24, 0.0  ;;  %v354_v28 = vadd.f32 %v353_v25, %v352_v23  ;;  %v776_v55 = vsub.f32 %v713_v3, %v306_v50 }
  0xb1   : > { %316 = vadd.xlane.f32.xlu0 %v315_v27 }
  0xb2   : > { %633 = vpush %v354_v28  ;;  %v314_v59 = vmul.f32 %v776_v55, %v776_v55 }
  0xb4   : > { %v324_v60 = vsel %vm289_vm0, %v314_v59, 0.0 }
  0xb5   : > { %322 = vadd.xlane.f32.xlu0 %v321_v29 }
  0xcb   : > { %398 = vperm.xlu0 %646, %v392_v30  }
  0xcf   : > { %463 = vperm.xlu0 %646, %v453_v31  }
  0xd3   : > { %473 = vperm.xlu0 %646, %v455_v32  }
  0xd7   : > { %491 = vperm.xlu0 %646, %v481_v33  }
  0xdb   : > { %501 = vperm.xlu0 %646, %v483_v34  }
  0xe3   : > { %s634_s7 = spop %633 }
  0xe4   : > { %v356_v35 = vstv %s634_s7 }
  0xe5   : > { %v358_v36 = vmul.f32 0.00048828125, %v356_v35 }
  0xe7   : > { %v750_v38 = vsub.f32 %v285_v0, %v358_v36  ;;  %v753_v39 = vsub.f32 %v711_v1, %v358_v36  ;;  %v755_v40 = vsub.f32 %v287_v2, %v358_v36  ;;  %v758_v41 = vsub.f32 %v713_v3, %v358_v36 }
  0xe8   : > { %v420_v0 = vsub.f32 1.0, %v392_v30  ;;  %v421_v1 = vsub.f32 1.0, %v393_v61  ;;  %v422_v2 = vsub.f32 1.0, %v394_v62  ;;  %v423_v3 = vsub.f32 1.0, %v395_v63 }
  0xe9   : > { %v363_v43 = vmul.f32 %v750_v38, %v750_v38  ;;  %v364_v44 = vmul.f32 %v753_v39, %v753_v39  ;;  %v365_v45 = vmul.f32 %v755_v40, %v755_v40  ;;  %v366_v47 = vmul.f32 %v758_v41, %v758_v41 }
  0xeb   : > { %v367_v48 = vsel %vm289_vm0, %v363_v43, 0.0  ;;  %v368_v49 = vsel %vm289_vm0, %v364_v44, 0.0  ;;  %v370_v52 = vsel %vm289_vm0, %v365_v45, 0.0  ;;  %v372_v54 = vsel %vm289_vm0, %v366_v47, 0.0 }
  0xec   : > { %v369_v51 = vadd.f32 %v368_v49, %v367_v48 }
  0xee   : > { %v371_v53 = vadd.f32 %v370_v52, %v369_v51 }
  0xf0   : > { %v373_v57 = vadd.f32 %v372_v54, %v371_v53 }
  0xf2   : > { %374 = vadd.xlane.f32.xlu1 %v373_v57 }
  0xf6   : > { %319 = vadd.xlane.f32.xlu1 %v318_v58 }
  0xfa   : > { %325 = vadd.xlane.f32.xlu1 %v324_v60 }
 0x10b   : > { %403 = vperm.xlu1 %647, %v393_v61  }
 0x10f   : > { %408 = vperm.xlu1 %647, %v394_v62  }
 0x113   : > { %413 = vperm.xlu1 %647, %v395_v63  }
 0x117   : > { %426 = vperm.xlu1 %647, %v420_v0  }
 0x11b   : > { %431 = vperm.xlu1 %647, %v421_v1  }
 0x11f   : > { %436 = vperm.xlu1 %647, %v422_v2  }
 0x123   : > { %441 = vperm.xlu1 %647, %v423_v3  }
 0x127   : > { %458 = vperm.xlu1 %647, %v452_v4  }
 0x12b   : > { %468 = vperm.xlu1 %647, %v454_v5  }
 0x12f   : > { %486 = vperm.xlu1 %647, %v480_v6  }
 0x133   : > { %496 = vperm.xlu1 %647, %v482_v7  }
 0x13e   : > { %v317_v23 = vpop.xlane.xlu0 %316 }
 0x13f   : > { %v328_v25 = vmul.f32 0.015873017, %v317_v23 }
 0x141   : > { %v332_v30 = vadd.f32 1e-05, %v328_v25 }
 0x142   : > { %v323_v26 = vpop.xlane.xlu0 %322 }
 0x143   : > { %v330_v31 = vmul.f32 0.015873017, %v323_v26  ;;  %648 = vrsqrt.f32 %v332_v30 }
 0x145   : > { %v334_v34 = vadd.f32 1e-05, %v330_v31 }
 0x14a   : > { %v399_v37 = vpop.permute.xlu0 %398 }
 0x14d   : > { %v649_v47 = vpop.eup %648 }
 0x14e   : > { %v464_v45 = vpop.permute.xlu0 %463  ;;  %v340_v53 = vmul.f32 %v649_v47, %v723_v22 }
 0x150   : > { %v416_v63 = vmul.f32 %v399_v37, %v340_v53 }
 0x152   : > { %v474_v51 = vpop.permute.xlu0 %473 }
 0x17f   : > { %v375_v8 = vpop.xlane.xlu1 %374 }
 0x180   : > { %v376_v9 = vrot.slane %v375_v8, 4 }
 0x182   : > { %v377_v10 = vadd.f32 %v376_v9, %v375_v8  ;;  %v508_v9 = vld [vmem:[%s279_s17] sm:$0xff] }
 0x183   : > { %v320_v15 = vpop.xlane.xlu1 %319 }
 0x184   : > { %v378_v11 = vrot.slane %v377_v10, 2  ;;  %v329_v27 = vmul.f32 0.015873017, %v320_v15 }
 0x186   : > { %v379_v12 = vadd.f32 %v378_v11, %v377_v10  ;;  %v333_v32 = vadd.f32 1e-05, %v329_v27  ;;  %v509_v11 = vld [vmem:[%s279_s17 + $0x8] sm:$0xff] }
 0x187   : > { %v326_v16 = vpop.xlane.xlu1 %325 }
 0x188   : > { %v380_v13 = vrot.slane %v379_v12, 1  ;;  %v331_v28 = vmul.f32 0.015873017, %v326_v16  ;;  %650 = vrsqrt.f32 %v333_v32 }
 0x18a   : > { %v381_v14 = vadd.f32 %v380_v13, %v379_v12  ;;  %v335_v33 = vadd.f32 1e-05, %v331_v28  ;;  %v510_v12 = vld [vmem:[%s279_s17 + $0x10] sm:$0xff]  ;;  %v511_v13 = vld [vmem:[%s279_s17 + $0x18] sm:$0xff] }
 0x18b   : > { %v404_v17 = vpop.permute.xlu1 %403 }
 0x18c   : > { %635 = vpush %v381_v14  ;;  %652 = vrsqrt.f32 %v335_v33 }
 0x18d   : > { %654 = vrsqrt.f32 %v334_v34 }
 0x18f   : > { %v409_v18 = vpop.permute.xlu1 %408 }
 0x192   : > { %v651_v48 = vpop.eup %650 }
 0x193   : > { %v414_v19 = vpop.permute.xlu1 %413  ;;  %v341_v54 = vmul.f32 %v651_v48, %v767_v46  ;;  %v492_v46 = vpop.permute.xlu0 %491 }
 0x195   : > { %v417_v0 = vmul.f32 %v404_v17, %v341_v54 }
 0x196   : > { %v653_v49 = vpop.eup %652 }
 0x197   : > { %v427_v20 = vpop.permute.xlu1 %426  ;;  %v655_v52 = vpop.eup %654  ;;  %v343_v56 = vmul.f32 %v653_v49, %v776_v55 }
 0x198   : > { %v342_v58 = vmul.f32 %v655_v52, %v721_v21  ;;  %v502_v14 = vpop.permute.xlu0 %501 }
 0x199   : > { %v419_v22 = vmul.f32 %v414_v19, %v343_v56 }
 0x19a   : > { %v418_v1 = vmul.f32 %v409_v18, %v342_v58 }
 0x19b   : > { %v432_v24 = vpop.permute.xlu1 %431 }
 0x19f   : > { %v437_v29 = vpop.permute.xlu1 %436 }
 0x1a3   : > { %v442_v35 = vpop.permute.xlu1 %441 }
 0x1a7   : > { %v459_v44 = vpop.permute.xlu1 %458 }
 0x1ab   : > { %v469_v50 = vpop.permute.xlu1 %468 }
 0x1af   : > { %v487_v2 = vpop.permute.xlu1 %486 }
 0x1b3   : > { %v497_v10 = vpop.permute.xlu1 %496 }
 0x1bd   : > { %s636_s14 = spop %635 }
 0x1be   : > { %v383_v36 = vstv %s636_s14 }
 0x1bf   : > { %v385_v42 = vmul.f32 0.0004885198, %v383_v36 }
 0x1c1   : > { %v386_v43 = vadd.f32 1e-05, %v385_v42 }
 0x1c3   : > { %656 = vrsqrt.f32 %v386_v43 }
 0x1cd   : > { %v657_v57 = vpop.eup %656 }
 0x1ce   : > { %v391_v59 = vmul.f32 %v657_v57, %v758_v41  ;;  %v388_v60 = vmul.f32 %v657_v57, %v750_v38  ;;  %v389_v61 = vmul.f32 %v657_v57, %v753_v39  ;;  %v390_v62 = vmul.f32 %v657_v57, %v755_v40 }
 0x1d0   : > { %v447_v3 = vmul.f32 %v442_v35, %v391_v59  ;;  %v444_v55 = vmul.f32 %v427_v20, %v388_v60  ;;  %v445_v4 = vmul.f32 %v432_v24, %v389_v61  ;;  %v446_v5 = vmul.f32 %v437_v29, %v390_v62 }
 0x1d2   : > { %v451_v21 = vadd.f32 %v447_v3, %v419_v22  ;;  %v448_v38 = vadd.f32 %v444_v55, %v416_v63  ;;  %v449_v41 = vadd.f32 %v445_v4, %v417_v0  ;;  %v450_v39 = vadd.f32 %v446_v5, %v418_v1 }
 0x1d4   : > { %v479_v40 = vmul.f32 %v474_v51, %v451_v21  ;;  %v476_v6 = vmul.f32 %v459_v44, %v448_v38  ;;  %v477_v7 = vmul.f32 %v464_v45, %v449_v41  ;;  %v478_v8 = vmul.f32 %v469_v50, %v450_v39 }
 0x1d6   : > { %v504_v15 = vadd.f32 %v487_v2, %v476_v6  ;;  %v506_v16 = vadd.f32 %v497_v10, %v478_v8  ;;  %v505_v17 = vadd.f32 %v492_v46, %v477_v7  ;;  %v507_v18 = vadd.f32 %v502_v14, %v479_v40 }
 0x1d8   : > { %v512_v19 = vadd.f32 %v508_v9, %v504_v15  ;;  %v514_v20 = vadd.f32 %v510_v12, %v506_v16  ;;  %v513_v23 = vadd.f32 %v509_v11, %v505_v17  ;;  %v515_v24 = vadd.f32 %v511_v13, %v507_v18 }
 0x1da   : > { %516 = vst.msk [vmem:[%s284_s22] sm:$0xff] %vm289_vm0, %v512_v19  ;;  %518 = vst.msk [vmem:[%s284_s22 + $0x10] sm:$0xff] %vm289_vm0, %v514_v20 }
 0x1db   : > { %517 = vst.msk [vmem:[%s284_s22 + $0x8] sm:$0xff] %vm289_vm0, %v513_v23  ;;  %519 = vst.msk [vmem:[%s284_s22 + $0x18] sm:$0xff] %vm289_vm0, %v515_v24 }
 0x1dc PF: > { %s15_s18 = sadd.s32 1, %s664_s18  }
 0x1dd   : > { %p12_p4 = scmp.ge.s32.totalorder %s15_s18, 4  }
 0x1df   :  { %14 = sbr.rel (!%p12_p4) target bundleno = 1 (0x1), region = 79 }

// kernel: resnet_generator.51
= control target key start
LH: loop header
LB: loop body
LE: loop exit
PB: predicated region body
PF: predicated region fallthrough
CT: control target
= control target key end

     0   :  { %s828_s12 = smov 0   ;;  %s830_s13 = smov 0   ;;  %s918_s0 = inlined_call_operand.vmem [shape: bf16[16,288], index: 0, kind: input, shape index: {}]   ;;  %s919_s1 = inlined_call_operand.vmem [shape: bf16[2,288,256], index: 1, kind: input, shape index: {}]   ;;  %s920_s2 = inlined_call_operand.vmem [shape: f32[16,1], index: 2, kind: input, shape index: {}]   ;;  %s921_s3 = inlined_call_operand.vmem [shape: f32[2,16,256], index: 3, kind: output, shape index: {}]  }
   0x1   :  { %s832_s14 = smov 0  }
   0x2 LB: > { %s25_s15 = sadd.s32 1, %s801_s13  ;;  %p643_p0 = scmp.ge.s32.totalorder %s805_s14, 1  ;;  %s805_s14 = sphi %s832_s14, %s13_s14   ;;  %s801_s13 = sphi %s830_s13, %s923_s13   ;;  %s797_s12 = sphi %s828_s12, %s922_s12  }
   0x3   : > { %p27_p1 = scmp.ge.s32.totalorder %s25_s15, 2  ;;  %p158_p2 = scmp.lt.s32.totalorder %s805_s14, 3 }
   0x5   : > { %s925_s15 = smov (%p27_p1, %s25_s15), 0  ;;  %p159_p3 = pnand %p643_p0, %p158_p2 }
   0x6   : > { %p191_p4 = scmp.lt.s32.totalorder (!%p159_p3), %s797_s12, 1  ;;  %v807_v0 = vmov (!%p159_p3), 0   ;;  %v781_v1 = vld [vmem:[%s918_s0 + $0x4] ss:$12 sps:$4 sm:$0xff] (!%p159_p3)   ;;  %v252_v3 = vld [vmem:[%s920_s2 + $0x8] sm:$0xff] (!%p159_p3)  ;;  %vm458_vm0 = vcmask (!%p159_p3), 261120  }
   0x7   : > { %162 = sbr.rel (%p159_p3) target bundleno = 303 (0x12f), region = 32  ;;  %537 = vmatprep.mubr.bf16.mxu0 (!%p159_p3), %v807_v0  ;;  %724 = vset.pattern.permute.xlu0 (!%p159_p3), %v807_v0  ;;  %v251_v2 = vld [vmem:[%s920_s2] sm:$0xff] (!%p159_p3)  ;;  %v782_v23 = vld [vmem:[%s918_s0 + $0x8] ss:$12 sps:$4 sm:$0xff] (!%p159_p3)  }
   0x8   : > { %494 = vmatprep.mubr.bf16.mxu1 (!%p159_p3), %v781_v1  ;;  %255 = vperm.xlu0 (!%p159_p3), %724, %v251_v2   ;;  %v779_v41 = vld [vmem:[%s918_s0] ss:$12 sps:$4 sm:$0xff] (!%p159_p3)  }
   0xc   : > { %260 = vperm.xlu0 (!%p159_p3), %724, %v252_v3  }
   0xe   : > { %s927_s12 = smov (!%p191_p4, %s797_s12), 1 }
   0xf   : > { %s698_s20 = smul.u32 288, %s927_s12  ;;  %s689_s30 = sshll.u32 %s927_s12, 5 }
  0x10   : > { %s208_s6 = scalar_lea.vmem %s921_s3, %s689_s30 }
  0x11   : > { %s861_s25 = scalar_lea.vmem %s919_s1, %s698_s20 }
  0x12   : > { %v725_v4 = vld [vmem:[%s861_s25 + $0x4] ss:$8 sps:$4 sm:$0xff]   ;;  %v727_v5 = vld [vmem:[%s861_s25] ss:$8 sps:$4 sm:$0xff]   ;;  %v728_v6 = vld [vmem:[%s861_s25 + $0x14] ss:$8 sps:$4 sm:$0xff]  }
  0x13   : > { %462 = vmatprep.subr.bf16.mxu1 %v725_v4  ;;  %v730_v7 = vld [vmem:[%s861_s25 + $0x10] ss:$8 sps:$4 sm:$0xff]   ;;  %v731_v8 = vld [vmem:[%s861_s25 + $0x24] ss:$8 sps:$4 sm:$0xff]   ;;  %v733_v9 = vld [vmem:[%s861_s25 + $0x20] ss:$8 sps:$4 sm:$0xff]  }
  0x14   : > { %463 = vmatpush1.bf16.msra.mxu1 %v727_v5  ;;  %v734_v10 = vld [vmem:[%s861_s25 + $0x34] ss:$8 sps:$4 sm:$0xff]   ;;  %v736_v11 = vld [vmem:[%s861_s25 + $0x30] ss:$8 sps:$4 sm:$0xff]   ;;  %v737_v12 = vld [vmem:[%s861_s25 + $0x44] ss:$8 sps:$4 sm:$0xff]  }
  0x15   : > { %464 = vmatprep.subr.bf16.mxu1 %v728_v6  ;;  %v739_v13 = vld [vmem:[%s861_s25 + $0x40] ss:$8 sps:$4 sm:$0xff]   ;;  %v740_v14 = vld [vmem:[%s861_s25 + $0x54] ss:$8 sps:$4 sm:$0xff]   ;;  %v742_v15 = vld [vmem:[%s861_s25 + $0x50] ss:$8 sps:$4 sm:$0xff]  }
  0x16   : > { %v767_v16 = vld [vmem:[%s861_s25 + $0x104] ss:$8 sps:$4 sm:$0xff]   ;;  %v771_v18 = vld [vmem:[%s861_s25 + $0x100] ss:$8 sps:$4 sm:$0xff]   ;;  %v773_v19 = vld [vmem:[%s861_s25 + $0x114] ss:$8 sps:$4 sm:$0xff]  }
  0x17   : > { %v743_v17 = vld [vmem:[%s861_s25 + $0x64] ss:$8 sps:$4 sm:$0xff]   ;;  %505 = vmatprep.subr.bf16.mxu0 %v767_v16  ;;  %v745_v20 = vld [vmem:[%s861_s25 + $0x60] ss:$8 sps:$4 sm:$0xff]   ;;  %v777_v21 = vld [vmem:[%s861_s25 + $0x110] ss:$8 sps:$4 sm:$0xff]  }
  0x18   : > { %465 = vmatpush1.bf16.msra.mxu1 %v730_v7  ;;  %506 = vmatpush1.bf16.msra.mxu0 %v771_v18  ;;  %v746_v22 = vld [vmem:[%s861_s25 + $0x74] ss:$8 sps:$4 sm:$0xff]   ;;  %v748_v24 = vld [vmem:[%s861_s25 + $0x70] ss:$8 sps:$4 sm:$0xff]   ;;  %v749_v25 = vld [vmem:[%s861_s25 + $0x84] ss:$8 sps:$4 sm:$0xff]  }
  0x19   : > { %466 = vmatprep.subr.bf16.mxu1 %v731_v8  ;;  %507 = vmatprep.subr.bf16.mxu0 %v773_v19  ;;  %v751_v26 = vld [vmem:[%s861_s25 + $0x80] ss:$8 sps:$4 sm:$0xff]   ;;  %v752_v27 = vld [vmem:[%s861_s25 + $0x94] ss:$8 sps:$4 sm:$0xff]   ;;  %v754_v28 = vld [vmem:[%s861_s25 + $0x90] ss:$8 sps:$4 sm:$0xff]  }
  0x1a   : > { %v755_v29 = vld [vmem:[%s861_s25 + $0xa4] ss:$8 sps:$4 sm:$0xff]   ;;  %v757_v30 = vld [vmem:[%s861_s25 + $0xa0] ss:$8 sps:$4 sm:$0xff]   ;;  %v758_v31 = vld [vmem:[%s861_s25 + $0xb4] ss:$8 sps:$4 sm:$0xff]  }
  0x1b   : > { %v760_v32 = vld [vmem:[%s861_s25 + $0xb0] ss:$8 sps:$4 sm:$0xff]   ;;  %v761_v33 = vld [vmem:[%s861_s25 + $0xc4] ss:$8 sps:$4 sm:$0xff]   ;;  %v763_v34 = vld [vmem:[%s861_s25 + $0xc0] ss:$8 sps:$4 sm:$0xff]  }
  0x1c   : > { %467 = vmatpush1.bf16.msra.mxu1 %v733_v9  ;;  %508 = vmatpush1.bf16.msra.mxu0 %v777_v21  ;;  %v764_v35 = vld [vmem:[%s861_s25 + $0xd4] ss:$8 sps:$4 sm:$0xff]   ;;  %v766_v36 = vld [vmem:[%s861_s25 + $0xd0] ss:$8 sps:$4 sm:$0xff]   ;;  %v769_v37 = vld [vmem:[%s861_s25 + $0xe4] ss:$8 sps:$4 sm:$0xff]  }
  0x1d   : > { %468 = vmatprep.subr.bf16.mxu1 %v734_v10  ;;  %v772_v38 = vld [vmem:[%s861_s25 + $0xe0] ss:$8 sps:$4 sm:$0xff]   ;;  %v775_v39 = vld [vmem:[%s861_s25 + $0xf4] ss:$8 sps:$4 sm:$0xff]   ;;  %v778_v40 = vld [vmem:[%s861_s25 + $0xf0] ss:$8 sps:$4 sm:$0xff]  }
  0x1f   : > { %686 = vmatmul.mubr.msk.bf16.vlgmr.msra.gmra.mrb[0].mxu0 %vm458_vm0, %v782_v23 }
  0x20   : > { %469 = vmatpush1.bf16.msra.mxu1 %v736_v11 }
  0x21   : > { %470 = vmatprep.subr.bf16.mxu1 %v737_v12 }
  0x24   : > { %471 = vmatpush1.bf16.msra.mxu1 %v739_v13 }
  0x25   : > { %472 = vmatprep.subr.bf16.mxu1 %v740_v14 }
  0x28   : > { %473 = vmatpush1.bf16.msra.mxu1 %v742_v15 }
  0x29   : > { %474 = vmatprep.subr.bf16.mxu1 %v743_v17 }
  0x2c   : > { %475 = vmatpush1.bf16.msra.mxu1 %v745_v20 }
  0x2d   : > { %476 = vmatprep.subr.bf16.mxu1 %v746_v22 }
  0x30   : > { %477 = vmatpush1.bf16.msra.mxu1 %v748_v24 }
  0x31   : > { %478 = vmatprep.subr.bf16.mxu1 %v749_v25 }
  0x34   : > { %479 = vmatpush1.bf16.msra.mxu1 %v751_v26 }
  0x35   : > { %480 = vmatprep.subr.bf16.mxu1 %v752_v27 }
  0x38   : > { %481 = vmatpush1.bf16.msra.mxu1 %v754_v28 }
  0x39   : > { %482 = vmatprep.subr.bf16.mxu1 %v755_v29 }
  0x3c   : > { %483 = vmatpush1.bf16.msra.mxu1 %v757_v30 }
  0x3d   : > { %484 = vmatprep.subr.bf16.mxu1 %v758_v31 }
  0x40   : > { %485 = vmatpush1.bf16.msra.mxu1 %v760_v32 }
  0x41   : > { %486 = vmatprep.subr.bf16.mxu1 %v761_v33 }
  0x44   : > { %487 = vmatpush1.bf16.msra.mxu1 %v763_v34 }
  0x45   : > { %488 = vmatprep.subr.bf16.mxu1 %v764_v35 }
  0x48   : > { %489 = vmatpush1.bf16.msra.mxu1 %v766_v36 }
  0x49   : > { %490 = vmatprep.subr.bf16.mxu1 %v769_v37 }
  0x4c   : > { %491 = vmatpush1.bf16.msra.mxu1 %v772_v38 }
  0x4d   : > { %492 = vmatprep.subr.bf16.mxu1 %v775_v39 }
  0x50   : > { %493 = vmatpush1.bf16.msra.mxu1 %v778_v40 }
  0x53   : > { %495 = vmatmul.mubr.bf16.vlgmr.msra.gmra.mrb[0].mxu1 %v779_v41 }
  0x87   : > { %v256_v46 = vpop.permute.xlu0 %255 }
  0x8b   : > { %v261_v50 = vpop.permute.xlu0 %260 }
  0xf2   : > { %v539_v42 = vpop.f32.mrb[0].mxu0 }
  0xf3   : > { %v541_v43 = vpop.f32.mrb[1].mxu0 }
  0xf4   : > { %v543_v44 = vpop.f32.mrb[2].mxu0 }
  0xf5   : > { %v545_v45 = vpop.f32.mrb[3].mxu0 }
 0x126   : > { %v496_v47 = vpop.f32.mrb[0].mxu1 }
 0x127   : > { %v497_v48 = vadd.f32 %v496_v47, %v256_v46  ;;  %v498_v49 = vpop.f32.mrb[1].mxu1 }
 0x128   : > { %v499_v51 = vadd.f32 %v498_v49, %v256_v46  ;;  %v500_v52 = vpop.f32.mrb[2].mxu1 }
 0x129   : > { %v540_v53 = vadd.f32 %v539_v42, %v497_v48  ;;  %v501_v54 = vadd.f32 %v500_v52, %v261_v50  ;;  %v502_v55 = vpop.f32.mrb[3].mxu1 }
 0x12a   : > { %v542_v56 = vadd.f32 %v541_v43, %v499_v51  ;;  %v503_v57 = vadd.f32 %v502_v55, %v261_v50 }
 0x12b   : > { %548 = vst [vmem:[%s208_s6] sm:$0xff] %v540_v53  ;;  %v544_v58 = vadd.f32 %v543_v44, %v501_v54 }
 0x12c   : > { %549 = vst [vmem:[%s208_s6 + $0x8] sm:$0xff] %v542_v56  ;;  %v546_v59 = vadd.f32 %v545_v45, %v503_v57 }
 0x12d   : > { %550 = vst [vmem:[%s208_s6 + $0x10] sm:$0xff] %v544_v58 }
 0x12e   : > { %551 = vst [vmem:[%s208_s6 + $0x18] sm:$0xff] %v546_v59 }
 0x12f PF: > { %s13_s14 = sadd.s32 1, %s805_s14   ;;  %s922_s12 = smov %s801_s13 }
 0x130   : > { %p10_p5 = scmp.ge.s32.totalorder %s13_s14, 4   ;;  %s923_s13 = smov %s925_s15 }
 0x132   :  { %12 = sbr.rel (!%p10_p5) target bundleno = 2 (0x2), region = 62 }

// kernel: resnet_generator.52
= control target key start
LH: loop header
LB: loop body
LE: loop exit
PB: predicated region body
PF: predicated region fallthrough
CT: control target
= control target key end

     0   :  { %s548_s15 = smov 0   ;;  %s615_s0 = inlined_call_operand.vmem [shape: f32[2,16,256], index: 0, kind: input, shape index: {}]   ;;  %s616_s1 = inlined_call_operand.vmem [shape: f32[16,1], index: 1, kind: input, shape index: {}]   ;;  %s617_s2 = inlined_call_operand.vmem [shape: f32[2,16,1], index: 2, kind: input, shape index: {}]   ;;  %s618_s3 = inlined_call_operand.vmem [shape: f32[2,16,1], index: 3, kind: input, shape index: {}]   ;;  %s619_s4 = inlined_call_operand.vmem [shape: f32[2,16,256], index: 4, kind: output, shape index: {}]  }
   0x1 LB: > { %s474_s16 = sadd.s32 4294967295, %s520_s15   ;;  %p478_p0 = scmp.ge.s32.totalorder %s520_s15, 1  ;;  %s520_s15 = sphi %s548_s15, %s14_s15  }
   0x2   : > { %p182_p1 = scmp.lt.s32.totalorder %s520_s15, 3 }
   0x4   : > { %p183_p2 = pnand %p478_p0, %p182_p1 }
   0x5   : > { %p218_p3 = scmp.lt.s32.totalorder (!%p183_p2), %s474_s16, 1  ;;  %v522_v8 = vmov (!%p183_p2), 0   ;;  %v319_v23 = vld [vmem:[%s616_s1] sm:$0xff] (!%p183_p2)  ;;  %v320_v44 = vld [vmem:[%s616_s1 + $0x8] sm:$0xff] (!%p183_p2) }
   0x6   : > { %186 = sbr.rel (%p183_p2) target bundleno = 474 (0x1da), region = 36  ;;  %506 = vset.pattern.permute.xlu0 (!%p183_p2), %v522_v8  ;;  %507 = vset.pattern.permute.xlu1 (!%p183_p2), %v522_v8  ;;  %v335_v45 = vsub.f32 (!%p183_p2), 1.0, %v319_v23  ;;  %v336_v46 = vsub.f32 (!%p183_p2), 1.0, %v320_v44 }
   0xd   : > { %s621_s16 = smov (!%p218_p3, %s474_s16), 1 }
   0xe   : > { %s489_s17 = sshll.u32 %s621_s16, 5  ;;  %s490_s26 = sshll.u32 %s621_s16, 4 }
   0xf   : > { %s222_s20 = scalar_lea.vmem %s615_s0, %s489_s17  ;;  %s227_s29 = scalar_lea.vmem %s617_s2, %s490_s26 }
  0x10   : > { %v238_v0 = vld [vmem:[%s222_s20] sm:$0xff]  ;;  %v239_v1 = vld [vmem:[%s222_s20 + $0x8] sm:$0xff]  ;;  %v240_v2 = vld [vmem:[%s222_s20 + $0x10] sm:$0xff]  ;;  %s232_s6 = scalar_lea.vmem %s618_s3, %s490_s26  ;;  %s237_s10 = scalar_lea.vmem %s619_s4, %s489_s17 }
  0x11   : > { %v241_v3 = vld [vmem:[%s222_s20 + $0x18] sm:$0xff]  ;;  %v242_v4 = vadd.f32 %v239_v1, %v238_v0  ;;  %v355_v47 = vld [vmem:[%s227_s29] sm:$0xff]  ;;  %v356_v48 = vld [vmem:[%s227_s29 + $0x8] sm:$0xff] }
  0x12   : > { %v245_v5 = vadd.f32 %v241_v3, %v240_v2  ;;  %v371_v49 = vld [vmem:[%s232_s6] sm:$0xff]  ;;  %v372_v50 = vld [vmem:[%s232_s6 + $0x8] sm:$0xff] }
  0x13   : > { %v276_v6 = vadd.f32 %v242_v4, %v240_v2 }
  0x14   : > { %246 = vadd.xlane.f32.xlu1 %v245_v5 }
  0x15   : > { %v277_v7 = vadd.f32 %v276_v6, %v241_v3 }
  0x17   : > { %278 = vadd.xlane.f32.xlu0 %v277_v7 }
  0x1b   : > { %243 = vadd.xlane.f32.xlu0 %v242_v4 }
  0xa1   : > { %v247_v24 = vpop.xlane.xlu1 %246 }
  0xa2   : > { %v250_v26 = vmul.f32 0.00390625, %v247_v24 }
  0xa4   : > { %v279_v9 = vpop.xlane.xlu0 %278  ;;  %v253_v31 = vsub.f32 %v240_v2, %v250_v26  ;;  %v254_v32 = vsub.f32 %v241_v3, %v250_v26 }
  0xa5   : > { %v280_v10 = vrot.slane %v279_v9, 4 }
  0xa6   : > { %v257_v40 = vmul.f32 %v253_v31, %v253_v31  ;;  %v258_v41 = vmul.f32 %v254_v32, %v254_v32 }
  0xa7   : > { %v281_v11 = vadd.f32 %v280_v10, %v279_v9 }
  0xa8   : > { %v244_v12 = vpop.xlane.xlu0 %243  ;;  %v262_v43 = vadd.f32 %v258_v41, %v257_v40 }
  0xa9   : > { %v282_v13 = vrot.slane %v281_v11, 2  ;;  %v249_v14 = vmul.f32 0.00390625, %v244_v12 }
  0xab   : > { %v564_v15 = vsub.f32 %v238_v0, %v249_v14  ;;  %v566_v16 = vsub.f32 %v239_v1, %v249_v14  ;;  %v283_v17 = vadd.f32 %v282_v13, %v281_v11 }
  0xad   : > { %v284_v18 = vrot.slane %v283_v17, 1  ;;  %v255_v19 = vmul.f32 %v564_v15, %v564_v15  ;;  %v256_v20 = vmul.f32 %v566_v16, %v566_v16 }
  0xaf   : > { %v285_v21 = vadd.f32 %v284_v18, %v283_v17  ;;  %v259_v22 = vadd.f32 %v256_v20, %v255_v19 }
  0xb1   : > { %493 = vpush %v285_v21  ;;  %260 = vadd.xlane.f32.xlu0 %v259_v22 }
  0xc7   : > { %323 = vperm.xlu0 %506, %v319_v23  }
  0xe2   : > { %s494_s23 = spop %493 }
  0xe3   : > { %v287_v25 = vstv %s494_s23 }
  0xe4   : > { %v289_v27 = vmul.f32 0.00024414063, %v287_v25 }
  0xe6   : > { %v575_v28 = vsub.f32 %v238_v0, %v289_v27  ;;  %v577_v29 = vsub.f32 %v239_v1, %v289_v27  ;;  %v579_v30 = vsub.f32 %v240_v2, %v289_v27  ;;  %v581_v33 = vsub.f32 %v241_v3, %v289_v27 }
  0xe8   : > { %v294_v34 = vmul.f32 %v575_v28, %v575_v28  ;;  %v295_v35 = vmul.f32 %v577_v29, %v577_v29  ;;  %v296_v36 = vmul.f32 %v579_v30, %v579_v30  ;;  %v297_v38 = vmul.f32 %v581_v33, %v581_v33 }
  0xea   : > { %v298_v37 = vadd.f32 %v295_v35, %v294_v34 }
  0xec   : > { %v299_v39 = vadd.f32 %v298_v37, %v296_v36 }
  0xee   : > { %v300_v42 = vadd.f32 %v299_v39, %v297_v38 }
  0xf0   : > { %301 = vadd.xlane.f32.xlu1 %v300_v42 }
  0xf4   : > { %263 = vadd.xlane.f32.xlu1 %v262_v43 }
 0x105   : > { %328 = vperm.xlu1 %507, %v320_v44  }
 0x109   : > { %339 = vperm.xlu1 %507, %v335_v45  }
 0x10d   : > { %344 = vperm.xlu1 %507, %v336_v46  }
 0x111   : > { %359 = vperm.xlu1 %507, %v355_v47  }
 0x115   : > { %364 = vperm.xlu1 %507, %v356_v48  }
 0x119   : > { %375 = vperm.xlu1 %507, %v371_v49  }
 0x11d   : > { %380 = vperm.xlu1 %507, %v372_v50  }
 0x13e   : > { %v261_v59 = vpop.xlane.xlu0 %260 }
 0x13f   : > { %v266_v61 = vmul.f32 0.003921569, %v261_v59 }
 0x141   : > { %v268_v0 = vadd.f32 1e-05, %v266_v61 }
 0x143   : > { %508 = vrsqrt.f32 %v268_v0 }
 0x146   : > { %v324_v14 = vpop.permute.xlu0 %323 }
 0x14d   : > { %v509_v7 = vpop.eup %508 }
 0x14e   : > { %v272_v10 = vmul.f32 %v509_v7, %v564_v15  ;;  %v273_v11 = vmul.f32 %v509_v7, %v566_v16 }
 0x150   : > { %v331_v22 = vmul.f32 %v324_v14, %v272_v10  ;;  %v332_v23 = vmul.f32 %v324_v14, %v273_v11 }
 0x17d   : > { %v302_v51 = vpop.xlane.xlu1 %301 }
 0x17e   : > { %v303_v52 = vrot.slane %v302_v51, 4 }
 0x180   : > { %v304_v53 = vadd.f32 %v303_v52, %v302_v51 }
 0x181   : > { %v264_v58 = vpop.xlane.xlu1 %263 }
 0x182   : > { %v305_v54 = vrot.slane %v304_v53, 2  ;;  %v267_v62 = vmul.f32 0.003921569, %v264_v58 }
 0x184   : > { %v306_v55 = vadd.f32 %v305_v54, %v304_v53  ;;  %v269_v1 = vadd.f32 1e-05, %v267_v62 }
 0x185   : > { %v329_v60 = vpop.permute.xlu1 %328 }
 0x186   : > { %v307_v56 = vrot.slane %v306_v55, 1  ;;  %510 = vrsqrt.f32 %v269_v1 }
 0x188   : > { %v308_v57 = vadd.f32 %v307_v56, %v306_v55 }
 0x189   : > { %v340_v63 = vpop.permute.xlu1 %339 }
 0x18a   : > { %495 = vpush %v308_v57 }
 0x18d   : > { %v345_v2 = vpop.permute.xlu1 %344 }
 0x190   : > { %v511_v8 = vpop.eup %510 }
 0x191   : > { %v360_v6 = vpop.permute.xlu1 %359  ;;  %v274_v12 = vmul.f32 %v511_v8, %v253_v31  ;;  %v275_v13 = vmul.f32 %v511_v8, %v254_v32 }
 0x193   : > { %v333_v24 = vmul.f32 %v329_v60, %v274_v12  ;;  %v334_v25 = vmul.f32 %v329_v60, %v275_v13 }
 0x195   : > { %v365_v9 = vpop.permute.xlu1 %364 }
 0x199   : > { %v376_v26 = vpop.permute.xlu1 %375 }
 0x19d   : > { %v381_v38 = vpop.permute.xlu1 %380 }
 0x1bb   : > { %s496_s7 = spop %495 }
 0x1bc   : > { %v310_v3 = vstv %s496_s7 }
 0x1bd   : > { %v312_v4 = vmul.f32 0.00024420026, %v310_v3 }
 0x1bf   : > { %v313_v5 = vadd.f32 1e-05, %v312_v4 }
 0x1c1   : > { %512 = vrsqrt.f32 %v313_v5 }
 0x1cb   : > { %v513_v17 = vpop.eup %512 }
 0x1cc   : > { %v315_v18 = vmul.f32 %v513_v17, %v575_v28  ;;  %v316_v19 = vmul.f32 %v513_v17, %v577_v29  ;;  %v317_v20 = vmul.f32 %v513_v17, %v579_v30  ;;  %v318_v21 = vmul.f32 %v513_v17, %v581_v33 }
 0x1ce   : > { %v347_v15 = vmul.f32 %v340_v63, %v315_v18  ;;  %v348_v27 = vmul.f32 %v340_v63, %v316_v19  ;;  %v349_v16 = vmul.f32 %v345_v2, %v317_v20  ;;  %v350_v31 = vmul.f32 %v345_v2, %v318_v21 }
 0x1d0   : > { %v353_v32 = vadd.f32 %v349_v16, %v333_v24  ;;  %v354_v34 = vadd.f32 %v350_v31, %v334_v25  ;;  %v351_v35 = vadd.f32 %v347_v15, %v331_v22  ;;  %v352_v28 = vadd.f32 %v348_v27, %v332_v23 }
 0x1d2   : > { %v369_v36 = vmul.f32 %v365_v9, %v353_v32  ;;  %v370_v29 = vmul.f32 %v365_v9, %v354_v34  ;;  %v367_v37 = vmul.f32 %v360_v6, %v351_v35  ;;  %v368_v30 = vmul.f32 %v360_v6, %v352_v28 }
 0x1d4   : > { %v383_v33 = vadd.f32 %v376_v26, %v367_v37  ;;  %v384_v39 = vadd.f32 %v376_v26, %v368_v30  ;;  %v385_v40 = vadd.f32 %v381_v38, %v369_v36  ;;  %v386_v41 = vadd.f32 %v381_v38, %v370_v29 }
 0x1d6   : > { %v387_v42 = vmax.f32 %v383_v33, 0.0  ;;  %v388_v43 = vmax.f32 %v384_v39, 0.0  ;;  %v389_v44 = vmax.f32 %v385_v40, 0.0  ;;  %v390_v45 = vmax.f32 %v386_v41, 0.0 }
 0x1d8   : > { %391 = vst [vmem:[%s237_s10] sm:$0xff] %v387_v42  ;;  %392 = vst [vmem:[%s237_s10 + $0x8] sm:$0xff] %v388_v43 }
 0x1d9   : > { %393 = vst [vmem:[%s237_s10 + $0x10] sm:$0xff] %v389_v44  ;;  %394 = vst [vmem:[%s237_s10 + $0x18] sm:$0xff] %v390_v45 }
 0x1da PF: > { %s14_s15 = sadd.s32 1, %s520_s15  }
 0x1db   : > { %p11_p4 = scmp.ge.s32.totalorder %s14_s15, 4  }
 0x1dd   :  { %13 = sbr.rel (!%p11_p4) target bundleno = 1 (0x1), region = 72 }

// kernel: resnet_generator.53
= control target key start
LH: loop header
LB: loop body
LE: loop exit
PB: predicated region body
PF: predicated region fallthrough
CT: control target
= control target key end

     0   :  { %s1082_s12 = smov 0   ;;  %s1084_s13 = smov 0   ;;  %s1231_s0 = inlined_call_operand.vmem [shape: bf16[8,144], index: 0, kind: input, shape index: {}]   ;;  %s1232_s1 = inlined_call_operand.vmem [shape: bf16[2,144,1024], index: 1, kind: input, shape index: {}]   ;;  %s1233_s2 = inlined_call_operand.vmem [shape: f32[8,1], index: 2, kind: input, shape index: {}]   ;;  %s1234_s3 = inlined_call_operand.vmem [shape: f32[2,8,1024], index: 3, kind: output, shape index: {}]  }
   0x1   :  { %s1086_s14 = smov 0  }
   0x2 LB: > { %s25_s15 = sadd.s32 1, %s1055_s13  ;;  %p923_p0 = scmp.ge.s32.totalorder %s1059_s14, 1  ;;  %s1059_s14 = sphi %s1086_s14, %s13_s14   ;;  %s1055_s13 = sphi %s1084_s13, %s1236_s13   ;;  %s1051_s12 = sphi %s1082_s12, %s1235_s12  }
   0x3   : > { %p27_p1 = scmp.ge.s32.totalorder %s25_s15, 2  ;;  %p158_p2 = scmp.lt.s32.totalorder %s1059_s14, 3 }
   0x5   : > { %s1238_s15 = smov (%p27_p1, %s25_s15), 0  ;;  %p159_p3 = pnand %p923_p0, %p158_p2 }
   0x6   : > { %p191_p4 = scmp.lt.s32.totalorder (!%p159_p3), %s1051_s12, 1  ;;  %v1103_v0 = vld [vmem:[%s1231_s0] sm:$0xff] (!%p159_p3)  ;;  %vm656_vm0 = vcmask (!%p159_p3), 130048   ;;  %v1061_v3 = vmov (!%p159_p3), 0  }
   0x7   : > { %162 = sbr.rel (%p159_p3) target bundleno = 310 (0x136), region = 32  ;;  %v284_v1 = vld [vmem:[%s1233_s2] sm:$0xff] (!%p159_p3)  ;;  %v1110_v2 = vcombine.high (!%p159_p3), %v1103_v0, %v1103_v0  ;;  %1034 = vset.pattern.permute.xlu0 (!%p159_p3), %v1061_v3 }
   0x8   : > { %287 = vperm.xlu0 (!%p159_p3), %1034, %v284_v1  }
   0x9   : > { %1001 = vmatprep.mubr.msk.bf16.mxu0 (!%p159_p3), %vm656_vm0, %v1110_v2  ;;  %1002 = vmatprep.mubr.msk.bf16.mxu1 (!%p159_p3), %vm656_vm0, %v1110_v2 }
   0xe   : > { %s1240_s12 = smov (!%p191_p4, %s1051_s12), 1 }
   0xf   : > { %s1008_s20 = smul.u32 576, %s1240_s12  ;;  %s1007_s24 = sshll.u32 %s1240_s12, 6 }
  0x10   : > { %s1212_s27 = scalar_lea.vmem %s1234_s3, %s1007_s24 }
  0x11   : > { %s1122_s23 = scalar_lea.vmem %s1232_s1, %s1008_s20 }
  0x12   : > { %v212_v4 = vld [vmem:[%s1122_s23] sm:$0xff]  ;;  %v213_v6 = vld [vmem:[%s1122_s23 + $0x8] sm:$0xff] }
  0x13   : > { %v216_v5 = vld [vmem:[%s1122_s23 + $0x20] sm:$0xff]  ;;  %v217_v8 = vld [vmem:[%s1122_s23 + $0x28] sm:$0xff] }
  0x14   : > { %v930_v7 = vcombine.high %v212_v4, %v216_v5  ;;  %v929_v9 = vcombine.low %v212_v4, %v216_v5  ;;  %v220_v10 = vld [vmem:[%s1122_s23 + $0x40] sm:$0xff]  ;;  %v932_v12 = vcombine.high %v213_v6, %v217_v8  ;;  %v931_v13 = vcombine.low %v213_v6, %v217_v8  ;;  %v221_v15 = vld [vmem:[%s1122_s23 + $0x48] sm:$0xff] }
  0x15   : > { %v224_v11 = vld [vmem:[%s1122_s23 + $0x60] sm:$0xff]  ;;  %v225_v16 = vld [vmem:[%s1122_s23 + $0x68] sm:$0xff] }
  0x16   : > { %v938_v14 = vcombine.high %v220_v10, %v224_v11  ;;  %v228_v17 = vld [vmem:[%s1122_s23 + $0x80] sm:$0xff]  ;;  %660 = vmatprep.subr.bf16.mxu0 %v930_v7  ;;  %v940_v18 = vcombine.high %v221_v15, %v225_v16  ;;  %v229_v20 = vld [vmem:[%s1122_s23 + $0x88] sm:$0xff]  ;;  %701 = vmatprep.subr.bf16.mxu1 %v932_v12  ;;  %v937_v22 = vcombine.low %v220_v10, %v224_v11  ;;  %v214_v12 = vld [vmem:[%s1122_s23 + $0x10] sm:$0xff] }
  0x17   : > { %v232_v19 = vld [vmem:[%s1122_s23 + $0xa0] sm:$0xff]  ;;  %v233_v21 = vld [vmem:[%s1122_s23 + $0xa8] sm:$0xff]  ;;  %661 = vmatpush1.bf16.msra.mxu0 %v929_v9  ;;  %702 = vmatpush1.bf16.msra.mxu1 %v931_v13  ;;  %v939_v23 = vcombine.low %v221_v15, %v225_v16  ;;  %v218_v13 = vld [vmem:[%s1122_s23 + $0x30] sm:$0xff] }
  0x18   : > { %662 = vmatprep.subr.bf16.mxu0 %v938_v14  ;;  %v946_v24 = vcombine.high %v228_v17, %v232_v19  ;;  %703 = vmatprep.subr.bf16.mxu1 %v940_v18  ;;  %v948_v25 = vcombine.high %v229_v20, %v233_v21  ;;  %v236_v26 = vld [vmem:[%s1122_s23 + $0xc0] sm:$0xff]  ;;  %v237_v28 = vld [vmem:[%s1122_s23 + $0xc8] sm:$0xff]  ;;  %v945_v30 = vcombine.low %v228_v17, %v232_v19  ;;  %v215_v14 = vld [vmem:[%s1122_s23 + $0x18] sm:$0xff] }
  0x19   : > { %v240_v27 = vld [vmem:[%s1122_s23 + $0xe0] sm:$0xff]  ;;  %v241_v29 = vld [vmem:[%s1122_s23 + $0xe8] sm:$0xff]  ;;  %v947_v31 = vcombine.low %v229_v20, %v233_v21  ;;  %v219_v15 = vld [vmem:[%s1122_s23 + $0x38] sm:$0xff]  ;;  %v934_v18 = vcombine.high %v214_v12, %v218_v13 }
  0x1a   : > { %v954_v32 = vcombine.high %v236_v26, %v240_v27  ;;  %v956_v33 = vcombine.high %v237_v28, %v241_v29  ;;  %v244_v34 = vld [vmem:[%s1122_s23 + $0x100] sm:$0xff]  ;;  %v245_v36 = vld [vmem:[%s1122_s23 + $0x108] sm:$0xff]  ;;  %v953_v38 = vcombine.low %v236_v26, %v240_v27  ;;  %v955_v39 = vcombine.low %v237_v28, %v241_v29  ;;  %v222_v20 = vld [vmem:[%s1122_s23 + $0x50] sm:$0xff] }
  0x1b   : > { %663 = vmatpush1.bf16.msra.mxu0 %v937_v22  ;;  %704 = vmatpush1.bf16.msra.mxu1 %v939_v23  ;;  %v248_v35 = vld [vmem:[%s1122_s23 + $0x120] sm:$0xff]  ;;  %v249_v37 = vld [vmem:[%s1122_s23 + $0x128] sm:$0xff]  ;;  %v936_v19 = vcombine.high %v215_v14, %v219_v15  ;;  %v226_v21 = vld [vmem:[%s1122_s23 + $0x70] sm:$0xff]  ;;  %v1168_v22 = vcombine.low %v1103_v0, %v1103_v0  ;;  %v935_v26 = vcombine.low %v215_v14, %v219_v15 }
  0x1c   : > { %664 = vmatprep.subr.bf16.mxu0 %v946_v24  ;;  %705 = vmatprep.subr.bf16.mxu1 %v948_v25  ;;  %v962_v40 = vcombine.high %v244_v34, %v248_v35  ;;  %v964_v41 = vcombine.high %v245_v36, %v249_v37  ;;  %v252_v42 = vld [vmem:[%s1122_s23 + $0x140] sm:$0xff]  ;;  %v253_v44 = vld [vmem:[%s1122_s23 + $0x148] sm:$0xff]  ;;  %v961_v46 = vcombine.low %v244_v34, %v248_v35  ;;  %v223_v23 = vld [vmem:[%s1122_s23 + $0x58] sm:$0xff] }
  0x1d   : > { %v256_v43 = vld [vmem:[%s1122_s23 + $0x160] sm:$0xff]  ;;  %v257_v45 = vld [vmem:[%s1122_s23 + $0x168] sm:$0xff]  ;;  %v963_v47 = vcombine.low %v245_v36, %v249_v37  ;;  %v227_v24 = vld [vmem:[%s1122_s23 + $0x78] sm:$0xff]  ;;  %v933_v25 = vcombine.low %v214_v12, %v218_v13  ;;  %v942_v27 = vcombine.high %v222_v20, %v226_v21 }
  0x1e   : > { %v970_v48 = vcombine.high %v252_v42, %v256_v43  ;;  %v972_v49 = vcombine.high %v253_v44, %v257_v45  ;;  %v260_v50 = vld [vmem:[%s1122_s23 + $0x180] sm:$0xff]  ;;  %v261_v52 = vld [vmem:[%s1122_s23 + $0x188] sm:$0xff]  ;;  %v969_v54 = vcombine.low %v252_v42, %v256_v43  ;;  %v971_v55 = vcombine.low %v253_v44, %v257_v45  ;;  %v230_v29 = vld [vmem:[%s1122_s23 + $0x90] sm:$0xff] }
  0x1f   : > { %665 = vmatpush1.bf16.msra.mxu0 %v945_v30  ;;  %706 = vmatpush1.bf16.msra.mxu1 %v947_v31  ;;  %v264_v51 = vld [vmem:[%s1122_s23 + $0x1a0] sm:$0xff]  ;;  %v265_v53 = vld [vmem:[%s1122_s23 + $0x1a8] sm:$0xff]  ;;  %v944_v28 = vcombine.high %v223_v23, %v227_v24  ;;  %v234_v30 = vld [vmem:[%s1122_s23 + $0xb0] sm:$0xff] }
  0x20   : > { %666 = vmatprep.subr.bf16.mxu0 %v954_v32  ;;  %707 = vmatprep.subr.bf16.mxu1 %v956_v33  ;;  %v978_v56 = vcombine.high %v260_v50, %v264_v51  ;;  %v980_v57 = vcombine.high %v261_v52, %v265_v53  ;;  %v268_v58 = vld [vmem:[%s1122_s23 + $0x1c0] sm:$0xff]  ;;  %v269_v60 = vld [vmem:[%s1122_s23 + $0x1c8] sm:$0xff]  ;;  %v977_v62 = vcombine.low %v260_v50, %v264_v51  ;;  %v231_v0 = vld [vmem:[%s1122_s23 + $0x98] sm:$0xff] }
  0x21   : > { %v272_v59 = vld [vmem:[%s1122_s23 + $0x1e0] sm:$0xff]  ;;  %v273_v61 = vld [vmem:[%s1122_s23 + $0x1e8] sm:$0xff]  ;;  %v979_v63 = vcombine.low %v261_v52, %v265_v53  ;;  %v235_v31 = vld [vmem:[%s1122_s23 + $0xb8] sm:$0xff]  ;;  %v941_v32 = vcombine.low %v222_v20, %v226_v21  ;;  %v943_v33 = vcombine.low %v223_v23, %v227_v24  ;;  %v950_v34 = vcombine.high %v230_v29, %v234_v30 }
  0x22   : > { %v986_v1 = vcombine.high %v268_v58, %v272_v59  ;;  %v988_v3 = vcombine.high %v269_v60, %v273_v61  ;;  %v276_v4 = vld [vmem:[%s1122_s23 + $0x200] sm:$0xff]  ;;  %v277_v6 = vld [vmem:[%s1122_s23 + $0x208] sm:$0xff]  ;;  %v985_v8 = vcombine.low %v268_v58, %v272_v59  ;;  %v987_v9 = vcombine.low %v269_v60, %v273_v61  ;;  %v238_v36 = vld [vmem:[%s1122_s23 + $0xd0] sm:$0xff] }
  0x23   : > { %667 = vmatpush1.bf16.msra.mxu0 %v953_v38  ;;  %708 = vmatpush1.bf16.msra.mxu1 %v955_v39  ;;  %v280_v5 = vld [vmem:[%s1122_s23 + $0x220] sm:$0xff]  ;;  %v281_v7 = vld [vmem:[%s1122_s23 + $0x228] sm:$0xff]  ;;  %v952_v35 = vcombine.high %v231_v0, %v235_v31  ;;  %v242_v37 = vld [vmem:[%s1122_s23 + $0xf0] sm:$0xff] }
  0x24   : > { %668 = vmatprep.subr.bf16.mxu0 %v962_v40  ;;  %709 = vmatprep.subr.bf16.mxu1 %v964_v41  ;;  %v994_v10 = vcombine.high %v276_v4, %v280_v5  ;;  %v996_v11 = vcombine.high %v277_v6, %v281_v7  ;;  %v993_v16 = vcombine.low %v276_v4, %v280_v5  ;;  %v239_v38 = vld [vmem:[%s1122_s23 + $0xd8] sm:$0xff]  ;;  %v246_v44 = vld [vmem:[%s1122_s23 + $0x110] sm:$0xff] }
  0x25   : > { %v995_v17 = vcombine.low %v277_v6, %v281_v7  ;;  %v243_v39 = vld [vmem:[%s1122_s23 + $0xf8] sm:$0xff]  ;;  %v949_v40 = vcombine.low %v230_v29, %v234_v30  ;;  %v951_v41 = vcombine.low %v231_v0, %v235_v31  ;;  %v958_v42 = vcombine.high %v238_v36, %v242_v37  ;;  %v250_v45 = vld [vmem:[%s1122_s23 + $0x130] sm:$0xff] }
  0x26   : > { %v960_v43 = vcombine.high %v239_v38, %v243_v39  ;;  %v254_v51 = vld [vmem:[%s1122_s23 + $0x150] sm:$0xff]  ;;  %v255_v53 = vld [vmem:[%s1122_s23 + $0x158] sm:$0xff] }
  0x27   : > { %669 = vmatpush1.bf16.msra.mxu0 %v961_v46  ;;  %710 = vmatpush1.bf16.msra.mxu1 %v963_v47  ;;  %v247_v46 = vld [vmem:[%s1122_s23 + $0x118] sm:$0xff]  ;;  %v258_v52 = vld [vmem:[%s1122_s23 + $0x170] sm:$0xff] }
  0x28   : > { %670 = vmatprep.subr.bf16.mxu0 %v970_v48  ;;  %711 = vmatprep.subr.bf16.mxu1 %v972_v49  ;;  %v251_v47 = vld [vmem:[%s1122_s23 + $0x138] sm:$0xff]  ;;  %v957_v48 = vcombine.low %v238_v36, %v242_v37  ;;  %v966_v49 = vcombine.high %v246_v44, %v250_v45  ;;  %v262_v59 = vld [vmem:[%s1122_s23 + $0x190] sm:$0xff] }
  0x29   : > { %v968_v50 = vcombine.high %v247_v46, %v251_v47  ;;  %v266_v60 = vld [vmem:[%s1122_s23 + $0x1b0] sm:$0xff]  ;;  %v263_v61 = vld [vmem:[%s1122_s23 + $0x198] sm:$0xff] }
  0x2a   : > { %v270_v5 = vld [vmem:[%s1122_s23 + $0x1d0] sm:$0xff]  ;;  %v271_v7 = vld [vmem:[%s1122_s23 + $0x1d8] sm:$0xff] }
  0x2b   : > { %671 = vmatpush1.bf16.msra.mxu0 %v969_v54  ;;  %712 = vmatpush1.bf16.msra.mxu1 %v971_v55  ;;  %v259_v54 = vld [vmem:[%s1122_s23 + $0x178] sm:$0xff]  ;;  %v965_v55 = vcombine.low %v246_v44, %v250_v45  ;;  %v274_v6 = vld [vmem:[%s1122_s23 + $0x1f0] sm:$0xff] }
  0x2c   : > { %672 = vmatprep.subr.bf16.mxu0 %v978_v56  ;;  %713 = vmatprep.subr.bf16.mxu1 %v980_v57  ;;  %v967_v56 = vcombine.low %v247_v46, %v251_v47  ;;  %v974_v57 = vcombine.high %v254_v51, %v258_v52  ;;  %v976_v58 = vcombine.high %v255_v53, %v259_v54  ;;  %v278_v13 = vld [vmem:[%s1122_s23 + $0x210] sm:$0xff]  ;;  %v279_v15 = vld [vmem:[%s1122_s23 + $0x218] sm:$0xff] }
  0x2d   : > { %v282_v14 = vld [vmem:[%s1122_s23 + $0x230] sm:$0xff] }
  0x2e   : > { %v997_v21 = vcombine.low %v278_v13, %v282_v14 }
  0x2f   : > { %673 = vmatpush1.bf16.msra.mxu0 %v977_v62  ;;  %714 = vmatpush1.bf16.msra.mxu1 %v979_v63  ;;  %v267_v62 = vld [vmem:[%s1122_s23 + $0x1b8] sm:$0xff]  ;;  %v973_v63 = vcombine.low %v254_v51, %v258_v52 }
  0x30   : > { %674 = vmatprep.subr.bf16.mxu0 %v986_v1  ;;  %715 = vmatprep.subr.bf16.mxu1 %v988_v3  ;;  %v975_v1 = vcombine.low %v255_v53, %v259_v54  ;;  %v982_v3 = vcombine.high %v262_v59, %v266_v60  ;;  %v984_v4 = vcombine.high %v263_v61, %v267_v62 }
  0x33   : > { %675 = vmatpush1.bf16.msra.mxu0 %v985_v8  ;;  %716 = vmatpush1.bf16.msra.mxu1 %v987_v9  ;;  %v275_v8 = vld [vmem:[%s1122_s23 + $0x1f8] sm:$0xff]  ;;  %v981_v9 = vcombine.low %v262_v59, %v266_v60 }
  0x34   : > { %676 = vmatprep.subr.bf16.mxu0 %v994_v10  ;;  %717 = vmatprep.subr.bf16.mxu1 %v996_v11  ;;  %v983_v10 = vcombine.low %v263_v61, %v267_v62  ;;  %v990_v11 = vcombine.high %v270_v5, %v274_v6  ;;  %v992_v12 = vcombine.high %v271_v7, %v275_v8 }
  0x37   : > { %677 = vmatpush1.bf16.msra.mxu0 %v993_v16  ;;  %718 = vmatpush1.bf16.msra.mxu1 %v995_v17  ;;  %v283_v16 = vld [vmem:[%s1122_s23 + $0x238] sm:$0xff]  ;;  %v989_v17 = vcombine.low %v270_v5, %v274_v6 }
  0x38   : > { %742 = vmatprep.subr.bf16.mxu0 %v934_v18  ;;  %783 = vmatprep.subr.bf16.mxu1 %v936_v19  ;;  %v991_v18 = vcombine.low %v271_v7, %v275_v8  ;;  %v998_v19 = vcombine.high %v278_v13, %v282_v14  ;;  %v1000_v20 = vcombine.high %v279_v15, %v283_v16 }
  0x39   : > { %v999_v23 = vcombine.low %v279_v15, %v283_v16 }
  0x3a   : > { %693 = vmatmul.mubr.bf16.vlgmr.msra.gmra.mrb[0].mxu0 %v1168_v22  ;;  %734 = vmatmul.mubr.bf16.vlgmr.msra.gmra.mrb[0].mxu1 %v1168_v22 }
  0x3b   : > { %743 = vmatpush1.bf16.msra.mxu0 %v933_v25  ;;  %784 = vmatpush1.bf16.msra.mxu1 %v935_v26 }
  0x3c   : > { %744 = vmatprep.subr.bf16.mxu0 %v942_v27  ;;  %785 = vmatprep.subr.bf16.mxu1 %v944_v28 }
  0x3d   : > { %1003 = vmatprep.mubr.msk.bf16.mxu0 %vm656_vm0, %v1110_v2  ;;  %1004 = vmatprep.mubr.msk.bf16.mxu1 %vm656_vm0, %v1110_v2  ;;  %v959_v2 = vcombine.low %v239_v38, %v243_v39 }
  0x3f   : > { %745 = vmatpush1.bf16.msra.mxu0 %v941_v32  ;;  %786 = vmatpush1.bf16.msra.mxu1 %v943_v33 }
  0x40   : > { %746 = vmatprep.subr.bf16.mxu0 %v950_v34  ;;  %787 = vmatprep.subr.bf16.mxu1 %v952_v35 }
  0x43   : > { %747 = vmatpush1.bf16.msra.mxu0 %v949_v40  ;;  %788 = vmatpush1.bf16.msra.mxu1 %v951_v41 }
  0x44   : > { %748 = vmatprep.subr.bf16.mxu0 %v958_v42  ;;  %789 = vmatprep.subr.bf16.mxu1 %v960_v43 }
  0x47   : > { %749 = vmatpush1.bf16.msra.mxu0 %v957_v48  ;;  %790 = vmatpush1.bf16.msra.mxu1 %v959_v2 }
  0x48   : > { %750 = vmatprep.subr.bf16.mxu0 %v966_v49  ;;  %791 = vmatprep.subr.bf16.mxu1 %v968_v50 }
  0x4b   : > { %751 = vmatpush1.bf16.msra.mxu0 %v965_v55  ;;  %792 = vmatpush1.bf16.msra.mxu1 %v967_v56 }
  0x4c   : > { %752 = vmatprep.subr.bf16.mxu0 %v974_v57  ;;  %793 = vmatprep.subr.bf16.mxu1 %v976_v58 }
  0x4f   : > { %753 = vmatpush1.bf16.msra.mxu0 %v973_v63  ;;  %794 = vmatpush1.bf16.msra.mxu1 %v975_v1 }
  0x50   : > { %754 = vmatprep.subr.bf16.mxu0 %v982_v3  ;;  %795 = vmatprep.subr.bf16.mxu1 %v984_v4 }
  0x53   : > { %755 = vmatpush1.bf16.msra.mxu0 %v981_v9  ;;  %796 = vmatpush1.bf16.msra.mxu1 %v983_v10 }
  0x54   : > { %756 = vmatprep.subr.bf16.mxu0 %v990_v11  ;;  %797 = vmatprep.subr.bf16.mxu1 %v992_v12 }
  0x57   : > { %757 = vmatpush1.bf16.msra.mxu0 %v989_v17  ;;  %798 = vmatpush1.bf16.msra.mxu1 %v991_v18 }
  0x58   : > { %758 = vmatprep.subr.bf16.mxu0 %v998_v19  ;;  %799 = vmatprep.subr.bf16.mxu1 %v1000_v20 }
  0x5b   : > { %759 = vmatpush1.bf16.msra.mxu0 %v997_v21  ;;  %800 = vmatpush1.bf16.msra.mxu1 %v999_v23 }
  0x5e   : > { %775 = vmatmul.mubr.bf16.vlgmr.msra.gmra.mrb[4].mxu0 %v1168_v22  ;;  %816 = vmatmul.mubr.bf16.vlgmr.msra.gmra.mrb[4].mxu1 %v1168_v22 }
  0x87   : > { %v288_v24 = vpop.permute.xlu0 %287 }
 0x10d   : > { %v694_v25 = vpop.f32.mrb[0].mxu0  ;;  %v735_v26 = vpop.f32.mrb[0].mxu1 }
 0x10e   : > { %v695_v27 = vadd.f32 %v694_v25, %v288_v24  ;;  %v696_v28 = vpop.f32.mrb[1].mxu0  ;;  %v736_v29 = vadd.f32 %v735_v26, %v288_v24  ;;  %v737_v0 = vpop.f32.mrb[1].mxu1 }
 0x10f   : > { %v697_v30 = vadd.f32 %v696_v28, %v288_v24  ;;  %v698_v31 = vpop.f32.mrb[2].mxu0  ;;  %v738_v22 = vadd.f32 %v737_v0, %v288_v24  ;;  %v739_v32 = vpop.f32.mrb[2].mxu1 }
 0x110   : > { %824 = vst [vmem:[%s1212_s27] sm:$0xff] %v695_v27  ;;  %v699_v33 = vpop.f32.mrb[3].mxu0  ;;  %826 = vst [vmem:[%s1212_s27 + $0x10] sm:$0xff] %v736_v29  ;;  %v740_v34 = vpop.f32.mrb[3].mxu1 }
 0x111   : > { %825 = vst [vmem:[%s1212_s27 + $0x8] sm:$0xff] %v697_v30  ;;  %827 = vst [vmem:[%s1212_s27 + $0x18] sm:$0xff] %v738_v22 }
 0x131   : > { %v776_v35 = vpop.f32.mrb[4].mxu0  ;;  %v817_v37 = vpop.f32.mrb[4].mxu1 }
 0x132   : > { %v777_v36 = vadd.f32 %v776_v35, %v288_v24  ;;  %v778_v38 = vpop.f32.mrb[5].mxu0  ;;  %v818_v39 = vadd.f32 %v817_v37, %v288_v24  ;;  %v819_v41 = vpop.f32.mrb[5].mxu1 }
 0x133   : > { %v779_v40 = vadd.f32 %v778_v38, %v288_v24  ;;  %v780_v42 = vpop.f32.mrb[6].mxu0  ;;  %v820_v43 = vadd.f32 %v819_v41, %v288_v24  ;;  %v821_v44 = vpop.f32.mrb[6].mxu1 }
 0x134   : > { %828 = vst [vmem:[%s1212_s27 + $0x20] sm:$0xff] %v777_v36  ;;  %v781_v45 = vpop.f32.mrb[7].mxu0  ;;  %830 = vst [vmem:[%s1212_s27 + $0x30] sm:$0xff] %v818_v39  ;;  %v822_v46 = vpop.f32.mrb[7].mxu1 }
 0x135   : > { %829 = vst [vmem:[%s1212_s27 + $0x28] sm:$0xff] %v779_v40  ;;  %831 = vst [vmem:[%s1212_s27 + $0x38] sm:$0xff] %v820_v43 }
 0x136 PF: > { %s13_s14 = sadd.s32 1, %s1059_s14   ;;  %s1235_s12 = smov %s1055_s13 }
 0x137   : > { %p10_p5 = scmp.ge.s32.totalorder %s13_s14, 4   ;;  %s1236_s13 = smov %s1238_s15 }
 0x139   :  { %12 = sbr.rel (!%p10_p5) target bundleno = 2 (0x2), region = 62 }

// kernel: resnet_generator.54
= control target key start
LH: loop header
LB: loop body
LE: loop exit
PB: predicated region body
PF: predicated region fallthrough
CT: control target
= control target key end

     0   :  { %s570_s15 = smov 0   ;;  %s704_s0 = inlined_call_operand.vmem [shape: f32[2,8,1024], index: 0, kind: input, shape index: {}]   ;;  %s705_s1 = inlined_call_operand.vmem [shape: f32[8,1], index: 1, kind: input, shape index: {}]   ;;  %s706_s2 = inlined_call_operand.vmem [shape: f32[2,8,1], index: 2, kind: input, shape index: {}]   ;;  %s707_s3 = inlined_call_operand.vmem [shape: f32[2,8,1], index: 3, kind: input, shape index: {}]   ;;  %s708_s4 = inlined_call_operand.vmem [shape: f32[2,8,1024], index: 4, kind: output, shape index: {}]  }
   0x1 LB: > { %s502_s16 = sadd.s32 4294967295, %s542_s15   ;;  %p506_p0 = scmp.ge.s32.totalorder %s542_s15, 1  ;;  %s542_s15 = sphi %s570_s15, %s14_s15  }
   0x2   : > { %p180_p1 = scmp.lt.s32.totalorder %s542_s15, 3 }
   0x4   : > { %p181_p2 = pnand %p506_p0, %p180_p1 }
   0x5   : > { %p214_p3 = scmp.lt.s32.totalorder (!%p181_p2), %s502_s16, 1  ;;  %v544_v15 = vmov (!%p181_p2), 0   ;;  %v343_v47 = vld [vmem:[%s705_s1] sm:$0xff] (!%p181_p2) }
   0x6   : > { %184 = sbr.rel (%p181_p2) target bundleno = 492 (0x1ec), region = 36  ;;  %530 = vset.pattern.permute.xlu1 (!%p181_p2), %v544_v15  ;;  %531 = vset.pattern.permute.xlu0 (!%p181_p2), %v544_v15 }
   0xd   : > { %s710_s16 = smov (!%p214_p3, %s502_s16), 1 }
   0xe   : > { %s515_s17 = sshll.u32 %s710_s16, 6  ;;  %s509_s23 = sshll.u32 %s710_s16, 3 }
   0xf   : > { %s218_s20 = scalar_lea.vmem %s704_s0, %s515_s17  ;;  %s222_s26 = scalar_lea.vmem %s706_s2, %s509_s23 }
  0x10   : > { %v586_v0 = vld [vmem:[%s218_s20] sm:$0xff]  ;;  %v588_v1 = vld [vmem:[%s218_s20 + $0x8] sm:$0xff]  ;;  %v590_v2 = vld [vmem:[%s218_s20 + $0x10] sm:$0xff]  ;;  %s226_s29 = scalar_lea.vmem %s707_s3, %s509_s23  ;;  %s231_s8 = scalar_lea.vmem %s708_s4, %s515_s17 }
  0x11   : > { %v240_v3 = vadd.f32 %v588_v1, %v586_v0  ;;  %v594_v4 = vld [vmem:[%s218_s20 + $0x18] sm:$0xff]  ;;  %v597_v6 = vld [vmem:[%s218_s20 + $0x20] sm:$0xff]  ;;  %v600_v8 = vld [vmem:[%s218_s20 + $0x28] sm:$0xff] }
  0x12   : > { %v603_v10 = vld [vmem:[%s218_s20 + $0x30] sm:$0xff]  ;;  %v606_v12 = vld [vmem:[%s218_s20 + $0x38] sm:$0xff]  ;;  %v379_v48 = vld [vmem:[%s222_s26] sm:$0xff] }
  0x13   : > { %v241_v5 = vadd.f32 %v240_v3, %v590_v2  ;;  %v393_v49 = vld [vmem:[%s226_s29] sm:$0xff] }
  0x15   : > { %v242_v7 = vadd.f32 %v241_v5, %v594_v4 }
  0x17   : > { %v243_v9 = vadd.f32 %v242_v7, %v597_v6 }
  0x19   : > { %v244_v11 = vadd.f32 %v243_v9, %v600_v8 }
  0x1b   : > { %v245_v13 = vadd.f32 %v244_v11, %v603_v10 }
  0x1d   : > { %v246_v14 = vadd.f32 %v245_v13, %v606_v12 }
  0x1f   : > { %247 = vadd.xlane.f32.xlu0 %v246_v14  ;;  %v357_v14 = vsub.f32 1.0, %v343_v47 }
  0xac   : > { %v248_v16 = vpop.xlane.xlu0 %247 }
  0xad   : > { %v250_v17 = vmul.f32 0.0009765625, %v248_v16  ;;  %v288_v18 = vrot.slane %v248_v16, 4 }
  0xaf   : > { %v289_v19 = vadd.f32 %v288_v18, %v248_v16  ;;  %v611_v20 = vsub.f32 %v586_v0, %v250_v17  ;;  %v614_v21 = vsub.f32 %v588_v1, %v250_v17  ;;  %v617_v22 = vsub.f32 %v590_v2, %v250_v17 }
  0xb0   : > { %v620_v24 = vsub.f32 %v594_v4, %v250_v17  ;;  %v627_v28 = vsub.f32 %v597_v6, %v250_v17  ;;  %v632_v32 = vsub.f32 %v600_v8, %v250_v17  ;;  %v637_v36 = vsub.f32 %v603_v10, %v250_v17 }
  0xb1   : > { %v290_v23 = vrot.slane %v289_v19, 2  ;;  %v259_v25 = vmul.f32 %v611_v20, %v611_v20  ;;  %v260_v26 = vmul.f32 %v614_v21, %v614_v21  ;;  %v261_v29 = vmul.f32 %v617_v22, %v617_v22 }
  0xb2   : > { %v262_v33 = vmul.f32 %v620_v24, %v620_v24  ;;  %v263_v37 = vmul.f32 %v627_v28, %v627_v28  ;;  %v642_v39 = vsub.f32 %v606_v12, %v250_v17  ;;  %v264_v40 = vmul.f32 %v632_v32, %v632_v32 }
  0xb3   : > { %v291_v27 = vadd.f32 %v290_v23, %v289_v19  ;;  %v267_v30 = vadd.f32 %v260_v26, %v259_v25  ;;  %v265_v42 = vmul.f32 %v637_v36, %v637_v36 }
  0xb4   : > { %v266_v44 = vmul.f32 %v642_v39, %v642_v39 }
  0xb5   : > { %v292_v31 = vrot.slane %v291_v27, 1  ;;  %v268_v34 = vadd.f32 %v267_v30, %v261_v29 }
  0xb7   : > { %v293_v35 = vadd.f32 %v292_v31, %v291_v27  ;;  %v269_v38 = vadd.f32 %v268_v34, %v262_v33 }
  0xb9   : > { %517 = vpush %v293_v35  ;;  %v270_v41 = vadd.f32 %v269_v38, %v263_v37 }
  0xbb   : > { %v271_v43 = vadd.f32 %v270_v41, %v264_v40 }
  0xbd   : > { %v272_v45 = vadd.f32 %v271_v43, %v265_v42 }
  0xbf   : > { %v273_v46 = vadd.f32 %v272_v45, %v266_v44 }
  0xc1   : > { %274 = vadd.xlane.f32.xlu1 %v273_v46 }
  0xd2   : > { %346 = vperm.xlu1 %530, %v343_v47  }
  0xd6   : > { %382 = vperm.xlu1 %530, %v379_v48  }
  0xda   : > { %396 = vperm.xlu1 %530, %v393_v49  }
  0xea   : > { %s518_s30 = spop %517 }
  0xeb   : > { %v295_v50 = vstv %s518_s30 }
  0xec   : > { %v297_v51 = vmul.f32 0.00012207031, %v295_v50 }
  0xee   : > { %v661_v52 = vsub.f32 %v586_v0, %v297_v51  ;;  %v664_v53 = vsub.f32 %v588_v1, %v297_v51  ;;  %v667_v54 = vsub.f32 %v590_v2, %v297_v51  ;;  %v670_v55 = vsub.f32 %v594_v4, %v297_v51 }
  0xef   : > { %v302_v58 = vsub.f32 %v597_v6, %v297_v51  ;;  %v303_v61 = vsub.f32 %v600_v8, %v297_v51  ;;  %v304_v0 = vsub.f32 %v603_v10, %v297_v51  ;;  %v305_v3 = vsub.f32 %v606_v12, %v297_v51 }
  0xf0   : > { %v306_v56 = vmul.f32 %v661_v52, %v661_v52  ;;  %v307_v57 = vmul.f32 %v664_v53, %v664_v53  ;;  %v308_v59 = vmul.f32 %v667_v54, %v667_v54  ;;  %v309_v62 = vmul.f32 %v670_v55, %v670_v55 }
  0xf1   : > { %v310_v1 = vmul.f32 %v302_v58, %v302_v58  ;;  %v311_v4 = vmul.f32 %v303_v61, %v303_v61  ;;  %v312_v7 = vmul.f32 %v304_v0, %v304_v0  ;;  %v313_v9 = vmul.f32 %v305_v3, %v305_v3 }
  0xf2   : > { %v314_v60 = vadd.f32 %v307_v57, %v306_v56 }
  0xf4   : > { %v315_v63 = vadd.f32 %v314_v60, %v308_v59 }
  0xf6   : > { %v316_v2 = vadd.f32 %v315_v63, %v309_v62 }
  0xf8   : > { %v317_v5 = vadd.f32 %v316_v2, %v310_v1 }
  0xfa   : > { %v318_v6 = vadd.f32 %v317_v5, %v311_v4 }
  0xfc   : > { %v319_v11 = vadd.f32 %v318_v6, %v312_v7 }
  0xfe   : > { %v320_v13 = vadd.f32 %v319_v11, %v313_v9 }
 0x100   : > { %321 = vadd.xlane.f32.xlu0 %v320_v13 }
 0x116   : > { %360 = vperm.xlu0 %531, %v357_v14  }
 0x14e   : > { %v275_v23 = vpop.xlane.xlu1 %274 }
 0x14f   : > { %v277_v12 = vmul.f32 0.0009775171, %v275_v23 }
 0x151   : > { %v278_v25 = vadd.f32 1e-05, %v277_v12 }
 0x152   : > { %v347_v37 = vpop.permute.xlu1 %346 }
 0x153   : > { %532 = vrsqrt.f32 %v278_v25 }
 0x156   : > { %v383_v50 = vpop.permute.xlu1 %382 }
 0x15a   : > { %v397_v13 = vpop.permute.xlu1 %396 }
 0x15d   : > { %v533_v30 = vpop.eup %532 }
 0x15e   : > { %v280_v31 = vmul.f32 %v533_v30, %v611_v20  ;;  %v281_v33 = vmul.f32 %v533_v30, %v614_v21  ;;  %v282_v34 = vmul.f32 %v533_v30, %v617_v22  ;;  %v283_v35 = vmul.f32 %v533_v30, %v620_v24 }
 0x15f   : > { %v284_v38 = vmul.f32 %v533_v30, %v627_v28  ;;  %v285_v40 = vmul.f32 %v533_v30, %v632_v32  ;;  %v286_v41 = vmul.f32 %v533_v30, %v637_v36  ;;  %v287_v42 = vmul.f32 %v533_v30, %v642_v39 }
 0x160   : > { %v349_v43 = vmul.f32 %v347_v37, %v280_v31  ;;  %v350_v44 = vmul.f32 %v347_v37, %v281_v33  ;;  %v351_v45 = vmul.f32 %v347_v37, %v282_v34  ;;  %v352_v46 = vmul.f32 %v347_v37, %v283_v35 }
 0x161   : > { %v353_v47 = vmul.f32 %v347_v37, %v284_v38  ;;  %v354_v21 = vmul.f32 %v347_v37, %v285_v40  ;;  %v355_v48 = vmul.f32 %v347_v37, %v286_v41  ;;  %v356_v22 = vmul.f32 %v347_v37, %v287_v42 }
 0x18d   : > { %v322_v8 = vpop.xlane.xlu0 %321 }
 0x18e   : > { %v323_v15 = vrot.slane %v322_v8, 4 }
 0x190   : > { %v324_v16 = vadd.f32 %v323_v15, %v322_v8 }
 0x192   : > { %v325_v17 = vrot.slane %v324_v16, 2 }
 0x194   : > { %v326_v18 = vadd.f32 %v325_v17, %v324_v16 }
 0x195   : > { %v361_v49 = vpop.permute.xlu0 %360 }
 0x196   : > { %v327_v10 = vrot.slane %v326_v18, 1 }
 0x198   : > { %v328_v19 = vadd.f32 %v327_v10, %v326_v18 }
 0x19a   : > { %519 = vpush %v328_v19 }
 0x1cb   : > { %s520_s5 = spop %519 }
 0x1cc   : > { %v330_v26 = vstv %s520_s5 }
 0x1cd   : > { %v332_v27 = vmul.f32 0.00012208521, %v330_v26 }
 0x1cf   : > { %v333_v29 = vadd.f32 1e-05, %v332_v27 }
 0x1d1   : > { %534 = vrsqrt.f32 %v333_v29 }
 0x1db   : > { %v535_v20 = vpop.eup %534 }
 0x1dc   : > { %v335_v24 = vmul.f32 %v535_v20, %v661_v52  ;;  %v336_v28 = vmul.f32 %v535_v20, %v664_v53  ;;  %v337_v32 = vmul.f32 %v535_v20, %v667_v54  ;;  %v338_v36 = vmul.f32 %v535_v20, %v670_v55 }
 0x1dd   : > { %v339_v39 = vmul.f32 %v535_v20, %v302_v58  ;;  %v340_v51 = vmul.f32 %v535_v20, %v303_v61  ;;  %v341_v56 = vmul.f32 %v535_v20, %v304_v0  ;;  %v342_v57 = vmul.f32 %v535_v20, %v305_v3 }
 0x1de   : > { %v363_v59 = vmul.f32 %v361_v49, %v335_v24  ;;  %v364_v60 = vmul.f32 %v361_v49, %v336_v28  ;;  %v365_v62 = vmul.f32 %v361_v49, %v337_v32  ;;  %v366_v63 = vmul.f32 %v361_v49, %v338_v36 }
 0x1df   : > { %v367_v1 = vmul.f32 %v361_v49, %v339_v39  ;;  %v368_v2 = vmul.f32 %v361_v49, %v340_v51  ;;  %v369_v4 = vmul.f32 %v361_v49, %v341_v56  ;;  %v370_v5 = vmul.f32 %v361_v49, %v342_v57 }
 0x1e0   : > { %v371_v52 = vadd.f32 %v363_v59, %v349_v43  ;;  %v372_v7 = vadd.f32 %v364_v60, %v350_v44  ;;  %v373_v53 = vadd.f32 %v365_v62, %v351_v45  ;;  %v374_v6 = vadd.f32 %v366_v63, %v352_v46 }
 0x1e1   : > { %v375_v54 = vadd.f32 %v367_v1, %v353_v47  ;;  %v376_v9 = vadd.f32 %v368_v2, %v354_v21  ;;  %v377_v55 = vadd.f32 %v369_v4, %v355_v48  ;;  %v378_v58 = vadd.f32 %v370_v5, %v356_v22 }
 0x1e2   : > { %v385_v61 = vmul.f32 %v383_v50, %v371_v52  ;;  %v386_v0 = vmul.f32 %v383_v50, %v372_v7  ;;  %v387_v3 = vmul.f32 %v383_v50, %v373_v53  ;;  %v388_v11 = vmul.f32 %v383_v50, %v374_v6 }
 0x1e3   : > { %v389_v14 = vmul.f32 %v383_v50, %v375_v54  ;;  %v390_v8 = vmul.f32 %v383_v50, %v376_v9  ;;  %v391_v15 = vmul.f32 %v383_v50, %v377_v55  ;;  %v392_v16 = vmul.f32 %v383_v50, %v378_v58 }
 0x1e4   : > { %v399_v17 = vadd.f32 %v397_v13, %v385_v61  ;;  %v400_v18 = vadd.f32 %v397_v13, %v386_v0  ;;  %v401_v10 = vadd.f32 %v397_v13, %v387_v3  ;;  %v402_v19 = vadd.f32 %v397_v13, %v388_v11 }
 0x1e5   : > { %v403_v23 = vadd.f32 %v397_v13, %v389_v14  ;;  %v404_v12 = vadd.f32 %v397_v13, %v390_v8  ;;  %v405_v25 = vadd.f32 %v397_v13, %v391_v15  ;;  %v406_v26 = vadd.f32 %v397_v13, %v392_v16 }
 0x1e6   : > { %v407_v27 = vmax.f32 %v399_v17, 0.0  ;;  %v408_v29 = vmax.f32 %v400_v18, 0.0  ;;  %v409_v30 = vmax.f32 %v401_v10, 0.0  ;;  %v410_v31 = vmax.f32 %v402_v19, 0.0 }
 0x1e7   : > { %v411_v33 = vmax.f32 %v403_v23, 0.0  ;;  %v412_v34 = vmax.f32 %v404_v12, 0.0  ;;  %v413_v35 = vmax.f32 %v405_v25, 0.0  ;;  %v414_v37 = vmax.f32 %v406_v26, 0.0 }
 0x1e8   : > { %415 = vst [vmem:[%s231_s8] sm:$0xff] %v407_v27  ;;  %416 = vst [vmem:[%s231_s8 + $0x8] sm:$0xff] %v408_v29 }
 0x1e9   : > { %417 = vst [vmem:[%s231_s8 + $0x10] sm:$0xff] %v409_v30  ;;  %418 = vst [vmem:[%s231_s8 + $0x18] sm:$0xff] %v410_v31 }
 0x1ea   : > { %419 = vst [vmem:[%s231_s8 + $0x20] sm:$0xff] %v411_v33  ;;  %420 = vst [vmem:[%s231_s8 + $0x28] sm:$0xff] %v412_v34 }
 0x1eb   : > { %421 = vst [vmem:[%s231_s8 + $0x30] sm:$0xff] %v413_v35  ;;  %422 = vst [vmem:[%s231_s8 + $0x38] sm:$0xff] %v414_v37 }
 0x1ec PF: > { %s14_s15 = sadd.s32 1, %s542_s15  }
 0x1ed   : > { %p11_p4 = scmp.ge.s32.totalorder %s14_s15, 4  }
 0x1ef   :  { %13 = sbr.rel (!%p11_p4) target bundleno = 1 (0x1), region = 72 }

// kernel: resnet_generator.55
= control target key start
LH: loop header
LB: loop body
LE: loop exit
PB: predicated region body
PF: predicated region fallthrough
CT: control target
= control target key end

     0   :  { %s2229_s12 = smov 0   ;;  %s2231_s13 = smov 0   ;;  %s2519_s0 = inlined_call_operand.vmem [shape: bf16[3,392], index: 0, kind: input, shape index: {}]   ;;  %s2520_s1 = inlined_call_operand.vmem [shape: bf16[2,392,1024], index: 1, kind: input, shape index: {}]   ;;  %s2521_s2 = inlined_call_operand.vmem [shape: f32[3,1], index: 2, kind: input, shape index: {}]   ;;  %s2522_s3 = inlined_call_operand.vmem [shape: f32[2,3,1024], index: 3, kind: output, shape index: {}]  }
   0x1   :  { %s2233_s14 = smov 0  }
   0x2 LB: > { %s25_s15 = sadd.s32 1, %s2201_s13  ;;  %p1891_p0 = scmp.ge.s32.totalorder %s2205_s14, 1  ;;  %s2205_s14 = sphi %s2233_s14, %s13_s14   ;;  %s2201_s13 = sphi %s2231_s13, %s2524_s13   ;;  %s2197_s12 = sphi %s2229_s12, %s2523_s12  }
   0x3   : > { %p27_p1 = scmp.ge.s32.totalorder %s25_s15, 2  ;;  %p158_p2 = scmp.lt.s32.totalorder %s2205_s14, 3 }
   0x5   : > { %s2526_s15 = smov (%p27_p1, %s25_s15), 0  ;;  %p159_p3 = pnand %p1891_p0, %p158_p2 }
   0x6   : > { %p191_p4 = scmp.lt.s32.totalorder (!%p159_p3), %s2197_s12, 1  ;;  %v419_v0 = vlaneseq (!%p159_p3)  ;;  %v2207_v1 = vmov (!%p159_p3), 1983009808   ;;  %v2253_v5 = vld [vmem:[%s2519_s0] sm:$0xff] (!%p159_p3)  ;;  %vm1415_vm0 = vcmask (!%p159_p3), 64512   ;;  %vm1419_vm1 = vcmask (!%p159_p3), 1043456  }
   0x7   : > { %162 = sbr.rel (%p159_p3) target bundleno = 453 (0x1c5), region = 32  ;;  %v417_v2 = vunpack.c.l.s4 (!%p159_p3), %v2207_v1 }
   0x8   : > { %v420_v3 = vshrl.u32 (!%p159_p3), %v419_v0, 7 }
   0x9   : > { %v418_v4 = vunpack.c.0.s8 (!%p159_p3), %v417_v2 }
   0xb   : > { %v2255_v6 = vsub.s32 (!%p159_p3), %v418_v4, %v420_v3 }
   0xd   : > { %v2267_v10 = vrot.slane (!%p159_p3), %v2253_v5, %v2255_v6 }
   0xe   : > { %s2528_s12 = smov (!%p191_p4, %s2197_s12), 1 }
   0xf   : > { %s2130_s16 = smul.u32 1568, %s2528_s12  ;;  %v2280_v26 = vcombine.high %v2267_v10, %v2267_v10  ;;  %s2105_s24 = sshll.u32 %s2528_s12, 5 }
  0x10   : > { %s208_s27 = scalar_lea.vmem %s2522_s3, %s2105_s24 }
  0x11   : > { %s2260_s21 = scalar_lea.vmem %s2520_s1, %s2130_s16  ;;  %1476 = vmatprep.mubr.bf16.mxu0 %v2280_v26  ;;  %1558 = vmatprep.mubr.bf16.mxu1 %v2280_v26 }
  0x12   : > { %v212_v7 = vld [vmem:[%s2260_s21] sm:$0xff]  ;;  %v213_v9 = vld [vmem:[%s2260_s21 + $0x8] sm:$0xff] }
  0x13   : > { %v216_v8 = vld [vmem:[%s2260_s21 + $0x20] sm:$0xff]  ;;  %v217_v12 = vld [vmem:[%s2260_s21 + $0x28] sm:$0xff] }
  0x14   : > { %v1896_v11 = vcombine.high %v212_v7, %v216_v8  ;;  %v1895_v13 = vcombine.low %v212_v7, %v216_v8  ;;  %v220_v14 = vld [vmem:[%s2260_s21 + $0x40] sm:$0xff]  ;;  %v1898_v16 = vcombine.high %v213_v9, %v217_v12  ;;  %v1897_v17 = vcombine.low %v213_v9, %v217_v12  ;;  %v221_v19 = vld [vmem:[%s2260_s21 + $0x48] sm:$0xff] }
  0x15   : > { %v224_v15 = vld [vmem:[%s2260_s21 + $0x60] sm:$0xff]  ;;  %v225_v20 = vld [vmem:[%s2260_s21 + $0x68] sm:$0xff] }
  0x16   : > { %v1904_v18 = vcombine.high %v220_v14, %v224_v15  ;;  %v228_v21 = vld [vmem:[%s2260_s21 + $0x80] sm:$0xff]  ;;  %1444 = vmatprep.subr.bf16.mxu0 %v1896_v11  ;;  %v1906_v22 = vcombine.high %v221_v19, %v225_v20  ;;  %v229_v24 = vld [vmem:[%s2260_s21 + $0x88] sm:$0xff]  ;;  %1526 = vmatprep.subr.bf16.mxu1 %v1898_v16  ;;  %v1903_v27 = vcombine.low %v220_v14, %v224_v15 }
  0x17   : > { %v232_v23 = vld [vmem:[%s2260_s21 + $0xa0] sm:$0xff]  ;;  %v233_v25 = vld [vmem:[%s2260_s21 + $0xa8] sm:$0xff]  ;;  %1445 = vmatpush1.bf16.msra.mxu0 %v1895_v13  ;;  %1527 = vmatpush1.bf16.msra.mxu1 %v1897_v17  ;;  %v1905_v28 = vcombine.low %v221_v19, %v225_v20 }
  0x18   : > { %1446 = vmatprep.subr.bf16.mxu0 %v1904_v18  ;;  %v1912_v29 = vcombine.high %v228_v21, %v232_v23  ;;  %1528 = vmatprep.subr.bf16.mxu1 %v1906_v22  ;;  %v1914_v30 = vcombine.high %v229_v24, %v233_v25  ;;  %v236_v31 = vld [vmem:[%s2260_s21 + $0xc0] sm:$0xff]  ;;  %v237_v33 = vld [vmem:[%s2260_s21 + $0xc8] sm:$0xff]  ;;  %v1911_v35 = vcombine.low %v228_v21, %v232_v23 }
  0x19   : > { %v240_v32 = vld [vmem:[%s2260_s21 + $0xe0] sm:$0xff]  ;;  %v241_v34 = vld [vmem:[%s2260_s21 + $0xe8] sm:$0xff]  ;;  %v1913_v36 = vcombine.low %v229_v24, %v233_v25 }
  0x1a   : > { %v1920_v37 = vcombine.high %v236_v31, %v240_v32  ;;  %v1922_v38 = vcombine.high %v237_v33, %v241_v34  ;;  %v244_v39 = vld [vmem:[%s2260_s21 + $0x100] sm:$0xff]  ;;  %v245_v41 = vld [vmem:[%s2260_s21 + $0x108] sm:$0xff]  ;;  %v1919_v43 = vcombine.low %v236_v31, %v240_v32  ;;  %v1921_v44 = vcombine.low %v237_v33, %v241_v34 }
  0x1b   : > { %1447 = vmatpush1.bf16.msra.mxu0 %v1903_v27  ;;  %1529 = vmatpush1.bf16.msra.mxu1 %v1905_v28  ;;  %v248_v40 = vld [vmem:[%s2260_s21 + $0x120] sm:$0xff]  ;;  %v249_v42 = vld [vmem:[%s2260_s21 + $0x128] sm:$0xff] }
  0x1c   : > { %1448 = vmatprep.subr.bf16.mxu0 %v1912_v29  ;;  %1530 = vmatprep.subr.bf16.mxu1 %v1914_v30  ;;  %v1928_v45 = vcombine.high %v244_v39, %v248_v40  ;;  %v1930_v46 = vcombine.high %v245_v41, %v249_v42  ;;  %v252_v47 = vld [vmem:[%s2260_s21 + $0x140] sm:$0xff]  ;;  %v253_v49 = vld [vmem:[%s2260_s21 + $0x148] sm:$0xff]  ;;  %v1927_v51 = vcombine.low %v244_v39, %v248_v40 }
  0x1d   : > { %v256_v48 = vld [vmem:[%s2260_s21 + $0x160] sm:$0xff]  ;;  %v257_v50 = vld [vmem:[%s2260_s21 + $0x168] sm:$0xff]  ;;  %v1929_v52 = vcombine.low %v245_v41, %v249_v42 }
  0x1e   : > { %v1936_v53 = vcombine.high %v252_v47, %v256_v48  ;;  %v1938_v54 = vcombine.high %v253_v49, %v257_v50  ;;  %v260_v55 = vld [vmem:[%s2260_s21 + $0x180] sm:$0xff]  ;;  %v261_v57 = vld [vmem:[%s2260_s21 + $0x188] sm:$0xff]  ;;  %v1935_v59 = vcombine.low %v252_v47, %v256_v48  ;;  %v1937_v60 = vcombine.low %v253_v49, %v257_v50 }
  0x1f   : > { %1449 = vmatpush1.bf16.msra.mxu0 %v1911_v35  ;;  %1531 = vmatpush1.bf16.msra.mxu1 %v1913_v36  ;;  %v264_v56 = vld [vmem:[%s2260_s21 + $0x1a0] sm:$0xff]  ;;  %v265_v58 = vld [vmem:[%s2260_s21 + $0x1a8] sm:$0xff] }
  0x20   : > { %1450 = vmatprep.subr.bf16.mxu0 %v1920_v37  ;;  %1532 = vmatprep.subr.bf16.mxu1 %v1922_v38  ;;  %v1944_v61 = vcombine.high %v260_v55, %v264_v56  ;;  %v1946_v62 = vcombine.high %v261_v57, %v265_v58  ;;  %v268_v63 = vld [vmem:[%s2260_s21 + $0x1c0] sm:$0xff]  ;;  %v269_v1 = vld [vmem:[%s2260_s21 + $0x1c8] sm:$0xff]  ;;  %v1943_v3 = vcombine.low %v260_v55, %v264_v56 }
  0x21   : > { %v272_v0 = vld [vmem:[%s2260_s21 + $0x1e0] sm:$0xff]  ;;  %v273_v2 = vld [vmem:[%s2260_s21 + $0x1e8] sm:$0xff]  ;;  %v1945_v4 = vcombine.low %v261_v57, %v265_v58 }
  0x22   : > { %v1952_v7 = vcombine.high %v268_v63, %v272_v0  ;;  %v1954_v8 = vcombine.high %v269_v1, %v273_v2  ;;  %v276_v9 = vld [vmem:[%s2260_s21 + $0x200] sm:$0xff]  ;;  %v277_v12 = vld [vmem:[%s2260_s21 + $0x208] sm:$0xff]  ;;  %v1951_v14 = vcombine.low %v268_v63, %v272_v0  ;;  %v1953_v15 = vcombine.low %v269_v1, %v273_v2 }
  0x23   : > { %1451 = vmatpush1.bf16.msra.mxu0 %v1919_v43  ;;  %1533 = vmatpush1.bf16.msra.mxu1 %v1921_v44  ;;  %v280_v11 = vld [vmem:[%s2260_s21 + $0x220] sm:$0xff]  ;;  %v281_v13 = vld [vmem:[%s2260_s21 + $0x228] sm:$0xff] }
  0x24   : > { %1452 = vmatprep.subr.bf16.mxu0 %v1928_v45  ;;  %1534 = vmatprep.subr.bf16.mxu1 %v1930_v46  ;;  %v1960_v16 = vcombine.high %v276_v9, %v280_v11  ;;  %v1962_v17 = vcombine.high %v277_v12, %v281_v13  ;;  %v284_v18 = vld [vmem:[%s2260_s21 + $0x240] sm:$0xff]  ;;  %v285_v20 = vld [vmem:[%s2260_s21 + $0x248] sm:$0xff]  ;;  %v1959_v22 = vcombine.low %v276_v9, %v280_v11 }
  0x25   : > { %v288_v19 = vld [vmem:[%s2260_s21 + $0x260] sm:$0xff]  ;;  %v289_v21 = vld [vmem:[%s2260_s21 + $0x268] sm:$0xff]  ;;  %v1961_v23 = vcombine.low %v277_v12, %v281_v13 }
  0x26   : > { %v1968_v24 = vcombine.high %v284_v18, %v288_v19  ;;  %v1970_v25 = vcombine.high %v285_v20, %v289_v21  ;;  %v292_v27 = vld [vmem:[%s2260_s21 + $0x280] sm:$0xff]  ;;  %v293_v29 = vld [vmem:[%s2260_s21 + $0x288] sm:$0xff]  ;;  %v1967_v31 = vcombine.low %v284_v18, %v288_v19  ;;  %v1969_v32 = vcombine.low %v285_v20, %v289_v21 }
  0x27   : > { %1453 = vmatpush1.bf16.msra.mxu0 %v1927_v51  ;;  %1535 = vmatpush1.bf16.msra.mxu1 %v1929_v52  ;;  %v296_v28 = vld [vmem:[%s2260_s21 + $0x2a0] sm:$0xff]  ;;  %v297_v30 = vld [vmem:[%s2260_s21 + $0x2a8] sm:$0xff]  ;;  %v2208_v19 = vmov 0  }
  0x28   : > { %1454 = vmatprep.subr.bf16.mxu0 %v1936_v53  ;;  %1536 = vmatprep.subr.bf16.mxu1 %v1938_v54  ;;  %v1976_v33 = vcombine.high %v292_v27, %v296_v28  ;;  %v1978_v34 = vcombine.high %v293_v29, %v297_v30  ;;  %v300_v35 = vld [vmem:[%s2260_s21 + $0x2c0] sm:$0xff]  ;;  %v301_v37 = vld [vmem:[%s2260_s21 + $0x2c8] sm:$0xff]  ;;  %v1975_v39 = vcombine.low %v292_v27, %v296_v28 }
  0x29   : > { %v304_v36 = vld [vmem:[%s2260_s21 + $0x2e0] sm:$0xff]  ;;  %v305_v38 = vld [vmem:[%s2260_s21 + $0x2e8] sm:$0xff]  ;;  %v1977_v40 = vcombine.low %v293_v29, %v297_v30  ;;  %2157 = vset.pattern.permute.xlu0 %v2208_v19 }
  0x2a   : > { %v1984_v41 = vcombine.high %v300_v35, %v304_v36  ;;  %v1986_v42 = vcombine.high %v301_v37, %v305_v38  ;;  %v308_v43 = vld [vmem:[%s2260_s21 + $0x300] sm:$0xff]  ;;  %v309_v45 = vld [vmem:[%s2260_s21 + $0x308] sm:$0xff]  ;;  %v1983_v47 = vcombine.low %v300_v35, %v304_v36  ;;  %v1985_v48 = vcombine.low %v301_v37, %v305_v38 }
  0x2b   : > { %1455 = vmatpush1.bf16.msra.mxu0 %v1935_v59  ;;  %1537 = vmatpush1.bf16.msra.mxu1 %v1937_v60  ;;  %v312_v44 = vld [vmem:[%s2260_s21 + $0x320] sm:$0xff]  ;;  %v313_v46 = vld [vmem:[%s2260_s21 + $0x328] sm:$0xff] }
  0x2c   : > { %1456 = vmatprep.subr.bf16.mxu0 %v1944_v61  ;;  %1538 = vmatprep.subr.bf16.mxu1 %v1946_v62  ;;  %v1992_v49 = vcombine.high %v308_v43, %v312_v44  ;;  %v1994_v50 = vcombine.high %v309_v45, %v313_v46  ;;  %v316_v51 = vld [vmem:[%s2260_s21 + $0x340] sm:$0xff]  ;;  %v317_v53 = vld [vmem:[%s2260_s21 + $0x348] sm:$0xff]  ;;  %v1991_v55 = vcombine.low %v308_v43, %v312_v44 }
  0x2d   : > { %v320_v52 = vld [vmem:[%s2260_s21 + $0x360] sm:$0xff]  ;;  %v321_v54 = vld [vmem:[%s2260_s21 + $0x368] sm:$0xff]  ;;  %v1993_v56 = vcombine.low %v309_v45, %v313_v46 }
  0x2e   : > { %v2000_v57 = vcombine.high %v316_v51, %v320_v52  ;;  %v2002_v58 = vcombine.high %v317_v53, %v321_v54  ;;  %v324_v59 = vld [vmem:[%s2260_s21 + $0x380] sm:$0xff]  ;;  %v325_v61 = vld [vmem:[%s2260_s21 + $0x388] sm:$0xff]  ;;  %v1999_v63 = vcombine.low %v316_v51, %v320_v52  ;;  %v2001_v0 = vcombine.low %v317_v53, %v321_v54 }
  0x2f   : > { %1457 = vmatpush1.bf16.msra.mxu0 %v1943_v3  ;;  %1539 = vmatpush1.bf16.msra.mxu1 %v1945_v4  ;;  %v328_v60 = vld [vmem:[%s2260_s21 + $0x3a0] sm:$0xff]  ;;  %v329_v62 = vld [vmem:[%s2260_s21 + $0x3a8] sm:$0xff] }
  0x30   : > { %1458 = vmatprep.subr.bf16.mxu0 %v1952_v7  ;;  %1540 = vmatprep.subr.bf16.mxu1 %v1954_v8  ;;  %v2008_v1 = vcombine.high %v324_v59, %v328_v60  ;;  %v2010_v2 = vcombine.high %v325_v61, %v329_v62  ;;  %v332_v3 = vld [vmem:[%s2260_s21 + $0x3c0] sm:$0xff]  ;;  %v333_v7 = vld [vmem:[%s2260_s21 + $0x3c8] sm:$0xff]  ;;  %v2007_v9 = vcombine.low %v324_v59, %v328_v60 }
  0x31   : > { %v336_v4 = vld [vmem:[%s2260_s21 + $0x3e0] sm:$0xff]  ;;  %v337_v8 = vld [vmem:[%s2260_s21 + $0x3e8] sm:$0xff]  ;;  %v2009_v11 = vcombine.low %v325_v61, %v329_v62 }
  0x32   : > { %v2016_v12 = vcombine.high %v332_v3, %v336_v4  ;;  %v2018_v13 = vcombine.high %v333_v7, %v337_v8  ;;  %v345_v18 = vld [vmem:[%s2260_s21 + $0x428] sm:$0xff]  ;;  %v2015_v20 = vcombine.low %v332_v3, %v336_v4  ;;  %v408_v21 = vld [vmem:[%s2521_s2] sm:$0x7] }
  0x33   : > { %1459 = vmatpush1.bf16.msra.mxu0 %v1951_v14  ;;  %1541 = vmatpush1.bf16.msra.mxu1 %v1953_v15  ;;  %v340_v14 = vld [vmem:[%s2260_s21 + $0x400] sm:$0xff]  ;;  %v349_v28 = vld [vmem:[%s2260_s21 + $0x448] sm:$0xff] }
  0x34   : > { %1460 = vmatprep.subr.bf16.mxu0 %v1960_v16  ;;  %1542 = vmatprep.subr.bf16.mxu1 %v1962_v17  ;;  %v344_v15 = vld [vmem:[%s2260_s21 + $0x420] sm:$0xff]  ;;  %v415_v16 = vcombine.high %v2253_v5, %v2253_v5  ;;  %v341_v17 = vld [vmem:[%s2260_s21 + $0x408] sm:$0xff] }
  0x35   : > { %v348_v5 = vld [vmem:[%s2260_s21 + $0x440] sm:$0xff]  ;;  %411 = vperm.xlu0 %2157, %v408_v21   ;;  %v353_v29 = vld [vmem:[%s2260_s21 + $0x468] sm:$0xff]  ;;  %v2023_v30 = vcombine.low %v340_v14, %v344_v15 }
  0x36   : > { %v2348_v27 = vrot.slane %v415_v16, %v2255_v6  ;;  %v360_v35 = vld [vmem:[%s2260_s21 + $0x4a0] sm:$0xff]  ;;  %v357_v36 = vld [vmem:[%s2260_s21 + $0x488] sm:$0xff] }
  0x37   : > { %1461 = vmatpush1.bf16.msra.mxu0 %v1959_v22  ;;  %1543 = vmatpush1.bf16.msra.mxu1 %v1961_v23  ;;  %v2017_v22 = vcombine.low %v333_v7, %v337_v8  ;;  %v2024_v23 = vcombine.high %v340_v14, %v344_v15  ;;  %v361_v37 = vld [vmem:[%s2260_s21 + $0x4a8] sm:$0xff]  ;;  %v368_v43 = vld [vmem:[%s2260_s21 + $0x4e0] sm:$0xff] }
  0x38   : > { %1462 = vmatprep.subr.bf16.mxu0 %v1968_v24  ;;  %1544 = vmatprep.subr.bf16.mxu1 %v1970_v25  ;;  %v2026_v24 = vcombine.high %v341_v17, %v345_v18  ;;  %v352_v25 = vld [vmem:[%s2260_s21 + $0x460] sm:$0xff]  ;;  %v2356_v6 = vcombine.high %v2348_v27, %v2348_v27  ;;  %v365_v44 = vld [vmem:[%s2260_s21 + $0x4c8] sm:$0xff] }
  0x39   : > { %v2031_v38 = vcombine.low %v348_v5, %v352_v25  ;;  %v369_v45 = vld [vmem:[%s2260_s21 + $0x4e8] sm:$0xff]  ;;  %v376_v51 = vld [vmem:[%s2260_s21 + $0x520] sm:$0xff] }
  0x3a   : > { %v373_v52 = vld [vmem:[%s2260_s21 + $0x508] sm:$0xff]  ;;  %v384_v59 = vld [vmem:[%s2260_s21 + $0x560] sm:$0xff] }
  0x3b   : > { %1463 = vmatpush1.bf16.msra.mxu0 %v1967_v31  ;;  %1545 = vmatpush1.bf16.msra.mxu1 %v1969_v32  ;;  %v2025_v31 = vcombine.low %v341_v17, %v345_v18  ;;  %v2032_v32 = vcombine.high %v348_v5, %v352_v25  ;;  %v377_v53 = vld [vmem:[%s2260_s21 + $0x528] sm:$0xff]  ;;  %v392_v3 = vld [vmem:[%s2260_s21 + $0x5a0] sm:$0xff] }
  0x3c   : > { %1464 = vmatprep.subr.bf16.mxu0 %v1976_v33  ;;  %1546 = vmatprep.subr.bf16.mxu1 %v1978_v34  ;;  %v2034_v33 = vcombine.high %v349_v28, %v353_v29  ;;  %v356_v34 = vld [vmem:[%s2260_s21 + $0x480] sm:$0xff]  ;;  %v381_v60 = vld [vmem:[%s2260_s21 + $0x548] sm:$0xff] }
  0x3d   : > { %v2039_v46 = vcombine.low %v356_v34, %v360_v35  ;;  %v385_v61 = vld [vmem:[%s2260_s21 + $0x568] sm:$0xff]  ;;  %v400_v14 = vld [vmem:[%s2260_s21 + $0x5e0] sm:$0xff] }
  0x3e   : > { %v389_v4 = vld [vmem:[%s2260_s21 + $0x588] sm:$0xff]  ;;  %v404_v21 = vld [vmem:[%s2260_s21 + $0x600] sm:$0xff] }
  0x3f   : > { %1465 = vmatpush1.bf16.msra.mxu0 %v1975_v39  ;;  %1547 = vmatpush1.bf16.msra.mxu1 %v1977_v40  ;;  %v2033_v39 = vcombine.low %v349_v28, %v353_v29  ;;  %v2040_v40 = vcombine.high %v356_v34, %v360_v35  ;;  %v393_v7 = vld [vmem:[%s2260_s21 + $0x5a8] sm:$0xff]  ;;  %v2088_v5 = vcombine.high %v404_v21, %v404_v21 }
  0x40   : > { %1466 = vmatprep.subr.bf16.mxu0 %v1984_v41  ;;  %1548 = vmatprep.subr.bf16.mxu1 %v1986_v42  ;;  %v2042_v41 = vcombine.high %v357_v36, %v361_v37  ;;  %v364_v42 = vld [vmem:[%s2260_s21 + $0x4c0] sm:$0xff]  ;;  %v397_v15 = vld [vmem:[%s2260_s21 + $0x5c8] sm:$0xff]  ;;  %v2073_v18 = vcombine.low %v389_v4, %v393_v7  ;;  %v2087_v25 = vcombine.low %v404_v21, %v404_v21 }
  0x41   : > { %v2047_v54 = vcombine.low %v364_v42, %v368_v43  ;;  %v401_v16 = vld [vmem:[%s2260_s21 + $0x5e8] sm:$0xff] }
  0x42   : > { %v1421_v34 = vsel %vm1419_vm1, %v2087_v25, 0  ;;  %v271_v25 = vld [vmem:[%s2260_s21 + $0x1d8] sm:$0xff] }
  0x43   : > { %1467 = vmatpush1.bf16.msra.mxu0 %v1983_v47  ;;  %1549 = vmatpush1.bf16.msra.mxu1 %v1985_v48  ;;  %v2041_v47 = vcombine.low %v357_v36, %v361_v37  ;;  %v2048_v48 = vcombine.high %v364_v42, %v368_v43 }
  0x44   : > { %1468 = vmatprep.subr.bf16.mxu0 %v1992_v49  ;;  %1550 = vmatprep.subr.bf16.mxu1 %v1994_v50  ;;  %v2050_v49 = vcombine.high %v365_v44, %v369_v45  ;;  %v372_v50 = vld [vmem:[%s2260_s21 + $0x500] sm:$0xff] }
  0x45   : > { %v2055_v62 = vcombine.low %v372_v50, %v376_v51 }
  0x47   : > { %1469 = vmatpush1.bf16.msra.mxu0 %v1991_v55  ;;  %1551 = vmatpush1.bf16.msra.mxu1 %v1993_v56  ;;  %v2049_v55 = vcombine.low %v365_v44, %v369_v45  ;;  %v2056_v56 = vcombine.high %v372_v50, %v376_v51 }
  0x48   : > { %1470 = vmatprep.subr.bf16.mxu0 %v2000_v57  ;;  %1552 = vmatprep.subr.bf16.mxu1 %v2002_v58  ;;  %v2058_v57 = vcombine.high %v373_v52, %v377_v53  ;;  %v380_v58 = vld [vmem:[%s2260_s21 + $0x540] sm:$0xff] }
  0x49   : > { %v2063_v8 = vcombine.low %v380_v58, %v384_v59 }
  0x4b   : > { %1471 = vmatpush1.bf16.msra.mxu0 %v1999_v63  ;;  %1553 = vmatpush1.bf16.msra.mxu1 %v2001_v0  ;;  %v2057_v63 = vcombine.low %v373_v52, %v377_v53  ;;  %v2064_v0 = vcombine.high %v380_v58, %v384_v59 }
  0x4c   : > { %1472 = vmatprep.subr.bf16.mxu0 %v2008_v1  ;;  %1554 = vmatprep.subr.bf16.mxu1 %v2010_v2  ;;  %v2066_v1 = vcombine.high %v381_v60, %v385_v61  ;;  %v388_v2 = vld [vmem:[%s2260_s21 + $0x580] sm:$0xff] }
  0x4d   : > { %v2071_v17 = vcombine.low %v388_v2, %v392_v3 }
  0x4f   : > { %1473 = vmatpush1.bf16.msra.mxu0 %v2007_v9  ;;  %1555 = vmatpush1.bf16.msra.mxu1 %v2009_v11  ;;  %v2065_v9 = vcombine.low %v381_v60, %v385_v61  ;;  %v2072_v11 = vcombine.high %v388_v2, %v392_v3 }
  0x50   : > { %1474 = vmatprep.subr.bf16.mxu0 %v2016_v12  ;;  %1556 = vmatprep.subr.bf16.mxu1 %v2018_v13  ;;  %v2074_v12 = vcombine.high %v389_v4, %v393_v7  ;;  %v396_v13 = vld [vmem:[%s2260_s21 + $0x5c0] sm:$0xff]  ;;  %v254_v7 = vld [vmem:[%s2260_s21 + $0x150] sm:$0xff] }
  0x51   : > { %v2080_v19 = vcombine.high %v396_v13, %v400_v14 }
  0x53   : > { %1475 = vmatpush1.bf16.msra.mxu0 %v2015_v20  ;;  %1557 = vmatpush1.bf16.msra.mxu1 %v2017_v22  ;;  %v2082_v20 = vcombine.high %v397_v15, %v401_v16  ;;  %v405_v22 = vld [vmem:[%s2260_s21 + $0x608] sm:$0xff] }
  0x54   : > { %1485 = vmatprep.subr.bf16.mxu0 %v2024_v23  ;;  %1567 = vmatprep.subr.bf16.mxu1 %v2026_v24  ;;  %v2079_v23 = vcombine.low %v396_v13, %v400_v14  ;;  %v2081_v24 = vcombine.low %v397_v15, %v401_v16  ;;  %v2090_v28 = vcombine.high %v405_v22, %v405_v22  ;;  %v262_v16 = vld [vmem:[%s2260_s21 + $0x190] sm:$0xff] }
  0x55   : > { %v2089_v29 = vcombine.low %v405_v22, %v405_v22 }
  0x56   : > { %1477 = vmatmul.mubr.bf16.vlgmr.msra.gmra.mrb[0].mxu0 %v2267_v10  ;;  %1559 = vmatmul.mubr.bf16.vlgmr.msra.gmra.mrb[0].mxu1 %v2267_v10 }
  0x57   : > { %1486 = vmatpush1.bf16.msra.mxu0 %v2023_v30  ;;  %1568 = vmatpush1.bf16.msra.mxu1 %v2025_v31  ;;  %v214_v30 = vld [vmem:[%s2260_s21 + $0x10] sm:$0xff]  ;;  %v1427_v36 = vsel %vm1419_vm1, %v2089_v29, 0 }
  0x58   : > { %1487 = vmatprep.subr.bf16.mxu0 %v2032_v32  ;;  %1569 = vmatprep.subr.bf16.mxu1 %v2034_v33  ;;  %v218_v31 = vld [vmem:[%s2260_s21 + $0x30] sm:$0xff]  ;;  %v215_v32 = vld [vmem:[%s2260_s21 + $0x18] sm:$0xff] }
  0x59   : > { %2096 = vmatprep.mubr.msk.bf16.mxu0 %vm1415_vm0, %v2356_v6  ;;  %2098 = vmatprep.mubr.msk.bf16.mxu1 %vm1415_vm0, %v2356_v6  ;;  %v219_v33 = vld [vmem:[%s2260_s21 + $0x38] sm:$0xff]  ;;  %v1900_v35 = vcombine.high %v214_v30, %v218_v31  ;;  %v1899_v42 = vcombine.low %v214_v30, %v218_v31 }
  0x5a   : > { %v1902_v37 = vcombine.high %v215_v32, %v219_v33  ;;  %v1901_v43 = vcombine.low %v215_v32, %v219_v33  ;;  %v278_v33 = vld [vmem:[%s2260_s21 + $0x210] sm:$0xff] }
  0x5b   : > { %1488 = vmatpush1.bf16.msra.mxu0 %v2031_v38  ;;  %1570 = vmatpush1.bf16.msra.mxu1 %v2033_v39  ;;  %v222_v38 = vld [vmem:[%s2260_s21 + $0x50] sm:$0xff] }
  0x5c   : > { %1489 = vmatprep.subr.bf16.mxu0 %v2040_v40  ;;  %1571 = vmatprep.subr.bf16.mxu1 %v2042_v41  ;;  %v226_v39 = vld [vmem:[%s2260_s21 + $0x70] sm:$0xff]  ;;  %v223_v40 = vld [vmem:[%s2260_s21 + $0x58] sm:$0xff] }
  0x5d   : > { %v227_v41 = vld [vmem:[%s2260_s21 + $0x78] sm:$0xff]  ;;  %v1908_v44 = vcombine.high %v222_v38, %v226_v39  ;;  %v1907_v50 = vcombine.low %v222_v38, %v226_v39 }
  0x5e   : > { %v1910_v45 = vcombine.high %v223_v40, %v227_v41  ;;  %v1909_v51 = vcombine.low %v223_v40, %v227_v41  ;;  %v286_v41 = vld [vmem:[%s2260_s21 + $0x250] sm:$0xff] }
  0x5f   : > { %1490 = vmatpush1.bf16.msra.mxu0 %v2039_v46  ;;  %1572 = vmatpush1.bf16.msra.mxu1 %v2041_v47  ;;  %v230_v46 = vld [vmem:[%s2260_s21 + $0x90] sm:$0xff] }
  0x60   : > { %1491 = vmatprep.subr.bf16.mxu0 %v2048_v48  ;;  %1573 = vmatprep.subr.bf16.mxu1 %v2050_v49  ;;  %v234_v47 = vld [vmem:[%s2260_s21 + $0xb0] sm:$0xff]  ;;  %v231_v48 = vld [vmem:[%s2260_s21 + $0x98] sm:$0xff] }
  0x61   : > { %v235_v49 = vld [vmem:[%s2260_s21 + $0xb8] sm:$0xff]  ;;  %v1916_v52 = vcombine.high %v230_v46, %v234_v47  ;;  %v1915_v58 = vcombine.low %v230_v46, %v234_v47 }
  0x62   : > { %v1918_v53 = vcombine.high %v231_v48, %v235_v49  ;;  %v1917_v59 = vcombine.low %v231_v48, %v235_v49  ;;  %v294_v49 = vld [vmem:[%s2260_s21 + $0x290] sm:$0xff] }
  0x63   : > { %1492 = vmatpush1.bf16.msra.mxu0 %v2047_v54  ;;  %1574 = vmatpush1.bf16.msra.mxu1 %v2049_v55  ;;  %v238_v54 = vld [vmem:[%s2260_s21 + $0xd0] sm:$0xff] }
  0x64   : > { %1493 = vmatprep.subr.bf16.mxu0 %v2056_v56  ;;  %1575 = vmatprep.subr.bf16.mxu1 %v2058_v57  ;;  %v242_v55 = vld [vmem:[%s2260_s21 + $0xf0] sm:$0xff]  ;;  %v239_v56 = vld [vmem:[%s2260_s21 + $0xd8] sm:$0xff] }
  0x65   : > { %v243_v57 = vld [vmem:[%s2260_s21 + $0xf8] sm:$0xff]  ;;  %v1924_v60 = vcombine.high %v238_v54, %v242_v55  ;;  %v1923_v2 = vcombine.low %v238_v54, %v242_v55 }
  0x66   : > { %v1926_v61 = vcombine.high %v239_v56, %v243_v57 }
  0x67   : > { %1494 = vmatpush1.bf16.msra.mxu0 %v2055_v62  ;;  %1576 = vmatpush1.bf16.msra.mxu1 %v2057_v63  ;;  %v246_v62 = vld [vmem:[%s2260_s21 + $0x110] sm:$0xff] }
  0x68   : > { %1495 = vmatprep.subr.bf16.mxu0 %v2064_v0  ;;  %1577 = vmatprep.subr.bf16.mxu1 %v2066_v1  ;;  %v250_v63 = vld [vmem:[%s2260_s21 + $0x130] sm:$0xff]  ;;  %v247_v0 = vld [vmem:[%s2260_s21 + $0x118] sm:$0xff] }
  0x69   : > { %v251_v1 = vld [vmem:[%s2260_s21 + $0x138] sm:$0xff]  ;;  %v1932_v3 = vcombine.high %v246_v62, %v250_v63 }
  0x6a   : > { %v1934_v4 = vcombine.high %v247_v0, %v251_v1  ;;  %v1933_v13 = vcombine.low %v247_v0, %v251_v1  ;;  %v310_v1 = vld [vmem:[%s2260_s21 + $0x310] sm:$0xff] }
  0x6b   : > { %1496 = vmatpush1.bf16.msra.mxu0 %v2063_v8  ;;  %1578 = vmatpush1.bf16.msra.mxu1 %v2065_v9  ;;  %v258_v8 = vld [vmem:[%s2260_s21 + $0x170] sm:$0xff]  ;;  %v255_v9 = vld [vmem:[%s2260_s21 + $0x158] sm:$0xff] }
  0x6c   : > { %1497 = vmatprep.subr.bf16.mxu0 %v2072_v11  ;;  %1579 = vmatprep.subr.bf16.mxu1 %v2074_v12  ;;  %v259_v11 = vld [vmem:[%s2260_s21 + $0x178] sm:$0xff]  ;;  %v1931_v12 = vcombine.low %v246_v62, %v250_v63  ;;  %v1940_v14 = vcombine.high %v254_v7, %v258_v8 }
  0x6d   : > { %v1942_v15 = vcombine.high %v255_v9, %v259_v11  ;;  %v1941_v21 = vcombine.low %v255_v9, %v259_v11  ;;  %v318_v11 = vld [vmem:[%s2260_s21 + $0x350] sm:$0xff] }
  0x6f   : > { %1498 = vmatpush1.bf16.msra.mxu0 %v2071_v17  ;;  %1580 = vmatpush1.bf16.msra.mxu1 %v2073_v18  ;;  %v266_v17 = vld [vmem:[%s2260_s21 + $0x1b0] sm:$0xff]  ;;  %v263_v18 = vld [vmem:[%s2260_s21 + $0x198] sm:$0xff] }
  0x70   : > { %1499 = vmatprep.subr.bf16.mxu0 %v2080_v19  ;;  %1581 = vmatprep.subr.bf16.mxu1 %v2082_v20  ;;  %v267_v19 = vld [vmem:[%s2260_s21 + $0x1b8] sm:$0xff]  ;;  %v1939_v20 = vcombine.low %v254_v7, %v258_v8  ;;  %v1948_v22 = vcombine.high %v262_v16, %v266_v17  ;;  %v1947_v29 = vcombine.low %v262_v16, %v266_v17 }
  0x71   : > { %v1949_v30 = vcombine.low %v263_v18, %v267_v19 }
  0x73   : > { %1500 = vmatpush1.bf16.msra.mxu0 %v2079_v23  ;;  %1582 = vmatpush1.bf16.msra.mxu1 %v2081_v24  ;;  %v1950_v23 = vcombine.high %v263_v18, %v267_v19  ;;  %v270_v24 = vld [vmem:[%s2260_s21 + $0x1d0] sm:$0xff] }
  0x74   : > { %2095 = vmatprep.subr.msk.bf16.mxu0 %vm1419_vm1, %v2088_v5  ;;  %2097 = vmatprep.subr.msk.bf16.mxu1 %vm1419_vm1, %v2090_v28  ;;  %v274_v5 = vld [vmem:[%s2260_s21 + $0x1f0] sm:$0xff]  ;;  %v275_v28 = vld [vmem:[%s2260_s21 + $0x1f8] sm:$0xff] }
  0x75   : > { %v1956_v31 = vcombine.high %v270_v24, %v274_v5  ;;  %v1958_v32 = vcombine.high %v271_v25, %v275_v28  ;;  %v1957_v38 = vcombine.low %v271_v25, %v275_v28  ;;  %v326_v19 = vld [vmem:[%s2260_s21 + $0x390] sm:$0xff] }
  0x76   : > { %v334_v28 = vld [vmem:[%s2260_s21 + $0x3d0] sm:$0xff] }
  0x77   : > { %1502 = vmatpush1.bf16.msra.mxu0 %v1421_v34  ;;  %1584 = vmatpush1.bf16.msra.mxu1 %v1427_v36  ;;  %v282_v34 = vld [vmem:[%s2260_s21 + $0x230] sm:$0xff]  ;;  %v283_v36 = vld [vmem:[%s2260_s21 + $0x238] sm:$0xff] }
  0x78   : > { %1608 = vmatprep.subr.bf16.mxu0 %v1900_v35  ;;  %1690 = vmatprep.subr.bf16.mxu1 %v1902_v37  ;;  %v279_v35 = vld [vmem:[%s2260_s21 + $0x218] sm:$0xff]  ;;  %v1955_v37 = vcombine.low %v270_v24, %v274_v5  ;;  %v1964_v39 = vcombine.high %v278_v33, %v282_v34 }
  0x79   : > { %v1966_v40 = vcombine.high %v279_v35, %v283_v36  ;;  %v1965_v46 = vcombine.low %v279_v35, %v283_v36  ;;  %v342_v36 = vld [vmem:[%s2260_s21 + $0x410] sm:$0xff] }
  0x7a   : > { %1518 = vmatmul.mubr.bf16.vlgmr.msra.gmra.mrb[0].mxu0 %v2348_v27  ;;  %1600 = vmatmul.mubr.bf16.vlgmr.msra.gmra.mrb[0].mxu1 %v2348_v27 }
  0x7b   : > { %1609 = vmatpush1.bf16.msra.mxu0 %v1899_v42  ;;  %1691 = vmatpush1.bf16.msra.mxu1 %v1901_v43  ;;  %v290_v42 = vld [vmem:[%s2260_s21 + $0x270] sm:$0xff]  ;;  %v287_v43 = vld [vmem:[%s2260_s21 + $0x258] sm:$0xff] }
  0x7c   : > { %1610 = vmatprep.subr.bf16.mxu0 %v1908_v44  ;;  %1692 = vmatprep.subr.bf16.mxu1 %v1910_v45  ;;  %v291_v44 = vld [vmem:[%s2260_s21 + $0x278] sm:$0xff]  ;;  %v1963_v45 = vcombine.low %v278_v33, %v282_v34  ;;  %v1972_v47 = vcombine.high %v286_v41, %v290_v42 }
  0x7d   : > { %1640 = vmatprep.mubr.bf16.mxu0 %v2280_v26  ;;  %1722 = vmatprep.mubr.bf16.mxu1 %v2280_v26  ;;  %v1925_v26 = vcombine.low %v239_v56, %v243_v57  ;;  %v1974_v48 = vcombine.high %v287_v43, %v291_v44  ;;  %v1973_v54 = vcombine.low %v287_v43, %v291_v44  ;;  %v302_v57 = vld [vmem:[%s2260_s21 + $0x2d0] sm:$0xff] }
  0x7e   : > { %v350_v44 = vld [vmem:[%s2260_s21 + $0x450] sm:$0xff] }
  0x7f   : > { %1611 = vmatpush1.bf16.msra.mxu0 %v1907_v50  ;;  %1693 = vmatpush1.bf16.msra.mxu1 %v1909_v51  ;;  %v298_v50 = vld [vmem:[%s2260_s21 + $0x2b0] sm:$0xff]  ;;  %v295_v51 = vld [vmem:[%s2260_s21 + $0x298] sm:$0xff] }
  0x80   : > { %1612 = vmatprep.subr.bf16.mxu0 %v1916_v52  ;;  %1694 = vmatprep.subr.bf16.mxu1 %v1918_v53  ;;  %v299_v52 = vld [vmem:[%s2260_s21 + $0x2b8] sm:$0xff]  ;;  %v1971_v53 = vcombine.low %v286_v41, %v290_v42  ;;  %v1980_v55 = vcombine.high %v294_v49, %v298_v50 }
  0x81   : > { %v1982_v56 = vcombine.high %v295_v51, %v299_v52  ;;  %v1981_v62 = vcombine.low %v295_v51, %v299_v52  ;;  %v358_v52 = vld [vmem:[%s2260_s21 + $0x490] sm:$0xff] }
  0x83   : > { %1613 = vmatpush1.bf16.msra.mxu0 %v1915_v58  ;;  %1695 = vmatpush1.bf16.msra.mxu1 %v1917_v59  ;;  %v306_v58 = vld [vmem:[%s2260_s21 + $0x2f0] sm:$0xff]  ;;  %v303_v59 = vld [vmem:[%s2260_s21 + $0x2d8] sm:$0xff] }
  0x84   : > { %1614 = vmatprep.subr.bf16.mxu0 %v1924_v60  ;;  %1696 = vmatprep.subr.bf16.mxu1 %v1926_v61  ;;  %v307_v60 = vld [vmem:[%s2260_s21 + $0x2f8] sm:$0xff]  ;;  %v1979_v61 = vcombine.low %v294_v49, %v298_v50  ;;  %v1988_v63 = vcombine.high %v302_v57, %v306_v58 }
  0x85   : > { %v1990_v0 = vcombine.high %v303_v59, %v307_v60  ;;  %v1989_v7 = vcombine.low %v303_v59, %v307_v60  ;;  %v366_v60 = vld [vmem:[%s2260_s21 + $0x4d0] sm:$0xff] }
  0x87   : > { %1615 = vmatpush1.bf16.msra.mxu0 %v1923_v2  ;;  %1697 = vmatpush1.bf16.msra.mxu1 %v1925_v26  ;;  %v314_v2 = vld [vmem:[%s2260_s21 + $0x330] sm:$0xff]  ;;  %v311_v26 = vld [vmem:[%s2260_s21 + $0x318] sm:$0xff] }
  0x88   : > { %1616 = vmatprep.subr.bf16.mxu0 %v1932_v3  ;;  %1698 = vmatprep.subr.bf16.mxu1 %v1934_v4  ;;  %v315_v3 = vld [vmem:[%s2260_s21 + $0x338] sm:$0xff]  ;;  %v1987_v4 = vcombine.low %v302_v57, %v306_v58  ;;  %v1996_v8 = vcombine.high %v310_v1, %v314_v2 }
  0x89   : > { %v1998_v9 = vcombine.high %v311_v26, %v315_v3  ;;  %v1997_v16 = vcombine.low %v311_v26, %v315_v3  ;;  %v374_v26 = vld [vmem:[%s2260_s21 + $0x510] sm:$0xff] }
  0x8a   : > { %v378_v3 = vld [vmem:[%s2260_s21 + $0x530] sm:$0xff] }
  0x8b   : > { %1617 = vmatpush1.bf16.msra.mxu0 %v1931_v12  ;;  %1699 = vmatpush1.bf16.msra.mxu1 %v1933_v13  ;;  %v322_v12 = vld [vmem:[%s2260_s21 + $0x370] sm:$0xff]  ;;  %v319_v13 = vld [vmem:[%s2260_s21 + $0x358] sm:$0xff] }
  0x8c   : > { %1618 = vmatprep.subr.bf16.mxu0 %v1940_v14  ;;  %1700 = vmatprep.subr.bf16.mxu1 %v1942_v15  ;;  %v323_v14 = vld [vmem:[%s2260_s21 + $0x378] sm:$0xff]  ;;  %v1995_v15 = vcombine.low %v310_v1, %v314_v2  ;;  %v2004_v17 = vcombine.high %v318_v11, %v322_v12 }
  0x8d   : > { %v2006_v18 = vcombine.high %v319_v13, %v323_v14  ;;  %v2005_v24 = vcombine.low %v319_v13, %v323_v14  ;;  %v386_v13 = vld [vmem:[%s2260_s21 + $0x570] sm:$0xff]  ;;  %v383_v14 = vld [vmem:[%s2260_s21 + $0x558] sm:$0xff] }
  0x8f   : > { %1619 = vmatpush1.bf16.msra.mxu0 %v1939_v20  ;;  %1701 = vmatpush1.bf16.msra.mxu1 %v1941_v21  ;;  %v330_v20 = vld [vmem:[%s2260_s21 + $0x3b0] sm:$0xff]  ;;  %v327_v21 = vld [vmem:[%s2260_s21 + $0x398] sm:$0xff] }
  0x90   : > { %1620 = vmatprep.subr.bf16.mxu0 %v1948_v22  ;;  %1702 = vmatprep.subr.bf16.mxu1 %v1950_v23  ;;  %v331_v22 = vld [vmem:[%s2260_s21 + $0x3b8] sm:$0xff]  ;;  %v2003_v23 = vcombine.low %v318_v11, %v322_v12  ;;  %v2012_v5 = vcombine.high %v326_v19, %v330_v20  ;;  %v382_v12 = vld [vmem:[%s2260_s21 + $0x550] sm:$0xff] }
  0x91   : > { %v2014_v25 = vcombine.high %v327_v21, %v331_v22  ;;  %v2013_v33 = vcombine.low %v327_v21, %v331_v22  ;;  %v394_v21 = vld [vmem:[%s2260_s21 + $0x5b0] sm:$0xff]  ;;  %v391_v22 = vld [vmem:[%s2260_s21 + $0x598] sm:$0xff] }
  0x93   : > { %1621 = vmatpush1.bf16.msra.mxu0 %v1947_v29  ;;  %1703 = vmatpush1.bf16.msra.mxu1 %v1949_v30  ;;  %v338_v29 = vld [vmem:[%s2260_s21 + $0x3f0] sm:$0xff]  ;;  %v335_v30 = vld [vmem:[%s2260_s21 + $0x3d8] sm:$0xff] }
  0x94   : > { %1622 = vmatprep.subr.bf16.mxu0 %v1956_v31  ;;  %1704 = vmatprep.subr.bf16.mxu1 %v1958_v32  ;;  %v339_v31 = vld [vmem:[%s2260_s21 + $0x3f8] sm:$0xff]  ;;  %v2011_v32 = vcombine.low %v326_v19, %v330_v20  ;;  %v2020_v34 = vcombine.high %v334_v28, %v338_v29  ;;  %v390_v20 = vld [vmem:[%s2260_s21 + $0x590] sm:$0xff] }
  0x95   : > { %v2022_v35 = vcombine.high %v335_v30, %v339_v31  ;;  %v2021_v41 = vcombine.low %v335_v30, %v339_v31  ;;  %v402_v30 = vld [vmem:[%s2260_s21 + $0x5f0] sm:$0xff]  ;;  %v399_v31 = vld [vmem:[%s2260_s21 + $0x5d8] sm:$0xff] }
  0x97   : > { %1623 = vmatpush1.bf16.msra.mxu0 %v1955_v37  ;;  %1705 = vmatpush1.bf16.msra.mxu1 %v1957_v38  ;;  %v346_v37 = vld [vmem:[%s2260_s21 + $0x430] sm:$0xff]  ;;  %v343_v38 = vld [vmem:[%s2260_s21 + $0x418] sm:$0xff] }
  0x98   : > { %1624 = vmatprep.subr.bf16.mxu0 %v1964_v39  ;;  %1706 = vmatprep.subr.bf16.mxu1 %v1966_v40  ;;  %v347_v39 = vld [vmem:[%s2260_s21 + $0x438] sm:$0xff]  ;;  %v2019_v40 = vcombine.low %v334_v28, %v338_v29  ;;  %v2028_v42 = vcombine.high %v342_v36, %v346_v37  ;;  %v398_v29 = vld [vmem:[%s2260_s21 + $0x5d0] sm:$0xff] }
  0x99   : > { %v2030_v43 = vcombine.high %v343_v38, %v347_v39  ;;  %v2029_v49 = vcombine.low %v343_v38, %v347_v39  ;;  %v407_v38 = vld [vmem:[%s2260_s21 + $0x618] sm:$0xff]  ;;  %v2083_v39 = vcombine.low %v398_v29, %v402_v30 }
  0x9b   : > { %1625 = vmatpush1.bf16.msra.mxu0 %v1963_v45  ;;  %1707 = vmatpush1.bf16.msra.mxu1 %v1965_v46  ;;  %v354_v45 = vld [vmem:[%s2260_s21 + $0x470] sm:$0xff]  ;;  %v351_v46 = vld [vmem:[%s2260_s21 + $0x458] sm:$0xff] }
  0x9c   : > { %1626 = vmatprep.subr.bf16.mxu0 %v1972_v47  ;;  %1708 = vmatprep.subr.bf16.mxu1 %v1974_v48  ;;  %v355_v47 = vld [vmem:[%s2260_s21 + $0x478] sm:$0xff]  ;;  %v2027_v48 = vcombine.low %v342_v36, %v346_v37  ;;  %v2036_v50 = vcombine.high %v350_v44, %v354_v45  ;;  %v406_v37 = vld [vmem:[%s2260_s21 + $0x610] sm:$0xff] }
  0x9d   : > { %v2038_v51 = vcombine.high %v351_v46, %v355_v47  ;;  %v2037_v57 = vcombine.low %v351_v46, %v355_v47 }
  0x9f   : > { %1627 = vmatpush1.bf16.msra.mxu0 %v1971_v53  ;;  %1709 = vmatpush1.bf16.msra.mxu1 %v1973_v54  ;;  %v362_v53 = vld [vmem:[%s2260_s21 + $0x4b0] sm:$0xff]  ;;  %v359_v54 = vld [vmem:[%s2260_s21 + $0x498] sm:$0xff] }
  0xa0   : > { %1628 = vmatprep.subr.bf16.mxu0 %v1980_v55  ;;  %1710 = vmatprep.subr.bf16.mxu1 %v1982_v56  ;;  %v363_v55 = vld [vmem:[%s2260_s21 + $0x4b8] sm:$0xff]  ;;  %v2035_v56 = vcombine.low %v350_v44, %v354_v45  ;;  %v2044_v58 = vcombine.high %v358_v52, %v362_v53  ;;  %v2093_v44 = vcombine.low %v407_v38, %v407_v38 }
  0xa1   : > { %v2046_v59 = vcombine.high %v359_v54, %v363_v55 }
  0xa2   : > { %v1439_v46 = vsel %vm1419_vm1, %v2093_v44, 0 }
  0xa3   : > { %1629 = vmatpush1.bf16.msra.mxu0 %v1979_v61  ;;  %1711 = vmatpush1.bf16.msra.mxu1 %v1981_v62  ;;  %v370_v61 = vld [vmem:[%s2260_s21 + $0x4f0] sm:$0xff]  ;;  %v367_v62 = vld [vmem:[%s2260_s21 + $0x4d8] sm:$0xff] }
  0xa4   : > { %1630 = vmatprep.subr.bf16.mxu0 %v1988_v63  ;;  %1712 = vmatprep.subr.bf16.mxu1 %v1990_v0  ;;  %v371_v63 = vld [vmem:[%s2260_s21 + $0x4f8] sm:$0xff]  ;;  %v2045_v0 = vcombine.low %v359_v54, %v363_v55  ;;  %v2052_v1 = vcombine.high %v366_v60, %v370_v61 }
  0xa5   : > { %v2054_v2 = vcombine.high %v367_v62, %v371_v63 }
  0xa7   : > { %1631 = vmatpush1.bf16.msra.mxu0 %v1987_v4  ;;  %1713 = vmatpush1.bf16.msra.mxu1 %v1989_v7  ;;  %v375_v4 = vld [vmem:[%s2260_s21 + $0x518] sm:$0xff] }
  0xa8   : > { %1632 = vmatprep.subr.bf16.mxu0 %v1996_v8  ;;  %1714 = vmatprep.subr.bf16.mxu1 %v1998_v9  ;;  %v379_v7 = vld [vmem:[%s2260_s21 + $0x538] sm:$0xff]  ;;  %v2051_v8 = vcombine.low %v366_v60, %v370_v61  ;;  %v2060_v9 = vcombine.high %v374_v26, %v378_v3 }
  0xa9   : > { %v2062_v11 = vcombine.high %v375_v4, %v379_v7 }
  0xab   : > { %1633 = vmatpush1.bf16.msra.mxu0 %v1995_v15  ;;  %1715 = vmatpush1.bf16.msra.mxu1 %v1997_v16  ;;  %v387_v15 = vld [vmem:[%s2260_s21 + $0x578] sm:$0xff]  ;;  %v2059_v16 = vcombine.low %v374_v26, %v378_v3 }
  0xac   : > { %1634 = vmatprep.subr.bf16.mxu0 %v2004_v17  ;;  %1716 = vmatprep.subr.bf16.mxu1 %v2006_v18  ;;  %v2061_v17 = vcombine.low %v375_v4, %v379_v7  ;;  %v2068_v18 = vcombine.high %v382_v12, %v386_v13  ;;  %v2070_v19 = vcombine.high %v383_v14, %v387_v15 }
  0xaf   : > { %1635 = vmatpush1.bf16.msra.mxu0 %v2003_v23  ;;  %1717 = vmatpush1.bf16.msra.mxu1 %v2005_v24  ;;  %v395_v23 = vld [vmem:[%s2260_s21 + $0x5b8] sm:$0xff]  ;;  %v2067_v24 = vcombine.low %v382_v12, %v386_v13 }
  0xb0   : > { %1636 = vmatprep.subr.bf16.mxu0 %v2012_v5  ;;  %1718 = vmatprep.subr.bf16.mxu1 %v2014_v25  ;;  %v2069_v5 = vcombine.low %v383_v14, %v387_v15  ;;  %v2076_v25 = vcombine.high %v390_v20, %v394_v21  ;;  %v2078_v28 = vcombine.high %v391_v22, %v395_v23 }
  0xb3   : > { %1637 = vmatpush1.bf16.msra.mxu0 %v2011_v32  ;;  %1719 = vmatpush1.bf16.msra.mxu1 %v2013_v33  ;;  %v403_v32 = vld [vmem:[%s2260_s21 + $0x5f8] sm:$0xff]  ;;  %v2075_v33 = vcombine.low %v390_v20, %v394_v21 }
  0xb4   : > { %1638 = vmatprep.subr.bf16.mxu0 %v2020_v34  ;;  %1720 = vmatprep.subr.bf16.mxu1 %v2022_v35  ;;  %v2077_v34 = vcombine.low %v391_v22, %v395_v23  ;;  %v2084_v35 = vcombine.high %v398_v29, %v402_v30  ;;  %v2086_v36 = vcombine.high %v399_v31, %v403_v32  ;;  %v412_v47 = vpop.permute.xlu0 %411 }
  0xb7   : > { %1639 = vmatpush1.bf16.msra.mxu0 %v2019_v40  ;;  %1721 = vmatpush1.bf16.msra.mxu1 %v2021_v41  ;;  %v2085_v40 = vcombine.low %v399_v31, %v403_v32  ;;  %v2092_v41 = vcombine.high %v406_v37, %v406_v37 }
  0xb8   : > { %1649 = vmatprep.subr.bf16.mxu0 %v2028_v42  ;;  %1731 = vmatprep.subr.bf16.mxu1 %v2030_v43  ;;  %v2091_v42 = vcombine.low %v406_v37, %v406_v37  ;;  %v2094_v43 = vcombine.high %v407_v38, %v407_v38 }
  0xba   : > { %1641 = vmatmul.mubr.bf16.vlgmr.msra.gmra.mrb[4].mxu0 %v2267_v10  ;;  %1723 = vmatmul.mubr.bf16.vlgmr.msra.gmra.mrb[4].mxu1 %v2267_v10  ;;  %v2043_v10 = vcombine.low %v358_v52, %v362_v53  ;;  %v1433_v45 = vsel %vm1419_vm1, %v2091_v42, 0 }
  0xbb   : > { %1650 = vmatpush1.bf16.msra.mxu0 %v2027_v48  ;;  %1732 = vmatpush1.bf16.msra.mxu1 %v2029_v49 }
  0xbc   : > { %1651 = vmatprep.subr.bf16.mxu0 %v2036_v50  ;;  %1733 = vmatprep.subr.bf16.mxu1 %v2038_v51 }
  0xbd   : > { %2100 = vmatprep.mubr.msk.bf16.mxu0 %vm1415_vm0, %v2356_v6  ;;  %2102 = vmatprep.mubr.msk.bf16.mxu1 %vm1415_vm0, %v2356_v6  ;;  %v2053_v6 = vcombine.low %v367_v62, %v371_v63 }
  0xbf   : > { %1652 = vmatpush1.bf16.msra.mxu0 %v2035_v56  ;;  %1734 = vmatpush1.bf16.msra.mxu1 %v2037_v57 }
  0xc0   : > { %1653 = vmatprep.subr.bf16.mxu0 %v2044_v58  ;;  %1735 = vmatprep.subr.bf16.mxu1 %v2046_v59 }
  0xc3   : > { %1654 = vmatpush1.bf16.msra.mxu0 %v2043_v10  ;;  %1736 = vmatpush1.bf16.msra.mxu1 %v2045_v0 }
  0xc4   : > { %1655 = vmatprep.subr.bf16.mxu0 %v2052_v1  ;;  %1737 = vmatprep.subr.bf16.mxu1 %v2054_v2 }
  0xc7   : > { %1656 = vmatpush1.bf16.msra.mxu0 %v2051_v8  ;;  %1738 = vmatpush1.bf16.msra.mxu1 %v2053_v6 }
  0xc8   : > { %1657 = vmatprep.subr.bf16.mxu0 %v2060_v9  ;;  %1739 = vmatprep.subr.bf16.mxu1 %v2062_v11 }
  0xcb   : > { %1658 = vmatpush1.bf16.msra.mxu0 %v2059_v16  ;;  %1740 = vmatpush1.bf16.msra.mxu1 %v2061_v17 }
  0xcc   : > { %1659 = vmatprep.subr.bf16.mxu0 %v2068_v18  ;;  %1741 = vmatprep.subr.bf16.mxu1 %v2070_v19 }
  0xcf   : > { %1660 = vmatpush1.bf16.msra.mxu0 %v2067_v24  ;;  %1742 = vmatpush1.bf16.msra.mxu1 %v2069_v5 }
  0xd0   : > { %1661 = vmatprep.subr.bf16.mxu0 %v2076_v25  ;;  %1743 = vmatprep.subr.bf16.mxu1 %v2078_v28 }
  0xd3   : > { %1662 = vmatpush1.bf16.msra.mxu0 %v2075_v33  ;;  %1744 = vmatpush1.bf16.msra.mxu1 %v2077_v34 }
  0xd4   : > { %1663 = vmatprep.subr.bf16.mxu0 %v2084_v35  ;;  %1745 = vmatprep.subr.bf16.mxu1 %v2086_v36 }
  0xd7   : > { %1664 = vmatpush1.bf16.msra.mxu0 %v2083_v39  ;;  %1746 = vmatpush1.bf16.msra.mxu1 %v2085_v40 }
  0xd8   : > { %2099 = vmatprep.subr.msk.bf16.mxu0 %vm1419_vm1, %v2092_v41  ;;  %2101 = vmatprep.subr.msk.bf16.mxu1 %vm1419_vm1, %v2094_v43 }
  0xdb   : > { %1666 = vmatpush1.bf16.msra.mxu0 %v1433_v45  ;;  %1748 = vmatpush1.bf16.msra.mxu1 %v1439_v46 }
  0xde   : > { %1682 = vmatmul.mubr.bf16.vlgmr.msra.gmra.mrb[4].mxu0 %v2348_v27  ;;  %1764 = vmatmul.mubr.bf16.vlgmr.msra.gmra.mrb[4].mxu1 %v2348_v27 }
 0x14d   : > { %v1519_v48 = vpop.f32.mrb[0].mxu0  ;;  %v1601_v50 = vpop.f32.mrb[0].mxu1 }
 0x14e   : > { %v2106_v49 = vadd.f32 %v1519_v48, %v412_v47  ;;  %v1521_v51 = vpop.f32.mrb[1].mxu0  ;;  %v2108_v52 = vadd.f32 %v1601_v50, %v412_v47  ;;  %v1603_v54 = vpop.f32.mrb[1].mxu1 }
 0x14f   : > { %v2107_v53 = vadd.f32 %v1521_v51, %v412_v47  ;;  %v1523_v55 = vpop.f32.mrb[2].mxu0  ;;  %v2109_v56 = vadd.f32 %v1603_v54, %v412_v47  ;;  %v1605_v57 = vpop.f32.mrb[2].mxu1 }
 0x150   : > { %2167 = vtanh.f32 %v2106_v49  ;;  %v1524_v58 = vpop.f32.mrb[3].mxu0  ;;  %v1606_v59 = vpop.f32.mrb[3].mxu1 }
 0x151   : > { %2169 = vtanh.f32 %v2108_v52 }
 0x152   : > { %2171 = vtanh.f32 %v2107_v53 }
 0x153   : > { %2173 = vtanh.f32 %v2109_v56 }
 0x15a   : > { %v2168_v27 = vpop.eup %2167 }
 0x15b   : > { %v2170_v60 = vpop.eup %2169 }
 0x15c   : > { %v2172_v61 = vpop.eup %2171 }
 0x15d   : > { %v2174_v62 = vpop.eup %2173  ;;  %v1788_v63 = vcombine.low %v2168_v27, %v2172_v61 }
 0x15e   : > { %v1789_v10 = vcombine.low %v2170_v60, %v2174_v62 }
 0x15f   : > { %1796 = vst [vmem:[%s208_s27] sm:$0x77] %v1788_v63 }
 0x160   : > { %1797 = vst [vmem:[%s208_s27 + $0x8] sm:$0x77] %v1789_v10 }
 0x1b1   : > { %v1683_v0 = vpop.f32.mrb[4].mxu0  ;;  %v1765_v2 = vpop.f32.mrb[4].mxu1 }
 0x1b2   : > { %v2110_v1 = vadd.f32 %v1683_v0, %v412_v47  ;;  %v1685_v26 = vpop.f32.mrb[5].mxu0  ;;  %v2112_v3 = vadd.f32 %v1765_v2, %v412_v47  ;;  %v1767_v7 = vpop.f32.mrb[5].mxu1 }
 0x1b3   : > { %v2111_v4 = vadd.f32 %v1685_v26, %v412_v47  ;;  %v1687_v8 = vpop.f32.mrb[6].mxu0  ;;  %v2113_v6 = vadd.f32 %v1767_v7, %v412_v47  ;;  %v1769_v9 = vpop.f32.mrb[6].mxu1 }
 0x1b4   : > { %2175 = vtanh.f32 %v2110_v1  ;;  %v1688_v11 = vpop.f32.mrb[7].mxu0  ;;  %v1770_v12 = vpop.f32.mrb[7].mxu1 }
 0x1b5   : > { %2177 = vtanh.f32 %v2112_v3 }
 0x1b6   : > { %2179 = vtanh.f32 %v2111_v4 }
 0x1b7   : > { %2181 = vtanh.f32 %v2113_v6 }
 0x1be   : > { %v2176_v13 = vpop.eup %2175 }
 0x1bf   : > { %v2178_v14 = vpop.eup %2177 }
 0x1c0   : > { %v2180_v15 = vpop.eup %2179 }
 0x1c1   : > { %v2182_v16 = vpop.eup %2181  ;;  %v1790_v17 = vcombine.low %v2176_v13, %v2180_v15 }
 0x1c2   : > { %v1791_v18 = vcombine.low %v2178_v14, %v2182_v16 }
 0x1c3   : > { %1798 = vst [vmem:[%s208_s27 + $0x10] sm:$0x77] %v1790_v17 }
 0x1c4   : > { %1799 = vst [vmem:[%s208_s27 + $0x18] sm:$0x77] %v1791_v18 }
 0x1c5 PF: > { %s13_s14 = sadd.s32 1, %s2205_s14   ;;  %s2523_s12 = smov %s2201_s13 }
 0x1c6   : > { %p10_p5 = scmp.ge.s32.totalorder %s13_s14, 4   ;;  %s2524_s13 = smov %s2526_s15 }
 0x1c8   :  { %12 = sbr.rel (!%p10_p5) target bundleno = 2 (0x2), region = 62 }

</bundles_post_ra>
